<compile_context>
chip_gen: v7x
topology: tpu7x:2x2x1
jax: 0.10.0
libtpu: 0.0.40
codegen_flags: <defaults>
</compile_context>

<pallas_src>
import numpy as np
import jax
import jax.numpy as jnp
from jax.experimental import pallas as pl
from jax.experimental.pallas import tpu as pltpu


# --------------------------------------------------------------------------- #
# Trace-time (numpy) gather / scatter plan builders.                           #
# --------------------------------------------------------------------------- #

def _conv_gather_stack(H, W, k, s, p):
    """0/1 gather matrices, one per tap, for Conv2d(kernel=k, stride=s, pad=p)."""
    OH = (H + 2 * p - k) // s + 1
    OW = (W + 2 * p - k) // s + 1
    oy, ox = np.meshgrid(np.arange(OH), np.arange(OW), indexing="ij")
    G = np.zeros((k * k, OH * OW, H * W), np.float32)
    for ky in range(k):
        for kx in range(k):
            iy = oy * s + ky - p
            ix = ox * s + kx - p
            valid = (iy >= 0) & (iy < H) & (ix >= 0) & (ix < W)
            G[ky * k + kx, (oy * OW + ox)[valid], (iy * W + ix)[valid]] = 1.0
    return G, OH, OW


def _deconv_gather_stack(H, W, k, s, p):
    """Phase-decomposed gathers for ConvTranspose2d(kernel=k, stride=s, pad=p).

    The (s*H, s*W) output is split into s*s phases; each phase is a stride-1
    conv with (k//s)^2 taps.  Returns gather matrices (phase-major, tap-minor)
    and the (ky, kx) tap per slot (used to slice the weight).
    """
    assert k == s + 2 * p, "phase decomposition assumes k == s + 2*p"
    n = k // s
    m_, n_ = np.meshgrid(np.arange(H), np.arange(W), indexing="ij")
    G = np.zeros((s * s * n * n, H * W, H * W), np.float32)
    kpos = []
    for a in range(s):
        for b in range(s):
            kys = [ky for ky in range(k) if (ky - a - p) % s == 0]
            kxs = [kx for kx in range(k) if (kx - b - p) % s == 0]
            for si, ky in enumerate(kys):
                for sj, kx in enumerate(kxs):
                    idx = (a * s + b) * (n * n) + si * n + sj
                    kpos.append((ky, kx))
                    iy = (s * m_ + a + p - ky) // s
                    ix = (s * n_ + b + p - kx) // s
                    valid = (iy >= 0) & (iy < H) & (ix >= 0) & (ix < W)
                    G[idx, (m_ * W + n_)[valid], (iy * W + ix)[valid]] = 1.0
    return G, kpos


def _deconv_scatter_stack(H, W, s):
    """0/1 scatter matrices recombining the s*s phase outputs to raster order."""
    m_, n_ = np.meshgrid(np.arange(H), np.arange(W), indexing="ij")
    S = np.zeros((s * s, (s * H) * (s * W), H * W), np.float32)
    for a in range(s):
        for b in range(s):
            full = (s * m_ + a) * (s * W) + (s * n_ + b)
            S[a * s + b, full.ravel(), (m_ * W + n_).ravel()] = 1.0
    return S


# --------------------------------------------------------------------------- #
# Weight / input preprocessing (cheap JAX glue, runs once per call).            #
# --------------------------------------------------------------------------- #

def _conv_weight_stack(w_oihw):
    co, ci, k, _ = w_oihw.shape
    return jnp.transpose(w_oihw, (2, 3, 1, 0)).reshape(k * k, ci, co)


def _deconv_weight_stack(w_iohw, kpos):
    return jnp.stack([w_iohw[:, :, ky, kx] for (ky, kx) in kpos], axis=0)


def _im2col(x_nhwc, k, stride, pad):
    """Patch matrix for the (tiny, 1-channel) network input only."""
    n, h, w, c = x_nhwc.shape
    xp = jnp.pad(x_nhwc, ((0, 0), (pad, pad), (pad, pad), (0, 0)))
    oh = (h + 2 * pad - k) // stride + 1
    ow = (w + 2 * pad - k) // stride + 1
    cols = []
    for i in range(k):
        for j in range(k):
            cols.append(xp[:, i:i + stride * oh:stride, j:j + stride * ow:stride, :])
    col = jnp.stack(cols, axis=3)                      # [N, OH, OW, k*k, C]
    return col.reshape(n, oh * ow, k * k * c), oh, ow


# --------------------------------------------------------------------------- #
# The fused Pallas kernel: one grid step == one image, all 6 layers in VMEM.    #
# --------------------------------------------------------------------------- #

def _fused_colorization_kernel(
        xcol_ref, w1_ref, b1_ref,
        g2_ref, w2_ref, b2_ref,
        g3_ref, w3_ref, b3_ref,
        g4_ref, w4_ref, b4_ref,
        g5_ref, w5_ref, b5_ref,
        w6_ref, g6_ref, b6_ref,
        out_ref):
    f32, bf16 = jnp.float32, jnp.bfloat16

    def patches(x_bf16, g, ntaps):
        # One row-stacked 0/1 gather matmul for all taps (entries are exact
        # copies of bf16 activations -> bf16 round-trip is exact), then a
        # tile-aligned lane-concat of the per-tap row blocks into the im2col
        # patch matrix [rows, ntaps * Cin].
        rows = g.shape[0] // ntaps
        r = jnp.dot(g, x_bf16, preferred_element_type=f32).astype(bf16)
        return jnp.concatenate(
            [r[t * rows:(t + 1) * rows, :] for t in range(ntaps)], axis=1)

    def conv_relu(x_bf16, g_ref, w_ref, b_ref):
        p = patches(x_bf16, g_ref[...], 9)
        y = jnp.dot(p, w_ref[...], preferred_element_type=f32)
        return jnp.maximum(y + b_ref[...], 0.0)

    # ------------------------------ encoder ------------------------------
    y = jnp.dot(xcol_ref[0], w1_ref[...], preferred_element_type=f32)
    y = jnp.maximum(y + b1_ref[...], 0.0)                       # [HW, 128]  (64 real + 64 zero-pad)
    y = conv_relu(y.astype(bf16), g2_ref, w2_ref, b2_ref)       # [HW/4, 128]
    y = conv_relu(y.astype(bf16), g3_ref, w3_ref, b3_ref)       # [HW/16, 256]

    # ---------------- decoder (phase-split activations, no scatters) -----
    def deconv_relu(x_f32, g_ref, w_ref, b_ref):
        xb = x_f32.astype(bf16)
        outs = []
        for q in range(4):                                      # 4 output phases
            p = patches(xb, g_ref[q], 4)
            yq = jnp.dot(p, w_ref[q], preferred_element_type=f32)
            outs.append(jnp.maximum(yq + b_ref[...], 0.0))
        return jnp.concatenate(outs, axis=0)                    # phase-stacked [4*rows, Cout]

    y = deconv_relu(y, g4_ref, w4_ref, b4_ref)                  # [HW/4, 128] (phase-stacked 8x8)
    y = deconv_relu(y, g5_ref, w5_ref, b5_ref)                  # [HW, 64]    (phase-stacked 16x16)

    # --------- d3: channel-major (transposed) + lane-dense output --------
    # a_all[8j + c, pix] = (W6_j^T @ Y^T)[c, pix]; rows 3..7 of each block are 0.
    a_all = jax.lax.dot_general(
        w6_ref[...], y.astype(bf16),
        dimension_numbers=(((1,), (1,)), ((), ())),             # W @ Y^T  (trans_b)
        preferred_element_type=f32)                             # [128, HW] f32
    for ph in range(4):
        acat = jnp.concatenate(
            [a_all[8 * (4 * ph + t): 8 * (4 * ph + t) + 8, :] for t in range(4)],
            axis=1)                                             # [8, 4*HW] f32
        yp = jnp.dot(acat, g6_ref[ph], preferred_element_type=f32)   # [8, HW]
        out_ref[0, ph, :, :] = jnp.tanh(yp + b6_ref[...])[0:3, :].astype(out_ref.dtype)


# --------------------------------------------------------------------------- #
# Forward pass (NCHW in / NCHW out, same semantics as the PyTorch module).      #
# --------------------------------------------------------------------------- #

def colorization_forward(params, x_nchw):
    B, cin, H, W = x_nchw.shape
    assert cin == 1
    assert H % 4 == 0 and W % 4 == 0
    bf16, f32 = jnp.bfloat16, jnp.float32

    # ---- static gather plans (numpy -> baked-in constants) ----
    G2, H2, W2 = _conv_gather_stack(H, W, 3, 2, 1)         # e2
    G3, H3, W3 = _conv_gather_stack(H2, W2, 3, 2, 1)       # e3
    G4, kp4 = _deconv_gather_stack(H3, W3, 4, 2, 1)        # d1
    S4 = _deconv_scatter_stack(H3, W3, 2)
    H4, W4 = 2 * H3, 2 * W3
    G5, kp5 = _deconv_gather_stack(H4, W4, 4, 2, 1)        # d2
    S5 = _deconv_scatter_stack(H4, W4, 2)
    H5, W5 = 2 * H4, 2 * W4
    G6, kp6 = _deconv_gather_stack(H5, W5, 4, 2, 1)        # d3 (phase-split out)

    n1, n2, n3 = H * W, H2 * W2, H3 * W3
    hw4, mph = H4 * W4, H5 * W5

    # Compose the decoder gathers with the previous layer's phase scatter so
    # inter-decoder activations can stay phase-split (no scatter matmuls).
    Scat4 = np.concatenate(list(S4), axis=1)               # [hw4, 4*n3]
    Scat5 = np.concatenate(list(S5), axis=1)               # [mph, 4*hw4]
    G5c = G4.dtype.type(0) + (G5 @ Scat4)                  # [16, hw4, 4*n3]
    G6c = G6 @ Scat5                                       # [16, mph, 4*hw4]

    g2 = jnp.asarray(G2.reshape(9 * n2, n1), bf16)
    g3 = jnp.asarray(G3.reshape(9 * n3, n2), bf16)
    g4 = jnp.asarray(G4.reshape(4, 4 * n3, n3), bf16)
    g5 = jnp.asarray(G5c.reshape(4, 4 * hw4, 4 * n3), bf16)
    g6 = jnp.asarray(
        np.stack([np.concatenate([G6c[4 * p + t].T for t in range(4)], axis=0)
                  for p in range(4)]), f32)                # [4, 4*mph, mph]  (f32: keeps d3 accumulation all-f32)

    # ---- weights (tap-stacked, e1 channels padded 64 -> 128 for alignment) ----
    x_nhwc = jnp.transpose(x_nchw, (0, 2, 3, 1))
    xcol, oh1, ow1 = _im2col(x_nhwc, 3, 1, 1)              # [B, H*W, 9]
    assert (oh1, ow1) == (H, W)
    xcol = xcol.astype(bf16)

    w1 = jnp.pad(_conv_weight_stack(params["e1_w"]).reshape(9, 64),
                 ((0, 0), (0, 64))).astype(bf16)                                  # [9, 128]
    w2t = jnp.transpose(params["e2_w"], (2, 3, 1, 0))                             # [3,3,64,128]
    w2 = jnp.pad(w2t, ((0, 0), (0, 0), (0, 64), (0, 0))).reshape(9 * 128, 128).astype(bf16)
    w3 = _conv_weight_stack(params["e3_w"]).reshape(9 * 128, 256).astype(bf16)    # [1152, 256]
    w4 = _deconv_weight_stack(params["d1_w"], kp4).reshape(4, 4 * 256, 128).astype(bf16)
    w5 = _deconv_weight_stack(params["d2_w"], kp5).reshape(4, 4 * 128, 64).astype(bf16)
    w6 = jnp.concatenate(
        [jnp.pad(params["d3_w"][:, :, ky, kx].T, ((0, 5), (0, 0))) for (ky, kx) in kp6],
        axis=0).astype(bf16)                                                      # [16*8, 64]

    b1 = jnp.pad(params["e1_b"], (0, 64)).reshape(1, 128).astype(f32)
    b2 = params["e2_b"].reshape(1, -1).astype(f32)
    b3 = params["e3_b"].reshape(1, -1).astype(f32)
    b4 = params["d1_b"].reshape(1, -1).astype(f32)
    b5 = params["d2_b"].reshape(1, -1).astype(f32)
    b6 = jnp.zeros((8, mph), f32).at[0:3, :].set(params["d3_b"].astype(f32)[:, None])

    operands = (xcol, w1, b1, g2, w2, b2, g3, w3, b3,
                g4, w4, b4, g5, w5, b5, w6, g6, b6)

    # TODO(synk): switch constant operands to pipeline_mode=pl.Buffered(1) once
    # single-buffering is verified on the target jax version (halves their VMEM
    # footprint; matters when H, W grow).
    def _const_spec(a):
        nd = a.ndim
        return pl.BlockSpec(a.shape, lambda i, _nd=nd: (0,) * _nd)

    in_specs = [pl.BlockSpec((1,) + xcol.shape[1:], lambda i: (i, 0, 0))]
    in_specs += [_const_spec(a) for a in operands[1:]]

    # advisory cost estimate: lets XLA overlap the one-shot constant DMA.
    flops = 2 * B * (
        n1 * 9 * 128
        + (9 * n2) * n1 * 128 + n2 * (9 * 128) * 128
        + (9 * n3) * n2 * 128 + n3 * (9 * 128) * 256
        + 4 * ((4 * n3) * n3 * 256 + n3 * (4 * 256) * 128)
        + 4 * ((4 * hw4) * (4 * n3) * 128 + hw4 * (4 * 128) * 64)
        + 128 * 64 * mph + 4 * (8 * (4 * mph) * mph))
    bytes_accessed = int(sum(int(np.prod(a.shape)) * a.dtype.itemsize for a in operands)
                         + B * 4 * 3 * mph * 4)
    cost = pl.CostEstimate(flops=int(flops),
                           transcendentals=int(B * 4 * 8 * mph),
                           bytes_accessed=bytes_accessed)

    out4 = pl.pallas_call(
        _fused_colorization_kernel,
        out_shape=jax.ShapeDtypeStruct((B, 4, 3, mph), f32),
        grid_spec=pltpu.PrefetchScalarGridSpec(
            num_scalar_prefetch=0,
            grid=(B,),
            in_specs=in_specs,
            out_specs=pl.BlockSpec((1, 4, 3, mph), lambda i: (i, 0, 0, 0)),
        ),
        compiler_params=pltpu.CompilerParams(
            dimension_semantics=("parallel",),
            vmem_limit_bytes=32 * 1024 * 1024),
        cost_estimate=cost,
    )(*operands)

    # de-interleave the 4 output phases -> NCHW
    y = out4.reshape(B, 2, 2, 3, H5, W5)                       # (b, a, bb, c, m, n)
    y = jnp.transpose(y, (0, 3, 4, 1, 5, 2)).reshape(B, 3, 2 * H5, 2 * W5)
    return y


# --------------------------------------------------------------------------- #
# Params + pure-JAX (lax) reference for the numerical check.                    #
# --------------------------------------------------------------------------- #

def init_params(key, scale=2.0):
    # PyTorch-style fan-in uniform init; `scale` keeps activation magnitudes
    # O(1) through all 6 layers so the check against the f32 reference is a
    # meaningful test (forward semantics are unaffected by the init choice).
    def conv_init(k, cout, cin, ksz):
        k1, k2 = jax.random.split(k)
        bound = scale / np.sqrt(cin * ksz * ksz)
        w = jax.random.uniform(k1, (cout, cin, ksz, ksz), jnp.float32, -bound, bound)
        b = jax.random.uniform(k2, (cout,), jnp.float32, -bound, bound)
        return w, b

    def convT_init(k, cin, cout, ksz):
        k1, k2 = jax.random.split(k)
        bound = scale / np.sqrt(cout * ksz * ksz)
        w = jax.random.uniform(k1, (cin, cout, ksz, ksz), jnp.float32, -bound, bound)
        b = jax.random.uniform(k2, (cout,), jnp.float32, -bound, bound)
        return w, b

    keys = jax.random.split(key, 6)
    p = {}
    p["e1_w"], p["e1_b"] = conv_init(keys[0], 64, 1, 3)
    p["e2_w"], p["e2_b"] = conv_init(keys[1], 128, 64, 3)
    p["e3_w"], p["e3_b"] = conv_init(keys[2], 256, 128, 3)
    p["d1_w"], p["d1_b"] = convT_init(keys[3], 256, 128, 4)
    p["d2_w"], p["d2_b"] = convT_init(keys[4], 128, 64, 4)
    p["d3_w"], p["d3_b"] = convT_init(keys[5], 64, 3, 4)
    return p


def _conv_ref(x, w_oihw, b, stride, pad):
    w_hwio = jnp.transpose(w_oihw, (2, 3, 1, 0))
    y = jax.lax.conv_general_dilated(
        x, w_hwio, (stride, stride), [(pad, pad), (pad, pad)],
        dimension_numbers=("NHWC", "HWIO", "NHWC"))
    return y + b


def _convT_ref(x, w_iohw, b, stride, pad):
    k = w_iohw.shape[2]
    w_hwio = jnp.transpose(w_iohw[:, :, ::-1, ::-1], (2, 3, 0, 1))
    ep = k - 1 - pad
    y = jax.lax.conv_general_dilated(
        x, w_hwio, (1, 1), [(ep, ep), (ep, ep)], lhs_dilation=(stride, stride),
        dimension_numbers=("NHWC", "HWIO", "NHWC"))
    return y + b


def colorization_ref(params, x_nchw):
    x = jnp.transpose(x_nchw, (0, 2, 3, 1))
    x = jax.nn.relu(_conv_ref(x, params["e1_w"], params["e1_b"], 1, 1))
    x = jax.nn.relu(_conv_ref(x, params["e2_w"], params["e2_b"], 2, 1))
    x = jax.nn.relu(_conv_ref(x, params["e3_w"], params["e3_b"], 2, 1))
    x = jax.nn.relu(_convT_ref(x, params["d1_w"], params["d1_b"], 2, 1))
    x = jax.nn.relu(_convT_ref(x, params["d2_w"], params["d2_b"], 2, 1))
    x = jnp.tanh(_convT_ref(x, params["d3_w"], params["d3_b"], 2, 1))
    return jnp.transpose(x, (0, 3, 1, 2))


# --------------------------------------------------------------------------- #

if __name__ == "__main__":
    key = jax.random.PRNGKey(0)
    pkey, xkey = jax.random.split(key)
    params = init_params(pkey)

    # grayscale input, PyTorch NCHW convention: [batch=2, 1, 16, 16]
    x = jax.random.normal(xkey, (2, 1, 16, 16), dtype=jnp.float32)

    out = jax.block_until_ready(jax.jit(colorization_forward)(params, x))
    assert out.shape == (2, 3, 32, 32), out.shape
    assert out.dtype == jnp.float32

    ref = jax.block_until_ready(jax.jit(colorization_ref)(params, x))
    # bf16 MXU operands + f32 accumulation => small relative error vs f32 ref.
    np.testing.assert_allclose(np.asarray(out), np.asarray(ref),
                               rtol=2e-2, atol=2e-2)

    print("KERNEL_OK")
</pallas_src>

<mosaic_0001>
module attributes {stable_mosaic.version = 11 : i64} {
  func.func @_fused_colorization_kernel(%arg0: i32, %arg1: memref<1x256x9xbf16, #tpu.memory_space<vmem>>, %arg2: memref<9x128xbf16, #tpu.memory_space<vmem>>, %arg3: memref<1x128xf32, #tpu.memory_space<vmem>>, %arg4: memref<576x256xbf16, #tpu.memory_space<vmem>>, %arg5: memref<1152x128xbf16, #tpu.memory_space<vmem>>, %arg6: memref<1x128xf32, #tpu.memory_space<vmem>>, %arg7: memref<144x64xbf16, #tpu.memory_space<vmem>>, %arg8: memref<1152x256xbf16, #tpu.memory_space<vmem>>, %arg9: memref<1x256xf32, #tpu.memory_space<vmem>>, %arg10: memref<4x64x16xbf16, #tpu.memory_space<vmem>>, %arg11: memref<4x1024x128xbf16, #tpu.memory_space<vmem>>, %arg12: memref<1x128xf32, #tpu.memory_space<vmem>>, %arg13: memref<4x256x64xbf16, #tpu.memory_space<vmem>>, %arg14: memref<4x512x64xbf16, #tpu.memory_space<vmem>>, %arg15: memref<1x64xf32, #tpu.memory_space<vmem>>, %arg16: memref<128x64xbf16, #tpu.memory_space<vmem>>, %arg17: memref<4x1024x256xf32, #tpu.memory_space<vmem>>, %arg18: memref<8x256xf32, #tpu.memory_space<vmem>>, %arg19: memref<1x4x3x256xf32, #tpu.memory_space<vmem>>) attributes {dimension_semantics = [#tpu.dimension_semantics<parallel>], iteration_bounds = array<i64: 2>, scalar_prefetch = 0 : i64, scratch_operands = 0 : i64, tpu.core_type = #tpu.core_type<tc>, window_params = [{transform_indices = @transform_0, window_bounds = array<i64: 1, 256, 9>}, {pipeline_mode = #tpu.pipeline_mode<synchronous>, transform_indices = @transform_1, window_bounds = array<i64: 9, 128>}, {pipeline_mode = #tpu.pipeline_mode<synchronous>, transform_indices = @transform_2, window_bounds = array<i64: 1, 128>}, {pipeline_mode = #tpu.pipeline_mode<synchronous>, transform_indices = @transform_3, window_bounds = array<i64: 576, 256>}, {pipeline_mode = #tpu.pipeline_mode<synchronous>, transform_indices = @transform_4, window_bounds = array<i64: 1152, 128>}, {pipeline_mode = #tpu.pipeline_mode<synchronous>, transform_indices = @transform_5, window_bounds = array<i64: 1, 128>}, {pipeline_mode = #tpu.pipeline_mode<synchronous>, transform_indices = @transform_6, window_bounds = array<i64: 144, 64>}, {pipeline_mode = #tpu.pipeline_mode<synchronous>, transform_indices = @transform_7, window_bounds = array<i64: 1152, 256>}, {pipeline_mode = #tpu.pipeline_mode<synchronous>, transform_indices = @transform_8, window_bounds = array<i64: 1, 256>}, {pipeline_mode = #tpu.pipeline_mode<synchronous>, transform_indices = @transform_9, window_bounds = array<i64: 4, 64, 16>}, {pipeline_mode = #tpu.pipeline_mode<synchronous>, transform_indices = @transform_10, window_bounds = array<i64: 4, 1024, 128>}, {pipeline_mode = #tpu.pipeline_mode<synchronous>, transform_indices = @transform_11, window_bounds = array<i64: 1, 128>}, {pipeline_mode = #tpu.pipeline_mode<synchronous>, transform_indices = @transform_12, window_bounds = array<i64: 4, 256, 64>}, {pipeline_mode = #tpu.pipeline_mode<synchronous>, transform_indices = @transform_13, window_bounds = array<i64: 4, 512, 64>}, {pipeline_mode = #tpu.pipeline_mode<synchronous>, transform_indices = @transform_14, window_bounds = array<i64: 1, 64>}, {pipeline_mode = #tpu.pipeline_mode<synchronous>, transform_indices = @transform_15, window_bounds = array<i64: 128, 64>}, {pipeline_mode = #tpu.pipeline_mode<synchronous>, transform_indices = @transform_16, window_bounds = array<i64: 4, 1024, 256>}, {pipeline_mode = #tpu.pipeline_mode<synchronous>, transform_indices = @transform_17, window_bounds = array<i64: 8, 256>}, {transform_indices = @transform_18, window_bounds = array<i64: 1, 4, 3, 256>}]} {
    %c0 = arith.constant 0 : index
    %c0_0 = arith.constant 0 : index
    %c0_1 = arith.constant 0 : index
    %0 = vector.load %arg1[%c0, %c0_0, %c0_1] : memref<1x256x9xbf16, #tpu.memory_space<vmem>>, vector<1x256x9xbf16>
    %1 = vector.shape_cast %0 : vector<1x256x9xbf16> to vector<256x9xbf16>
    %c0_2 = arith.constant 0 : index
    %c0_3 = arith.constant 0 : index
    %2 = vector.load %arg2[%c0_2, %c0_3] : memref<9x128xbf16, #tpu.memory_space<vmem>>, vector<9x128xbf16>
    %cst = arith.constant dense<0.000000e+00> : vector<256x128xf32>
    %3 = tpu.matmul %1, %2, %cst {dimension_numbers = #tpu.dot_dimension_numbers<[1], [0], [0], [1], [0, 0, 1, 1], [], []>} : vector<256x9xbf16>, vector<9x128xbf16>, vector<256x128xf32> -> vector<256x128xf32>
    %c0_4 = arith.constant 0 : index
    %c0_5 = arith.constant 0 : index
    %4 = vector.load %arg3[%c0_4, %c0_5] : memref<1x128xf32, #tpu.memory_space<vmem>>, vector<1x128xf32>
    %5 = vector.broadcast %4 : vector<1x128xf32> to vector<256x128xf32>
    %6 = arith.addf %3, %5 : vector<256x128xf32>
    %cst_6 = arith.constant 0.000000e+00 : f32
    %7 = vector.broadcast %cst_6 : f32 to vector<256x128xf32>
    %8 = arith.maximumf %6, %7 : vector<256x128xf32>
    %9 = arith.truncf %8 : vector<256x128xf32> to vector<256x128xbf16>
    %c0_7 = arith.constant 0 : index
    %c0_8 = arith.constant 0 : index
    %10 = vector.load %arg4[%c0_7, %c0_8] : memref<576x256xbf16, #tpu.memory_space<vmem>>, vector<576x256xbf16>
    %cst_9 = arith.constant dense<0.000000e+00> : vector<576x128xf32>
    %11 = tpu.matmul %10, %9, %cst_9 {dimension_numbers = #tpu.dot_dimension_numbers<[1], [0], [0], [1], [0, 0, 1, 1], [], []>} : vector<576x256xbf16>, vector<256x128xbf16>, vector<576x128xf32> -> vector<576x128xf32>
    %12 = arith.truncf %11 : vector<576x128xf32> to vector<576x128xbf16>
    %13 = vector.extract_strided_slice %12 {offsets = [0, 0], sizes = [64, 128], strides = [1, 1]} : vector<576x128xbf16> to vector<64x128xbf16>
    %14 = vector.extract_strided_slice %12 {offsets = [64, 0], sizes = [64, 128], strides = [1, 1]} : vector<576x128xbf16> to vector<64x128xbf16>
    %15 = vector.extract_strided_slice %12 {offsets = [128, 0], sizes = [64, 128], strides = [1, 1]} : vector<576x128xbf16> to vector<64x128xbf16>
    %16 = vector.extract_strided_slice %12 {offsets = [192, 0], sizes = [64, 128], strides = [1, 1]} : vector<576x128xbf16> to vector<64x128xbf16>
    %17 = vector.extract_strided_slice %12 {offsets = [256, 0], sizes = [64, 128], strides = [1, 1]} : vector<576x128xbf16> to vector<64x128xbf16>
    %18 = vector.extract_strided_slice %12 {offsets = [320, 0], sizes = [64, 128], strides = [1, 1]} : vector<576x128xbf16> to vector<64x128xbf16>
    %19 = vector.extract_strided_slice %12 {offsets = [384, 0], sizes = [64, 128], strides = [1, 1]} : vector<576x128xbf16> to vector<64x128xbf16>
    %20 = vector.extract_strided_slice %12 {offsets = [448, 0], sizes = [64, 128], strides = [1, 1]} : vector<576x128xbf16> to vector<64x128xbf16>
    %21 = vector.extract_strided_slice %12 {offsets = [512, 0], sizes = [64, 128], strides = [1, 1]} : vector<576x128xbf16> to vector<64x128xbf16>
    %22 = tpu.concatenate %13, %14, %15, %16, %17, %18, %19, %20, %21 in 1 : vector<64x128xbf16>, vector<64x128xbf16>, vector<64x128xbf16>, vector<64x128xbf16>, vector<64x128xbf16>, vector<64x128xbf16>, vector<64x128xbf16>, vector<64x128xbf16>, vector<64x128xbf16> -> vector<64x1152xbf16>
    %c0_10 = arith.constant 0 : index
    %c0_11 = arith.constant 0 : index
    %23 = vector.load %arg5[%c0_10, %c0_11] : memref<1152x128xbf16, #tpu.memory_space<vmem>>, vector<1152x128xbf16>
    %cst_12 = arith.constant dense<0.000000e+00> : vector<64x128xf32>
    %24 = tpu.matmul %22, %23, %cst_12 {dimension_numbers = #tpu.dot_dimension_numbers<[1], [0], [0], [1], [0, 0, 1, 1], [], []>} : vector<64x1152xbf16>, vector<1152x128xbf16>, vector<64x128xf32> -> vector<64x128xf32>
    %c0_13 = arith.constant 0 : index
    %c0_14 = arith.constant 0 : index
    %25 = vector.load %arg6[%c0_13, %c0_14] : memref<1x128xf32, #tpu.memory_space<vmem>>, vector<1x128xf32>
    %26 = vector.broadcast %25 : vector<1x128xf32> to vector<64x128xf32>
    %27 = arith.addf %24, %26 : vector<64x128xf32>
    %cst_15 = arith.constant 0.000000e+00 : f32
    %28 = vector.broadcast %cst_15 : f32 to vector<64x128xf32>
    %29 = arith.maximumf %27, %28 : vector<64x128xf32>
    %30 = arith.truncf %29 : vector<64x128xf32> to vector<64x128xbf16>
    %c0_16 = arith.constant 0 : index
    %c0_17 = arith.constant 0 : index
    %31 = vector.load %arg7[%c0_16, %c0_17] : memref<144x64xbf16, #tpu.memory_space<vmem>>, vector<144x64xbf16>
    %cst_18 = arith.constant dense<0.000000e+00> : vector<144x128xf32>
    %32 = tpu.matmul %31, %30, %cst_18 {dimension_numbers = #tpu.dot_dimension_numbers<[1], [0], [0], [1], [0, 0, 1, 1], [], []>} : vector<144x64xbf16>, vector<64x128xbf16>, vector<144x128xf32> -> vector<144x128xf32>
    %33 = arith.truncf %32 : vector<144x128xf32> to vector<144x128xbf16>
    %34 = vector.extract_strided_slice %33 {offsets = [0, 0], sizes = [16, 128], strides = [1, 1]} : vector<144x128xbf16> to vector<16x128xbf16>
    %35 = vector.extract_strided_slice %33 {offsets = [16, 0], sizes = [16, 128], strides = [1, 1]} : vector<144x128xbf16> to vector<16x128xbf16>
    %36 = vector.extract_strided_slice %33 {offsets = [32, 0], sizes = [16, 128], strides = [1, 1]} : vector<144x128xbf16> to vector<16x128xbf16>
    %37 = vector.extract_strided_slice %33 {offsets = [48, 0], sizes = [16, 128], strides = [1, 1]} : vector<144x128xbf16> to vector<16x128xbf16>
    %38 = vector.extract_strided_slice %33 {offsets = [64, 0], sizes = [16, 128], strides = [1, 1]} : vector<144x128xbf16> to vector<16x128xbf16>
    %39 = vector.extract_strided_slice %33 {offsets = [80, 0], sizes = [16, 128], strides = [1, 1]} : vector<144x128xbf16> to vector<16x128xbf16>
    %40 = vector.extract_strided_slice %33 {offsets = [96, 0], sizes = [16, 128], strides = [1, 1]} : vector<144x128xbf16> to vector<16x128xbf16>
    %41 = vector.extract_strided_slice %33 {offsets = [112, 0], sizes = [16, 128], strides = [1, 1]} : vector<144x128xbf16> to vector<16x128xbf16>
    %42 = vector.extract_strided_slice %33 {offsets = [128, 0], sizes = [16, 128], strides = [1, 1]} : vector<144x128xbf16> to vector<16x128xbf16>
    %43 = tpu.concatenate %34, %35, %36, %37, %38, %39, %40, %41, %42 in 1 : vector<16x128xbf16>, vector<16x128xbf16>, vector<16x128xbf16>, vector<16x128xbf16>, vector<16x128xbf16>, vector<16x128xbf16>, vector<16x128xbf16>, vector<16x128xbf16>, vector<16x128xbf16> -> vector<16x1152xbf16>
    %c0_19 = arith.constant 0 : index
    %c0_20 = arith.constant 0 : index
    %44 = vector.load %arg8[%c0_19, %c0_20] : memref<1152x256xbf16, #tpu.memory_space<vmem>>, vector<1152x256xbf16>
    %cst_21 = arith.constant dense<0.000000e+00> : vector<16x256xf32>
    %45 = tpu.matmul %43, %44, %cst_21 {dimension_numbers = #tpu.dot_dimension_numbers<[1], [0], [0], [1], [0, 0, 1, 1], [], []>} : vector<16x1152xbf16>, vector<1152x256xbf16>, vector<16x256xf32> -> vector<16x256xf32>
    %c0_22 = arith.constant 0 : index
    %c0_23 = arith.constant 0 : index
    %46 = vector.load %arg9[%c0_22, %c0_23] : memref<1x256xf32, #tpu.memory_space<vmem>>, vector<1x256xf32>
    %47 = vector.broadcast %46 : vector<1x256xf32> to vector<16x256xf32>
    %48 = arith.addf %45, %47 : vector<16x256xf32>
    %cst_24 = arith.constant 0.000000e+00 : f32
    %49 = vector.broadcast %cst_24 : f32 to vector<16x256xf32>
    %50 = arith.maximumf %48, %49 : vector<16x256xf32>
    %51 = arith.truncf %50 : vector<16x256xf32> to vector<16x256xbf16>
    %c0_25 = arith.constant 0 : index
    %c0_26 = arith.constant 0 : index
    %c0_27 = arith.constant 0 : index
    %52 = vector.load %arg10[%c0_25, %c0_26, %c0_27] : memref<4x64x16xbf16, #tpu.memory_space<vmem>>, vector<1x64x16xbf16>
    %53 = vector.shape_cast %52 : vector<1x64x16xbf16> to vector<64x16xbf16>
    %cst_28 = arith.constant dense<0.000000e+00> : vector<64x256xf32>
    %54 = tpu.matmul %53, %51, %cst_28 {dimension_numbers = #tpu.dot_dimension_numbers<[1], [0], [0], [1], [0, 0, 1, 1], [], []>} : vector<64x16xbf16>, vector<16x256xbf16>, vector<64x256xf32> -> vector<64x256xf32>
    %55 = arith.truncf %54 : vector<64x256xf32> to vector<64x256xbf16>
    %56 = vector.extract_strided_slice %55 {offsets = [0, 0], sizes = [16, 256], strides = [1, 1]} : vector<64x256xbf16> to vector<16x256xbf16>
    %57 = vector.extract_strided_slice %55 {offsets = [16, 0], sizes = [16, 256], strides = [1, 1]} : vector<64x256xbf16> to vector<16x256xbf16>
    %58 = vector.extract_strided_slice %55 {offsets = [32, 0], sizes = [16, 256], strides = [1, 1]} : vector<64x256xbf16> to vector<16x256xbf16>
    %59 = vector.extract_strided_slice %55 {offsets = [48, 0], sizes = [16, 256], strides = [1, 1]} : vector<64x256xbf16> to vector<16x256xbf16>
    %60 = tpu.concatenate %56, %57, %58, %59 in 1 : vector<16x256xbf16>, vector<16x256xbf16>, vector<16x256xbf16>, vector<16x256xbf16> -> vector<16x1024xbf16>
    %c0_29 = arith.constant 0 : index
    %c0_30 = arith.constant 0 : index
    %c0_31 = arith.constant 0 : index
    %61 = vector.load %arg11[%c0_29, %c0_30, %c0_31] : memref<4x1024x128xbf16, #tpu.memory_space<vmem>>, vector<1x1024x128xbf16>
    %62 = vector.shape_cast %61 : vector<1x1024x128xbf16> to vector<1024x128xbf16>
    %cst_32 = arith.constant dense<0.000000e+00> : vector<16x128xf32>
    %63 = tpu.matmul %60, %62, %cst_32 {dimension_numbers = #tpu.dot_dimension_numbers<[1], [0], [0], [1], [0, 0, 1, 1], [], []>} : vector<16x1024xbf16>, vector<1024x128xbf16>, vector<16x128xf32> -> vector<16x128xf32>
    %c0_33 = arith.constant 0 : index
    %c0_34 = arith.constant 0 : index
    %64 = vector.load %arg12[%c0_33, %c0_34] : memref<1x128xf32, #tpu.memory_space<vmem>>, vector<1x128xf32>
    %65 = vector.broadcast %64 : vector<1x128xf32> to vector<16x128xf32>
    %66 = arith.addf %63, %65 : vector<16x128xf32>
    %cst_35 = arith.constant 0.000000e+00 : f32
    %67 = vector.broadcast %cst_35 : f32 to vector<16x128xf32>
    %68 = arith.maximumf %66, %67 : vector<16x128xf32>
    %c1 = arith.constant 1 : index
    %c0_36 = arith.constant 0 : index
    %c0_37 = arith.constant 0 : index
    %69 = vector.load %arg10[%c1, %c0_36, %c0_37] : memref<4x64x16xbf16, #tpu.memory_space<vmem>>, vector<1x64x16xbf16>
    %70 = vector.shape_cast %69 : vector<1x64x16xbf16> to vector<64x16xbf16>
    %cst_38 = arith.constant dense<0.000000e+00> : vector<64x256xf32>
    %71 = tpu.matmul %70, %51, %cst_38 {dimension_numbers = #tpu.dot_dimension_numbers<[1], [0], [0], [1], [0, 0, 1, 1], [], []>} : vector<64x16xbf16>, vector<16x256xbf16>, vector<64x256xf32> -> vector<64x256xf32>
    %72 = arith.truncf %71 : vector<64x256xf32> to vector<64x256xbf16>
    %73 = vector.extract_strided_slice %72 {offsets = [0, 0], sizes = [16, 256], strides = [1, 1]} : vector<64x256xbf16> to vector<16x256xbf16>
    %74 = vector.extract_strided_slice %72 {offsets = [16, 0], sizes = [16, 256], strides = [1, 1]} : vector<64x256xbf16> to vector<16x256xbf16>
    %75 = vector.extract_strided_slice %72 {offsets = [32, 0], sizes = [16, 256], strides = [1, 1]} : vector<64x256xbf16> to vector<16x256xbf16>
    %76 = vector.extract_strided_slice %72 {offsets = [48, 0], sizes = [16, 256], strides = [1, 1]} : vector<64x256xbf16> to vector<16x256xbf16>
    %77 = tpu.concatenate %73, %74, %75, %76 in 1 : vector<16x256xbf16>, vector<16x256xbf16>, vector<16x256xbf16>, vector<16x256xbf16> -> vector<16x1024xbf16>
    %c1_39 = arith.constant 1 : index
    %c0_40 = arith.constant 0 : index
    %c0_41 = arith.constant 0 : index
    %78 = vector.load %arg11[%c1_39, %c0_40, %c0_41] : memref<4x1024x128xbf16, #tpu.memory_space<vmem>>, vector<1x1024x128xbf16>
    %79 = vector.shape_cast %78 : vector<1x1024x128xbf16> to vector<1024x128xbf16>
    %cst_42 = arith.constant dense<0.000000e+00> : vector<16x128xf32>
    %80 = tpu.matmul %77, %79, %cst_42 {dimension_numbers = #tpu.dot_dimension_numbers<[1], [0], [0], [1], [0, 0, 1, 1], [], []>} : vector<16x1024xbf16>, vector<1024x128xbf16>, vector<16x128xf32> -> vector<16x128xf32>
    %c0_43 = arith.constant 0 : index
    %c0_44 = arith.constant 0 : index
    %81 = vector.load %arg12[%c0_43, %c0_44] : memref<1x128xf32, #tpu.memory_space<vmem>>, vector<1x128xf32>
    %82 = vector.broadcast %81 : vector<1x128xf32> to vector<16x128xf32>
    %83 = arith.addf %80, %82 : vector<16x128xf32>
    %cst_45 = arith.constant 0.000000e+00 : f32
    %84 = vector.broadcast %cst_45 : f32 to vector<16x128xf32>
    %85 = arith.maximumf %83, %84 : vector<16x128xf32>
    %c2 = arith.constant 2 : index
    %c0_46 = arith.constant 0 : index
    %c0_47 = arith.constant 0 : index
    %86 = vector.load %arg10[%c2, %c0_46, %c0_47] : memref<4x64x16xbf16, #tpu.memory_space<vmem>>, vector<1x64x16xbf16>
    %87 = vector.shape_cast %86 : vector<1x64x16xbf16> to vector<64x16xbf16>
    %cst_48 = arith.constant dense<0.000000e+00> : vector<64x256xf32>
    %88 = tpu.matmul %87, %51, %cst_48 {dimension_numbers = #tpu.dot_dimension_numbers<[1], [0], [0], [1], [0, 0, 1, 1], [], []>} : vector<64x16xbf16>, vector<16x256xbf16>, vector<64x256xf32> -> vector<64x256xf32>
    %89 = arith.truncf %88 : vector<64x256xf32> to vector<64x256xbf16>
    %90 = vector.extract_strided_slice %89 {offsets = [0, 0], sizes = [16, 256], strides = [1, 1]} : vector<64x256xbf16> to vector<16x256xbf16>
    %91 = vector.extract_strided_slice %89 {offsets = [16, 0], sizes = [16, 256], strides = [1, 1]} : vector<64x256xbf16> to vector<16x256xbf16>
    %92 = vector.extract_strided_slice %89 {offsets = [32, 0], sizes = [16, 256], strides = [1, 1]} : vector<64x256xbf16> to vector<16x256xbf16>
    %93 = vector.extract_strided_slice %89 {offsets = [48, 0], sizes = [16, 256], strides = [1, 1]} : vector<64x256xbf16> to vector<16x256xbf16>
    %94 = tpu.concatenate %90, %91, %92, %93 in 1 : vector<16x256xbf16>, vector<16x256xbf16>, vector<16x256xbf16>, vector<16x256xbf16> -> vector<16x1024xbf16>
    %c2_49 = arith.constant 2 : index
    %c0_50 = arith.constant 0 : index
    %c0_51 = arith.constant 0 : index
    %95 = vector.load %arg11[%c2_49, %c0_50, %c0_51] : memref<4x1024x128xbf16, #tpu.memory_space<vmem>>, vector<1x1024x128xbf16>
    %96 = vector.shape_cast %95 : vector<1x1024x128xbf16> to vector<1024x128xbf16>
    %cst_52 = arith.constant dense<0.000000e+00> : vector<16x128xf32>
    %97 = tpu.matmul %94, %96, %cst_52 {dimension_numbers = #tpu.dot_dimension_numbers<[1], [0], [0], [1], [0, 0, 1, 1], [], []>} : vector<16x1024xbf16>, vector<1024x128xbf16>, vector<16x128xf32> -> vector<16x128xf32>
    %c0_53 = arith.constant 0 : index
    %c0_54 = arith.constant 0 : index
    %98 = vector.load %arg12[%c0_53, %c0_54] : memref<1x128xf32, #tpu.memory_space<vmem>>, vector<1x128xf32>
    %99 = vector.broadcast %98 : vector<1x128xf32> to vector<16x128xf32>
    %100 = arith.addf %97, %99 : vector<16x128xf32>
    %cst_55 = arith.constant 0.000000e+00 : f32
    %101 = vector.broadcast %cst_55 : f32 to vector<16x128xf32>
    %102 = arith.maximumf %100, %101 : vector<16x128xf32>
    %c3 = arith.constant 3 : index
    %c0_56 = arith.constant 0 : index
    %c0_57 = arith.constant 0 : index
    %103 = vector.load %arg10[%c3, %c0_56, %c0_57] : memref<4x64x16xbf16, #tpu.memory_space<vmem>>, vector<1x64x16xbf16>
    %104 = vector.shape_cast %103 : vector<1x64x16xbf16> to vector<64x16xbf16>
    %cst_58 = arith.constant dense<0.000000e+00> : vector<64x256xf32>
    %105 = tpu.matmul %104, %51, %cst_58 {dimension_numbers = #tpu.dot_dimension_numbers<[1], [0], [0], [1], [0, 0, 1, 1], [], []>} : vector<64x16xbf16>, vector<16x256xbf16>, vector<64x256xf32> -> vector<64x256xf32>
    %106 = arith.truncf %105 : vector<64x256xf32> to vector<64x256xbf16>
    %107 = vector.extract_strided_slice %106 {offsets = [0, 0], sizes = [16, 256], strides = [1, 1]} : vector<64x256xbf16> to vector<16x256xbf16>
    %108 = vector.extract_strided_slice %106 {offsets = [16, 0], sizes = [16, 256], strides = [1, 1]} : vector<64x256xbf16> to vector<16x256xbf16>
    %109 = vector.extract_strided_slice %106 {offsets = [32, 0], sizes = [16, 256], strides = [1, 1]} : vector<64x256xbf16> to vector<16x256xbf16>
    %110 = vector.extract_strided_slice %106 {offsets = [48, 0], sizes = [16, 256], strides = [1, 1]} : vector<64x256xbf16> to vector<16x256xbf16>
    %111 = tpu.concatenate %107, %108, %109, %110 in 1 : vector<16x256xbf16>, vector<16x256xbf16>, vector<16x256xbf16>, vector<16x256xbf16> -> vector<16x1024xbf16>
    %c3_59 = arith.constant 3 : index
    %c0_60 = arith.constant 0 : index
    %c0_61 = arith.constant 0 : index
    %112 = vector.load %arg11[%c3_59, %c0_60, %c0_61] : memref<4x1024x128xbf16, #tpu.memory_space<vmem>>, vector<1x1024x128xbf16>
    %113 = vector.shape_cast %112 : vector<1x1024x128xbf16> to vector<1024x128xbf16>
    %cst_62 = arith.constant dense<0.000000e+00> : vector<16x128xf32>
    %114 = tpu.matmul %111, %113, %cst_62 {dimension_numbers = #tpu.dot_dimension_numbers<[1], [0], [0], [1], [0, 0, 1, 1], [], []>} : vector<16x1024xbf16>, vector<1024x128xbf16>, vector<16x128xf32> -> vector<16x128xf32>
    %c0_63 = arith.constant 0 : index
    %c0_64 = arith.constant 0 : index
    %115 = vector.load %arg12[%c0_63, %c0_64] : memref<1x128xf32, #tpu.memory_space<vmem>>, vector<1x128xf32>
    %116 = vector.broadcast %115 : vector<1x128xf32> to vector<16x128xf32>
    %117 = arith.addf %114, %116 : vector<16x128xf32>
    %cst_65 = arith.constant 0.000000e+00 : f32
    %118 = vector.broadcast %cst_65 : f32 to vector<16x128xf32>
    %119 = arith.maximumf %117, %118 : vector<16x128xf32>
    %120 = tpu.concatenate %68, %85, %102, %119 in 0 : vector<16x128xf32>, vector<16x128xf32>, vector<16x128xf32>, vector<16x128xf32> -> vector<64x128xf32>
    %121 = arith.truncf %120 : vector<64x128xf32> to vector<64x128xbf16>
    %c0_66 = arith.constant 0 : index
    %c0_67 = arith.constant 0 : index
    %c0_68 = arith.constant 0 : index
    %122 = vector.load %arg13[%c0_66, %c0_67, %c0_68] : memref<4x256x64xbf16, #tpu.memory_space<vmem>>, vector<1x256x64xbf16>
    %123 = vector.shape_cast %122 : vector<1x256x64xbf16> to vector<256x64xbf16>
    %cst_69 = arith.constant dense<0.000000e+00> : vector<256x128xf32>
    %124 = tpu.matmul %123, %121, %cst_69 {dimension_numbers = #tpu.dot_dimension_numbers<[1], [0], [0], [1], [0, 0, 1, 1], [], []>} : vector<256x64xbf16>, vector<64x128xbf16>, vector<256x128xf32> -> vector<256x128xf32>
    %125 = arith.truncf %124 : vector<256x128xf32> to vector<256x128xbf16>
    %126 = vector.extract_strided_slice %125 {offsets = [0, 0], sizes = [64, 128], strides = [1, 1]} : vector<256x128xbf16> to vector<64x128xbf16>
    %127 = vector.extract_strided_slice %125 {offsets = [64, 0], sizes = [64, 128], strides = [1, 1]} : vector<256x128xbf16> to vector<64x128xbf16>
    %128 = vector.extract_strided_slice %125 {offsets = [128, 0], sizes = [64, 128], strides = [1, 1]} : vector<256x128xbf16> to vector<64x128xbf16>
    %129 = vector.extract_strided_slice %125 {offsets = [192, 0], sizes = [64, 128], strides = [1, 1]} : vector<256x128xbf16> to vector<64x128xbf16>
    %130 = tpu.concatenate %126, %127, %128, %129 in 1 : vector<64x128xbf16>, vector<64x128xbf16>, vector<64x128xbf16>, vector<64x128xbf16> -> vector<64x512xbf16>
    %c0_70 = arith.constant 0 : index
    %c0_71 = arith.constant 0 : index
    %c0_72 = arith.constant 0 : index
    %131 = vector.load %arg14[%c0_70, %c0_71, %c0_72] : memref<4x512x64xbf16, #tpu.memory_space<vmem>>, vector<1x512x64xbf16>
    %132 = vector.shape_cast %131 : vector<1x512x64xbf16> to vector<512x64xbf16>
    %cst_73 = arith.constant dense<0.000000e+00> : vector<64x64xf32>
    %133 = tpu.matmul %130, %132, %cst_73 {dimension_numbers = #tpu.dot_dimension_numbers<[1], [0], [0], [1], [0, 0, 1, 1], [], []>} : vector<64x512xbf16>, vector<512x64xbf16>, vector<64x64xf32> -> vector<64x64xf32>
    %c0_74 = arith.constant 0 : index
    %c0_75 = arith.constant 0 : index
    %134 = vector.load %arg15[%c0_74, %c0_75] : memref<1x64xf32, #tpu.memory_space<vmem>>, vector<1x64xf32>
    %135 = vector.broadcast %134 : vector<1x64xf32> to vector<64x64xf32>
    %136 = arith.addf %133, %135 : vector<64x64xf32>
    %cst_76 = arith.constant 0.000000e+00 : f32
    %137 = vector.broadcast %cst_76 : f32 to vector<64x64xf32>
    %138 = arith.maximumf %136, %137 : vector<64x64xf32>
    %c1_77 = arith.constant 1 : index
    %c0_78 = arith.constant 0 : index
    %c0_79 = arith.constant 0 : index
    %139 = vector.load %arg13[%c1_77, %c0_78, %c0_79] : memref<4x256x64xbf16, #tpu.memory_space<vmem>>, vector<1x256x64xbf16>
    %140 = vector.shape_cast %139 : vector<1x256x64xbf16> to vector<256x64xbf16>
    %cst_80 = arith.constant dense<0.000000e+00> : vector<256x128xf32>
    %141 = tpu.matmul %140, %121, %cst_80 {dimension_numbers = #tpu.dot_dimension_numbers<[1], [0], [0], [1], [0, 0, 1, 1], [], []>} : vector<256x64xbf16>, vector<64x128xbf16>, vector<256x128xf32> -> vector<256x128xf32>
    %142 = arith.truncf %141 : vector<256x128xf32> to vector<256x128xbf16>
    %143 = vector.extract_strided_slice %142 {offsets = [0, 0], sizes = [64, 128], strides = [1, 1]} : vector<256x128xbf16> to vector<64x128xbf16>
    %144 = vector.extract_strided_slice %142 {offsets = [64, 0], sizes = [64, 128], strides = [1, 1]} : vector<256x128xbf16> to vector<64x128xbf16>
    %145 = vector.extract_strided_slice %142 {offsets = [128, 0], sizes = [64, 128], strides = [1, 1]} : vector<256x128xbf16> to vector<64x128xbf16>
    %146 = vector.extract_strided_slice %142 {offsets = [192, 0], sizes = [64, 128], strides = [1, 1]} : vector<256x128xbf16> to vector<64x128xbf16>
    %147 = tpu.concatenate %143, %144, %145, %146 in 1 : vector<64x128xbf16>, vector<64x128xbf16>, vector<64x128xbf16>, vector<64x128xbf16> -> vector<64x512xbf16>
    %c1_81 = arith.constant 1 : index
    %c0_82 = arith.constant 0 : index
    %c0_83 = arith.constant 0 : index
    %148 = vector.load %arg14[%c1_81, %c0_82, %c0_83] : memref<4x512x64xbf16, #tpu.memory_space<vmem>>, vector<1x512x64xbf16>
    %149 = vector.shape_cast %148 : vector<1x512x64xbf16> to vector<512x64xbf16>
    %cst_84 = arith.constant dense<0.000000e+00> : vector<64x64xf32>
    %150 = tpu.matmul %147, %149, %cst_84 {dimension_numbers = #tpu.dot_dimension_numbers<[1], [0], [0], [1], [0, 0, 1, 1], [], []>} : vector<64x512xbf16>, vector<512x64xbf16>, vector<64x64xf32> -> vector<64x64xf32>
    %c0_85 = arith.constant 0 : index
    %c0_86 = arith.constant 0 : index
    %151 = vector.load %arg15[%c0_85, %c0_86] : memref<1x64xf32, #tpu.memory_space<vmem>>, vector<1x64xf32>
    %152 = vector.broadcast %151 : vector<1x64xf32> to vector<64x64xf32>
    %153 = arith.addf %150, %152 : vector<64x64xf32>
    %cst_87 = arith.constant 0.000000e+00 : f32
    %154 = vector.broadcast %cst_87 : f32 to vector<64x64xf32>
    %155 = arith.maximumf %153, %154 : vector<64x64xf32>
    %c2_88 = arith.constant 2 : index
    %c0_89 = arith.constant 0 : index
    %c0_90 = arith.constant 0 : index
    %156 = vector.load %arg13[%c2_88, %c0_89, %c0_90] : memref<4x256x64xbf16, #tpu.memory_space<vmem>>, vector<1x256x64xbf16>
    %157 = vector.shape_cast %156 : vector<1x256x64xbf16> to vector<256x64xbf16>
    %cst_91 = arith.constant dense<0.000000e+00> : vector<256x128xf32>
    %158 = tpu.matmul %157, %121, %cst_91 {dimension_numbers = #tpu.dot_dimension_numbers<[1], [0], [0], [1], [0, 0, 1, 1], [], []>} : vector<256x64xbf16>, vector<64x128xbf16>, vector<256x128xf32> -> vector<256x128xf32>
    %159 = arith.truncf %158 : vector<256x128xf32> to vector<256x128xbf16>
    %160 = vector.extract_strided_slice %159 {offsets = [0, 0], sizes = [64, 128], strides = [1, 1]} : vector<256x128xbf16> to vector<64x128xbf16>
    %161 = vector.extract_strided_slice %159 {offsets = [64, 0], sizes = [64, 128], strides = [1, 1]} : vector<256x128xbf16> to vector<64x128xbf16>
    %162 = vector.extract_strided_slice %159 {offsets = [128, 0], sizes = [64, 128], strides = [1, 1]} : vector<256x128xbf16> to vector<64x128xbf16>
    %163 = vector.extract_strided_slice %159 {offsets = [192, 0], sizes = [64, 128], strides = [1, 1]} : vector<256x128xbf16> to vector<64x128xbf16>
    %164 = tpu.concatenate %160, %161, %162, %163 in 1 : vector<64x128xbf16>, vector<64x128xbf16>, vector<64x128xbf16>, vector<64x128xbf16> -> vector<64x512xbf16>
    %c2_92 = arith.constant 2 : index
    %c0_93 = arith.constant 0 : index
    %c0_94 = arith.constant 0 : index
    %165 = vector.load %arg14[%c2_92, %c0_93, %c0_94] : memref<4x512x64xbf16, #tpu.memory_space<vmem>>, vector<1x512x64xbf16>
    %166 = vector.shape_cast %165 : vector<1x512x64xbf16> to vector<512x64xbf16>
    %cst_95 = arith.constant dense<0.000000e+00> : vector<64x64xf32>
    %167 = tpu.matmul %164, %166, %cst_95 {dimension_numbers = #tpu.dot_dimension_numbers<[1], [0], [0], [1], [0, 0, 1, 1], [], []>} : vector<64x512xbf16>, vector<512x64xbf16>, vector<64x64xf32> -> vector<64x64xf32>
    %c0_96 = arith.constant 0 : index
    %c0_97 = arith.constant 0 : index
    %168 = vector.load %arg15[%c0_96, %c0_97] : memref<1x64xf32, #tpu.memory_space<vmem>>, vector<1x64xf32>
    %169 = vector.broadcast %168 : vector<1x64xf32> to vector<64x64xf32>
    %170 = arith.addf %167, %169 : vector<64x64xf32>
    %cst_98 = arith.constant 0.000000e+00 : f32
    %171 = vector.broadcast %cst_98 : f32 to vector<64x64xf32>
    %172 = arith.maximumf %170, %171 : vector<64x64xf32>
    %c3_99 = arith.constant 3 : index
    %c0_100 = arith.constant 0 : index
    %c0_101 = arith.constant 0 : index
    %173 = vector.load %arg13[%c3_99, %c0_100, %c0_101] : memref<4x256x64xbf16, #tpu.memory_space<vmem>>, vector<1x256x64xbf16>
    %174 = vector.shape_cast %173 : vector<1x256x64xbf16> to vector<256x64xbf16>
    %cst_102 = arith.constant dense<0.000000e+00> : vector<256x128xf32>
    %175 = tpu.matmul %174, %121, %cst_102 {dimension_numbers = #tpu.dot_dimension_numbers<[1], [0], [0], [1], [0, 0, 1, 1], [], []>} : vector<256x64xbf16>, vector<64x128xbf16>, vector<256x128xf32> -> vector<256x128xf32>
    %176 = arith.truncf %175 : vector<256x128xf32> to vector<256x128xbf16>
    %177 = vector.extract_strided_slice %176 {offsets = [0, 0], sizes = [64, 128], strides = [1, 1]} : vector<256x128xbf16> to vector<64x128xbf16>
    %178 = vector.extract_strided_slice %176 {offsets = [64, 0], sizes = [64, 128], strides = [1, 1]} : vector<256x128xbf16> to vector<64x128xbf16>
    %179 = vector.extract_strided_slice %176 {offsets = [128, 0], sizes = [64, 128], strides = [1, 1]} : vector<256x128xbf16> to vector<64x128xbf16>
    %180 = vector.extract_strided_slice %176 {offsets = [192, 0], sizes = [64, 128], strides = [1, 1]} : vector<256x128xbf16> to vector<64x128xbf16>
    %181 = tpu.concatenate %177, %178, %179, %180 in 1 : vector<64x128xbf16>, vector<64x128xbf16>, vector<64x128xbf16>, vector<64x128xbf16> -> vector<64x512xbf16>
    %c3_103 = arith.constant 3 : index
    %c0_104 = arith.constant 0 : index
    %c0_105 = arith.constant 0 : index
    %182 = vector.load %arg14[%c3_103, %c0_104, %c0_105] : memref<4x512x64xbf16, #tpu.memory_space<vmem>>, vector<1x512x64xbf16>
    %183 = vector.shape_cast %182 : vector<1x512x64xbf16> to vector<512x64xbf16>
    %cst_106 = arith.constant dense<0.000000e+00> : vector<64x64xf32>
    %184 = tpu.matmul %181, %183, %cst_106 {dimension_numbers = #tpu.dot_dimension_numbers<[1], [0], [0], [1], [0, 0, 1, 1], [], []>} : vector<64x512xbf16>, vector<512x64xbf16>, vector<64x64xf32> -> vector<64x64xf32>
    %c0_107 = arith.constant 0 : index
    %c0_108 = arith.constant 0 : index
    %185 = vector.load %arg15[%c0_107, %c0_108] : memref<1x64xf32, #tpu.memory_space<vmem>>, vector<1x64xf32>
    %186 = vector.broadcast %185 : vector<1x64xf32> to vector<64x64xf32>
    %187 = arith.addf %184, %186 : vector<64x64xf32>
    %cst_109 = arith.constant 0.000000e+00 : f32
    %188 = vector.broadcast %cst_109 : f32 to vector<64x64xf32>
    %189 = arith.maximumf %187, %188 : vector<64x64xf32>
    %190 = tpu.concatenate %138, %155, %172, %189 in 0 : vector<64x64xf32>, vector<64x64xf32>, vector<64x64xf32>, vector<64x64xf32> -> vector<256x64xf32>
    %c0_110 = arith.constant 0 : index
    %c0_111 = arith.constant 0 : index
    %191 = vector.load %arg16[%c0_110, %c0_111] : memref<128x64xbf16, #tpu.memory_space<vmem>>, vector<128x64xbf16>
    %192 = arith.truncf %190 : vector<256x64xf32> to vector<256x64xbf16>
    %cst_112 = arith.constant dense<0.000000e+00> : vector<128x256xf32>
    %193 = tpu.matmul %191, %192, %cst_112 {dimension_numbers = #tpu.dot_dimension_numbers<[1], [1], [0], [0], [0, 0, 1, 0], [], []>} : vector<128x64xbf16>, vector<256x64xbf16>, vector<128x256xf32> -> vector<128x256xf32>
    %194 = vector.extract_strided_slice %193 {offsets = [0, 0], sizes = [8, 256], strides = [1, 1]} : vector<128x256xf32> to vector<8x256xf32>
    %195 = vector.extract_strided_slice %193 {offsets = [8, 0], sizes = [8, 256], strides = [1, 1]} : vector<128x256xf32> to vector<8x256xf32>
    %196 = vector.extract_strided_slice %193 {offsets = [16, 0], sizes = [8, 256], strides = [1, 1]} : vector<128x256xf32> to vector<8x256xf32>
    %197 = vector.extract_strided_slice %193 {offsets = [24, 0], sizes = [8, 256], strides = [1, 1]} : vector<128x256xf32> to vector<8x256xf32>
    %198 = tpu.concatenate %194, %195, %196, %197 in 1 : vector<8x256xf32>, vector<8x256xf32>, vector<8x256xf32>, vector<8x256xf32> -> vector<8x1024xf32>
    %c0_113 = arith.constant 0 : index
    %c0_114 = arith.constant 0 : index
    %c0_115 = arith.constant 0 : index
    %199 = vector.load %arg17[%c0_113, %c0_114, %c0_115] : memref<4x1024x256xf32, #tpu.memory_space<vmem>>, vector<1x1024x256xf32>
    %200 = vector.shape_cast %199 : vector<1x1024x256xf32> to vector<1024x256xf32>
    %cst_116 = arith.constant dense<0.000000e+00> : vector<8x256xf32>
    %201 = tpu.matmul %198, %200, %cst_116 {dimension_numbers = #tpu.dot_dimension_numbers<[1], [0], [0], [1], [0, 0, 1, 1], [], []>} : vector<8x1024xf32>, vector<1024x256xf32>, vector<8x256xf32> -> vector<8x256xf32>
    %c0_117 = arith.constant 0 : index
    %c0_118 = arith.constant 0 : index
    %202 = vector.load %arg18[%c0_117, %c0_118] : memref<8x256xf32, #tpu.memory_space<vmem>>, vector<8x256xf32>
    %203 = arith.addf %201, %202 : vector<8x256xf32>
    %204 = math.tanh %203 : vector<8x256xf32>
    %205 = vector.extract_strided_slice %204 {offsets = [0, 0], sizes = [3, 256], strides = [1, 1]} : vector<8x256xf32> to vector<3x256xf32>
    %c0_119 = arith.constant 0 : index
    %c0_120 = arith.constant 0 : index
    %c0_121 = arith.constant 0 : index
    %c0_122 = arith.constant 0 : index
    %206 = vector.load %arg19[%c0_119, %c0_120, %c0_121, %c0_122] : memref<1x4x3x256xf32, #tpu.memory_space<vmem>>, vector<1x1x3x256xf32>
    %207 = vector.shape_cast %206 : vector<1x1x3x256xf32> to vector<3x256xf32>
    %208 = vector.shape_cast %205 : vector<3x256xf32> to vector<1x1x3x256xf32>
    tpu.vector_store %arg19[%c0_119, %c0_120, %c0_121, %c0_122], %208 {strides = array<i32>} : memref<1x4x3x256xf32, #tpu.memory_space<vmem>>, vector<1x1x3x256xf32>,
    %209 = vector.extract_strided_slice %193 {offsets = [32, 0], sizes = [8, 256], strides = [1, 1]} : vector<128x256xf32> to vector<8x256xf32>
    %210 = vector.extract_strided_slice %193 {offsets = [40, 0], sizes = [8, 256], strides = [1, 1]} : vector<128x256xf32> to vector<8x256xf32>
    %211 = vector.extract_strided_slice %193 {offsets = [48, 0], sizes = [8, 256], strides = [1, 1]} : vector<128x256xf32> to vector<8x256xf32>
    %212 = vector.extract_strided_slice %193 {offsets = [56, 0], sizes = [8, 256], strides = [1, 1]} : vector<128x256xf32> to vector<8x256xf32>
    %213 = tpu.concatenate %209, %210, %211, %212 in 1 : vector<8x256xf32>, vector<8x256xf32>, vector<8x256xf32>, vector<8x256xf32> -> vector<8x1024xf32>
    %c1_123 = arith.constant 1 : index
    %c0_124 = arith.constant 0 : index
    %c0_125 = arith.constant 0 : index
    %214 = vector.load %arg17[%c1_123, %c0_124, %c0_125] : memref<4x1024x256xf32, #tpu.memory_space<vmem>>, vector<1x1024x256xf32>
    %215 = vector.shape_cast %214 : vector<1x1024x256xf32> to vector<1024x256xf32>
    %cst_126 = arith.constant dense<0.000000e+00> : vector<8x256xf32>
    %216 = tpu.matmul %213, %215, %cst_126 {dimension_numbers = #tpu.dot_dimension_numbers<[1], [0], [0], [1], [0, 0, 1, 1], [], []>} : vector<8x1024xf32>, vector<1024x256xf32>, vector<8x256xf32> -> vector<8x256xf32>
    %c0_127 = arith.constant 0 : index
    %c0_128 = arith.constant 0 : index
    %217 = vector.load %arg18[%c0_127, %c0_128] : memref<8x256xf32, #tpu.memory_space<vmem>>, vector<8x256xf32>
    %218 = arith.addf %216, %217 : vector<8x256xf32>
    %219 = math.tanh %218 : vector<8x256xf32>
    %220 = vector.extract_strided_slice %219 {offsets = [0, 0], sizes = [3, 256], strides = [1, 1]} : vector<8x256xf32> to vector<3x256xf32>
    %c0_129 = arith.constant 0 : index
    %c1_130 = arith.constant 1 : index
    %c0_131 = arith.constant 0 : index
    %c0_132 = arith.constant 0 : index
    %221 = vector.load %arg19[%c0_129, %c1_130, %c0_131, %c0_132] : memref<1x4x3x256xf32, #tpu.memory_space<vmem>>, vector<1x1x3x256xf32>
    %222 = vector.shape_cast %221 : vector<1x1x3x256xf32> to vector<3x256xf32>
    %223 = vector.shape_cast %220 : vector<3x256xf32> to vector<1x1x3x256xf32>
    tpu.vector_store %arg19[%c0_129, %c1_130, %c0_131, %c0_132], %223 {strides = array<i32>} : memref<1x4x3x256xf32, #tpu.memory_space<vmem>>, vector<1x1x3x256xf32>,
    %224 = vector.extract_strided_slice %193 {offsets = [64, 0], sizes = [8, 256], strides = [1, 1]} : vector<128x256xf32> to vector<8x256xf32>
    %225 = vector.extract_strided_slice %193 {offsets = [72, 0], sizes = [8, 256], strides = [1, 1]} : vector<128x256xf32> to vector<8x256xf32>
    %226 = vector.extract_strided_slice %193 {offsets = [80, 0], sizes = [8, 256], strides = [1, 1]} : vector<128x256xf32> to vector<8x256xf32>
    %227 = vector.extract_strided_slice %193 {offsets = [88, 0], sizes = [8, 256], strides = [1, 1]} : vector<128x256xf32> to vector<8x256xf32>
    %228 = tpu.concatenate %224, %225, %226, %227 in 1 : vector<8x256xf32>, vector<8x256xf32>, vector<8x256xf32>, vector<8x256xf32> -> vector<8x1024xf32>
    %c2_133 = arith.constant 2 : index
    %c0_134 = arith.constant 0 : index
    %c0_135 = arith.constant 0 : index
    %229 = vector.load %arg17[%c2_133, %c0_134, %c0_135] : memref<4x1024x256xf32, #tpu.memory_space<vmem>>, vector<1x1024x256xf32>
    %230 = vector.shape_cast %229 : vector<1x1024x256xf32> to vector<1024x256xf32>
    %cst_136 = arith.constant dense<0.000000e+00> : vector<8x256xf32>
    %231 = tpu.matmul %228, %230, %cst_136 {dimension_numbers = #tpu.dot_dimension_numbers<[1], [0], [0], [1], [0, 0, 1, 1], [], []>} : vector<8x1024xf32>, vector<1024x256xf32>, vector<8x256xf32> -> vector<8x256xf32>
    %c0_137 = arith.constant 0 : index
    %c0_138 = arith.constant 0 : index
    %232 = vector.load %arg18[%c0_137, %c0_138] : memref<8x256xf32, #tpu.memory_space<vmem>>, vector<8x256xf32>
    %233 = arith.addf %231, %232 : vector<8x256xf32>
    %234 = math.tanh %233 : vector<8x256xf32>
    %235 = vector.extract_strided_slice %234 {offsets = [0, 0], sizes = [3, 256], strides = [1, 1]} : vector<8x256xf32> to vector<3x256xf32>
    %c0_139 = arith.constant 0 : index
    %c2_140 = arith.constant 2 : index
    %c0_141 = arith.constant 0 : index
    %c0_142 = arith.constant 0 : index
    %236 = vector.load %arg19[%c0_139, %c2_140, %c0_141, %c0_142] : memref<1x4x3x256xf32, #tpu.memory_space<vmem>>, vector<1x1x3x256xf32>
    %237 = vector.shape_cast %236 : vector<1x1x3x256xf32> to vector<3x256xf32>
    %238 = vector.shape_cast %235 : vector<3x256xf32> to vector<1x1x3x256xf32>
    tpu.vector_store %arg19[%c0_139, %c2_140, %c0_141, %c0_142], %238 {strides = array<i32>} : memref<1x4x3x256xf32, #tpu.memory_space<vmem>>, vector<1x1x3x256xf32>,
    %239 = vector.extract_strided_slice %193 {offsets = [96, 0], sizes = [8, 256], strides = [1, 1]} : vector<128x256xf32> to vector<8x256xf32>
    %240 = vector.extract_strided_slice %193 {offsets = [104, 0], sizes = [8, 256], strides = [1, 1]} : vector<128x256xf32> to vector<8x256xf32>
    %241 = vector.extract_strided_slice %193 {offsets = [112, 0], sizes = [8, 256], strides = [1, 1]} : vector<128x256xf32> to vector<8x256xf32>
    %242 = vector.extract_strided_slice %193 {offsets = [120, 0], sizes = [8, 256], strides = [1, 1]} : vector<128x256xf32> to vector<8x256xf32>
    %243 = tpu.concatenate %239, %240, %241, %242 in 1 : vector<8x256xf32>, vector<8x256xf32>, vector<8x256xf32>, vector<8x256xf32> -> vector<8x1024xf32>
    %c3_143 = arith.constant 3 : index
    %c0_144 = arith.constant 0 : index
    %c0_145 = arith.constant 0 : index
    %244 = vector.load %arg17[%c3_143, %c0_144, %c0_145] : memref<4x1024x256xf32, #tpu.memory_space<vmem>>, vector<1x1024x256xf32>
    %245 = vector.shape_cast %244 : vector<1x1024x256xf32> to vector<1024x256xf32>
    %cst_146 = arith.constant dense<0.000000e+00> : vector<8x256xf32>
    %246 = tpu.matmul %243, %245, %cst_146 {dimension_numbers = #tpu.dot_dimension_numbers<[1], [0], [0], [1], [0, 0, 1, 1], [], []>} : vector<8x1024xf32>, vector<1024x256xf32>, vector<8x256xf32> -> vector<8x256xf32>
    %c0_147 = arith.constant 0 : index
    %c0_148 = arith.constant 0 : index
    %247 = vector.load %arg18[%c0_147, %c0_148] : memref<8x256xf32, #tpu.memory_space<vmem>>, vector<8x256xf32>
    %248 = arith.addf %246, %247 : vector<8x256xf32>
    %249 = math.tanh %248 : vector<8x256xf32>
    %250 = vector.extract_strided_slice %249 {offsets = [0, 0], sizes = [3, 256], strides = [1, 1]} : vector<8x256xf32> to vector<3x256xf32>
    %c0_149 = arith.constant 0 : index
    %c3_150 = arith.constant 3 : index
    %c0_151 = arith.constant 0 : index
    %c0_152 = arith.constant 0 : index
    %251 = vector.load %arg19[%c0_149, %c3_150, %c0_151, %c0_152] : memref<1x4x3x256xf32, #tpu.memory_space<vmem>>, vector<1x1x3x256xf32>
    %252 = vector.shape_cast %251 : vector<1x1x3x256xf32> to vector<3x256xf32>
    %253 = vector.shape_cast %250 : vector<3x256xf32> to vector<1x1x3x256xf32>
    tpu.vector_store %arg19[%c0_149, %c3_150, %c0_151, %c0_152], %253 {strides = array<i32>} : memref<1x4x3x256xf32, #tpu.memory_space<vmem>>, vector<1x1x3x256xf32>,
    return
  }
  func.func @transform_0(%arg0: i32) -> (i32, i32, i32) {
    %c0_i32 = arith.constant 0 : i32
    %c0_i32_0 = arith.constant 0 : i32
    %c0_i32_1 = arith.constant 0 : i32
    return %arg0, %c0_i32, %c0_i32_0 : i32, i32, i32
  }
  func.func @transform_1(%arg0: i32) -> (i32, i32) {
    %c0_i32 = arith.constant 0 : i32
    %c0_i32_0 = arith.constant 0 : i32
    %c0_i32_1 = arith.constant 0 : i32
    return %c0_i32, %c0_i32_0 : i32, i32
  }
  func.func @transform_2(%arg0: i32) -> (i32, i32) {
    %c0_i32 = arith.constant 0 : i32
    %c0_i32_0 = arith.constant 0 : i32
    %c0_i32_1 = arith.constant 0 : i32
    return %c0_i32, %c0_i32_0 : i32, i32
  }
  func.func @transform_3(%arg0: i32) -> (i32, i32) {
    %c0_i32 = arith.constant 0 : i32
    %c0_i32_0 = arith.constant 0 : i32
    %c0_i32_1 = arith.constant 0 : i32
    return %c0_i32, %c0_i32_0 : i32, i32
  }
  func.func @transform_4(%arg0: i32) -> (i32, i32) {
    %c0_i32 = arith.constant 0 : i32
    %c0_i32_0 = arith.constant 0 : i32
    %c0_i32_1 = arith.constant 0 : i32
    return %c0_i32, %c0_i32_0 : i32, i32
  }
  func.func @transform_5(%arg0: i32) -> (i32, i32) {
    %c0_i32 = arith.constant 0 : i32
    %c0_i32_0 = arith.constant 0 : i32
    %c0_i32_1 = arith.constant 0 : i32
    return %c0_i32, %c0_i32_0 : i32, i32
  }
  func.func @transform_6(%arg0: i32) -> (i32, i32) {
    %c0_i32 = arith.constant 0 : i32
    %c0_i32_0 = arith.constant 0 : i32
    %c0_i32_1 = arith.constant 0 : i32
    return %c0_i32, %c0_i32_0 : i32, i32
  }
  func.func @transform_7(%arg0: i32) -> (i32, i32) {
    %c0_i32 = arith.constant 0 : i32
    %c0_i32_0 = arith.constant 0 : i32
    %c0_i32_1 = arith.constant 0 : i32
    return %c0_i32, %c0_i32_0 : i32, i32
  }
  func.func @transform_8(%arg0: i32) -> (i32, i32) {
    %c0_i32 = arith.constant 0 : i32
    %c0_i32_0 = arith.constant 0 : i32
    %c0_i32_1 = arith.constant 0 : i32
    return %c0_i32, %c0_i32_0 : i32, i32
  }
  func.func @transform_9(%arg0: i32) -> (i32, i32, i32) {
    %c0_i32 = arith.constant 0 : i32
    %c0_i32_0 = arith.constant 0 : i32
    %c0_i32_1 = arith.constant 0 : i32
    %c0_i32_2 = arith.constant 0 : i32
    return %c0_i32, %c0_i32_0, %c0_i32_1 : i32, i32, i32
  }
  func.func @transform_10(%arg0: i32) -> (i32, i32, i32) {
    %c0_i32 = arith.constant 0 : i32
    %c0_i32_0 = arith.constant 0 : i32
    %c0_i32_1 = arith.constant 0 : i32
    %c0_i32_2 = arith.constant 0 : i32
    return %c0_i32, %c0_i32_0, %c0_i32_1 : i32, i32, i32
  }
  func.func @transform_11(%arg0: i32) -> (i32, i32) {
    %c0_i32 = arith.constant 0 : i32
    %c0_i32_0 = arith.constant 0 : i32
    %c0_i32_1 = arith.constant 0 : i32
    return %c0_i32, %c0_i32_0 : i32, i32
  }
  func.func @transform_12(%arg0: i32) -> (i32, i32, i32) {
    %c0_i32 = arith.constant 0 : i32
    %c0_i32_0 = arith.constant 0 : i32
    %c0_i32_1 = arith.constant 0 : i32
    %c0_i32_2 = arith.constant 0 : i32
    return %c0_i32, %c0_i32_0, %c0_i32_1 : i32, i32, i32
  }
  func.func @transform_13(%arg0: i32) -> (i32, i32, i32) {
    %c0_i32 = arith.constant 0 : i32
    %c0_i32_0 = arith.constant 0 : i32
    %c0_i32_1 = arith.constant 0 : i32
    %c0_i32_2 = arith.constant 0 : i32
    return %c0_i32, %c0_i32_0, %c0_i32_1 : i32, i32, i32
  }
  func.func @transform_14(%arg0: i32) -> (i32, i32) {
    %c0_i32 = arith.constant 0 : i32
    %c0_i32_0 = arith.constant 0 : i32
    %c0_i32_1 = arith.constant 0 : i32
    return %c0_i32, %c0_i32_0 : i32, i32
  }
  func.func @transform_15(%arg0: i32) -> (i32, i32) {
    %c0_i32 = arith.constant 0 : i32
    %c0_i32_0 = arith.constant 0 : i32
    %c0_i32_1 = arith.constant 0 : i32
    return %c0_i32, %c0_i32_0 : i32, i32
  }
  func.func @transform_16(%arg0: i32) -> (i32, i32, i32) {
    %c0_i32 = arith.constant 0 : i32
    %c0_i32_0 = arith.constant 0 : i32
    %c0_i32_1 = arith.constant 0 : i32
    %c0_i32_2 = arith.constant 0 : i32
    return %c0_i32, %c0_i32_0, %c0_i32_1 : i32, i32, i32
  }
  func.func @transform_17(%arg0: i32) -> (i32, i32) {
    %c0_i32 = arith.constant 0 : i32
    %c0_i32_0 = arith.constant 0 : i32
    %c0_i32_1 = arith.constant 0 : i32
    return %c0_i32, %c0_i32_0 : i32, i32
  }
  func.func @transform_18(%arg0: i32) -> (i32, i32, i32, i32) {
    %c0_i32 = arith.constant 0 : i32
    %c0_i32_0 = arith.constant 0 : i32
    %c0_i32_1 = arith.constant 0 : i32
    %c0_i32_2 = arith.constant 0 : i32
    return %arg0, %c0_i32, %c0_i32_0, %c0_i32_1 : i32, i32, i32, i32
  }
}

</mosaic_0001>

<bundles_post_ra>
// kernel: colorization_forward.1
= control target key start
LH: loop header
LB: loop body
LE: loop exit
PB: predicated region body
PF: predicated region fallthrough
CT: control target
= control target key end

     0   :  { %s18389_s27 = smov 0   ;;  %s24461_s0 = inlined_call_operand.vmem [shape: bf16[2,256,9], index: 0, kind: input, shape index: {}]   ;;  %s24462_s1 = inlined_call_operand.vmem [shape: bf16[9,128], index: 1, kind: input, shape index: {}]   ;;  %s24463_s2 = inlined_call_operand.vmem [shape: f32[1,128], index: 2, kind: input, shape index: {}]   ;;  %s24464_s3 = inlined_call_operand.vmem [shape: bf16[576,256], index: 3, kind: input, shape index: {}]   ;;  %s24465_s4 = inlined_call_operand.vmem [shape: bf16[1152,128], index: 4, kind: input, shape index: {}]   ;;  %s24466_s5 = inlined_call_operand.vmem [shape: f32[1,128], index: 5, kind: input, shape index: {}]   ;;  %s24467_s6 = inlined_call_operand.vmem [shape: bf16[144,64], index: 6, kind: input, shape index: {}]   ;;  %s24468_s7 = inlined_call_operand.vmem [shape: bf16[1152,256], index: 7, kind: input, shape index: {}]   ;;  %s24469_s8 = inlined_call_operand.vmem [shape: f32[1,256], index: 8, kind: input, shape index: {}]   ;;  %s24470_s9 = inlined_call_operand.vmem [shape: bf16[4,64,16], index: 9, kind: input, shape index: {}]   ;;  %s24471_s10 = inlined_call_operand.vmem [shape: bf16[4,1024,128], index: 10, kind: input, shape index: {}]   ;;  %s24472_s11 = inlined_call_operand.vmem [shape: f32[1,128], index: 11, kind: input, shape index: {}]   ;;  %s24473_s12 = inlined_call_operand.vmem [shape: bf16[4,256,64], index: 12, kind: input, shape index: {}]   ;;  %s24474_s13 = inlined_call_operand.vmem [shape: bf16[4,512,64], index: 13, kind: input, shape index: {}]   ;;  %s24475_s14 = inlined_call_operand.vmem [shape: f32[1,64], index: 14, kind: input, shape index: {}]   ;;  %s24476_s15 = inlined_call_operand.vmem [shape: bf16[128,64], index: 15, kind: input, shape index: {}]   ;;  %s24477_s16 = inlined_call_operand.vmem [shape: f32[4,1024,256], index: 16, kind: input, shape index: {}]   ;;  %s24478_s17 = inlined_call_operand.vmem [shape: f32[8,256], index: 17, kind: input, shape index: {}]   ;;  %s24479_s18 = inlined_call_operand.vmem [shape: f32[2,4,3,256], index: 18, kind: output, shape index: {}]  }
   0x1   :  { %24480 = sst [smem:[#allocation2_spill]] %s24461_s0 }
   0x2   :  { %24481 = sst [smem:[#allocation3_spill]] %s24462_s1 }
   0x3   :  { %24482 = sst [smem:[#allocation4_spill]] %s24463_s2 }
   0x4 LB: > { %s12644_s28 = sadd.s32 4294967295, %s18288_s27   ;;  %p12648_p0 = scmp.ge.s32.totalorder %s18288_s27, 1  ;;  %s18288_s27 = sphi %s18389_s27, %s28_s27  }
   0x5   : > { %p512_p1 = scmp.lt.s32.totalorder %s18288_s27, 3 }
   0x7   : > { %p513_p2 = pnand %p12648_p0, %p512_p1 }
   0x8   : > { %s24483_s0 = sld [smem:[#allocation3_spill]] (!%p513_p2)  ;;  %vm752_vm0 = vcmask (!%p513_p2), 1043456   ;;  %vm753_vm1 = vcmask (!%p513_p2), 1044480   ;;  %p566_p3 = scmp.lt.s32.totalorder (!%p513_p2), %s12644_s28, 1  ;;  %v18290_v1 = vmov (!%p513_p2), 65535   ;;  %vm703_vm2 = vcmask (!%p513_p2), 72704  }
   0x9   : > { %516 = sbr.rel (%p513_p2) target bundleno = 4655 (0x122f), region = 92  ;;  %v754_v2 = vsel (!%p513_p2), %vm752_vm0, 4294967295, %v18290_v1  ;;  %s24484_s21 = sld [smem:[#allocation2_spill]] (!%p513_p2)  ;;  %v18291_v21 = vmov (!%p513_p2), 0   ;;  %v17390_v22 = vld [vmem:[%s24464_s3 + $0x4] ss:$8 sps:$4 sm:$0xff] (!%p513_p2)  }
   0xa   : > { %v755_v3 = vsel (!%p513_p2), %vm753_vm1, %v754_v2, 0  ;;  %s24485_s26 = sld [smem:[#allocation4_spill]] (!%p513_p2)  ;;  %vm18293_vm3 = vmmov (!%p513_p2), 0   ;;  %vm2740_vm4 = vcmask (!%p513_p2), 523264   ;;  %vm4007_vm5 = vcmask (!%p513_p2), 130048  }
   0xe   : > { %v17371_v0 = vld [vmem:[%s24483_s0] sm:$0x1f] (!%p513_p2)  }
   0xf   : > { %v757_v4 = vand.u32 (!%p513_p2), %v17371_v0, %v755_v3 }
  0x10   : > { %s24487_s28 = smov (!%p566_p3, %s12644_s28), 1  ;;  %v18447_v23 = vld [vmem:[%s24485_s26] ss:$0 sm:$0xff] }
  0x11   : > { %s15025_s19 = sshll.u32 %s24487_s28, 7  ;;  %16013 = vmatprep.subr.bf16.mxu1 %v757_v4  ;;  %s15026_s1 = sshll.u32 %s24487_s28, 5 }
  0x12   : > { %s18406_s22 = scalar_lea.vmem %s24484_s21, %s15025_s19  ;;  %16014 = vmatpush3.bf16.msra.mxu1 %v757_v4  ;;  %s24264_s24 = scalar_lea.vmem %s24479_s18, %s15026_s1 }
  0x13   : > { %v17372_v5 = vld [vmem:[%s18406_s22] sm:$0xff]   ;;  %v17373_v6 = vld [vmem:[%s18406_s22 + $0x8] sm:$0xff]   ;;  %v17374_v7 = vld [vmem:[%s18406_s22 + $0x10] sm:$0xff]   ;;  %1400 = vmatprep.subr.bf16.mxu1 %v18291_v21 }
  0x14   : > { %16015 = vmatprep.mubr.msk.bf16.mxu1 %vm703_vm2, %v17372_v5  ;;  %v17375_v8 = vld [vmem:[%s18406_s22 + $0x18] sm:$0xff]   ;;  %v17376_v9 = vld [vmem:[%s18406_s22 + $0x20] sm:$0xff]   ;;  %v17377_v10 = vld [vmem:[%s18406_s22 + $0x28] sm:$0xff]  }
  0x15   : > { %16016 = vmatmul.mubr.msk.bf16.vlgmr.msra.gmra.mrb[0].mxu1 %vm703_vm2, %v17373_v6  ;;  %v17378_v11 = vld [vmem:[%s18406_s22 + $0x30] sm:$0xff]   ;;  %v17379_v12 = vld [vmem:[%s18406_s22 + $0x38] sm:$0xff]   ;;  %v17380_v13 = vld [vmem:[%s18406_s22 + $0x40] sm:$0xff]  }
  0x16   : > { %16019 = vmatprep.mubr.msk.bf16.mxu1 %vm703_vm2, %v17374_v7  ;;  %v17381_v14 = vld [vmem:[%s18406_s22 + $0x48] sm:$0xff]   ;;  %v17382_v15 = vld [vmem:[%s18406_s22 + $0x50] sm:$0xff]   ;;  %v17383_v16 = vld [vmem:[%s18406_s22 + $0x58] sm:$0xff]  }
  0x17   : > { %v17384_v17 = vld [vmem:[%s18406_s22 + $0x60] sm:$0xff]   ;;  %v17385_v18 = vld [vmem:[%s18406_s22 + $0x68] sm:$0xff]   ;;  %v17386_v19 = vld [vmem:[%s18406_s22 + $0x70] sm:$0xff]  }
  0x18   : > { %v17387_v20 = vld [vmem:[%s18406_s22 + $0x78] sm:$0xff]  }
  0x1d   : > { %16020 = vmatmul.mubr.msk.bf16.gmra.mrb[4].mxu1 %vm703_vm2, %v17375_v8 }
  0x1e   : > { %16023 = vmatprep.mubr.msk.bf16.mxu1 %vm703_vm2, %v17376_v9 }
  0x25   : > { %16024 = vmatmul.mubr.msk.bf16.gmra.mrb[8].mxu1 %vm703_vm2, %v17377_v10 }
  0x26   : > { %16027 = vmatprep.mubr.msk.bf16.mxu1 %vm703_vm2, %v17378_v11 }
  0x2d   : > { %16028 = vmatmul.mubr.msk.bf16.gmra.mrb[12].mxu1 %vm703_vm2, %v17379_v12 }
  0x2e   : > { %16031 = vmatprep.mubr.msk.bf16.mxu1 %vm703_vm2, %v17380_v13 }
  0x35   : > { %16032 = vmatmul.mubr.msk.bf16.gmra.mrb[16].mxu1 %vm703_vm2, %v17381_v14 }
  0x36   : > { %16035 = vmatprep.mubr.msk.bf16.mxu1 %vm703_vm2, %v17382_v15 }
  0x3d   : > { %16036 = vmatmul.mubr.msk.bf16.gmra.mrb[20].mxu1 %vm703_vm2, %v17383_v16 }
  0x3e   : > { %16039 = vmatprep.mubr.msk.bf16.mxu1 %vm703_vm2, %v17384_v17 }
  0x45   : > { %16040 = vmatmul.mubr.msk.bf16.gmra.mrb[24].mxu1 %vm703_vm2, %v17385_v18 }
  0x46   : > { %16043 = vmatprep.mubr.msk.bf16.mxu1 %vm703_vm2, %v17386_v19 }
  0x4d   : > { %16044 = vmatmul.mubr.msk.bf16.gmra.mrb[28].mxu1 %vm703_vm2, %v17387_v20 }
  0x4e   : > { %1432 = vmatprep.mubr.bf16.mxu1 %v17390_v22 }
  0xe8   : > { %v16017_v24 = vpop.f32.mrb[0].mxu1 }
  0xe9   : > { %v802_v25 = vadd.f32 %v16017_v24, %v18447_v23  ;;  %v793_v26 = vpop.f32.mrb[1].mxu1 }
  0xea   : > { %v794_v27 = vadd.f32 %v18447_v23, %v793_v26  ;;  %v16018_v28 = vpop.f32.mrb[2].mxu1 }
  0xeb   : > { %v805_v29 = vadd.f32 %v16018_v28, %v18447_v23  ;;  %v796_v30 = vpop.f32.mrb[3].mxu1  ;;  %v922_v32 = vmax.f32 %v802_v25, 0.0 }
  0xec   : > { %v797_v31 = vadd.f32 %v18447_v23, %v796_v30  ;;  %v920_v34 = vmax.f32 %v794_v27, 0.0 }
  0xed   : > { %v923_v33 = vmax.f32 %v805_v29, 0.0 }
  0xee   : > { %v921_v35 = vmax.f32 %v797_v31, 0.0 }
  0xef   : > { %v953_v36 = vpack.c.bf16 %v923_v33, %v922_v32 }
  0xf0   : > { %v952_v37 = vpack.c.bf16 %v921_v35, %v920_v34  ;;  %v16021_v38 = vpop.f32.mrb[4].mxu1 }
  0xf1   : > { %v818_v39 = vadd.f32 %v16021_v38, %v18447_v23  ;;  %v809_v40 = vpop.f32.mrb[5].mxu1 }
  0xf2   : > { %v810_v41 = vadd.f32 %v18447_v23, %v809_v40  ;;  %v16022_v42 = vpop.f32.mrb[6].mxu1  ;;  %1401 = vmatpush1.bf16.msra.mxu1 %v952_v37 }
  0xf3   : > { %v821_v43 = vadd.f32 %v16022_v42, %v18447_v23  ;;  %v812_v44 = vpop.f32.mrb[7].mxu1  ;;  %1402 = vmatprep.subr.bf16.mxu1 %v18291_v21  ;;  %v926_v46 = vmax.f32 %v818_v39, 0.0 }
  0xf4   : > { %v813_v45 = vadd.f32 %v18447_v23, %v812_v44  ;;  %v924_v48 = vmax.f32 %v810_v41, 0.0 }
  0xf5   : > { %v927_v47 = vmax.f32 %v821_v43, 0.0 }
  0xf6   : > { %v925_v49 = vmax.f32 %v813_v45, 0.0  ;;  %1403 = vmatpush1.bf16.msra.mxu1 %v953_v36 }
  0xf7   : > { %v955_v50 = vpack.c.bf16 %v927_v47, %v926_v46  ;;  %1404 = vmatprep.subr.bf16.mxu1 %v18291_v21 }
  0xf8   : > { %v954_v51 = vpack.c.bf16 %v925_v49, %v924_v48  ;;  %v16025_v52 = vpop.f32.mrb[8].mxu1 }
  0xf9   : > { %v834_v53 = vadd.f32 %v16025_v52, %v18447_v23  ;;  %v825_v54 = vpop.f32.mrb[9].mxu1 }
  0xfa   : > { %v826_v55 = vadd.f32 %v18447_v23, %v825_v54  ;;  %v16026_v56 = vpop.f32.mrb[10].mxu1  ;;  %1405 = vmatpush1.bf16.msra.mxu1 %v954_v51 }
  0xfb   : > { %v837_v57 = vadd.f32 %v16026_v56, %v18447_v23  ;;  %v828_v58 = vpop.f32.mrb[11].mxu1  ;;  %1406 = vmatprep.subr.bf16.mxu1 %v18291_v21  ;;  %v930_v60 = vmax.f32 %v834_v53, 0.0 }
  0xfc   : > { %v829_v59 = vadd.f32 %v18447_v23, %v828_v58  ;;  %v928_v62 = vmax.f32 %v826_v55, 0.0 }
  0xfd   : > { %v931_v61 = vmax.f32 %v837_v57, 0.0 }
  0xfe   : > { %v929_v63 = vmax.f32 %v829_v59, 0.0  ;;  %1407 = vmatpush1.bf16.msra.mxu1 %v955_v50 }
  0xff   : > { %v957_v0 = vpack.c.bf16 %v931_v61, %v930_v60  ;;  %1408 = vmatprep.subr.bf16.mxu1 %v18291_v21 }
 0x100   : > { %v956_v1 = vpack.c.bf16 %v929_v63, %v928_v62  ;;  %v16029_v2 = vpop.f32.mrb[12].mxu1 }
 0x101   : > { %v850_v3 = vadd.f32 %v16029_v2, %v18447_v23  ;;  %v841_v4 = vpop.f32.mrb[13].mxu1 }
 0x102   : > { %v842_v5 = vadd.f32 %v18447_v23, %v841_v4  ;;  %v16030_v6 = vpop.f32.mrb[14].mxu1  ;;  %1409 = vmatpush1.bf16.msra.mxu1 %v956_v1 }
 0x103   : > { %v853_v7 = vadd.f32 %v16030_v6, %v18447_v23  ;;  %v844_v8 = vpop.f32.mrb[15].mxu1  ;;  %1410 = vmatprep.subr.bf16.mxu1 %v18291_v21  ;;  %v934_v10 = vmax.f32 %v850_v3, 0.0 }
 0x104   : > { %v845_v9 = vadd.f32 %v18447_v23, %v844_v8  ;;  %v932_v12 = vmax.f32 %v842_v5, 0.0 }
 0x105   : > { %v935_v11 = vmax.f32 %v853_v7, 0.0 }
 0x106   : > { %v933_v13 = vmax.f32 %v845_v9, 0.0  ;;  %1411 = vmatpush1.bf16.msra.mxu1 %v957_v0 }
 0x107   : > { %v959_v14 = vpack.c.bf16 %v935_v11, %v934_v10  ;;  %1412 = vmatprep.subr.bf16.mxu1 %v18291_v21  ;;  %v17388_v10 = vld [vmem:[%s24464_s3] ss:$8 sps:$4 sm:$0xff]   ;;  %v17393_v11 = vld [vmem:[%s24464_s3 + $0x10] ss:$8 sps:$4 sm:$0xff]  }
 0x108   : > { %v958_v15 = vpack.c.bf16 %v933_v13, %v932_v12  ;;  %v16033_v16 = vpop.f32.mrb[16].mxu1  ;;  %v17394_v12 = vld [vmem:[%s24464_s3 + $0x24] ss:$8 sps:$4 sm:$0xff]   ;;  %v17396_v13 = vld [vmem:[%s24464_s3 + $0x20] ss:$8 sps:$4 sm:$0xff]  }
 0x109   : > { %v866_v17 = vadd.f32 %v16033_v16, %v18447_v23  ;;  %v857_v18 = vpop.f32.mrb[17].mxu1  ;;  %v17400_v16 = vld [vmem:[%s24464_s3 + $0x44] ss:$8 sps:$4 sm:$0xff]  }
 0x10a   : > { %v858_v19 = vadd.f32 %v18447_v23, %v857_v18  ;;  %v16034_v20 = vpop.f32.mrb[18].mxu1  ;;  %1413 = vmatpush1.bf16.msra.mxu1 %v958_v15  ;;  %v17399_v15 = vld [vmem:[%s24464_s3 + $0x30] ss:$8 sps:$4 sm:$0xff]   ;;  %v17403_v18 = vld [vmem:[%s24464_s3 + $0x54] ss:$8 sps:$4 sm:$0xff]  }
 0x10b   : > { %v869_v22 = vadd.f32 %v16034_v20, %v18447_v23  ;;  %v860_v24 = vpop.f32.mrb[19].mxu1  ;;  %1414 = vmatprep.subr.bf16.mxu1 %v18291_v21  ;;  %v938_v26 = vmax.f32 %v866_v17, 0.0  ;;  %v17402_v17 = vld [vmem:[%s24464_s3 + $0x40] ss:$8 sps:$4 sm:$0xff]   ;;  %v17406_v20 = vld [vmem:[%s24464_s3 + $0x64] ss:$8 sps:$4 sm:$0xff]  }
 0x10c   : > { %v861_v25 = vadd.f32 %v18447_v23, %v860_v24  ;;  %v936_v28 = vmax.f32 %v858_v19, 0.0  ;;  %v17405_v19 = vld [vmem:[%s24464_s3 + $0x50] ss:$8 sps:$4 sm:$0xff]   ;;  %v17409_v24 = vld [vmem:[%s24464_s3 + $0x74] ss:$8 sps:$4 sm:$0xff]  }
 0x10d   : > { %v939_v27 = vmax.f32 %v869_v22, 0.0  ;;  %v17408_v22 = vld [vmem:[%s24464_s3 + $0x60] ss:$8 sps:$4 sm:$0xff]  }
 0x10e   : > { %v937_v29 = vmax.f32 %v861_v25, 0.0  ;;  %1415 = vmatpush1.bf16.msra.mxu1 %v959_v14  ;;  %v17397_v14 = vld [vmem:[%s24464_s3 + $0x34] ss:$8 sps:$4 sm:$0xff]   ;;  %v17411_v25 = vld [vmem:[%s24464_s3 + $0x70] ss:$8 sps:$4 sm:$0xff]  }
 0x10f   : > { %v961_v30 = vpack.c.bf16 %v939_v27, %v938_v26  ;;  %1416 = vmatprep.subr.bf16.mxu1 %v18291_v21  ;;  %v17412_v26 = vld [vmem:[%s24464_s3 + $0x84] ss:$8 sps:$4 sm:$0xff]   ;;  %v17414_v27 = vld [vmem:[%s24464_s3 + $0x80] ss:$8 sps:$4 sm:$0xff]  }
 0x110   : > { %v960_v31 = vpack.c.bf16 %v937_v29, %v936_v28  ;;  %v16037_v32 = vpop.f32.mrb[20].mxu1  ;;  %v17415_v28 = vld [vmem:[%s24464_s3 + $0x94] ss:$8 sps:$4 sm:$0xff]   ;;  %v17417_v29 = vld [vmem:[%s24464_s3 + $0x90] ss:$8 sps:$4 sm:$0xff]  }
 0x111   : > { %v882_v33 = vadd.f32 %v16037_v32, %v18447_v23  ;;  %v873_v34 = vpop.f32.mrb[21].mxu1  ;;  %v17421_v32 = vld [vmem:[%s24464_s3 + $0xb4] ss:$8 sps:$4 sm:$0xff]  }
 0x112   : > { %v874_v35 = vadd.f32 %v18447_v23, %v873_v34  ;;  %v16038_v36 = vpop.f32.mrb[22].mxu1  ;;  %1417 = vmatpush1.bf16.msra.mxu1 %v960_v31  ;;  %v17420_v31 = vld [vmem:[%s24464_s3 + $0xa0] ss:$8 sps:$4 sm:$0xff]   ;;  %v17424_v34 = vld [vmem:[%s24464_s3 + $0xc4] ss:$8 sps:$4 sm:$0xff]  }
 0x113   : > { %v885_v37 = vadd.f32 %v16038_v36, %v18447_v23  ;;  %v876_v38 = vpop.f32.mrb[23].mxu1  ;;  %1418 = vmatprep.subr.bf16.mxu1 %v18291_v21  ;;  %v942_v40 = vmax.f32 %v882_v33, 0.0  ;;  %v17423_v33 = vld [vmem:[%s24464_s3 + $0xb0] ss:$8 sps:$4 sm:$0xff]   ;;  %v17473_v36 = vld [vmem:[%s24465_s4] sm:$0xff]  }
 0x114   : > { %v877_v39 = vadd.f32 %v18447_v23, %v876_v38  ;;  %v940_v42 = vmax.f32 %v874_v35, 0.0  ;;  %v17472_v35 = vld [vmem:[%s24465_s4 + $0x40] sm:$0xff]   ;;  %v17474_v38 = vld [vmem:[%s24465_s4 + $0x48] sm:$0xff]  }
 0x115   : > { %v943_v41 = vmax.f32 %v885_v37, 0.0  ;;  %15044 = vmatprep.subr.bf16.mxu0 %v17472_v35  ;;  %v17426_v37 = vld [vmem:[%s24464_s3 + $0xc0] ss:$8 sps:$4 sm:$0xff]   ;;  %v17485_v35 = vld [vmem:[%s24464_s3 + $0x1d0] ss:$8 sps:$4 sm:$0xff]  }
 0x116   : > { %v941_v43 = vmax.f32 %v877_v39, 0.0  ;;  %1419 = vmatpush1.bf16.msra.mxu1 %v961_v30  ;;  %v17418_v30 = vld [vmem:[%s24464_s3 + $0xa4] ss:$8 sps:$4 sm:$0xff]   ;;  %15045 = vmatpush3.bf16.msra.mxu0 %v17473_v36 }
 0x117   : > { %v963_v44 = vpack.c.bf16 %v943_v41, %v942_v40  ;;  %1420 = vmatprep.subr.bf16.mxu1 %v18291_v21  ;;  %v17475_v39 = vld [vmem:[%s24465_s4 + $0x8] sm:$0xff]   ;;  %v17427_v40 = vld [vmem:[%s24464_s3 + $0xd4] ss:$8 sps:$4 sm:$0xff]   ;;  %15046 = vmatprep.subr.bf16.mxu0 %v17474_v38 }
 0x118   : > { %v962_v45 = vpack.c.bf16 %v941_v43, %v940_v42  ;;  %v16041_v46 = vpop.f32.mrb[24].mxu1  ;;  %v17479_v41 = vld [vmem:[%s24465_s4 + $0x50] sm:$0xff]  }
 0x119   : > { %v898_v47 = vadd.f32 %v16041_v46, %v18447_v23  ;;  %v889_v48 = vpop.f32.mrb[25].mxu1  ;;  %v17480_v42 = vld [vmem:[%s24465_s4 + $0x10] sm:$0xff]   ;;  %v17430_v46 = vld [vmem:[%s24464_s3 + $0xe4] ss:$8 sps:$4 sm:$0xff]  }
 0x11a   : > { %v890_v49 = vadd.f32 %v18447_v23, %v889_v48  ;;  %v16042_v50 = vpop.f32.mrb[26].mxu1  ;;  %1421 = vmatpush1.bf16.msra.mxu1 %v962_v45  ;;  %15047 = vmatpush3.bf16.msra.mxu0 %v17475_v39  ;;  %v17429_v43 = vld [vmem:[%s24464_s3 + $0xd0] ss:$8 sps:$4 sm:$0xff]   ;;  %v17487_v48 = vld [vmem:[%s24465_s4 + $0x20] sm:$0xff]  }
 0x11b   : > { %v901_v51 = vadd.f32 %v16042_v50, %v18447_v23  ;;  %v892_v52 = vpop.f32.mrb[27].mxu1  ;;  %1422 = vmatprep.subr.bf16.mxu1 %v18291_v21  ;;  %v946_v54 = vmax.f32 %v898_v47, 0.0  ;;  %15048 = vmatprep.subr.bf16.mxu0 %v17479_v41  ;;  %v17482_v45 = vld [vmem:[%s24465_s4 + $0x18] sm:$0xff]   ;;  %v17486_v47 = vld [vmem:[%s24465_s4 + $0x60] sm:$0xff]   ;;  %v17488_v50 = vld [vmem:[%s24465_s4 + $0x68] sm:$0xff]  }
 0x11c   : > { %v893_v53 = vadd.f32 %v18447_v23, %v892_v52  ;;  %v944_v56 = vmax.f32 %v890_v49, 0.0  ;;  %v17432_v49 = vld [vmem:[%s24464_s3 + $0xe0] ss:$8 sps:$4 sm:$0xff]   ;;  %v17433_v52 = vld [vmem:[%s24464_s3 + $0xf4] ss:$8 sps:$4 sm:$0xff]  }
 0x11d   : > { %v947_v55 = vmax.f32 %v901_v51, 0.0  ;;  %v17489_v51 = vld [vmem:[%s24465_s4 + $0x28] sm:$0xff]  }
 0x11e   : > { %v945_v57 = vmax.f32 %v893_v53, 0.0  ;;  %1423 = vmatpush1.bf16.msra.mxu1 %v963_v44  ;;  %15049 = vmatpush3.bf16.msra.mxu0 %v17480_v42  ;;  %v17481_v44 = vld [vmem:[%s24465_s4 + $0x58] sm:$0xff]   ;;  %v17493_v53 = vld [vmem:[%s24465_s4 + $0x70] sm:$0xff]   ;;  %v17492_v42 = vld [vmem:[%s24464_s3 + $0x1e0] ss:$8 sps:$4 sm:$0xff]  }
 0x11f   : > { %v965_v58 = vpack.c.bf16 %v947_v55, %v946_v54  ;;  %1424 = vmatprep.subr.bf16.mxu1 %v18291_v21  ;;  %15050 = vmatprep.subr.bf16.mxu0 %v17481_v44  ;;  %v17494_v54 = vld [vmem:[%s24465_s4 + $0x30] sm:$0xff]  }
 0x120   : > { %v964_v59 = vpack.c.bf16 %v945_v57, %v944_v56  ;;  %v16045_v60 = vpop.f32.mrb[28].mxu1  ;;  %v17435_v55 = vld [vmem:[%s24464_s3 + $0xf0] ss:$8 sps:$4 sm:$0xff]   ;;  %v17497_v44 = vld [vmem:[%s24464_s3 + $0x1f4] ss:$8 sps:$4 sm:$0xff]  }
 0x121   : > { %v914_v61 = vadd.f32 %v16045_v60, %v18447_v23  ;;  %v905_v62 = vpop.f32.mrb[29].mxu1  ;;  %v17495_v56 = vld [vmem:[%s24465_s4 + $0x78] sm:$0xff]  }
 0x122   : > { %v906_v63 = vadd.f32 %v18447_v23, %v905_v62  ;;  %v16046_v0 = vpop.f32.mrb[30].mxu1  ;;  %1425 = vmatpush1.bf16.msra.mxu1 %v964_v59  ;;  %15051 = vmatpush3.bf16.msra.mxu0 %v17482_v45  ;;  %v17496_v57 = vld [vmem:[%s24465_s4 + $0x38] sm:$0xff]   ;;  %v17438_v59 = vld [vmem:[%s24464_s3 + $0x100] ss:$8 sps:$4 sm:$0xff]   ;;  %v17442_v62 = vld [vmem:[%s24464_s3 + $0x124] ss:$8 sps:$4 sm:$0xff]  }
 0x123   : > { %v917_v1 = vadd.f32 %v16046_v0, %v18447_v23  ;;  %v908_v2 = vpop.f32.mrb[31].mxu1  ;;  %1426 = vmatprep.subr.bf16.mxu1 %v18291_v21  ;;  %v950_v4 = vmax.f32 %v914_v61, 0.0  ;;  %15052 = vmatprep.subr.bf16.mxu0 %v17486_v47  ;;  %v17439_v60 = vld [vmem:[%s24464_s3 + $0x114] ss:$8 sps:$4 sm:$0xff]   ;;  %v17441_v61 = vld [vmem:[%s24464_s3 + $0x110] ss:$8 sps:$4 sm:$0xff]  }
 0x124   : > { %v909_v3 = vadd.f32 %v18447_v23, %v908_v2  ;;  %v948_v6 = vmax.f32 %v906_v63, 0.0  ;;  %v17391_v23 = vld [vmem:[%s24464_s3 + $0x14] ss:$8 sps:$4 sm:$0xff]   ;;  %v17444_v63 = vld [vmem:[%s24464_s3 + $0x120] ss:$8 sps:$4 sm:$0xff]  }
 0x125   : > { %v951_v5 = vmax.f32 %v917_v1, 0.0  ;;  %v17445_v0 = vld [vmem:[%s24464_s3 + $0x134] ss:$8 sps:$4 sm:$0xff]   ;;  %v17447_v1 = vld [vmem:[%s24464_s3 + $0x130] ss:$8 sps:$4 sm:$0xff]  }
 0x126   : > { %v949_v7 = vmax.f32 %v909_v3, 0.0  ;;  %1427 = vmatpush1.bf16.msra.mxu1 %v965_v58  ;;  %15053 = vmatpush3.bf16.msra.mxu0 %v17487_v48  ;;  %v17436_v58 = vld [vmem:[%s24464_s3 + $0x104] ss:$8 sps:$4 sm:$0xff]  }
 0x127   : > { %v967_v8 = vpack.c.bf16 %v951_v5, %v950_v4  ;;  %1428 = vmatprep.subr.bf16.mxu1 %v18291_v21  ;;  %15054 = vmatprep.subr.bf16.mxu0 %v17488_v50  ;;  %v17448_v2 = vld [vmem:[%s24464_s3 + $0x144] ss:$8 sps:$4 sm:$0xff]   ;;  %v17450_v4 = vld [vmem:[%s24464_s3 + $0x140] ss:$8 sps:$4 sm:$0xff]   ;;  %v17451_v5 = vld [vmem:[%s24464_s3 + $0x154] ss:$8 sps:$4 sm:$0xff]  }
 0x128   : > { %v966_v9 = vpack.c.bf16 %v949_v7, %v948_v6  ;;  %v17512_v3 = vld [vmem:[%s24465_s4 + $0xc0] sm:$0xff]   ;;  %v17453_v6 = vld [vmem:[%s24464_s3 + $0x150] ss:$8 sps:$4 sm:$0xff]  }
 0x129   : > { %v17454_v7 = vld [vmem:[%s24464_s3 + $0x164] ss:$8 sps:$4 sm:$0xff]  }
 0x12a   : > { %1429 = vmatpush1.bf16.msra.mxu1 %v966_v9  ;;  %15055 = vmatpush3.bf16.msra.mxu0 %v17489_v51  ;;  %v17457_v9 = vld [vmem:[%s24464_s3 + $0x174] ss:$8 sps:$4 sm:$0xff]   ;;  %v17500_v51 = vld [vmem:[%s24464_s3 + $0x204] ss:$8 sps:$4 sm:$0xff]  }
 0x12b   : > { %1430 = vmatprep.subr.bf16.mxu1 %v18291_v21  ;;  %15056 = vmatprep.subr.bf16.mxu0 %v17493_v53 }
 0x12e   : > { %1431 = vmatpush1.bf16.msra.mxu1 %v967_v8  ;;  %15057 = vmatpush3.bf16.msra.mxu0 %v17494_v54  ;;  %v17456_v8 = vld [vmem:[%s24464_s3 + $0x160] ss:$8 sps:$4 sm:$0xff]  }
 0x12f   : > { %15058 = vmatprep.subr.bf16.mxu0 %v17495_v56  ;;  %v17513_v54 = vld [vmem:[%s24465_s4 + $0x80] sm:$0xff]   ;;  %v17515_v56 = vld [vmem:[%s24465_s4 + $0x88] sm:$0xff]  }
 0x131   : > { %1433 = vmatmul.mubr.bf16.vlgmr.msra.gmra.mrb[32].mxu1 %v17388_v10  ;;  %v17459_v10 = vld [vmem:[%s24464_s3 + $0x170] ss:$8 sps:$4 sm:$0xff]  }
 0x132   : > { %1440 = vmatprep.mubr.bf16.mxu1 %v17391_v23  ;;  %15059 = vmatpush3.bf16.msra.mxu0 %v17496_v57  ;;  %v17460_v23 = vld [vmem:[%s24464_s3 + $0x184] ss:$8 sps:$4 sm:$0xff]  }
 0x133   : > { %15084 = vmatprep.subr.bf16.mxu0 %v17512_v3  ;;  %v17519_v3 = vld [vmem:[%s24465_s4 + $0x98] sm:$0xff]  }
 0x139   : > { %1441 = vmatmul.mubr.bf16.gmra.mrb[36].mxu1 %v17393_v11  ;;  %v17462_v11 = vld [vmem:[%s24464_s3 + $0x180] ss:$8 sps:$4 sm:$0xff]  }
 0x13a   : > { %1448 = vmatprep.mubr.bf16.mxu1 %v17394_v12  ;;  %v17463_v12 = vld [vmem:[%s24464_s3 + $0x194] ss:$8 sps:$4 sm:$0xff]  }
 0x141   : > { %1449 = vmatmul.mubr.bf16.gmra.mrb[40].mxu1 %v17396_v13  ;;  %v17465_v13 = vld [vmem:[%s24464_s3 + $0x190] ss:$8 sps:$4 sm:$0xff]  }
 0x142   : > { %1456 = vmatprep.mubr.bf16.mxu1 %v17397_v14  ;;  %v17466_v14 = vld [vmem:[%s24464_s3 + $0x1a4] ss:$8 sps:$4 sm:$0xff]  }
 0x149   : > { %1457 = vmatmul.mubr.bf16.gmra.mrb[44].mxu1 %v17399_v15  ;;  %v17468_v15 = vld [vmem:[%s24464_s3 + $0x1a0] ss:$8 sps:$4 sm:$0xff]  }
 0x14a   : > { %1464 = vmatprep.mubr.bf16.mxu1 %v17400_v16  ;;  %v17469_v16 = vld [vmem:[%s24464_s3 + $0x1b4] ss:$8 sps:$4 sm:$0xff]  }
 0x151   : > { %1465 = vmatmul.mubr.bf16.gmra.mrb[48].mxu1 %v17402_v17  ;;  %v17471_v17 = vld [vmem:[%s24464_s3 + $0x1b0] ss:$8 sps:$4 sm:$0xff]  }
 0x152   : > { %1472 = vmatprep.mubr.bf16.mxu1 %v17403_v18 }
 0x159   : > { %1473 = vmatmul.mubr.bf16.gmra.mrb[52].mxu1 %v17405_v19  ;;  %v17476_v19 = vld [vmem:[%s24464_s3 + $0x1c4] ss:$8 sps:$4 sm:$0xff]  }
 0x15a   : > { %1480 = vmatprep.mubr.bf16.mxu1 %v17406_v20 }
 0x161   : > { %1481 = vmatmul.mubr.bf16.gmra.mrb[56].mxu1 %v17408_v22 }
 0x162   : > { %1488 = vmatprep.mubr.bf16.mxu1 %v17409_v24 }
 0x169   : > { %1489 = vmatmul.mubr.bf16.gmra.mrb[60].mxu1 %v17411_v25 }
 0x16a   : > { %1496 = vmatprep.mubr.bf16.mxu1 %v17412_v26 }
 0x171   : > { %1497 = vmatmul.mubr.bf16.gmra.mrb[64].mxu1 %v17414_v27 }
 0x172   : > { %1504 = vmatprep.mubr.bf16.mxu1 %v17415_v28  ;;  %v17478_v28 = vld [vmem:[%s24464_s3 + $0x1c0] ss:$8 sps:$4 sm:$0xff]  }
 0x179   : > { %1505 = vmatmul.mubr.bf16.gmra.mrb[68].mxu1 %v17417_v29 }
 0x17a   : > { %1512 = vmatprep.mubr.bf16.mxu1 %v17418_v30  ;;  %v17483_v30 = vld [vmem:[%s24464_s3 + $0x1d4] ss:$8 sps:$4 sm:$0xff]  }
 0x181   : > { %1513 = vmatmul.mubr.bf16.gmra.mrb[72].mxu1 %v17420_v31 }
 0x182   : > { %1520 = vmatprep.mubr.bf16.mxu1 %v17421_v32 }
 0x189   : > { %1521 = vmatmul.mubr.bf16.gmra.mrb[76].mxu1 %v17423_v33 }
 0x18a   : > { %1528 = vmatprep.mubr.bf16.mxu1 %v17424_v34 }
 0x191   : > { %1529 = vmatmul.mubr.bf16.gmra.mrb[80].mxu1 %v17426_v37  ;;  %v17490_v37 = vld [vmem:[%s24464_s3 + $0x1e4] ss:$8 sps:$4 sm:$0xff]  }
 0x192   : > { %1536 = vmatprep.mubr.bf16.mxu1 %v17427_v40 }
 0x199   : > { %1537 = vmatmul.mubr.bf16.gmra.mrb[84].mxu1 %v17429_v43 }
 0x19a   : > { %1544 = vmatprep.mubr.bf16.mxu1 %v17430_v46 }
 0x1a1   : > { %1545 = vmatmul.mubr.bf16.gmra.mrb[88].mxu1 %v17432_v49  ;;  %v17499_v49 = vld [vmem:[%s24464_s3 + $0x1f0] ss:$8 sps:$4 sm:$0xff]  }
 0x1a2   : > { %1552 = vmatprep.mubr.bf16.mxu1 %v17433_v52 }
 0x1a9   : > { %1553 = vmatmul.mubr.bf16.gmra.mrb[92].mxu1 %v17435_v55  ;;  %v17514_v55 = vld [vmem:[%s24465_s4 + $0xc8] sm:$0xff]  }
 0x1aa   : > { %1560 = vmatprep.mubr.bf16.mxu1 %v17436_v58  ;;  %v17516_v58 = vld [vmem:[%s24465_s4 + $0xd0] sm:$0xff]  }
 0x1b1   : > { %1561 = vmatmul.mubr.bf16.gmra.mrb[96].mxu1 %v17438_v59 }
 0x1b2   : > { %1568 = vmatprep.mubr.bf16.mxu1 %v17439_v60  ;;  %v17502_v60 = vld [vmem:[%s24464_s3 + $0x200] ss:$8 sps:$4 sm:$0xff]  }
 0x1b9   : > { %1569 = vmatmul.mubr.bf16.gmra.mrb[100].mxu1 %v17441_v61 }
 0x1ba   : > { %1576 = vmatprep.mubr.bf16.mxu1 %v17442_v62  ;;  %v17503_v62 = vld [vmem:[%s24464_s3 + $0x214] ss:$8 sps:$4 sm:$0xff]  }
 0x1c1   : > { %1577 = vmatmul.mubr.bf16.gmra.mrb[104].mxu1 %v17444_v63 }
 0x1c2   : > { %1584 = vmatprep.mubr.bf16.mxu1 %v17445_v0 }
 0x1c9   : > { %1585 = vmatmul.mubr.bf16.gmra.mrb[108].mxu1 %v17447_v1  ;;  %v17517_v1 = vld [vmem:[%s24465_s4 + $0x90] sm:$0xff]  }
 0x1ca   : > { %1592 = vmatprep.mubr.bf16.mxu1 %v17448_v2  ;;  %v17518_v2 = vld [vmem:[%s24465_s4 + $0xd8] sm:$0xff]  }
 0x1d1   : > { %1593 = vmatmul.mubr.bf16.gmra.mrb[112].mxu1 %v17450_v4 }
 0x1d2   : > { %1600 = vmatprep.mubr.bf16.mxu1 %v17451_v5  ;;  %v17520_v5 = vld [vmem:[%s24465_s4 + $0xe0] sm:$0xff]  }
 0x1d9   : > { %1601 = vmatmul.mubr.bf16.gmra.mrb[116].mxu1 %v17453_v6 }
 0x1da   : > { %1608 = vmatprep.mubr.bf16.mxu1 %v17454_v7  ;;  %v17505_v7 = vld [vmem:[%s24464_s3 + $0x210] ss:$8 sps:$4 sm:$0xff]  }
 0x1e1   : > { %1609 = vmatmul.mubr.bf16.gmra.mrb[120].mxu1 %v17456_v8 }
 0x1e2   : > { %1616 = vmatprep.mubr.bf16.mxu1 %v17457_v9  ;;  %v17506_v9 = vld [vmem:[%s24464_s3 + $0x224] ss:$8 sps:$4 sm:$0xff]  }
 0x1e9   : > { %1617 = vmatmul.mubr.bf16.gmra.mrb[124].mxu1 %v17459_v10 }
 0x1ea   : > { %1624 = vmatprep.mubr.bf16.mxu1 %v17460_v23 }
 0x1f1   : > { %1625 = vmatmul.mubr.bf16.gmra.mrb[128].mxu1 %v17462_v11  ;;  %v17521_v11 = vld [vmem:[%s24465_s4 + $0xa0] sm:$0xff]  }
 0x1f2   : > { %1632 = vmatprep.mubr.bf16.mxu1 %v17463_v12  ;;  %v17522_v12 = vld [vmem:[%s24465_s4 + $0xe8] sm:$0xff]  }
 0x1f9   : > { %1633 = vmatmul.mubr.bf16.gmra.mrb[132].mxu1 %v17465_v13  ;;  %v17523_v13 = vld [vmem:[%s24465_s4 + $0xa8] sm:$0xff]  }
 0x1fa   : > { %1640 = vmatprep.mubr.bf16.mxu1 %v17466_v14 }
 0x201   : > { %1641 = vmatmul.mubr.bf16.gmra.mrb[136].mxu1 %v17468_v15  ;;  %v17524_v15 = vld [vmem:[%s24465_s4 + $0xf0] sm:$0xff]  }
 0x202   : > { %1648 = vmatprep.mubr.bf16.mxu1 %v17469_v16 }
 0x204   : > { %v1434_v18 = vpop.f32.mrb[32].mxu1 }
 0x205   : > { %v1436_v20 = vpop.f32.mrb[33].mxu1 }
 0x206   : > { %v1437_v22 = vpop.f32.mrb[34].mxu1 }
 0x207   : > { %v1721_v24 = vpack.c.bf16 %v1437_v22, %v1434_v18  ;;  %v1439_v25 = vpop.f32.mrb[35].mxu1 }
 0x208   : > { %v17526_v25 = vld [vmem:[%s24465_s4 + $0xf8] sm:$0xff]  }
 0x209   : > { %1649 = vmatmul.mubr.bf16.gmra.mrb[140].mxu1 %v17471_v17  ;;  %v17508_v17 = vld [vmem:[%s24464_s3 + $0x220] ss:$8 sps:$4 sm:$0xff]  }
 0x20a   : > { %1656 = vmatprep.mubr.bf16.mxu1 %v17476_v19  ;;  %v17509_v19 = vld [vmem:[%s24464_s3 + $0x234] ss:$8 sps:$4 sm:$0xff]  }
 0x20c   : > { %v1442_v26 = vpop.f32.mrb[36].mxu1 }
 0x20d   : > { %v1444_v27 = vpop.f32.mrb[37].mxu1 }
 0x20e   : > { %v1445_v29 = vpop.f32.mrb[38].mxu1 }
 0x20f   : > { %v1722_v31 = vpack.c.bf16 %v1445_v29, %v1442_v26  ;;  %v1447_v32 = vpop.f32.mrb[39].mxu1  ;;  %v17527_v26 = vld [vmem:[%s24465_s4 + $0xb8] sm:$0xff]  }
 0x211   : > { %1657 = vmatmul.mubr.bf16.gmra.mrb[144].mxu1 %v17478_v28  ;;  %v17528_v28 = vld [vmem:[%s24465_s4 + $0x140] sm:$0xff]  }
 0x212   : > { %1664 = vmatprep.mubr.bf16.mxu1 %v17483_v30  ;;  %v17511_v30 = vld [vmem:[%s24464_s3 + $0x230] ss:$8 sps:$4 sm:$0xff]  }
 0x214   : > { %v18721_v33 = vpop.f32.mrb[40].mxu1 }
 0x215   : > { %v1452_v34 = vpop.f32.mrb[41].mxu1 }
 0x216   : > { %v18726_v36 = vpop.f32.mrb[42].mxu1 }
 0x217   : > { %v1723_v38 = vpack.c.bf16 %v18726_v36, %v18721_v33  ;;  %v1455_v39 = vpop.f32.mrb[43].mxu1 }
 0x219   : > { %1665 = vmatmul.mubr.bf16.gmra.mrb[148].mxu1 %v17485_v35 }
 0x21a   : > { %1672 = vmatprep.mubr.bf16.mxu1 %v17490_v37 }
 0x21c   : > { %v18733_v40 = vpop.f32.mrb[44].mxu1 }
 0x21d   : > { %v1460_v41 = vpop.f32.mrb[45].mxu1 }
 0x21e   : > { %v18738_v43 = vpop.f32.mrb[46].mxu1 }
 0x21f   : > { %v1724_v45 = vpack.c.bf16 %v18738_v43, %v18733_v40  ;;  %v1463_v46 = vpop.f32.mrb[47].mxu1 }
 0x221   : > { %1673 = vmatmul.mubr.bf16.gmra.mrb[152].mxu1 %v17492_v42 }
 0x222   : > { %1680 = vmatprep.mubr.bf16.mxu1 %v17497_v44 }
 0x224   : > { %v1466_v47 = vpop.f32.mrb[48].mxu1 }
 0x225   : > { %v1468_v48 = vpop.f32.mrb[49].mxu1 }
 0x226   : > { %v1469_v50 = vpop.f32.mrb[50].mxu1 }
 0x227   : > { %v1471_v52 = vpop.f32.mrb[51].mxu1  ;;  %v1725_v53 = vpack.c.bf16 %v1469_v50, %v1466_v47 }
 0x229   : > { %1681 = vmatmul.mubr.bf16.gmra.mrb[156].mxu1 %v17499_v49  ;;  %2372 = vmatprep.mubr.bf16.mxu0 %v1725_v53 }
 0x22a   : > { %2373 = vmatmul.mubr.bf16.vlgmr.msra.gmra.mrb[0].mxu0 %v1721_v24  ;;  %1688 = vmatprep.mubr.bf16.mxu1 %v17500_v51  ;;  %v17525_v24 = vld [vmem:[%s24465_s4 + $0xb0] sm:$0xff]  }
 0x22b   : > { %15085 = vmatpush3.bf16.msra.mxu0 %v17513_v54  ;;  %v17529_v54 = vld [vmem:[%s24465_s4 + $0x100] sm:$0xff]  }
 0x22c   : > { %v1474_v57 = vpop.f32.mrb[52].mxu1  ;;  %15086 = vmatprep.subr.bf16.mxu0 %v17514_v55  ;;  %v17530_v55 = vld [vmem:[%s24465_s4 + $0x148] sm:$0xff]  }
 0x22d   : > { %v1476_v59 = vpop.f32.mrb[53].mxu1 }
 0x22e   : > { %v1477_v61 = vpop.f32.mrb[54].mxu1 }
 0x22f   : > { %v1726_v63 = vpack.c.bf16 %v1477_v61, %v1474_v57  ;;  %v1479_v0 = vpop.f32.mrb[55].mxu1  ;;  %15087 = vmatpush3.bf16.msra.mxu0 %v17515_v56  ;;  %v17531_v56 = vld [vmem:[%s24465_s4 + $0x108] sm:$0xff]  }
 0x230   : > { %15088 = vmatprep.subr.bf16.mxu0 %v17516_v58  ;;  %v17532_v58 = vld [vmem:[%s24465_s4 + $0x150] sm:$0xff]   ;;  %v17534_v0 = vld [vmem:[%s24465_s4 + $0x158] sm:$0xff]  }
 0x231   : > { %1689 = vmatmul.mubr.bf16.gmra.mrb[160].mxu1 %v17502_v60  ;;  %2380 = vmatprep.mubr.bf16.mxu0 %v1726_v63  ;;  %v17533_v63 = vld [vmem:[%s24465_s4 + $0x110] sm:$0xff]  }
 0x232   : > { %2381 = vmatmul.mubr.bf16.gmra.mrb[4].mxu0 %v1722_v31  ;;  %1696 = vmatprep.mubr.bf16.mxu1 %v17503_v62 }
 0x233   : > { %15089 = vmatpush3.bf16.msra.mxu0 %v17517_v1  ;;  %v17535_v1 = vld [vmem:[%s24465_s4 + $0x118] sm:$0xff]  }
 0x234   : > { %v1482_v4 = vpop.f32.mrb[56].mxu1  ;;  %15090 = vmatprep.subr.bf16.mxu0 %v17518_v2 }
 0x235   : > { %v1484_v6 = vpop.f32.mrb[57].mxu1 }
 0x236   : > { %v1485_v8 = vpop.f32.mrb[58].mxu1 }
 0x237   : > { %v1727_v10 = vpack.c.bf16 %v1485_v8, %v1482_v4  ;;  %v1487_v23 = vpop.f32.mrb[59].mxu1  ;;  %15091 = vmatpush3.bf16.msra.mxu0 %v17519_v3  ;;  %v17536_v3 = vld [vmem:[%s24465_s4 + $0x160] sm:$0xff]  }
 0x238   : > { %15092 = vmatprep.subr.bf16.mxu0 %v17520_v5  ;;  %v17537_v8 = vld [vmem:[%s24465_s4 + $0x120] sm:$0xff]  }
 0x239   : > { %1697 = vmatmul.mubr.bf16.gmra.mrb[164].mxu1 %v17505_v7  ;;  %2388 = vmatprep.mubr.bf16.mxu0 %v1727_v10  ;;  %v17539_v10 = vld [vmem:[%s24465_s4 + $0x128] sm:$0xff]  }
 0x23a   : > { %2389 = vmatmul.mubr.bf16.gmra.mrb[8].mxu0 %v1723_v38  ;;  %1704 = vmatprep.mubr.bf16.mxu1 %v17506_v9  ;;  %v17538_v9 = vld [vmem:[%s24465_s4 + $0x168] sm:$0xff]  }
 0x23b   : > { %15093 = vmatpush3.bf16.msra.mxu0 %v17521_v11  ;;  %v17540_v11 = vld [vmem:[%s24465_s4 + $0x170] sm:$0xff]  }
 0x23c   : > { %v1490_v14 = vpop.f32.mrb[60].mxu1  ;;  %15094 = vmatprep.subr.bf16.mxu0 %v17522_v12 }
 0x23d   : > { %v1492_v16 = vpop.f32.mrb[61].mxu1 }
 0x23e   : > { %v1493_v18 = vpop.f32.mrb[62].mxu1  ;;  %v17541_v16 = vld [vmem:[%s24465_s4 + $0x130] sm:$0xff]  }
 0x23f   : > { %v1728_v20 = vpack.c.bf16 %v1493_v18, %v1490_v14  ;;  %v1495_v22 = vpop.f32.mrb[63].mxu1  ;;  %15095 = vmatpush3.bf16.msra.mxu0 %v17523_v13  ;;  %v17543_v18 = vld [vmem:[%s24465_s4 + $0x138] sm:$0xff]  }
 0x240   : > { %15096 = vmatprep.subr.bf16.mxu0 %v17524_v15 }
 0x241   : > { %1705 = vmatmul.mubr.bf16.gmra.mrb[168].mxu1 %v17508_v17  ;;  %2396 = vmatprep.mubr.bf16.mxu0 %v1728_v20  ;;  %v17542_v17 = vld [vmem:[%s24465_s4 + $0x178] sm:$0xff]   ;;  %v17544_v20 = vld [vmem:[%s24465_s4 + $0x1c0] sm:$0xff]  }
 0x242   : > { %2397 = vmatmul.mubr.bf16.gmra.mrb[12].mxu0 %v1724_v45  ;;  %1712 = vmatprep.mubr.bf16.mxu1 %v17509_v19 }
 0x243   : > { %15097 = vmatpush3.bf16.msra.mxu0 %v17525_v24 }
 0x244   : > { %v1498_v27 = vpop.f32.mrb[64].mxu1  ;;  %15098 = vmatprep.subr.bf16.mxu0 %v17526_v25 }
 0x245   : > { %v1500_v29 = vpop.f32.mrb[65].mxu1 }
 0x246   : > { %v1501_v31 = vpop.f32.mrb[66].mxu1 }
 0x247   : > { %v1729_v32 = vpack.c.bf16 %v1501_v31, %v1498_v27  ;;  %v1503_v33 = vpop.f32.mrb[67].mxu1  ;;  %15099 = vmatpush3.bf16.msra.mxu0 %v17527_v26 }
 0x248   : > { %15124 = vmatprep.subr.bf16.mxu0 %v17528_v28 }
 0x249   : > { %1713 = vmatmul.mubr.bf16.gmra.mrb[172].mxu1 %v17511_v30 }
 0x24c   : > { %v1506_v34 = vpop.f32.mrb[68].mxu1 }
 0x24d   : > { %v1508_v35 = vpop.f32.mrb[69].mxu1 }
 0x24e   : > { %v1509_v36 = vpop.f32.mrb[70].mxu1 }
 0x24f   : > { %v1730_v37 = vpack.c.bf16 %v1509_v36, %v1506_v34  ;;  %v1511_v38 = vpop.f32.mrb[71].mxu1 }
 0x254   : > { %v1514_v39 = vpop.f32.mrb[72].mxu1 }
 0x255   : > { %v1516_v40 = vpop.f32.mrb[73].mxu1 }
 0x256   : > { %v1517_v41 = vpop.f32.mrb[74].mxu1 }
 0x257   : > { %v1731_v42 = vpack.c.bf16 %v1517_v41, %v1514_v39  ;;  %v1519_v43 = vpop.f32.mrb[75].mxu1 }
 0x25c   : > { %v1522_v44 = vpop.f32.mrb[76].mxu1 }
 0x25d   : > { %v1524_v45 = vpop.f32.mrb[77].mxu1 }
 0x25e   : > { %v1525_v46 = vpop.f32.mrb[78].mxu1 }
 0x25f   : > { %v1732_v47 = vpack.c.bf16 %v1525_v46, %v1522_v44  ;;  %v1527_v48 = vpop.f32.mrb[79].mxu1 }
 0x260   : > { %v17546_v48 = vld [vmem:[%s24465_s4 + $0x1c8] sm:$0xff]  }
 0x264   : > { %v1530_v49 = vpop.f32.mrb[80].mxu1 }
 0x265   : > { %v1532_v50 = vpop.f32.mrb[81].mxu1 }
 0x266   : > { %v1533_v51 = vpop.f32.mrb[82].mxu1 }
 0x267   : > { %v1733_v52 = vpack.c.bf16 %v1533_v51, %v1530_v49  ;;  %v1535_v53 = vpop.f32.mrb[83].mxu1  ;;  %v17547_v49 = vld [vmem:[%s24465_s4 + $0x188] sm:$0xff]   ;;  %v17548_v51 = vld [vmem:[%s24465_s4 + $0x1d0] sm:$0xff]  }
 0x269   : > { %2437 = vmatprep.mubr.bf16.mxu0 %v1733_v52 }
 0x26a   : > { %2438 = vmatmul.mubr.bf16.vlgmr.msra.gmra.mrb[16].mxu0 %v1729_v32 }
 0x26b   : > { %15125 = vmatpush3.bf16.msra.mxu0 %v17529_v54 }
 0x26c   : > { %v1538_v57 = vpop.f32.mrb[84].mxu1  ;;  %15126 = vmatprep.subr.bf16.mxu0 %v17530_v55 }
 0x26d   : > { %v1540_v59 = vpop.f32.mrb[85].mxu1 }
 0x26e   : > { %v1541_v60 = vpop.f32.mrb[86].mxu1 }
 0x26f   : > { %v1734_v61 = vpack.c.bf16 %v1541_v60, %v1538_v57  ;;  %v1543_v62 = vpop.f32.mrb[87].mxu1  ;;  %15127 = vmatpush3.bf16.msra.mxu0 %v17531_v56  ;;  %v17549_v56 = vld [vmem:[%s24465_s4 + $0x190] sm:$0xff]   ;;  %v17550_v57 = vld [vmem:[%s24465_s4 + $0x1d8] sm:$0xff]   ;;  %v17552_v60 = vld [vmem:[%s24465_s4 + $0x1e0] sm:$0xff]  }
 0x270   : > { %15128 = vmatprep.subr.bf16.mxu0 %v17532_v58  ;;  %v17551_v58 = vld [vmem:[%s24465_s4 + $0x198] sm:$0xff]  }
 0x271   : > { %2445 = vmatprep.mubr.bf16.mxu0 %v1734_v61 }
 0x272   : > { %2446 = vmatmul.mubr.bf16.gmra.mrb[20].mxu0 %v1730_v37 }
 0x273   : > { %15129 = vmatpush3.bf16.msra.mxu0 %v17533_v63 }
 0x274   : > { %v1546_v2 = vpop.f32.mrb[88].mxu1  ;;  %15130 = vmatprep.subr.bf16.mxu0 %v17534_v0 }
 0x275   : > { %v1548_v4 = vpop.f32.mrb[89].mxu1 }
 0x276   : > { %v1549_v5 = vpop.f32.mrb[90].mxu1 }
 0x277   : > { %v1735_v6 = vpack.c.bf16 %v1549_v5, %v1546_v2  ;;  %v1551_v7 = vpop.f32.mrb[91].mxu1  ;;  %15131 = vmatpush3.bf16.msra.mxu0 %v17535_v1  ;;  %v17553_v1 = vld [vmem:[%s24465_s4 + $0x1a0] sm:$0xff]   ;;  %v17554_v2 = vld [vmem:[%s24465_s4 + $0x1e8] sm:$0xff]   ;;  %v17556_v5 = vld [vmem:[%s24465_s4 + $0x1f0] sm:$0xff]  }
 0x278   : > { %15132 = vmatprep.subr.bf16.mxu0 %v17536_v3  ;;  %v17555_v3 = vld [vmem:[%s24465_s4 + $0x1a8] sm:$0xff]  }
 0x279   : > { %2453 = vmatprep.mubr.bf16.mxu0 %v1735_v6 }
 0x27a   : > { %2454 = vmatmul.mubr.bf16.gmra.mrb[24].mxu0 %v1731_v42 }
 0x27b   : > { %15133 = vmatpush3.bf16.msra.mxu0 %v17537_v8 }
 0x27c   : > { %v1554_v23 = vpop.f32.mrb[92].mxu1  ;;  %15134 = vmatprep.subr.bf16.mxu0 %v17538_v9 }
 0x27d   : > { %v1556_v12 = vpop.f32.mrb[93].mxu1 }
 0x27e   : > { %v1557_v13 = vpop.f32.mrb[94].mxu1 }
 0x27f   : > { %v1736_v14 = vpack.c.bf16 %v1557_v13, %v1554_v23  ;;  %v1559_v15 = vpop.f32.mrb[95].mxu1  ;;  %15135 = vmatpush3.bf16.msra.mxu0 %v17539_v10  ;;  %v17557_v10 = vld [vmem:[%s24465_s4 + $0x1b0] sm:$0xff]   ;;  %v17558_v23 = vld [vmem:[%s24465_s4 + $0x1f8] sm:$0xff]   ;;  %v17560_v13 = vld [vmem:[%s24465_s4 + $0x200] sm:$0xff]  }
 0x280   : > { %15136 = vmatprep.subr.bf16.mxu0 %v17540_v11  ;;  %v17559_v11 = vld [vmem:[%s24465_s4 + $0x1b8] sm:$0xff]  }
 0x281   : > { %2461 = vmatprep.mubr.bf16.mxu0 %v1736_v14 }
 0x282   : > { %2462 = vmatmul.mubr.bf16.gmra.mrb[28].mxu0 %v1732_v47  ;;  %v17545_v47 = vld [vmem:[%s24465_s4 + $0x180] sm:$0xff]  }
 0x283   : > { %15137 = vmatpush3.bf16.msra.mxu0 %v17541_v16 }
 0x284   : > { %v1562_v19 = vpop.f32.mrb[96].mxu1  ;;  %15138 = vmatprep.subr.bf16.mxu0 %v17542_v17 }
 0x285   : > { %v1564_v22 = vpop.f32.mrb[97].mxu1 }
 0x286   : > { %v1565_v24 = vpop.f32.mrb[98].mxu1 }
 0x287   : > { %v1737_v25 = vpack.c.bf16 %v1565_v24, %v1562_v19  ;;  %v1567_v26 = vpop.f32.mrb[99].mxu1  ;;  %15139 = vmatpush3.bf16.msra.mxu0 %v17543_v18 }
 0x288   : > { %15164 = vmatprep.subr.bf16.mxu0 %v17544_v20 }
 0x28c   : > { %v1570_v27 = vpop.f32.mrb[100].mxu1 }
 0x28d   : > { %v1572_v28 = vpop.f32.mrb[101].mxu1 }
 0x28e   : > { %v1573_v29 = vpop.f32.mrb[102].mxu1 }
 0x28f   : > { %v1738_v30 = vpack.c.bf16 %v1573_v29, %v1570_v27  ;;  %v1575_v31 = vpop.f32.mrb[103].mxu1 }
 0x294   : > { %v1578_v32 = vpop.f32.mrb[104].mxu1 }
 0x295   : > { %v1580_v33 = vpop.f32.mrb[105].mxu1 }
 0x296   : > { %v1581_v34 = vpop.f32.mrb[106].mxu1 }
 0x297   : > { %v1739_v35 = vpack.c.bf16 %v1581_v34, %v1578_v32  ;;  %v1583_v36 = vpop.f32.mrb[107].mxu1 }
 0x29c   : > { %v1586_v37 = vpop.f32.mrb[108].mxu1 }
 0x29d   : > { %v1588_v38 = vpop.f32.mrb[109].mxu1 }
 0x29e   : > { %v1589_v39 = vpop.f32.mrb[110].mxu1 }
 0x29f   : > { %v1740_v40 = vpack.c.bf16 %v1589_v39, %v1586_v37  ;;  %v1591_v41 = vpop.f32.mrb[111].mxu1 }
 0x2a4   : > { %v1594_v42 = vpop.f32.mrb[112].mxu1 }
 0x2a5   : > { %v1596_v43 = vpop.f32.mrb[113].mxu1 }
 0x2a6   : > { %v1597_v44 = vpop.f32.mrb[114].mxu1 }
 0x2a7   : > { %v1741_v45 = vpack.c.bf16 %v1597_v44, %v1594_v42  ;;  %v1599_v46 = vpop.f32.mrb[115].mxu1  ;;  %v17562_v42 = vld [vmem:[%s24465_s4 + $0x210] sm:$0xff]  }
 0x2a9   : > { %2502 = vmatprep.mubr.bf16.mxu0 %v1741_v45 }
 0x2aa   : > { %2503 = vmatmul.mubr.bf16.vlgmr.msra.gmra.mrb[32].mxu0 %v1737_v25 }
 0x2ab   : > { %15165 = vmatpush3.bf16.msra.mxu0 %v17545_v47  ;;  %v17563_v47 = vld [vmem:[%s24465_s4 + $0x218] sm:$0xff]  }
 0x2ac   : > { %v1602_v50 = vpop.f32.mrb[116].mxu1  ;;  %15166 = vmatprep.subr.bf16.mxu0 %v17546_v48 }
 0x2ad   : > { %v1604_v52 = vpop.f32.mrb[117].mxu1 }
 0x2ae   : > { %v1605_v53 = vpop.f32.mrb[118].mxu1 }
 0x2af   : > { %v1742_v54 = vpack.c.bf16 %v1605_v53, %v1602_v50  ;;  %v1607_v55 = vpop.f32.mrb[119].mxu1  ;;  %15167 = vmatpush3.bf16.msra.mxu0 %v17547_v49  ;;  %v17564_v49 = vld [vmem:[%s24465_s4 + $0x220] sm:$0xff]  }
 0x2b0   : > { %15168 = vmatprep.subr.bf16.mxu0 %v17548_v51 }
 0x2b1   : > { %2510 = vmatprep.mubr.bf16.mxu0 %v1742_v54  ;;  %v17565_v54 = vld [vmem:[%s24465_s4 + $0x228] sm:$0xff]  }
 0x2b2   : > { %2511 = vmatmul.mubr.bf16.gmra.mrb[36].mxu0 %v1738_v30 }
 0x2b3   : > { %15169 = vmatpush3.bf16.msra.mxu0 %v17549_v56  ;;  %v17566_v56 = vld [vmem:[%s24465_s4 + $0x230] sm:$0xff]  }
 0x2b4   : > { %v1610_v59 = vpop.f32.mrb[120].mxu1  ;;  %15170 = vmatprep.subr.bf16.mxu0 %v17550_v57 }
 0x2b5   : > { %v1612_v61 = vpop.f32.mrb[121].mxu1 }
 0x2b6   : > { %v1613_v62 = vpop.f32.mrb[122].mxu1 }
 0x2b7   : > { %v1743_v63 = vpack.c.bf16 %v1613_v62, %v1610_v59  ;;  %v1615_v0 = vpop.f32.mrb[123].mxu1  ;;  %15171 = vmatpush3.bf16.msra.mxu0 %v17551_v58 }
 0x2b8   : > { %15172 = vmatprep.subr.bf16.mxu0 %v17552_v60 }
 0x2b9   : > { %2518 = vmatprep.mubr.bf16.mxu0 %v1743_v63 }
 0x2ba   : > { %2519 = vmatmul.mubr.bf16.gmra.mrb[40].mxu0 %v1739_v35 }
 0x2bb   : > { %15173 = vmatpush3.bf16.msra.mxu0 %v17553_v1 }
 0x2bc   : > { %v1618_v4 = vpop.f32.mrb[124].mxu1  ;;  %15174 = vmatprep.subr.bf16.mxu0 %v17554_v2  ;;  %v17567_v2 = vld [vmem:[%s24465_s4 + $0x238] sm:$0xff]  }
 0x2bd   : > { %v1620_v6 = vpop.f32.mrb[125].mxu1 }
 0x2be   : > { %v1621_v7 = vpop.f32.mrb[126].mxu1 }
 0x2bf   : > { %v1744_v8 = vpack.c.bf16 %v1621_v7, %v1618_v4  ;;  %v1623_v9 = vpop.f32.mrb[127].mxu1  ;;  %15175 = vmatpush3.bf16.msra.mxu0 %v17555_v3 }
 0x2c0   : > { %15176 = vmatprep.subr.bf16.mxu0 %v17556_v5 }
 0x2c1   : > { %2526 = vmatprep.mubr.bf16.mxu0 %v1744_v8 }
 0x2c2   : > { %2527 = vmatmul.mubr.bf16.gmra.mrb[44].mxu0 %v1740_v40  ;;  %v17561_v40 = vld [vmem:[%s24465_s4 + $0x208] sm:$0xff]  }
 0x2c3   : > { %15177 = vmatpush3.bf16.msra.mxu0 %v17557_v10 }
 0x2c4   : > { %v1626_v12 = vpop.f32.mrb[128].mxu1  ;;  %15178 = vmatprep.subr.bf16.mxu0 %v17558_v23 }
 0x2c5   : > { %v1628_v14 = vpop.f32.mrb[129].mxu1 }
 0x2c6   : > { %v1629_v15 = vpop.f32.mrb[130].mxu1 }
 0x2c7   : > { %v1745_v16 = vpack.c.bf16 %v1629_v15, %v1626_v12  ;;  %v1631_v17 = vpop.f32.mrb[131].mxu1  ;;  %15179 = vmatpush3.bf16.msra.mxu0 %v17559_v11 }
 0x2c8   : > { %16047 = vmatprep.subr.bf16.mxu0 %v17560_v13 }
 0x2cc   : > { %v1634_v18 = vpop.f32.mrb[132].mxu1 }
 0x2cd   : > { %v1636_v19 = vpop.f32.mrb[133].mxu1 }
 0x2ce   : > { %v1637_v20 = vpop.f32.mrb[134].mxu1 }
 0x2cf   : > { %v1746_v22 = vpack.c.bf16 %v1637_v20, %v1634_v18  ;;  %v1639_v24 = vpop.f32.mrb[135].mxu1 }
 0x2d4   : > { %v1642_v25 = vpop.f32.mrb[136].mxu1 }
 0x2d5   : > { %v1644_v26 = vpop.f32.mrb[137].mxu1 }
 0x2d6   : > { %v1645_v27 = vpop.f32.mrb[138].mxu1 }
 0x2d7   : > { %v1747_v28 = vpack.c.bf16 %v1645_v27, %v1642_v25  ;;  %v1647_v29 = vpop.f32.mrb[139].mxu1 }
 0x2dc   : > { %v1650_v30 = vpop.f32.mrb[140].mxu1 }
 0x2dd   : > { %v1652_v31 = vpop.f32.mrb[141].mxu1 }
 0x2de   : > { %v1653_v32 = vpop.f32.mrb[142].mxu1 }
 0x2df   : > { %v1748_v33 = vpack.c.bf16 %v1653_v32, %v1650_v30  ;;  %v1655_v34 = vpop.f32.mrb[143].mxu1 }
 0x2e4   : > { %v1658_v35 = vpop.f32.mrb[144].mxu1 }
 0x2e5   : > { %v1660_v36 = vpop.f32.mrb[145].mxu1 }
 0x2e6   : > { %v1661_v37 = vpop.f32.mrb[146].mxu1 }
 0x2e7   : > { %v1749_v38 = vpack.c.bf16 %v1661_v37, %v1658_v35  ;;  %v1663_v39 = vpop.f32.mrb[147].mxu1 }
 0x2e9   : > { %2567 = vmatprep.mubr.bf16.mxu0 %v1749_v38 }
 0x2ea   : > { %2568 = vmatmul.mubr.bf16.vlgmr.msra.gmra.mrb[48].mxu0 %v1745_v16 }
 0x2eb   : > { %16048 = vmatpush3.bf16.msra.mxu0 %v17560_v13 }
 0x2ec   : > { %v1666_v41 = vpop.f32.mrb[148].mxu1  ;;  %16049 = vmatprep.subr.bf16.mxu0 %v17561_v40 }
 0x2ed   : > { %v1668_v43 = vpop.f32.mrb[149].mxu1 }
 0x2ee   : > { %v1669_v44 = vpop.f32.mrb[150].mxu1  ;;  %v12759_v43 = vld [vmem:[%s24466_s5] ss:$0 sm:$0xff] }
 0x2ef   : > { %v1750_v45 = vpack.c.bf16 %v1669_v44, %v1666_v41  ;;  %v1671_v46 = vpop.f32.mrb[151].mxu1  ;;  %16050 = vmatpush3.bf16.msra.mxu0 %v17561_v40 }
 0x2f0   : > { %16051 = vmatprep.subr.bf16.mxu0 %v17562_v42 }
 0x2f1   : > { %2575 = vmatprep.mubr.bf16.mxu0 %v1750_v45 }
 0x2f2   : > { %2576 = vmatmul.mubr.bf16.gmra.mrb[52].mxu0 %v1746_v22 }
 0x2f3   : > { %16052 = vmatpush3.bf16.msra.mxu0 %v17562_v42 }
 0x2f4   : > { %v1674_v48 = vpop.f32.mrb[152].mxu1  ;;  %16053 = vmatprep.subr.bf16.mxu0 %v17563_v47 }
 0x2f5   : > { %v1676_v50 = vpop.f32.mrb[153].mxu1 }
 0x2f6   : > { %v1677_v51 = vpop.f32.mrb[154].mxu1 }
 0x2f7   : > { %v1679_v52 = vpop.f32.mrb[155].mxu1  ;;  %v1751_v53 = vpack.c.bf16 %v1677_v51, %v1674_v48  ;;  %16054 = vmatpush3.bf16.msra.mxu0 %v17563_v47 }
 0x2f8   : > { %16055 = vmatprep.subr.bf16.mxu0 %v17564_v49 }
 0x2f9   : > { %2583 = vmatprep.mubr.bf16.mxu0 %v1751_v53 }
 0x2fa   : > { %2584 = vmatmul.mubr.bf16.gmra.mrb[56].mxu0 %v1747_v28 }
 0x2fb   : > { %16056 = vmatpush3.bf16.msra.mxu0 %v17564_v49 }
 0x2fc   : > { %v1682_v55 = vpop.f32.mrb[156].mxu1  ;;  %16057 = vmatprep.subr.bf16.mxu0 %v17565_v54 }
 0x2fd   : > { %v1684_v57 = vpop.f32.mrb[157].mxu1  ;;  %v15060_v58 = vpop.f32.mrb[0].mxu0 }
 0x2fe   : > { %v1685_v59 = vpop.f32.mrb[158].mxu1  ;;  %v15061_v60 = vpop.f32.mrb[1].mxu0 }
 0x2ff   : > { %v1752_v61 = vpack.c.bf16 %v1685_v59, %v1682_v55  ;;  %v15062_v62 = vadd.f32 %v15061_v60, %v15060_v58  ;;  %v1687_v63 = vpop.f32.mrb[159].mxu1  ;;  %v15063_v0 = vpop.f32.mrb[2].mxu0  ;;  %16058 = vmatpush3.bf16.msra.mxu0 %v17565_v54 }
 0x300   : > { %v15064_v1 = vpop.f32.mrb[3].mxu0  ;;  %16059 = vmatprep.subr.bf16.mxu0 %v17566_v56 }
 0x301   : > { %v15065_v3 = vadd.f32 %v15064_v1, %v15063_v0  ;;  %2591 = vmatprep.mubr.bf16.mxu0 %v1752_v61  ;;  %v2375_v46 = vadd.f32 %v15062_v62, %v12759_v43 }
 0x302   : > { %2592 = vmatmul.mubr.bf16.gmra.mrb[60].mxu0 %v1748_v33 }
 0x303   : > { %16060 = vmatpush3.bf16.msra.mxu0 %v17566_v56  ;;  %v2378_v50 = vadd.f32 %v15065_v3, %v12759_v43 }
 0x304   : > { %v1690_v4 = vpop.f32.mrb[160].mxu1  ;;  %16061 = vmatprep.subr.bf16.mxu0 %v17567_v2 }
 0x305   : > { %v1692_v5 = vpop.f32.mrb[161].mxu1  ;;  %v15066_v6 = vpop.f32.mrb[4].mxu0 }
 0x306   : > { %v1693_v7 = vpop.f32.mrb[162].mxu1  ;;  %v15067_v8 = vpop.f32.mrb[5].mxu0 }
 0x307   : > { %v1753_v9 = vpack.c.bf16 %v1693_v7, %v1690_v4  ;;  %v15068_v10 = vadd.f32 %v15067_v8, %v15066_v6  ;;  %v1695_v23 = vpop.f32.mrb[163].mxu1  ;;  %v15069_v11 = vpop.f32.mrb[6].mxu0  ;;  %16062 = vmatpush3.bf16.msra.mxu0 %v17567_v2 }
 0x308   : > { %v15070_v12 = vpop.f32.mrb[7].mxu0 }
 0x309   : > { %v15071_v13 = vadd.f32 %v15070_v12, %v15069_v11  ;;  %16063 = vmatprep.mubr.bf16.mxu0 %v1753_v9  ;;  %v2383_v56 = vadd.f32 %v15068_v10, %v12759_v43 }
 0x30b   : > { %v2386_v60 = vadd.f32 %v15071_v13, %v12759_v43 }
 0x30c   : > { %v1698_v14 = vpop.f32.mrb[164].mxu1 }
 0x30d   : > { %v1700_v15 = vpop.f32.mrb[165].mxu1  ;;  %v15072_v16 = vpop.f32.mrb[8].mxu0 }
 0x30e   : > { %v1701_v17 = vpop.f32.mrb[166].mxu1  ;;  %v15073_v18 = vpop.f32.mrb[9].mxu0 }
 0x30f   : > { %v1754_v19 = vpack.c.bf16 %v1701_v17, %v1698_v14  ;;  %v15074_v20 = vadd.f32 %v15073_v18, %v15072_v16  ;;  %v1703_v22 = vpop.f32.mrb[167].mxu1  ;;  %v15075_v24 = vpop.f32.mrb[10].mxu0 }
 0x310   : > { %v15076_v25 = vpop.f32.mrb[11].mxu0 }
 0x311   : > { %v15077_v26 = vadd.f32 %v15076_v25, %v15075_v24  ;;  %16064 = vmatmul.mubr.bf16.vlgmr.msra.gmra.mrb[64].mxu0 %v1754_v19  ;;  %v2391_v62 = vadd.f32 %v15074_v20, %v12759_v43  ;;  %v18292_v19 = vmov 0.0  }
 0x312   : > { %16071 = vmatprep.subr.bf16.mxu0 %v18292_v19 }
 0x313   : > { %v2394_v3 = vadd.f32 %v15077_v26, %v12759_v43 }
 0x314   : > { %v1706_v27 = vpop.f32.mrb[168].mxu1 }
 0x315   : > { %v1708_v28 = vpop.f32.mrb[169].mxu1  ;;  %v15078_v29 = vpop.f32.mrb[12].mxu0 }
 0x316   : > { %v1709_v30 = vpop.f32.mrb[170].mxu1  ;;  %v15079_v31 = vpop.f32.mrb[13].mxu0 }
 0x317   : > { %v1755_v32 = vpack.c.bf16 %v1709_v30, %v1706_v27  ;;  %v15080_v33 = vadd.f32 %v15079_v31, %v15078_v29  ;;  %v1711_v34 = vpop.f32.mrb[171].mxu1  ;;  %v15081_v35 = vpop.f32.mrb[14].mxu0 }
 0x318   : > { %v15082_v36 = vpop.f32.mrb[15].mxu0 }
 0x319   : > { %v15083_v37 = vadd.f32 %v15082_v36, %v15081_v35  ;;  %16067 = vmatprep.mubr.bf16.mxu0 %v1755_v32  ;;  %v2399_v10 = vadd.f32 %v15080_v33, %v12759_v43 }
 0x31b   : > { %v2402_v13 = vadd.f32 %v15083_v37, %v12759_v43 }
 0x31c   : > { %v1714_v38 = vpop.f32.mrb[172].mxu1 }
 0x31d   : > { %v1716_v39 = vpop.f32.mrb[173].mxu1 }
 0x31e   : > { %v1717_v40 = vpop.f32.mrb[174].mxu1 }
 0x31f   : > { %v1756_v41 = vpack.c.bf16 %v1717_v40, %v1714_v38  ;;  %v1719_v42 = vpop.f32.mrb[175].mxu1 }
 0x321   : > { %16068 = vmatmul.mubr.bf16.gmra.mrb[68].mxu0 %v1756_v41 }
 0x322   : > { %16079 = vmatprep.mubr.msk.bf16.mxu0 %vm18293_vm3, %v18292_v19 }
 0x33d   : > { %v15100_v44 = vpop.f32.mrb[16].mxu0 }
 0x33e   : > { %v15101_v45 = vpop.f32.mrb[17].mxu0 }
 0x33f   : > { %v15102_v47 = vadd.f32 %v15101_v45, %v15100_v44  ;;  %v15103_v48 = vpop.f32.mrb[18].mxu0 }
 0x340   : > { %v15104_v49 = vpop.f32.mrb[19].mxu0 }
 0x341   : > { %v2440_v51 = vadd.f32 %v15102_v47, %v2375_v46  ;;  %v15105_v52 = vadd.f32 %v15104_v49, %v15103_v48 }
 0x343   : > { %v2443_v53 = vadd.f32 %v15105_v52, %v2378_v50 }
 0x345   : > { %v15106_v54 = vpop.f32.mrb[20].mxu0 }
 0x346   : > { %v15107_v55 = vpop.f32.mrb[21].mxu0 }
 0x347   : > { %v15108_v57 = vadd.f32 %v15107_v55, %v15106_v54  ;;  %v15109_v58 = vpop.f32.mrb[22].mxu0 }
 0x348   : > { %v15110_v59 = vpop.f32.mrb[23].mxu0 }
 0x349   : > { %v2448_v61 = vadd.f32 %v15108_v57, %v2383_v56  ;;  %v15111_v63 = vadd.f32 %v15110_v59, %v15109_v58 }
 0x34b   : > { %v2451_v0 = vadd.f32 %v15111_v63, %v2386_v60 }
 0x34d   : > { %v15112_v1 = vpop.f32.mrb[24].mxu0 }
 0x34e   : > { %v15113_v2 = vpop.f32.mrb[25].mxu0 }
 0x34f   : > { %v15114_v4 = vadd.f32 %v15113_v2, %v15112_v1  ;;  %v15115_v5 = vpop.f32.mrb[26].mxu0 }
 0x350   : > { %v15116_v6 = vpop.f32.mrb[27].mxu0 }
 0x351   : > { %v2456_v7 = vadd.f32 %v15114_v4, %v2391_v62  ;;  %v15117_v8 = vadd.f32 %v15116_v6, %v15115_v5 }
 0x353   : > { %v2459_v9 = vadd.f32 %v15117_v8, %v2394_v3 }
 0x355   : > { %v15118_v23 = vpop.f32.mrb[28].mxu0 }
 0x356   : > { %v15119_v11 = vpop.f32.mrb[29].mxu0 }
 0x357   : > { %v15120_v12 = vadd.f32 %v15119_v11, %v15118_v23  ;;  %v15121_v14 = vpop.f32.mrb[30].mxu0 }
 0x358   : > { %v15122_v15 = vpop.f32.mrb[31].mxu0 }
 0x359   : > { %v15123_v16 = vadd.f32 %v15122_v15, %v15121_v14  ;;  %v2464_v17 = vadd.f32 %v15120_v12, %v2399_v10 }
 0x35b   : > { %v2467_v18 = vadd.f32 %v15123_v16, %v2402_v13 }
 0x37d   : > { %v15140_v20 = vpop.f32.mrb[32].mxu0 }
 0x37e   : > { %v15141_v22 = vpop.f32.mrb[33].mxu0 }
 0x37f   : > { %v15142_v24 = vadd.f32 %v15141_v22, %v15140_v20  ;;  %v15143_v25 = vpop.f32.mrb[34].mxu0 }
 0x380   : > { %v15144_v26 = vpop.f32.mrb[35].mxu0 }
 0x381   : > { %v15145_v27 = vadd.f32 %v15144_v26, %v15143_v25  ;;  %v2505_v28 = vadd.f32 %v15142_v24, %v2440_v51 }
 0x383   : > { %v2508_v29 = vadd.f32 %v15145_v27, %v2443_v53 }
 0x385   : > { %v15146_v30 = vpop.f32.mrb[36].mxu0 }
 0x386   : > { %v15147_v31 = vpop.f32.mrb[37].mxu0 }
 0x387   : > { %v15148_v32 = vadd.f32 %v15147_v31, %v15146_v30  ;;  %v15149_v33 = vpop.f32.mrb[38].mxu0 }
 0x388   : > { %v15150_v34 = vpop.f32.mrb[39].mxu0 }
 0x389   : > { %v15151_v35 = vadd.f32 %v15150_v34, %v15149_v33  ;;  %v2513_v36 = vadd.f32 %v15148_v32, %v2448_v61 }
 0x38b   : > { %v2516_v37 = vadd.f32 %v15151_v35, %v2451_v0 }
 0x38d   : > { %v15152_v38 = vpop.f32.mrb[40].mxu0 }
 0x38e   : > { %v15153_v39 = vpop.f32.mrb[41].mxu0 }
 0x38f   : > { %v15155_v40 = vpop.f32.mrb[42].mxu0  ;;  %v15154_v41 = vadd.f32 %v15153_v39, %v15152_v38 }
 0x390   : > { %v15156_v42 = vpop.f32.mrb[43].mxu0 }
 0x391   : > { %v2521_v43 = vadd.f32 %v15154_v41, %v2456_v7  ;;  %v15157_v44 = vadd.f32 %v15156_v42, %v15155_v40 }
 0x393   : > { %v2524_v45 = vadd.f32 %v15157_v44, %v2459_v9 }
 0x395   : > { %v15158_v46 = vpop.f32.mrb[44].mxu0 }
 0x396   : > { %v15159_v47 = vpop.f32.mrb[45].mxu0 }
 0x397   : > { %v15160_v48 = vadd.f32 %v15159_v47, %v15158_v46  ;;  %v15161_v49 = vpop.f32.mrb[46].mxu0 }
 0x398   : > { %v15162_v50 = vpop.f32.mrb[47].mxu0 }
 0x399   : > { %v2529_v51 = vadd.f32 %v15160_v48, %v2464_v17  ;;  %v15163_v52 = vadd.f32 %v15162_v50, %v15161_v49 }
 0x39b   : > { %v2532_v53 = vadd.f32 %v15163_v52, %v2467_v18  ;;  %v17576_v52 = vld [vmem:[%s24468_s7 + $0x4] ss:$8 sps:$4 sm:$0xff]  }
 0x3bd   : > { %v15180_v54 = vpop.f32.mrb[48].mxu0 }
 0x3be   : > { %v15181_v55 = vpop.f32.mrb[49].mxu0 }
 0x3bf   : > { %v15182_v56 = vadd.f32 %v15181_v55, %v15180_v54  ;;  %v15183_v57 = vpop.f32.mrb[50].mxu0  ;;  %v17574_v54 = vld [vmem:[%s24468_s7] ss:$8 sps:$4 sm:$0xff]   ;;  %v17579_v55 = vld [vmem:[%s24468_s7 + $0x14] ss:$8 sps:$4 sm:$0xff]  }
 0x3c0   : > { %v15184_v58 = vpop.f32.mrb[51].mxu0 }
 0x3c1   : > { %v15185_v59 = vadd.f32 %v15184_v58, %v15183_v57  ;;  %v2570_v60 = vadd.f32 %v15182_v56, %v2505_v28  ;;  %v17577_v56 = vld [vmem:[%s24468_s7 + $0x10] ss:$8 sps:$4 sm:$0xff]   ;;  %v17582_v57 = vld [vmem:[%s24468_s7 + $0x24] ss:$8 sps:$4 sm:$0xff]  }
 0x3c2   : > { %v17569_v58 = vld [vmem:[%s24467_s6 + $0x8] sm:$0xff]  }
 0x3c3   : > { %v2573_v61 = vadd.f32 %v15185_v59, %v2508_v29  ;;  %v17580_v59 = vld [vmem:[%s24468_s7 + $0x20] ss:$8 sps:$4 sm:$0xff]  }
 0x3c5   : > { %v15186_v63 = vpop.f32.mrb[52].mxu0 }
 0x3c6   : > { %v15187_v0 = vpop.f32.mrb[53].mxu0 }
 0x3c7   : > { %v15188_v1 = vadd.f32 %v15187_v0, %v15186_v63  ;;  %v15189_v2 = vpop.f32.mrb[54].mxu0  ;;  %v17588_v63 = vld [vmem:[%s24468_s7 + $0x44] ss:$8 sps:$4 sm:$0xff]   ;;  %v17570_v0 = vld [vmem:[%s24467_s6 + $0x10] sm:$0xff]  }
 0x3c8   : > { %v15190_v62 = vpop.f32.mrb[55].mxu0 }
 0x3c9   : > { %v15191_v4 = vadd.f32 %v15190_v62, %v15189_v2  ;;  %v2578_v5 = vadd.f32 %v15188_v1, %v2513_v36  ;;  %v17586_v1 = vld [vmem:[%s24468_s7 + $0x40] ss:$8 sps:$4 sm:$0xff]   ;;  %v17591_v2 = vld [vmem:[%s24468_s7 + $0x54] ss:$8 sps:$4 sm:$0xff]   ;;  %v17589_v62 = vld [vmem:[%s24468_s7 + $0x50] ss:$8 sps:$4 sm:$0xff]  }
 0x3cb   : > { %v2581_v6 = vadd.f32 %v15191_v4, %v2516_v37  ;;  %v17594_v4 = vld [vmem:[%s24468_s7 + $0x64] ss:$8 sps:$4 sm:$0xff]  }
 0x3cd   : > { %v15192_v3 = vpop.f32.mrb[56].mxu0 }
 0x3ce   : > { %v15193_v7 = vpop.f32.mrb[57].mxu0 }
 0x3cf   : > { %v15194_v8 = vadd.f32 %v15193_v7, %v15192_v3  ;;  %v15195_v9 = vpop.f32.mrb[58].mxu0  ;;  %v17597_v3 = vld [vmem:[%s24468_s7 + $0x74] ss:$8 sps:$4 sm:$0xff]   ;;  %v17595_v7 = vld [vmem:[%s24468_s7 + $0x70] ss:$8 sps:$4 sm:$0xff]  }
 0x3d0   : > { %v15196_v23 = vpop.f32.mrb[59].mxu0 }
 0x3d1   : > { %v15197_v11 = vadd.f32 %v15196_v23, %v15195_v9  ;;  %v2586_v10 = vadd.f32 %v15194_v8, %v2521_v43  ;;  %v17601_v8 = vld [vmem:[%s24468_s7 + $0x84] ss:$8 sps:$4 sm:$0xff]   ;;  %v17599_v23 = vld [vmem:[%s24468_s7 + $0x80] ss:$8 sps:$4 sm:$0xff]  }
 0x3d2   : > { %v17572_v9 = vld [vmem:[%s24467_s6 + $0x20] sm:$0xff]  }
 0x3d3   : > { %v2589_v12 = vadd.f32 %v15197_v11, %v2524_v45  ;;  %v17604_v11 = vld [vmem:[%s24468_s7 + $0x94] ss:$8 sps:$4 sm:$0xff]  }
 0x3d5   : > { %v15198_v14 = vpop.f32.mrb[60].mxu0 }
 0x3d6   : > { %v15199_v15 = vpop.f32.mrb[61].mxu0 }
 0x3d7   : > { %v15200_v13 = vadd.f32 %v15199_v15, %v15198_v14  ;;  %v15201_v16 = vpop.f32.mrb[62].mxu0  ;;  %v17573_v14 = vld [vmem:[%s24467_s6 + $0x28] sm:$0xff]  }
 0x3d8   : > { %v15202_v17 = vpop.f32.mrb[63].mxu0  ;;  %v17606_v15 = vld [vmem:[%s24468_s7 + $0xa0] ss:$8 sps:$4 sm:$0xff]  }
 0x3d9   : > { %v15203_v18 = vadd.f32 %v15202_v17, %v15201_v16  ;;  %v2594_v20 = vadd.f32 %v15200_v13, %v2529_v51  ;;  %v17611_v13 = vld [vmem:[%s24468_s7 + $0xb4] ss:$8 sps:$4 sm:$0xff]   ;;  %v17609_v16 = vld [vmem:[%s24468_s7 + $0xb0] ss:$8 sps:$4 sm:$0xff]   ;;  %v17614_v17 = vld [vmem:[%s24468_s7 + $0xc4] ss:$8 sps:$4 sm:$0xff]  }
 0x3db   : > { %v2597_v22 = vadd.f32 %v15203_v18, %v2532_v53  ;;  %v17568_v53 = vld [vmem:[%s24467_s6] sm:$0xff]   ;;  %v17598_v18 = vld [vmem:[%s24467_s6 + $0x30] sm:$0xff]  }
 0x3e4   : > { %v16065_v24 = vpop.f32.mrb[64].mxu0 }
 0x3e5   : > { %v2643_v25 = vadd.f32 %v16065_v24, %v2578_v5  ;;  %v2634_v26 = vpop.f32.mrb[65].mxu0  ;;  %v17571_v5 = vld [vmem:[%s24467_s6 + $0x18] sm:$0xff]  }
 0x3e6   : > { %v2635_v27 = vadd.f32 %v2634_v26, %v2570_v60  ;;  %v16066_v28 = vpop.f32.mrb[66].mxu0  ;;  %v17585_v60 = vld [vmem:[%s24468_s7 + $0x34] ss:$8 sps:$4 sm:$0xff]   ;;  %v17618_v26 = vld [vmem:[%s24467_s6 + $0x40] sm:$0xff]  }
 0x3e7   : > { %v2646_v29 = vadd.f32 %v16066_v28, %v2581_v6  ;;  %v2637_v30 = vpop.f32.mrb[67].mxu0  ;;  %v2667_v32 = vmax.f32 %v2643_v25, 0.0  ;;  %v17592_v6 = vld [vmem:[%s24468_s7 + $0x60] ss:$8 sps:$4 sm:$0xff]   ;;  %v17617_v24 = vld [vmem:[%s24468_s7 + $0xd4] ss:$8 sps:$4 sm:$0xff]  }
 0x3e8   : > { %v2638_v31 = vadd.f32 %v2637_v30, %v2573_v61  ;;  %v2665_v34 = vmax.f32 %v2635_v27, 0.0  ;;  %v17583_v61 = vld [vmem:[%s24468_s7 + $0x30] ss:$8 sps:$4 sm:$0xff]   ;;  %v17621_v27 = vld [vmem:[%s24468_s7 + $0xe4] ss:$8 sps:$4 sm:$0xff]  }
 0x3e9   : > { %v2668_v33 = vmax.f32 %v2646_v29, 0.0  ;;  %v17615_v25 = vld [vmem:[%s24468_s7 + $0xd0] ss:$8 sps:$4 sm:$0xff]   ;;  %v17624_v28 = vld [vmem:[%s24468_s7 + $0xf4] ss:$8 sps:$4 sm:$0xff]  }
 0x3ea   : > { %v2666_v35 = vmax.f32 %v2638_v31, 0.0  ;;  %v17622_v29 = vld [vmem:[%s24468_s7 + $0xf0] ss:$8 sps:$4 sm:$0xff]   ;;  %v17627_v30 = vld [vmem:[%s24468_s7 + $0x104] ss:$8 sps:$4 sm:$0xff]  }
 0x3eb   : > { %v2674_v36 = vpack.c.bf16 %v2668_v33, %v2667_v32 }
 0x3ec   : > { %v2673_v37 = vpack.c.bf16 %v2666_v35, %v2665_v34 }
 0x3ee   : > { %16072 = vmatpush3.bf16.msra.mxu0 %v2673_v37 }
 0x3ef   : > { %16073 = vmatprep.subr.bf16.mxu0 %v18292_v19 }
 0x3f2   : > { %16074 = vmatpush3.bf16.msra.mxu0 %v2674_v36 }
 0x3f3   : > { %16075 = vmatprep.subr.bf16.mxu0 %v18292_v19 }
 0x3f4   : > { %v16069_v38 = vpop.f32.mrb[68].mxu0 }
 0x3f5   : > { %v2659_v39 = vadd.f32 %v16069_v38, %v2594_v20  ;;  %v2650_v40 = vpop.f32.mrb[69].mxu0  ;;  %v17612_v20 = vld [vmem:[%s24468_s7 + $0xc0] ss:$8 sps:$4 sm:$0xff]  }
 0x3f6   : > { %v2651_v41 = vadd.f32 %v2650_v40, %v2586_v10  ;;  %v16070_v42 = vpop.f32.mrb[70].mxu0  ;;  %v17602_v10 = vld [vmem:[%s24468_s7 + $0x90] ss:$8 sps:$4 sm:$0xff]  }
 0x3f7   : > { %v2662_v43 = vadd.f32 %v16070_v42, %v2597_v22  ;;  %v2653_v44 = vpop.f32.mrb[71].mxu0  ;;  %v2671_v46 = vmax.f32 %v2659_v39, 0.0  ;;  %v17605_v22 = vld [vmem:[%s24467_s6 + $0x38] sm:$0xff]  }
 0x3f8   : > { %v2654_v45 = vadd.f32 %v2653_v44, %v2589_v12  ;;  %v2669_v48 = vmax.f32 %v2651_v41, 0.0  ;;  %v17608_v12 = vld [vmem:[%s24468_s7 + $0xa4] ss:$8 sps:$4 sm:$0xff]   ;;  %v17625_v41 = vld [vmem:[%s24468_s7 + $0x100] ss:$8 sps:$4 sm:$0xff]  }
 0x3f9   : > { %v2672_v47 = vmax.f32 %v2662_v43, 0.0  ;;  %v17630_v42 = vld [vmem:[%s24468_s7 + $0x114] ss:$8 sps:$4 sm:$0xff]   ;;  %v17628_v43 = vld [vmem:[%s24468_s7 + $0x110] ss:$8 sps:$4 sm:$0xff]  }
 0x3fa   : > { %v2670_v49 = vmax.f32 %v2654_v45, 0.0  ;;  %v17633_v44 = vld [vmem:[%s24468_s7 + $0x124] ss:$8 sps:$4 sm:$0xff]  }
 0x3fb   : > { %v2676_v50 = vpack.c.bf16 %v2672_v47, %v2671_v46 }
 0x3fc   : > { %v2675_v51 = vpack.c.bf16 %v2670_v49, %v2669_v48  ;;  %v17631_v48 = vld [vmem:[%s24468_s7 + $0x120] ss:$8 sps:$4 sm:$0xff]  }
 0x3fe   : > { %16076 = vmatpush3.bf16.msra.mxu0 %v2675_v51  ;;  %v17636_v51 = vld [vmem:[%s24468_s7 + $0x134] ss:$8 sps:$4 sm:$0xff]  }
 0x3ff   : > { %16077 = vmatprep.subr.bf16.mxu0 %v18292_v19 }
 0x402   : > { %16078 = vmatpush3.bf16.msra.mxu0 %v2676_v50 }
 0x403   : > { %3758 = vmatprep.subr.bf16.mxu0 %v17576_v52  ;;  %v17634_v52 = vld [vmem:[%s24468_s7 + $0x130] ss:$8 sps:$4 sm:$0xff]  }
 0x405   : > { %16080 = vmatmul.mubr.msk.bf16.vlgmr.msra.gmra.mrb[72].mxu0 %vm2740_vm4, %v17568_v53  ;;  %v17639_v53 = vld [vmem:[%s24468_s7 + $0x144] ss:$8 sps:$4 sm:$0xff]  }
 0x406   : > { %16083 = vmatprep.mubr.msk.bf16.mxu0 %vm18293_vm3, %v18292_v19  ;;  %3759 = vmatpush1.bf16.msra.mxu0 %v17574_v54 }
 0x407   : > { %3760 = vmatprep.subr.bf16.mxu0 %v17579_v55 }
 0x40a   : > { %3761 = vmatpush1.bf16.msra.mxu0 %v17577_v56 }
 0x40b   : > { %3762 = vmatprep.subr.bf16.mxu0 %v17582_v57  ;;  %v17637_v57 = vld [vmem:[%s24468_s7 + $0x140] ss:$8 sps:$4 sm:$0xff]  }
 0x40d   : > { %16084 = vmatmul.mubr.msk.bf16.gmra.mrb[76].mxu0 %vm2740_vm4, %v17569_v58 }
 0x40e   : > { %16087 = vmatprep.mubr.msk.bf16.mxu0 %vm18293_vm3, %v18292_v19  ;;  %3763 = vmatpush1.bf16.msra.mxu0 %v17580_v59 }
 0x40f   : > { %3764 = vmatprep.subr.bf16.mxu0 %v17585_v60  ;;  %v17642_v60 = vld [vmem:[%s24468_s7 + $0x154] ss:$8 sps:$4 sm:$0xff]  }
 0x412   : > { %3765 = vmatpush1.bf16.msra.mxu0 %v17583_v61  ;;  %v17640_v61 = vld [vmem:[%s24468_s7 + $0x150] ss:$8 sps:$4 sm:$0xff]  }
 0x413   : > { %3766 = vmatprep.subr.bf16.mxu0 %v17588_v63  ;;  %v17645_v63 = vld [vmem:[%s24468_s7 + $0x164] ss:$8 sps:$4 sm:$0xff]  }
 0x415   : > { %16088 = vmatmul.mubr.msk.bf16.gmra.mrb[80].mxu0 %vm2740_vm4, %v17570_v0 }
 0x416   : > { %16091 = vmatprep.mubr.msk.bf16.mxu0 %vm18293_vm3, %v18292_v19  ;;  %3767 = vmatpush1.bf16.msra.mxu0 %v17586_v1 }
 0x417   : > { %3768 = vmatprep.subr.bf16.mxu0 %v17591_v2 }
 0x41a   : > { %3769 = vmatpush1.bf16.msra.mxu0 %v17589_v62  ;;  %v17643_v62 = vld [vmem:[%s24468_s7 + $0x160] ss:$8 sps:$4 sm:$0xff]  }
 0x41b   : > { %3770 = vmatprep.subr.bf16.mxu0 %v17594_v4 }
 0x41d   : > { %16092 = vmatmul.mubr.msk.bf16.gmra.mrb[84].mxu0 %vm2740_vm4, %v17571_v5 }
 0x41e   : > { %16095 = vmatprep.mubr.msk.bf16.mxu0 %vm18293_vm3, %v18292_v19  ;;  %3771 = vmatpush1.bf16.msra.mxu0 %v17592_v6  ;;  %v17648_v6 = vld [vmem:[%s24468_s7 + $0x174] ss:$8 sps:$4 sm:$0xff]  }
 0x41f   : > { %3772 = vmatprep.subr.bf16.mxu0 %v17597_v3  ;;  %v17646_v3 = vld [vmem:[%s24468_s7 + $0x170] ss:$8 sps:$4 sm:$0xff]  }
 0x422   : > { %3773 = vmatpush1.bf16.msra.mxu0 %v17595_v7  ;;  %v17651_v7 = vld [vmem:[%s24468_s7 + $0x184] ss:$8 sps:$4 sm:$0xff]  }
 0x423   : > { %3774 = vmatprep.subr.bf16.mxu0 %v17601_v8 }
 0x425   : > { %16096 = vmatmul.mubr.msk.bf16.gmra.mrb[88].mxu0 %vm2740_vm4, %v17572_v9 }
 0x426   : > { %16099 = vmatprep.mubr.msk.bf16.mxu0 %vm18293_vm3, %v18292_v19  ;;  %3775 = vmatpush1.bf16.msra.mxu0 %v17599_v23 }
 0x427   : > { %3776 = vmatprep.subr.bf16.mxu0 %v17604_v11  ;;  %v17649_v11 = vld [vmem:[%s24468_s7 + $0x180] ss:$8 sps:$4 sm:$0xff]  }
 0x42a   : > { %3777 = vmatpush1.bf16.msra.mxu0 %v17602_v10 }
 0x42b   : > { %3778 = vmatprep.subr.bf16.mxu0 %v17608_v12 }
 0x42d   : > { %16100 = vmatmul.mubr.msk.bf16.gmra.mrb[92].mxu0 %vm2740_vm4, %v17573_v14  ;;  %v17654_v14 = vld [vmem:[%s24468_s7 + $0x194] ss:$8 sps:$4 sm:$0xff]  }
 0x42e   : > { %16103 = vmatprep.mubr.msk.bf16.mxu0 %vm18293_vm3, %v18292_v19  ;;  %3779 = vmatpush1.bf16.msra.mxu0 %v17606_v15  ;;  %v17652_v15 = vld [vmem:[%s24468_s7 + $0x190] ss:$8 sps:$4 sm:$0xff]  }
 0x42f   : > { %3780 = vmatprep.subr.bf16.mxu0 %v17611_v13  ;;  %v17657_v13 = vld [vmem:[%s24468_s7 + $0x1a4] ss:$8 sps:$4 sm:$0xff]  }
 0x432   : > { %3781 = vmatpush1.bf16.msra.mxu0 %v17609_v16  ;;  %v17655_v16 = vld [vmem:[%s24468_s7 + $0x1a0] ss:$8 sps:$4 sm:$0xff]  }
 0x433   : > { %3782 = vmatprep.subr.bf16.mxu0 %v17614_v17  ;;  %v17660_v17 = vld [vmem:[%s24468_s7 + $0x1b4] ss:$8 sps:$4 sm:$0xff]  }
 0x435   : > { %16104 = vmatmul.mubr.msk.bf16.gmra.mrb[96].mxu0 %vm2740_vm4, %v17598_v18  ;;  %v17658_v18 = vld [vmem:[%s24468_s7 + $0x1b0] ss:$8 sps:$4 sm:$0xff]  }
 0x436   : > { %16107 = vmatprep.mubr.msk.bf16.mxu0 %vm18293_vm3, %v18292_v19  ;;  %3783 = vmatpush1.bf16.msra.mxu0 %v17612_v20  ;;  %v17663_v20 = vld [vmem:[%s24468_s7 + $0x1c4] ss:$8 sps:$4 sm:$0xff]  }
 0x437   : > { %3784 = vmatprep.subr.bf16.mxu0 %v17617_v24 }
 0x43a   : > { %3785 = vmatpush1.bf16.msra.mxu0 %v17615_v25  ;;  %v17666_v25 = vld [vmem:[%s24468_s7 + $0x1d4] ss:$8 sps:$4 sm:$0xff]  }
 0x43b   : > { %3786 = vmatprep.subr.bf16.mxu0 %v17621_v27 }
 0x43d   : > { %16108 = vmatmul.mubr.msk.bf16.gmra.mrb[100].mxu0 %vm2740_vm4, %v17605_v22  ;;  %v17661_v22 = vld [vmem:[%s24468_s7 + $0x1c0] ss:$8 sps:$4 sm:$0xff]  }
 0x43e   : > { %16111 = vmatprep.mubr.msk.bf16.mxu0 %vm18293_vm3, %v18292_v19  ;;  %v17619_v19 = vld [vmem:[%s24468_s7 + $0xe0] ss:$8 sps:$4 sm:$0xff]  }
 0x43f   : > { %3787 = vmatpush1.bf16.msra.mxu0 %v17619_v19  ;;  %v17664_v19 = vld [vmem:[%s24468_s7 + $0x1d0] ss:$8 sps:$4 sm:$0xff]  }
 0x440   : > { %3788 = vmatprep.subr.bf16.mxu0 %v17624_v28  ;;  %v17669_v28 = vld [vmem:[%s24468_s7 + $0x1e4] ss:$8 sps:$4 sm:$0xff]  }
 0x443   : > { %3789 = vmatpush1.bf16.msra.mxu0 %v17622_v29 }
 0x444   : > { %3801 = vmatprep.subr.bf16.mxu0 %v17627_v30 }
 0x445   : > { %16112 = vmatmul.mubr.msk.bf16.gmra.mrb[104].mxu0 %vm2740_vm4, %v17618_v26 }
 0x4d8   : > { %v2802_v31 = vpop.f32.mrb[72].mxu0 }
 0x4d9   : > { %v16081_v32 = vpop.f32.mrb[73].mxu0 }
 0x4da   : > { %v2805_v33 = vpop.f32.mrb[74].mxu0 }
 0x4db   : > { %v2873_v34 = vpack.c.bf16 %v2805_v33, %v2802_v31  ;;  %v16082_v35 = vpop.f32.mrb[75].mxu0  ;;  %v17667_v31 = vld [vmem:[%s24468_s7 + $0x1e0] ss:$8 sps:$4 sm:$0xff]   ;;  %v17672_v33 = vld [vmem:[%s24468_s7 + $0x1f4] ss:$8 sps:$4 sm:$0xff]  }
 0x4dc   : > { %v17670_v35 = vld [vmem:[%s24468_s7 + $0x1f0] ss:$8 sps:$4 sm:$0xff]  }
 0x4e0   : > { %v2810_v36 = vpop.f32.mrb[76].mxu0 }
 0x4e1   : > { %v16085_v37 = vpop.f32.mrb[77].mxu0 }
 0x4e2   : > { %v2813_v38 = vpop.f32.mrb[78].mxu0  ;;  %v17675_v37 = vld [vmem:[%s24468_s7 + $0x204] ss:$8 sps:$4 sm:$0xff]  }
 0x4e3   : > { %v2874_v39 = vpack.c.bf16 %v2813_v38, %v2810_v36  ;;  %v16086_v40 = vpop.f32.mrb[79].mxu0 }
 0x4e4   : > { %v17673_v40 = vld [vmem:[%s24468_s7 + $0x200] ss:$8 sps:$4 sm:$0xff]  }
 0x4e5   : > { %3790 = vmatprep.mubr.bf16.mxu0 %v2874_v39 }
 0x4e6   : > { %3791 = vmatmul.mubr.bf16.vlgmr.msra.gmra.mrb[108].mxu0 %v2873_v34 }
 0x4e7   : > { %3802 = vmatpush1.bf16.msra.mxu0 %v17625_v41  ;;  %v17678_v41 = vld [vmem:[%s24468_s7 + $0x214] ss:$8 sps:$4 sm:$0xff]  }
 0x4e8   : > { %3803 = vmatprep.subr.bf16.mxu0 %v17630_v42  ;;  %v19112_v45 = vpop.f32.mrb[80].mxu0  ;;  %v17676_v42 = vld [vmem:[%s24468_s7 + $0x210] ss:$8 sps:$4 sm:$0xff]  }
 0x4e9   : > { %v16089_v46 = vpop.f32.mrb[81].mxu0 }
 0x4ea   : > { %v19114_v47 = vpop.f32.mrb[82].mxu0 }
 0x4eb   : > { %3804 = vmatpush1.bf16.msra.mxu0 %v17628_v43  ;;  %v2875_v49 = vpack.c.bf16 %v19114_v47, %v19112_v45  ;;  %v16090_v50 = vpop.f32.mrb[83].mxu0  ;;  %v17681_v43 = vld [vmem:[%s24468_s7 + $0x224] ss:$8 sps:$4 sm:$0xff]   ;;  %v17684_v45 = vld [vmem:[%s24468_s7 + $0x234] ss:$8 sps:$4 sm:$0xff]  }
 0x4ec   : > { %3805 = vmatprep.subr.bf16.mxu0 %v17633_v44  ;;  %v17679_v44 = vld [vmem:[%s24468_s7 + $0x220] ss:$8 sps:$4 sm:$0xff]   ;;  %v17682_v47 = vld [vmem:[%s24468_s7 + $0x230] ss:$8 sps:$4 sm:$0xff]  }
 0x4ef   : > { %3806 = vmatpush1.bf16.msra.mxu0 %v17631_v48 }
 0x4f0   : > { %3807 = vmatprep.subr.bf16.mxu0 %v17636_v51  ;;  %v2826_v54 = vpop.f32.mrb[84].mxu0 }
 0x4f1   : > { %v16093_v55 = vpop.f32.mrb[85].mxu0 }
 0x4f2   : > { %v2829_v56 = vpop.f32.mrb[86].mxu0  ;;  %v17688_v55 = vld [vmem:[%s24468_s7 + $0x250] ss:$8 sps:$4 sm:$0xff]  }
 0x4f3   : > { %3808 = vmatpush1.bf16.msra.mxu0 %v17634_v52  ;;  %v2876_v58 = vpack.c.bf16 %v2829_v56, %v2826_v54  ;;  %v16094_v59 = vpop.f32.mrb[87].mxu0  ;;  %v17690_v54 = vld [vmem:[%s24468_s7 + $0x254] ss:$8 sps:$4 sm:$0xff]   ;;  %v17693_v56 = vld [vmem:[%s24468_s7 + $0x264] ss:$8 sps:$4 sm:$0xff]  }
 0x4f4   : > { %3809 = vmatprep.subr.bf16.mxu0 %v17639_v53  ;;  %v17685_v53 = vld [vmem:[%s24468_s7 + $0x240] ss:$8 sps:$4 sm:$0xff]   ;;  %v17694_v59 = vld [vmem:[%s24468_s7 + $0x270] ss:$8 sps:$4 sm:$0xff]  }
 0x4f5   : > { %3833 = vmatprep.mubr.bf16.mxu0 %v2876_v58  ;;  %v17696_v58 = vld [vmem:[%s24468_s7 + $0x274] ss:$8 sps:$4 sm:$0xff]  }
 0x4f7   : > { %3810 = vmatpush1.bf16.msra.mxu0 %v17637_v57  ;;  %v17691_v57 = vld [vmem:[%s24468_s7 + $0x260] ss:$8 sps:$4 sm:$0xff]  }
 0x4f8   : > { %3811 = vmatprep.subr.bf16.mxu0 %v17642_v60  ;;  %v19142_v0 = vpop.f32.mrb[88].mxu0  ;;  %v17699_v60 = vld [vmem:[%s24468_s7 + $0x284] ss:$8 sps:$4 sm:$0xff]  }
 0x4f9   : > { %v16097_v1 = vpop.f32.mrb[89].mxu0 }
 0x4fa   : > { %v19144_v2 = vpop.f32.mrb[90].mxu0  ;;  %v17793_v1 = vld [vmem:[%s24471_s10 + $0x40] sm:$0xff]  }
 0x4fb   : > { %3812 = vmatpush1.bf16.msra.mxu0 %v17640_v61  ;;  %v2877_v4 = vpack.c.bf16 %v19144_v2, %v19142_v0  ;;  %v16098_v5 = vpop.f32.mrb[91].mxu0  ;;  %v17697_v61 = vld [vmem:[%s24468_s7 + $0x280] ss:$8 sps:$4 sm:$0xff]   ;;  %15229 = vmatprep.subr.bf16.mxu1 %v17793_v1  ;;  %v17732_v2 = vld [vmem:[%s24468_s7 + $0x334] ss:$8 sps:$4 sm:$0xff]  }
 0x4fc   : > { %3813 = vmatprep.subr.bf16.mxu0 %v17645_v63  ;;  %v17702_v63 = vld [vmem:[%s24468_s7 + $0x294] ss:$8 sps:$4 sm:$0xff]   ;;  %v17795_v5 = vld [vmem:[%s24471_s10 + $0x48] sm:$0xff]   ;;  %v17784_v1 = vld [vmem:[%s24468_s7 + $0x450] ss:$8 sps:$4 sm:$0xff]  }
 0x4fd   : > { %v17727_v0 = vld [vmem:[%s24468_s7 + $0x320] ss:$8 sps:$4 sm:$0xff]  }
 0x4ff   : > { %3814 = vmatpush1.bf16.msra.mxu0 %v17643_v62  ;;  %v17794_v62 = vld [vmem:[%s24471_s10] sm:$0xff]  }
 0x500   : > { %3815 = vmatprep.subr.bf16.mxu0 %v17648_v6  ;;  %v2842_v8 = vpop.f32.mrb[92].mxu0  ;;  %v17700_v6 = vld [vmem:[%s24468_s7 + $0x290] ss:$8 sps:$4 sm:$0xff]   ;;  %15230 = vmatpush3.bf16.msra.mxu1 %v17794_v62  ;;  %v17789_v62 = vld [vmem:[%s24468_s7 + $0x464] ss:$8 sps:$4 sm:$0xff]  }
 0x501   : > { %v16101_v9 = vpop.f32.mrb[93].mxu0  ;;  %15231 = vmatprep.subr.bf16.mxu1 %v17795_v5  ;;  %v17787_v5 = vld [vmem:[%s24468_s7 + $0x460] ss:$8 sps:$4 sm:$0xff]  }
 0x502   : > { %v2845_v23 = vpop.f32.mrb[94].mxu0  ;;  %v17708_v9 = vld [vmem:[%s24468_s7 + $0x2b4] ss:$8 sps:$4 sm:$0xff]  }
 0x503   : > { %3816 = vmatpush1.bf16.msra.mxu0 %v17646_v3  ;;  %v2878_v10 = vpack.c.bf16 %v2845_v23, %v2842_v8  ;;  %v16102_v12 = vpop.f32.mrb[95].mxu0  ;;  %v17705_v3 = vld [vmem:[%s24468_s7 + $0x2a4] ss:$8 sps:$4 sm:$0xff]   ;;  %v17703_v8 = vld [vmem:[%s24468_s7 + $0x2a0] ss:$8 sps:$4 sm:$0xff]  }
 0x504   : > { %3817 = vmatprep.subr.bf16.mxu0 %v17651_v7  ;;  %v17796_v7 = vld [vmem:[%s24471_s10 + $0x8] sm:$0xff]   ;;  %v17706_v23 = vld [vmem:[%s24468_s7 + $0x2b0] ss:$8 sps:$4 sm:$0xff]   ;;  %v17714_v12 = vld [vmem:[%s24468_s7 + $0x2d4] ss:$8 sps:$4 sm:$0xff]  }
 0x505   : > { %15232 = vmatpush3.bf16.msra.mxu1 %v17796_v7  ;;  %v17798_v7 = vld [vmem:[%s24471_s10 + $0x50] sm:$0xff]  }
 0x506   : > { %15233 = vmatprep.subr.bf16.mxu1 %v17798_v7  ;;  %v17822_v7 = vld [vmem:[%s24471_s10 + $0xa0] sm:$0xff]  }
 0x507   : > { %3818 = vmatpush1.bf16.msra.mxu0 %v17649_v11  ;;  %v17711_v11 = vld [vmem:[%s24468_s7 + $0x2c4] ss:$8 sps:$4 sm:$0xff]  }
 0x508   : > { %3819 = vmatprep.subr.bf16.mxu0 %v17654_v14  ;;  %v19187_v24 = vpop.f32.mrb[96].mxu0  ;;  %v17712_v14 = vld [vmem:[%s24468_s7 + $0x2d0] ss:$8 sps:$4 sm:$0xff]  }
 0x509   : > { %v16105_v26 = vpop.f32.mrb[97].mxu0 }
 0x50a   : > { %v19195_v27 = vpop.f32.mrb[98].mxu0  ;;  %v17729_v26 = vld [vmem:[%s24468_s7 + $0x324] ss:$8 sps:$4 sm:$0xff]  }
 0x50b   : > { %3820 = vmatpush1.bf16.msra.mxu0 %v17652_v15  ;;  %v2879_v29 = vpack.c.bf16 %v19195_v27, %v19187_v24  ;;  %v16106_v30 = vpop.f32.mrb[99].mxu0  ;;  %v17717_v15 = vld [vmem:[%s24468_s7 + $0x2e4] ss:$8 sps:$4 sm:$0xff]   ;;  %v17780_v24 = vld [vmem:[%s24468_s7 + $0x434] ss:$8 sps:$4 sm:$0xff]  }
 0x50c   : > { %3821 = vmatprep.subr.bf16.mxu0 %v17657_v13  ;;  %v17715_v13 = vld [vmem:[%s24468_s7 + $0x2e0] ss:$8 sps:$4 sm:$0xff]   ;;  %v17738_v30 = vld [vmem:[%s24468_s7 + $0x354] ss:$8 sps:$4 sm:$0xff]   ;;  %v17778_v27 = vld [vmem:[%s24468_s7 + $0x430] ss:$8 sps:$4 sm:$0xff]  }
 0x50f   : > { %3822 = vmatpush1.bf16.msra.mxu0 %v17655_v16  ;;  %v17720_v16 = vld [vmem:[%s24468_s7 + $0x2f4] ss:$8 sps:$4 sm:$0xff]  }
 0x510   : > { %3823 = vmatprep.subr.bf16.mxu0 %v17660_v17  ;;  %v19205_v32 = vpop.f32.mrb[100].mxu0  ;;  %v17718_v17 = vld [vmem:[%s24468_s7 + $0x2f0] ss:$8 sps:$4 sm:$0xff]  }
 0x511   : > { %v16109_v34 = vpop.f32.mrb[101].mxu0 }
 0x512   : > { %v19213_v36 = vpop.f32.mrb[102].mxu0  ;;  %v17744_v34 = vld [vmem:[%s24468_s7 + $0x374] ss:$8 sps:$4 sm:$0xff]  }
 0x513   : > { %3824 = vmatpush1.bf16.msra.mxu0 %v17658_v18  ;;  %v2880_v38 = vpack.c.bf16 %v19213_v36, %v19205_v32  ;;  %v16110_v39 = vpop.f32.mrb[103].mxu0  ;;  %v17723_v18 = vld [vmem:[%s24468_s7 + $0x304] ss:$8 sps:$4 sm:$0xff]  }
 0x514   : > { %3825 = vmatprep.subr.bf16.mxu0 %v17663_v20  ;;  %v17721_v20 = vld [vmem:[%s24468_s7 + $0x300] ss:$8 sps:$4 sm:$0xff]   ;;  %v17741_v32 = vld [vmem:[%s24468_s7 + $0x364] ss:$8 sps:$4 sm:$0xff]   ;;  %v17748_v39 = vld [vmem:[%s24468_s7 + $0x390] ss:$8 sps:$4 sm:$0xff]  }
 0x515   : > { %v17747_v36 = vld [vmem:[%s24468_s7 + $0x384] ss:$8 sps:$4 sm:$0xff]  }
 0x517   : > { %3826 = vmatpush1.bf16.msra.mxu0 %v17661_v22  ;;  %v17726_v22 = vld [vmem:[%s24468_s7 + $0x314] ss:$8 sps:$4 sm:$0xff]  }
 0x518   : > { %3827 = vmatprep.subr.bf16.mxu0 %v17666_v25  ;;  %v19241_v46 = vpop.f32.mrb[104].mxu0  ;;  %v17724_v25 = vld [vmem:[%s24468_s7 + $0x310] ss:$8 sps:$4 sm:$0xff]  }
 0x519   : > { %v16113_v48 = vpop.f32.mrb[105].mxu0 }
 0x51a   : > { %v19249_v50 = vpop.f32.mrb[106].mxu0  ;;  %v17760_v48 = vld [vmem:[%s24468_s7 + $0x3d0] ss:$8 sps:$4 sm:$0xff]  }
 0x51b   : > { %3828 = vmatpush1.bf16.msra.mxu0 %v17664_v19  ;;  %v2881_v51 = vpack.c.bf16 %v19249_v50, %v19241_v46  ;;  %v16114_v52 = vpop.f32.mrb[107].mxu0  ;;  %v17735_v19 = vld [vmem:[%s24468_s7 + $0x344] ss:$8 sps:$4 sm:$0xff]   ;;  %v17802_v46 = vld [vmem:[%s24471_s10 + $0x18] sm:$0xff]  }
 0x51c   : > { %3829 = vmatprep.subr.bf16.mxu0 %v17669_v28  ;;  %v17733_v28 = vld [vmem:[%s24468_s7 + $0x340] ss:$8 sps:$4 sm:$0xff]  }
 0x51d   : > { %v17763_v52 = vld [vmem:[%s24468_s7 + $0x3e0] ss:$8 sps:$4 sm:$0xff]  }
 0x51e   : > { %v17804_v50 = vld [vmem:[%s24471_s10 + $0x60] sm:$0xff]  }
 0x51f   : > { %3830 = vmatpush1.bf16.msra.mxu0 %v17667_v31  ;;  %v17736_v31 = vld [vmem:[%s24468_s7 + $0x350] ss:$8 sps:$4 sm:$0xff]  }
 0x520   : > { %3831 = vmatprep.subr.bf16.mxu0 %v17672_v33  ;;  %v17739_v33 = vld [vmem:[%s24468_s7 + $0x360] ss:$8 sps:$4 sm:$0xff]  }
 0x523   : > { %3832 = vmatpush1.bf16.msra.mxu0 %v17670_v35  ;;  %v17742_v35 = vld [vmem:[%s24468_s7 + $0x370] ss:$8 sps:$4 sm:$0xff]  }
 0x524   : > { %3844 = vmatprep.subr.bf16.mxu0 %v17675_v37  ;;  %v17745_v37 = vld [vmem:[%s24468_s7 + $0x380] ss:$8 sps:$4 sm:$0xff]  }
 0x526   : > { %3834 = vmatmul.mubr.bf16.vlgmr.msra.gmra.mrb[108].mxu0 %v2875_v49  ;;  %v17687_v49 = vld [vmem:[%s24468_s7 + $0x244] ss:$8 sps:$4 sm:$0xff]  }
 0x527   : > { %3845 = vmatpush1.bf16.msra.mxu0 %v17673_v40  ;;  %3876 = vmatprep.mubr.bf16.mxu0 %v2878_v10  ;;  %v17709_v10 = vld [vmem:[%s24468_s7 + $0x2c0] ss:$8 sps:$4 sm:$0xff]   ;;  %v17753_v40 = vld [vmem:[%s24468_s7 + $0x3a4] ss:$8 sps:$4 sm:$0xff]  }
 0x528   : > { %3846 = vmatprep.subr.bf16.mxu0 %v17678_v41  ;;  %v17751_v41 = vld [vmem:[%s24468_s7 + $0x3a0] ss:$8 sps:$4 sm:$0xff]  }
 0x52b   : > { %3847 = vmatpush1.bf16.msra.mxu0 %v17676_v42  ;;  %v17756_v42 = vld [vmem:[%s24468_s7 + $0x3b4] ss:$8 sps:$4 sm:$0xff]  }
 0x52c   : > { %3848 = vmatprep.subr.bf16.mxu0 %v17681_v43  ;;  %v17754_v43 = vld [vmem:[%s24468_s7 + $0x3b0] ss:$8 sps:$4 sm:$0xff]  }
 0x52f   : > { %3849 = vmatpush1.bf16.msra.mxu0 %v17679_v44  ;;  %v17759_v44 = vld [vmem:[%s24468_s7 + $0x3c4] ss:$8 sps:$4 sm:$0xff]  }
 0x530   : > { %3850 = vmatprep.subr.bf16.mxu0 %v17684_v45  ;;  %v17757_v45 = vld [vmem:[%s24468_s7 + $0x3c0] ss:$8 sps:$4 sm:$0xff]  }
 0x533   : > { %3851 = vmatpush1.bf16.msra.mxu0 %v17682_v47  ;;  %v17762_v47 = vld [vmem:[%s24468_s7 + $0x3d4] ss:$8 sps:$4 sm:$0xff]  }
 0x534   : > { %3852 = vmatprep.subr.bf16.mxu0 %v17687_v49  ;;  %v17765_v49 = vld [vmem:[%s24468_s7 + $0x3e4] ss:$8 sps:$4 sm:$0xff]  }
 0x537   : > { %3853 = vmatpush1.bf16.msra.mxu0 %v17685_v53  ;;  %v17768_v53 = vld [vmem:[%s24468_s7 + $0x3f4] ss:$8 sps:$4 sm:$0xff]  }
 0x538   : > { %3854 = vmatprep.subr.bf16.mxu0 %v17690_v54  ;;  %v17766_v54 = vld [vmem:[%s24468_s7 + $0x3f0] ss:$8 sps:$4 sm:$0xff]  }
 0x53b   : > { %3855 = vmatpush1.bf16.msra.mxu0 %v17688_v55  ;;  %v17771_v55 = vld [vmem:[%s24468_s7 + $0x404] ss:$8 sps:$4 sm:$0xff]  }
 0x53c   : > { %3856 = vmatprep.subr.bf16.mxu0 %v17693_v56  ;;  %v17769_v56 = vld [vmem:[%s24468_s7 + $0x400] ss:$8 sps:$4 sm:$0xff]  }
 0x53f   : > { %3857 = vmatpush1.bf16.msra.mxu0 %v17691_v57  ;;  %v17774_v57 = vld [vmem:[%s24468_s7 + $0x414] ss:$8 sps:$4 sm:$0xff]  }
 0x540   : > { %3858 = vmatprep.subr.bf16.mxu0 %v17696_v58  ;;  %v17772_v58 = vld [vmem:[%s24468_s7 + $0x410] ss:$8 sps:$4 sm:$0xff]  }
 0x543   : > { %3859 = vmatpush1.bf16.msra.mxu0 %v17694_v59  ;;  %v17777_v59 = vld [vmem:[%s24468_s7 + $0x424] ss:$8 sps:$4 sm:$0xff]  }
 0x544   : > { %3860 = vmatprep.subr.bf16.mxu0 %v17699_v60  ;;  %v17775_v60 = vld [vmem:[%s24468_s7 + $0x420] ss:$8 sps:$4 sm:$0xff]  }
 0x547   : > { %3861 = vmatpush1.bf16.msra.mxu0 %v17697_v61  ;;  %v17781_v61 = vld [vmem:[%s24468_s7 + $0x440] ss:$8 sps:$4 sm:$0xff]  }
 0x548   : > { %3862 = vmatprep.subr.bf16.mxu0 %v17702_v63  ;;  %v17786_v63 = vld [vmem:[%s24468_s7 + $0x454] ss:$8 sps:$4 sm:$0xff]  }
 0x54b   : > { %3863 = vmatpush1.bf16.msra.mxu0 %v17700_v6  ;;  %v17792_v6 = vld [vmem:[%s24468_s7 + $0x474] ss:$8 sps:$4 sm:$0xff]  }
 0x54c   : > { %3864 = vmatprep.subr.bf16.mxu0 %v17705_v3  ;;  %v17790_v3 = vld [vmem:[%s24468_s7 + $0x470] ss:$8 sps:$4 sm:$0xff]  }
 0x54f   : > { %3865 = vmatpush1.bf16.msra.mxu0 %v17703_v8  ;;  %v17799_v8 = vld [vmem:[%s24471_s10 + $0x10] sm:$0xff]  }
 0x550   : > { %3866 = vmatprep.subr.bf16.mxu0 %v17708_v9  ;;  %15234 = vmatpush3.bf16.msra.mxu1 %v17799_v8  ;;  %v17801_v9 = vld [vmem:[%s24471_s10 + $0x58] sm:$0xff]  }
 0x551   : > { %15235 = vmatprep.subr.bf16.mxu1 %v17801_v9  ;;  %v17823_v9 = vld [vmem:[%s24471_s10 + $0xe8] sm:$0xff]  }
 0x553   : > { %3867 = vmatpush1.bf16.msra.mxu0 %v17706_v23  ;;  %v17807_v23 = vld [vmem:[%s24471_s10 + $0x68] sm:$0xff]  }
 0x554   : > { %3868 = vmatprep.subr.bf16.mxu0 %v17711_v11  ;;  %15236 = vmatpush3.bf16.msra.mxu1 %v17802_v46  ;;  %v17808_v11 = vld [vmem:[%s24471_s10 + $0x28] sm:$0xff]  }
 0x555   : > { %15237 = vmatprep.subr.bf16.mxu1 %v17804_v50  ;;  %v17824_v46 = vld [vmem:[%s24471_s10 + $0xa8] sm:$0xff]  }
 0x557   : > { %3869 = vmatpush1.bf16.msra.mxu0 %v17709_v10  ;;  %v17809_v10 = vld [vmem:[%s24471_s10 + $0x70] sm:$0xff]  }
 0x558   : > { %3870 = vmatprep.subr.bf16.mxu0 %v17714_v12  ;;  %v17810_v12 = vld [vmem:[%s24471_s10 + $0x30] sm:$0xff]  }
 0x55b   : > { %3871 = vmatpush1.bf16.msra.mxu0 %v17712_v14  ;;  %v17811_v14 = vld [vmem:[%s24471_s10 + $0x78] sm:$0xff]  }
 0x55c   : > { %3872 = vmatprep.subr.bf16.mxu0 %v17717_v15  ;;  %v17812_v15 = vld [vmem:[%s24471_s10 + $0x38] sm:$0xff]  }
 0x55f   : > { %3873 = vmatpush1.bf16.msra.mxu0 %v17715_v13  ;;  %v3028_v13 = vlaneseq }
 0x560   : > { %3874 = vmatprep.subr.bf16.mxu0 %v17720_v16 }
 0x561   : > { %v3029_v16 = vshrl.u32 %v3028_v13, 7  ;;  %v17827_v13 = vld [vmem:[%s24471_s10 + $0xf8] sm:$0xff]  }
 0x563   : > { %3875 = vmatpush1.bf16.msra.mxu0 %v17718_v17  ;;  %v3030_v17 = vsub.s32 0, %v3029_v16 }
 0x564   : > { %3887 = vmatprep.subr.bf16.mxu0 %v17723_v18  ;;  %v3026_v18 = vld [vmem:[%s24469_s8] sm:$0x3] }
 0x566   : > { %3877 = vmatmul.mubr.bf16.vlgmr.msra.gmra.mrb[108].mxu0 %v2877_v4  ;;  %v17730_v4 = vld [vmem:[%s24468_s7 + $0x330] ss:$8 sps:$4 sm:$0xff]  }
 0x567   : > { %3888 = vmatpush1.bf16.msra.mxu0 %v17721_v20  ;;  %3919 = vmatprep.mubr.bf16.mxu0 %v2880_v38  ;;  %v17750_v38 = vld [vmem:[%s24468_s7 + $0x394] ss:$8 sps:$4 sm:$0xff]   ;;  %v3034_v20 = vsub.s32 1, %v3029_v16 }
 0x568   : > { %3889 = vmatprep.subr.bf16.mxu0 %v17726_v22  ;;  %v3031_v22 = vrot.slane %v3026_v18, %v3030_v17  ;;  %v17828_v16 = vld [vmem:[%s24471_s10 + $0xb8] sm:$0xff]   ;;  %v17829_v17 = vld [vmem:[%s24471_s10 + $0x140] sm:$0xff]  }
 0x56b   : > { %3890 = vmatpush1.bf16.msra.mxu0 %v17724_v25  ;;  %v3035_v25 = vrot.slane %v3026_v18, %v3034_v20  ;;  %v17830_v18 = vld [vmem:[%s24471_s10 + $0x100] sm:$0xff]   ;;  %v17831_v20 = vld [vmem:[%s24471_s10 + $0x148] sm:$0xff]  }
 0x56c   : > { %3891 = vmatprep.subr.bf16.mxu0 %v17729_v26 }
 0x56f   : > { %3892 = vmatpush1.bf16.msra.mxu0 %v17727_v0 }
 0x570   : > { %3893 = vmatprep.subr.bf16.mxu0 %v17732_v2 }
 0x573   : > { %3894 = vmatpush1.bf16.msra.mxu0 %v17730_v4 }
 0x574   : > { %3895 = vmatprep.subr.bf16.mxu0 %v17735_v19 }
 0x577   : > { %3896 = vmatpush1.bf16.msra.mxu0 %v17733_v28 }
 0x578   : > { %3897 = vmatprep.subr.bf16.mxu0 %v17738_v30 }
 0x57b   : > { %3898 = vmatpush1.bf16.msra.mxu0 %v17736_v31 }
 0x57c   : > { %3899 = vmatprep.subr.bf16.mxu0 %v17741_v32 }
 0x57f   : > { %3900 = vmatpush1.bf16.msra.mxu0 %v17739_v33 }
 0x580   : > { %3901 = vmatprep.subr.bf16.mxu0 %v17744_v34 }
 0x583   : > { %3902 = vmatpush1.bf16.msra.mxu0 %v17742_v35 }
 0x584   : > { %3903 = vmatprep.subr.bf16.mxu0 %v17747_v36 }
 0x587   : > { %3904 = vmatpush1.bf16.msra.mxu0 %v17745_v37 }
 0x588   : > { %3905 = vmatprep.subr.bf16.mxu0 %v17750_v38  ;;  %v17797_v38 = vld [vmem:[%s24470_s9] sm:$0xff]  }
 0x58b   : > { %3906 = vmatpush1.bf16.msra.mxu0 %v17748_v39  ;;  %v17800_v39 = vld [vmem:[%s24470_s9 + $0x8] sm:$0xff]  }
 0x58c   : > { %3907 = vmatprep.subr.bf16.mxu0 %v17753_v40  ;;  %v17803_v40 = vld [vmem:[%s24470_s9 + $0x10] sm:$0xff]  }
 0x58f   : > { %3908 = vmatpush1.bf16.msra.mxu0 %v17751_v41  ;;  %v17806_v41 = vld [vmem:[%s24470_s9 + $0x18] sm:$0xff]  }
 0x590   : > { %3909 = vmatprep.subr.bf16.mxu0 %v17756_v42  ;;  %v17813_v42 = vld [vmem:[%s24471_s10 + $0xc0] sm:$0xff]  }
 0x593   : > { %3910 = vmatpush1.bf16.msra.mxu0 %v17754_v43 }
 0x594   : > { %3911 = vmatprep.subr.bf16.mxu0 %v17759_v44 }
 0x597   : > { %3912 = vmatpush1.bf16.msra.mxu0 %v17757_v45 }
 0x598   : > { %3913 = vmatprep.subr.bf16.mxu0 %v17762_v47 }
 0x59b   : > { %3914 = vmatpush1.bf16.msra.mxu0 %v17760_v48 }
 0x59c   : > { %3915 = vmatprep.subr.bf16.mxu0 %v17765_v49 }
 0x59f   : > { %3916 = vmatpush1.bf16.msra.mxu0 %v17763_v52  ;;  %v17814_v52 = vld [vmem:[%s24471_s10 + $0x80] sm:$0xff]  }
 0x5a0   : > { %3917 = vmatprep.subr.bf16.mxu0 %v17768_v53  ;;  %v17815_v53 = vld [vmem:[%s24471_s10 + $0xc8] sm:$0xff]  }
 0x5a3   : > { %3918 = vmatpush1.bf16.msra.mxu0 %v17766_v54  ;;  %v17816_v54 = vld [vmem:[%s24471_s10 + $0x88] sm:$0xff]  }
 0x5a4   : > { %3930 = vmatprep.subr.bf16.mxu0 %v17771_v55 }
 0x5a6   : > { %3920 = vmatmul.mubr.bf16.vlgmr.msra.gmra.mrb[108].mxu0 %v2879_v29  ;;  %v17783_v29 = vld [vmem:[%s24468_s7 + $0x444] ss:$8 sps:$4 sm:$0xff]  }
 0x5a7   : > { %3931 = vmatpush1.bf16.msra.mxu0 %v17769_v56  ;;  %3962 = vmatprep.mubr.bf16.mxu0 %v18291_v21  ;;  %v17817_v56 = vld [vmem:[%s24471_s10 + $0xd0] sm:$0xff]  }
 0x5a8   : > { %3932 = vmatprep.subr.bf16.mxu0 %v17774_v57 }
 0x5ab   : > { %3933 = vmatpush1.bf16.msra.mxu0 %v17772_v58 }
 0x5ac   : > { %3934 = vmatprep.subr.bf16.mxu0 %v17777_v59 }
 0x5af   : > { %3935 = vmatpush1.bf16.msra.mxu0 %v17775_v60 }
 0x5b0   : > { %3936 = vmatprep.subr.bf16.mxu0 %v17780_v24  ;;  %v17818_v24 = vld [vmem:[%s24471_s10 + $0x90] sm:$0xff]  }
 0x5b3   : > { %3937 = vmatpush1.bf16.msra.mxu0 %v17778_v27 }
 0x5b4   : > { %3938 = vmatprep.subr.bf16.mxu0 %v17783_v29  ;;  %v17819_v29 = vld [vmem:[%s24471_s10 + $0xd8] sm:$0xff]  }
 0x5b7   : > { %3939 = vmatpush1.bf16.msra.mxu0 %v17781_v61  ;;  %v17820_v61 = vld [vmem:[%s24471_s10 + $0x98] sm:$0xff]  }
 0x5b8   : > { %3940 = vmatprep.subr.bf16.mxu0 %v17786_v63 }
 0x5bb   : > { %3941 = vmatpush1.bf16.msra.mxu0 %v17784_v1  ;;  %v17821_v1 = vld [vmem:[%s24471_s10 + $0xe0] sm:$0xff]  }
 0x5bc   : > { %3942 = vmatprep.subr.bf16.mxu0 %v17789_v62 }
 0x5bf   : > { %3943 = vmatpush1.bf16.msra.mxu0 %v17787_v5 }
 0x5c0   : > { %3944 = vmatprep.subr.bf16.mxu0 %v17792_v6 }
 0x5c3   : > { %3945 = vmatpush1.bf16.msra.mxu0 %v17790_v3 }
 0x5c6   : > { %3963 = vmatmul.mubr.bf16.vlgmr.msra.gmra.mrb[108].mxu0 %v2881_v51  ;;  %v17805_v51 = vld [vmem:[%s24471_s10 + $0x20] sm:$0xff]  }
 0x5c7   : > { %4052 = vmatprep.mubr.bf16.mxu0 %v18291_v21  ;;  %15238 = vmatpush3.bf16.msra.mxu1 %v17805_v51  ;;  %v17825_v51 = vld [vmem:[%s24471_s10 + $0xf0] sm:$0xff]  }
 0x5c8   : > { %15239 = vmatprep.subr.bf16.mxu1 %v17807_v23 }
 0x5cb   : > { %15240 = vmatpush3.bf16.msra.mxu1 %v17808_v11 }
 0x5cc   : > { %15241 = vmatprep.subr.bf16.mxu1 %v17809_v10 }
 0x5cf   : > { %15242 = vmatpush3.bf16.msra.mxu1 %v17810_v12 }
 0x5d0   : > { %15243 = vmatprep.subr.bf16.mxu1 %v17811_v14  ;;  %v17826_v14 = vld [vmem:[%s24471_s10 + $0xb0] sm:$0xff]  }
 0x5d3   : > { %15244 = vmatpush3.bf16.msra.mxu1 %v17812_v15 }
 0x5d4   : > { %15251 = vmatprep.subr.bf16.mxu1 %v17813_v42  ;;  %v17850_v42 = vld [vmem:[%s24471_s10 + $0x190] sm:$0xff]  }
 0x699   : > { %v3964_v26 = vpop.f32.mrb[108].mxu0 }
 0x69a   : > { %v17299_v0 = vadd.f32 %v3964_v26, %v3031_v22  ;;  %v3966_v2 = vpop.f32.mrb[109].mxu0  ;;  %v17834_v26 = vld [vmem:[%s24471_s10 + $0x110] sm:$0xff]  }
 0x69b   : > { %v17300_v4 = vadd.f32 %v3966_v2, %v3035_v25  ;;  %v3968_v19 = vpop.f32.mrb[110].mxu0  ;;  %v17836_v2 = vld [vmem:[%s24471_s10 + $0x118] sm:$0xff]  }
 0x69c   : > { %v17301_v28 = vadd.f32 %v3968_v19, %v3031_v22  ;;  %v3970_v30 = vpop.f32.mrb[111].mxu0  ;;  %v3973_v32 = vmax.f32 %v17299_v0, 0.0  ;;  %v17832_v22 = vld [vmem:[%s24471_s10 + $0x108] sm:$0xff]   ;;  %v17835_v0 = vld [vmem:[%s24471_s10 + $0x158] sm:$0xff]   ;;  %v17838_v19 = vld [vmem:[%s24471_s10 + $0x120] sm:$0xff]  }
 0x69d   : > { %v17302_v31 = vadd.f32 %v3970_v30, %v3035_v25  ;;  %v3974_v34 = vmax.f32 %v17300_v4, 0.0  ;;  %v17833_v25 = vld [vmem:[%s24471_s10 + $0x150] sm:$0xff]   ;;  %v17837_v4 = vld [vmem:[%s24471_s10 + $0x160] sm:$0xff]   ;;  %v17840_v30 = vld [vmem:[%s24471_s10 + $0x128] sm:$0xff]  }
 0x69e   : > { %v3975_v33 = vmax.f32 %v17301_v28, 0.0  ;;  %v17839_v28 = vld [vmem:[%s24471_s10 + $0x168] sm:$0xff]  }
 0x69f   : > { %v3976_v35 = vmax.f32 %v17302_v31, 0.0  ;;  %v17841_v31 = vld [vmem:[%s24471_s10 + $0x170] sm:$0xff]  }
 0x6a0   : > { %v19531_v36 = vpack.c.bf16 %v3975_v33, %v3973_v32  ;;  %v17842_v32 = vld [vmem:[%s24471_s10 + $0x130] sm:$0xff]   ;;  %v17843_v33 = vld [vmem:[%s24471_s10 + $0x178] sm:$0xff]  }
 0x6a1   : > { %v19533_v37 = vpack.c.bf16 %v3976_v35, %v3974_v34  ;;  %v17844_v34 = vld [vmem:[%s24471_s10 + $0x138] sm:$0xff]   ;;  %v17845_v35 = vld [vmem:[%s24471_s10 + $0x1c0] sm:$0xff]  }
 0x6a3   : > { %4020 = vmatprep.subr.bf16.mxu0 %v19533_v37 }
 0x6a4   : > { %4021 = vmatpush1.bf16.msra.mxu0 %v19531_v36 }
 0x6a7   : > { %12998 = vmatmul.mubr.msk.bf16.vlgmr.msra.gmra.mrb[112].mxu0 %vm4007_vm5, %v17797_v38  ;;  %v17846_v38 = vld [vmem:[%s24471_s10 + $0x180] sm:$0xff]  }
 0x6a8   : > { %4062 = vmatprep.mubr.bf16.mxu0 %v18291_v21 }
 0x6af   : > { %12999 = vmatmul.mubr.msk.bf16.gmra.mrb[116].mxu0 %vm4007_vm5, %v17800_v39  ;;  %v17847_v39 = vld [vmem:[%s24471_s10 + $0x1c8] sm:$0xff]  }
 0x6b0   : > { %4072 = vmatprep.mubr.bf16.mxu0 %v18291_v21 }
 0x6b7   : > { %13000 = vmatmul.mubr.msk.bf16.gmra.mrb[120].mxu0 %vm4007_vm5, %v17803_v40  ;;  %v17848_v40 = vld [vmem:[%s24471_s10 + $0x188] sm:$0xff]  }
 0x6b8   : > { %4082 = vmatprep.mubr.bf16.mxu0 %v18291_v21 }
 0x6bf   : > { %13001 = vmatmul.mubr.msk.bf16.gmra.mrb[124].mxu0 %vm4007_vm5, %v17806_v41  ;;  %v17849_v41 = vld [vmem:[%s24471_s10 + $0x1d0] sm:$0xff]  }
 0x77a   : > { %v4054_v43 = vpop.f32.mrb[112].mxu0 }
 0x77b   : > { %v4056_v44 = vpop.f32.mrb[113].mxu0 }
 0x77c   : > { %v4058_v45 = vpop.f32.mrb[114].mxu0 }
 0x77d   : > { %v4093_v47 = vpack.c.bf16 %v4058_v45, %v4054_v43  ;;  %v4060_v48 = vpop.f32.mrb[115].mxu0  ;;  %v17851_v43 = vld [vmem:[%s24471_s10 + $0x1d8] sm:$0xff]   ;;  %v17853_v45 = vld [vmem:[%s24471_s10 + $0x1e0] sm:$0xff]  }
 0x77e   : > { %v4094_v49 = vpack.c.bf16 %v4060_v48, %v4056_v44  ;;  %v17852_v44 = vld [vmem:[%s24471_s10 + $0x198] sm:$0xff]   ;;  %v17855_v48 = vld [vmem:[%s24471_s10 + $0x1e8] sm:$0xff]  }
 0x780   : > { %4652 = vmatprep.mubr.bf16.mxu1 %v4094_v49  ;;  %v17856_v49 = vld [vmem:[%s24471_s10 + $0x1a8] sm:$0xff]  }
 0x781   : > { %4653 = vmatmul.mubr.bf16.vlgmr.msra.gmra.mrb[176].mxu1 %v4093_v47  ;;  %v17854_v47 = vld [vmem:[%s24471_s10 + $0x1a0] sm:$0xff]  }
 0x782   : > { %15252 = vmatpush3.bf16.msra.mxu1 %v17814_v52  ;;  %v4064_v55 = vpop.f32.mrb[116].mxu0  ;;  %v17857_v52 = vld [vmem:[%s24471_s10 + $0x1f0] sm:$0xff]  }
 0x783   : > { %15253 = vmatprep.subr.bf16.mxu1 %v17815_v53  ;;  %v4066_v57 = vpop.f32.mrb[117].mxu0  ;;  %v17858_v53 = vld [vmem:[%s24471_s10 + $0x1b0] sm:$0xff]  }
 0x784   : > { %v4068_v58 = vpop.f32.mrb[118].mxu0 }
 0x785   : > { %v4095_v59 = vpack.c.bf16 %v4068_v58, %v4064_v55  ;;  %v4070_v60 = vpop.f32.mrb[119].mxu0  ;;  %v17860_v55 = vld [vmem:[%s24471_s10 + $0x1b8] sm:$0xff]   ;;  %v17863_v58 = vld [vmem:[%s24470_s9 + $0x30] sm:$0xff]  }
 0x786   : > { %15254 = vmatpush3.bf16.msra.mxu1 %v17816_v54  ;;  %v4096_v27 = vpack.c.bf16 %v4070_v60, %v4066_v57  ;;  %v17859_v54 = vld [vmem:[%s24471_s10 + $0x1f8] sm:$0xff]   ;;  %v17862_v57 = vld [vmem:[%s24470_s9 + $0x28] sm:$0xff]   ;;  %v17865_v60 = vld [vmem:[%s24471_s10 + $0x240] sm:$0xff]  }
 0x787   : > { %15255 = vmatprep.subr.bf16.mxu1 %v17817_v56  ;;  %v17861_v56 = vld [vmem:[%s24470_s9 + $0x20] sm:$0xff]  }
 0x788   : > { %4693 = vmatprep.mubr.bf16.mxu1 %v4096_v27  ;;  %v17867_v27 = vld [vmem:[%s24471_s10 + $0x248] sm:$0xff]  }
 0x78a   : > { %15256 = vmatpush3.bf16.msra.mxu1 %v17818_v24  ;;  %v19580_v63 = vpop.f32.mrb[120].mxu0  ;;  %v17866_v24 = vld [vmem:[%s24471_s10 + $0x200] sm:$0xff]  }
 0x78b   : > { %15257 = vmatprep.subr.bf16.mxu1 %v17819_v29  ;;  %v4076_v62 = vpop.f32.mrb[121].mxu0  ;;  %v17870_v29 = vld [vmem:[%s24471_s10 + $0x2c0] sm:$0xff]  }
 0x78c   : > { %v19585_v5 = vpop.f32.mrb[122].mxu0  ;;  %15339 = vmatprep.subr.bf16.mxu0 %v17870_v29 }
 0x78d   : > { %v4097_v6 = vpack.c.bf16 %v19585_v5, %v19580_v63  ;;  %v4080_v3 = vpop.f32.mrb[123].mxu0  ;;  %v17868_v63 = vld [vmem:[%s24471_s10 + $0x208] sm:$0xff]  }
 0x78e   : > { %15258 = vmatpush3.bf16.msra.mxu1 %v17820_v61  ;;  %v4098_v8 = vpack.c.bf16 %v4080_v3, %v4076_v62  ;;  %v17872_v61 = vld [vmem:[%s24471_s10 + $0x280] sm:$0xff]   ;;  %v17869_v62 = vld [vmem:[%s24471_s10 + $0x250] sm:$0xff]   ;;  %v17876_v5 = vld [vmem:[%s24471_s10 + $0x288] sm:$0xff]  }
 0x78f   : > { %15259 = vmatprep.subr.bf16.mxu1 %v17821_v1  ;;  %v17874_v1 = vld [vmem:[%s24471_s10 + $0x2c8] sm:$0xff]   ;;  %15340 = vmatpush3.bf16.msra.mxu0 %v17872_v61  ;;  %v17871_v3 = vld [vmem:[%s24471_s10 + $0x210] sm:$0xff]  }
 0x790   : > { %15341 = vmatprep.subr.bf16.mxu0 %v17874_v1 }
 0x792   : > { %15260 = vmatpush3.bf16.msra.mxu1 %v17822_v7  ;;  %v19598_v50 = vpop.f32.mrb[124].mxu0  ;;  %v17873_v7 = vld [vmem:[%s24471_s10 + $0x258] sm:$0xff]  }
 0x793   : > { %15261 = vmatprep.subr.bf16.mxu1 %v17823_v9  ;;  %v4086_v23 = vpop.f32.mrb[125].mxu0  ;;  %15342 = vmatpush3.bf16.msra.mxu0 %v17876_v5  ;;  %v17875_v9 = vld [vmem:[%s24471_s10 + $0x218] sm:$0xff]  }
 0x794   : > { %v19603_v11 = vpop.f32.mrb[126].mxu0 }
 0x795   : > { %v4099_v10 = vpack.c.bf16 %v19603_v11, %v19598_v50  ;;  %v4090_v12 = vpop.f32.mrb[127].mxu0  ;;  %v17879_v50 = vld [vmem:[%s24471_s10 + $0x220] sm:$0xff]   ;;  %v17883_v11 = vld [vmem:[%s24471_s10 + $0x228] sm:$0xff]  }
 0x796   : > { %15262 = vmatpush3.bf16.msra.mxu1 %v17824_v46  ;;  %v4100_v15 = vpack.c.bf16 %v4090_v12, %v4086_v23  ;;  %v17877_v46 = vld [vmem:[%s24471_s10 + $0x260] sm:$0xff]   ;;  %v17882_v23 = vld [vmem:[%s24471_s10 + $0x2d8] sm:$0xff]   ;;  %v17885_v12 = vld [vmem:[%s24471_s10 + $0x270] sm:$0xff]  }
 0x797   : > { %15263 = vmatprep.subr.bf16.mxu1 %v17825_v51  ;;  %v17881_v51 = vld [vmem:[%s24471_s10 + $0x268] sm:$0xff]  }
 0x79a   : > { %15264 = vmatpush3.bf16.msra.mxu1 %v17826_v14  ;;  %v17886_v14 = vld [vmem:[%s24471_s10 + $0x2e0] sm:$0xff]  }
 0x79b   : > { %15265 = vmatprep.subr.bf16.mxu1 %v17827_v13  ;;  %v17888_v13 = vld [vmem:[%s24471_s10 + $0x2a0] sm:$0xff]  }
 0x79e   : > { %15266 = vmatpush3.bf16.msra.mxu1 %v17828_v16  ;;  %v17889_v16 = vld [vmem:[%s24471_s10 + $0x278] sm:$0xff]  }
 0x79f   : > { %15273 = vmatprep.subr.bf16.mxu1 %v17829_v17  ;;  %v17890_v17 = vld [vmem:[%s24471_s10 + $0x2e8] sm:$0xff]  }
 0x7a1   : > { %4694 = vmatmul.mubr.bf16.vlgmr.msra.gmra.mrb[180].mxu1 %v4095_v59  ;;  %v17864_v59 = vld [vmem:[%s24470_s9 + $0x38] sm:$0xff]  }
 0x7a2   : > { %15274 = vmatpush3.bf16.msra.mxu1 %v17830_v18  ;;  %4734 = vmatprep.mubr.bf16.mxu1 %v4098_v8  ;;  %v17880_v8 = vld [vmem:[%s24471_s10 + $0x290] sm:$0xff]   ;;  %v17891_v18 = vld [vmem:[%s24471_s10 + $0x238] sm:$0xff]  }
 0x7a3   : > { %15275 = vmatprep.subr.bf16.mxu1 %v17831_v20  ;;  %v17892_v20 = vld [vmem:[%s24471_s10 + $0x2a8] sm:$0xff]  }
 0x7a6   : > { %15276 = vmatpush3.bf16.msra.mxu1 %v17832_v22  ;;  %v17893_v22 = vld [vmem:[%s24471_s10 + $0x2f0] sm:$0xff]  }
 0x7a7   : > { %15277 = vmatprep.subr.bf16.mxu1 %v17833_v25  ;;  %v17894_v25 = vld [vmem:[%s24471_s10 + $0x340] sm:$0xff]  }
 0x7aa   : > { %15278 = vmatpush3.bf16.msra.mxu1 %v17834_v26  ;;  %v17895_v26 = vld [vmem:[%s24471_s10 + $0x2b0] sm:$0xff]  }
 0x7ab   : > { %15279 = vmatprep.subr.bf16.mxu1 %v17835_v0  ;;  %v17897_v0 = vld [vmem:[%s24471_s10 + $0x2f8] sm:$0xff]  }
 0x7ae   : > { %15280 = vmatpush3.bf16.msra.mxu1 %v17836_v2  ;;  %v17899_v2 = vld [vmem:[%s24471_s10 + $0x2b8] sm:$0xff]  }
 0x7af   : > { %15281 = vmatprep.subr.bf16.mxu1 %v17837_v4  ;;  %v17902_v4 = vld [vmem:[%s24471_s10 + $0x3c0] sm:$0xff]  }
 0x7b2   : > { %15282 = vmatpush3.bf16.msra.mxu1 %v17838_v19 }
 0x7b3   : > { %15283 = vmatprep.subr.bf16.mxu1 %v17839_v28 }
 0x7b6   : > { %15284 = vmatpush3.bf16.msra.mxu1 %v17840_v30 }
 0x7b7   : > { %15285 = vmatprep.subr.bf16.mxu1 %v17841_v31 }
 0x7ba   : > { %15286 = vmatpush3.bf16.msra.mxu1 %v17842_v32 }
 0x7bb   : > { %15287 = vmatprep.subr.bf16.mxu1 %v17843_v33 }
 0x7be   : > { %15288 = vmatpush3.bf16.msra.mxu1 %v17844_v34  ;;  %v19842_v34 = vld [vmem:[%s24472_s11] ss:$0 sm:$0xff] }
 0x7bf   : > { %15295 = vmatprep.subr.bf16.mxu1 %v17845_v35 }
 0x7c1   : > { %4735 = vmatmul.mubr.bf16.vlgmr.msra.gmra.mrb[184].mxu1 %v4097_v6  ;;  %v17878_v6 = vld [vmem:[%s24471_s10 + $0x2d0] sm:$0xff]  }
 0x7c2   : > { %15296 = vmatpush3.bf16.msra.mxu1 %v17846_v38  ;;  %4775 = vmatprep.mubr.bf16.mxu1 %v4100_v15  ;;  %v17887_v15 = vld [vmem:[%s24471_s10 + $0x230] sm:$0xff]  }
 0x7c3   : > { %15297 = vmatprep.subr.bf16.mxu1 %v17847_v39  ;;  %15343 = vmatprep.subr.bf16.mxu0 %v17878_v6 }
 0x7c4   : > { %15344 = vmatpush3.bf16.msra.mxu0 %v17880_v8 }
 0x7c5   : > { %15345 = vmatprep.subr.bf16.mxu0 %v17882_v23 }
 0x7c6   : > { %15298 = vmatpush3.bf16.msra.mxu1 %v17848_v40 }
 0x7c7   : > { %15299 = vmatprep.subr.bf16.mxu1 %v17849_v41 }
 0x7ca   : > { %15300 = vmatpush3.bf16.msra.mxu1 %v17850_v42 }
 0x7cb   : > { %15301 = vmatprep.subr.bf16.mxu1 %v17851_v43 }
 0x7ce   : > { %15302 = vmatpush3.bf16.msra.mxu1 %v17852_v44 }
 0x7cf   : > { %15303 = vmatprep.subr.bf16.mxu1 %v17853_v45 }
 0x7d2   : > { %15304 = vmatpush3.bf16.msra.mxu1 %v17854_v47 }
 0x7d3   : > { %15305 = vmatprep.subr.bf16.mxu1 %v17855_v48 }
 0x7d6   : > { %15306 = vmatpush3.bf16.msra.mxu1 %v17856_v49 }
 0x7d7   : > { %15307 = vmatprep.subr.bf16.mxu1 %v17857_v52 }
 0x7da   : > { %15308 = vmatpush3.bf16.msra.mxu1 %v17858_v53 }
 0x7db   : > { %15309 = vmatprep.subr.bf16.mxu1 %v17859_v54 }
 0x7de   : > { %15310 = vmatpush3.bf16.msra.mxu1 %v17860_v55 }
 0x7df   : > { %4827 = vmatprep.subr.bf16.mxu1 %v19533_v37 }
 0x7e1   : > { %4776 = vmatmul.mubr.bf16.vlgmr.msra.gmra.mrb[188].mxu1 %v4099_v10  ;;  %v17884_v10 = vld [vmem:[%s24471_s10 + $0x298] sm:$0xff]  }
 0x7e2   : > { %4828 = vmatpush1.bf16.msra.mxu1 %v19531_v36  ;;  %4859 = vmatprep.mubr.bf16.mxu1 %v18291_v21 }
 0x7e3   : > { %15317 = vmatprep.subr.bf16.mxu1 %v17865_v60  ;;  %15346 = vmatpush3.bf16.msra.mxu0 %v17884_v10 }
 0x7e4   : > { %15347 = vmatprep.subr.bf16.mxu0 %v17886_v14 }
 0x7e7   : > { %15348 = vmatpush3.bf16.msra.mxu0 %v17888_v13 }
 0x7e8   : > { %15349 = vmatprep.subr.bf16.mxu0 %v17890_v17  ;;  %v17903_v17 = vld [vmem:[%s24471_s10 + $0x310] sm:$0xff]  }
 0x7e9   : > { %13079 = vmatmul.mubr.msk.bf16.vlgmr.msra.gmra.mrb[192].mxu1 %vm4007_vm5, %v17861_v56 }
 0x7ea   : > { %4869 = vmatprep.mubr.bf16.mxu1 %v18291_v21  ;;  %15318 = vmatpush3.bf16.msra.mxu1 %v17866_v24 }
 0x7eb   : > { %15319 = vmatprep.subr.bf16.mxu1 %v17867_v27  ;;  %15350 = vmatpush3.bf16.msra.mxu0 %v17892_v20  ;;  %v17905_v20 = vld [vmem:[%s24471_s10 + $0x358] sm:$0xff]  }
 0x7ec   : > { %15351 = vmatprep.subr.bf16.mxu0 %v17893_v22  ;;  %v17906_v22 = vld [vmem:[%s24471_s10 + $0x3c8] sm:$0xff]  }
 0x7ee   : > { %15320 = vmatpush3.bf16.msra.mxu1 %v17868_v63 }
 0x7ef   : > { %15321 = vmatprep.subr.bf16.mxu1 %v17869_v62  ;;  %15352 = vmatpush3.bf16.msra.mxu0 %v17895_v26  ;;  %v17908_v26 = vld [vmem:[%s24471_s10 + $0x388] sm:$0xff]  }
 0x7f0   : > { %15353 = vmatprep.subr.bf16.mxu0 %v17897_v0 }
 0x7f1   : > { %13080 = vmatmul.mubr.msk.bf16.gmra.mrb[196].mxu1 %vm4007_vm5, %v17862_v57 }
 0x7f2   : > { %4879 = vmatprep.mubr.bf16.mxu1 %v18291_v21  ;;  %15322 = vmatpush3.bf16.msra.mxu1 %v17871_v3 }
 0x7f3   : > { %15323 = vmatprep.subr.bf16.mxu1 %v17873_v7  ;;  %15354 = vmatpush3.bf16.msra.mxu0 %v17899_v2  ;;  %v17909_v2 = vld [vmem:[%s24471_s10 + $0x360] sm:$0xff]  }
 0x7f4   : > { %15383 = vmatprep.subr.bf16.mxu0 %v17902_v4  ;;  %v17910_v4 = vld [vmem:[%s24471_s10 + $0x3d0] sm:$0xff]  }
 0x7f6   : > { %15324 = vmatpush3.bf16.msra.mxu1 %v17875_v9 }
 0x7f7   : > { %15325 = vmatprep.subr.bf16.mxu1 %v17877_v46 }
 0x7f9   : > { %13081 = vmatmul.mubr.msk.bf16.gmra.mrb[200].mxu1 %vm4007_vm5, %v17863_v58 }
 0x7fa   : > { %4889 = vmatprep.mubr.bf16.mxu1 %v18291_v21  ;;  %15326 = vmatpush3.bf16.msra.mxu1 %v17879_v50  ;;  %v17896_v50 = vld [vmem:[%s24471_s10 + $0x300] sm:$0xff]  }
 0x7fb   : > { %15327 = vmatprep.subr.bf16.mxu1 %v17881_v51  ;;  %v17898_v51 = vld [vmem:[%s24471_s10 + $0x348] sm:$0xff]  }
 0x7fe   : > { %15328 = vmatpush3.bf16.msra.mxu1 %v17883_v11  ;;  %v17900_v11 = vld [vmem:[%s24471_s10 + $0x308] sm:$0xff]  }
 0x7ff   : > { %15329 = vmatprep.subr.bf16.mxu1 %v17885_v12  ;;  %v17901_v12 = vld [vmem:[%s24471_s10 + $0x350] sm:$0xff]  }
 0x801   : > { %13082 = vmatmul.mubr.msk.bf16.gmra.mrb[204].mxu1 %vm4007_vm5, %v17864_v59 }
 0x802   : > { %15330 = vmatpush3.bf16.msra.mxu1 %v17887_v15 }
 0x803   : > { %15331 = vmatprep.subr.bf16.mxu1 %v17889_v16 }
 0x806   : > { %15332 = vmatpush3.bf16.msra.mxu1 %v17891_v18  ;;  %v17904_v18 = vld [vmem:[%s24471_s10 + $0x380] sm:$0xff]  }
 0x807   : > { %15361 = vmatprep.subr.bf16.mxu1 %v17894_v25  ;;  %v17907_v25 = vld [vmem:[%s24471_s10 + $0x318] sm:$0xff]  }
 0x854   : > { %v15245_v19 = vpop.f32.mrb[176].mxu1 }
 0x855   : > { %v15246_v28 = vpop.f32.mrb[177].mxu1 }
 0x856   : > { %v15247_v30 = vadd.f32 %v15246_v28, %v15245_v19  ;;  %v15248_v31 = vpop.f32.mrb[178].mxu1 }
 0x857   : > { %v15249_v32 = vpop.f32.mrb[179].mxu1 }
 0x858   : > { %v15250_v33 = vadd.f32 %v15249_v32, %v15248_v31  ;;  %v4655_v39 = vadd.f32 %v15247_v30, %v19842_v34  ;;  %v17911_v32 = vld [vmem:[%s24471_s10 + $0x320] sm:$0xff]  }
 0x85a   : > { %v4658_v43 = vadd.f32 %v15250_v33, %v19842_v34  ;;  %v17912_v33 = vld [vmem:[%s24471_s10 + $0x390] sm:$0xff]  }
 0x874   : > { %v15267_v35 = vpop.f32.mrb[180].mxu1 }
 0x875   : > { %v15268_v38 = vpop.f32.mrb[181].mxu1 }
 0x876   : > { %v15269_v40 = vadd.f32 %v15268_v38, %v15267_v35  ;;  %v15270_v41 = vpop.f32.mrb[182].mxu1  ;;  %v17913_v38 = vld [vmem:[%s24471_s10 + $0x368] sm:$0xff]  }
 0x877   : > { %v15271_v42 = vpop.f32.mrb[183].mxu1 }
 0x878   : > { %v4696_v44 = vadd.f32 %v15269_v40, %v4655_v39  ;;  %v15272_v45 = vadd.f32 %v15271_v42, %v15270_v41  ;;  %v17914_v39 = vld [vmem:[%s24471_s10 + $0x3d8] sm:$0xff]   ;;  %v17915_v40 = vld [vmem:[%s24471_s10 + $0x328] sm:$0xff]  }
 0x879   : > { %v17916_v41 = vld [vmem:[%s24471_s10 + $0x398] sm:$0xff]  }
 0x87a   : > { %v4699_v47 = vadd.f32 %v15272_v45, %v4658_v43  ;;  %v17917_v43 = vld [vmem:[%s24471_s10 + $0x370] sm:$0xff]  }
 0x894   : > { %v15289_v48 = vpop.f32.mrb[184].mxu1 }
 0x895   : > { %v15290_v49 = vpop.f32.mrb[185].mxu1 }
 0x896   : > { %v15291_v52 = vadd.f32 %v15290_v49, %v15289_v48  ;;  %v15292_v53 = vpop.f32.mrb[186].mxu1 }
 0x897   : > { %v15293_v54 = vpop.f32.mrb[187].mxu1 }
 0x898   : > { %v4737_v55 = vadd.f32 %v15291_v52, %v4696_v44  ;;  %v15294_v56 = vadd.f32 %v15293_v54, %v15292_v53  ;;  %v17918_v44 = vld [vmem:[%s24471_s10 + $0x3e0] sm:$0xff]   ;;  %v17919_v52 = vld [vmem:[%s24471_s10 + $0x330] sm:$0xff]  }
 0x899   : > { %v17920_v53 = vld [vmem:[%s24471_s10 + $0x3a0] sm:$0xff]  }
 0x89a   : > { %v4740_v57 = vadd.f32 %v15294_v56, %v4699_v47  ;;  %v17922_v56 = vld [vmem:[%s24471_s10 + $0x3e8] sm:$0xff]  }
 0x8b4   : > { %v15311_v58 = vpop.f32.mrb[188].mxu1 }
 0x8b5   : > { %v15312_v59 = vpop.f32.mrb[189].mxu1 }
 0x8b6   : > { %v15313_v60 = vadd.f32 %v15312_v59, %v15311_v58  ;;  %v15314_v24 = vpop.f32.mrb[190].mxu1  ;;  %v17924_v58 = vld [vmem:[%s24471_s10 + $0x3a8] sm:$0xff]   ;;  %v17925_v59 = vld [vmem:[%s24471_s10 + $0x3f0] sm:$0xff]  }
 0x8b7   : > { %v15315_v27 = vpop.f32.mrb[191].mxu1 }
 0x8b8   : > { %v4778_v29 = vadd.f32 %v15313_v60, %v4737_v55  ;;  %v15316_v61 = vadd.f32 %v15315_v27, %v15314_v24  ;;  %v17921_v55 = vld [vmem:[%s24471_s10 + $0x378] sm:$0xff]   ;;  %v17926_v60 = vld [vmem:[%s24471_s10 + $0x3b0] sm:$0xff]  }
 0x8b9   : > { %v17927_v24 = vld [vmem:[%s24471_s10 + $0x3f8] sm:$0xff]  }
 0x8ba   : > { %v4781_v63 = vadd.f32 %v15316_v61, %v4740_v57  ;;  %v4784_v1 = vmax.f32 %v4778_v29, 0.0  ;;  %v17923_v57 = vld [vmem:[%s24471_s10 + $0x338] sm:$0xff]   ;;  %v17929_v29 = vld [vmem:[%s24470_s9 + $0x40] sm:$0xff]   ;;  %v17930_v61 = vld [vmem:[%s24470_s9 + $0x48] sm:$0xff]  }
 0x8bb   : > { %v17928_v27 = vld [vmem:[%s24471_s10 + $0x3b8] sm:$0xff]  }
 0x8bc   : > { %v4785_v62 = vmax.f32 %v4781_v63, 0.0  ;;  %v4861_v5 = vpop.f32.mrb[192].mxu1  ;;  %v17931_v63 = vld [vmem:[%s24470_s9 + $0x50] sm:$0xff]  }
 0x8bd   : > { %v4863_v6 = vpop.f32.mrb[193].mxu1 }
 0x8be   : > { %v19846_v3 = vpack.c.bf16 %v4785_v62, %v4784_v1  ;;  %v4865_v7 = vpop.f32.mrb[194].mxu1  ;;  %v17932_v1 = vld [vmem:[%s24470_s9 + $0x58] sm:$0xff]   ;;  %v17933_v62 = vld [vmem:[%s24471_s10 + $0x440] sm:$0xff]  }
 0x8bf   : > { %v4900_v8 = vpack.c.bf16 %v4865_v7, %v4861_v5  ;;  %v4867_v9 = vpop.f32.mrb[195].mxu1  ;;  %v17934_v5 = vld [vmem:[%s24471_s10 + $0x400] sm:$0xff]  }
 0x8c0   : > { %v4901_v46 = vpack.c.bf16 %v4867_v9, %v4863_v6  ;;  %v17935_v6 = vld [vmem:[%s24471_s10 + $0x448] sm:$0xff]   ;;  %v17938_v7 = vld [vmem:[%s24471_s10 + $0x4c0] sm:$0xff]  }
 0x8c1   : > { %v17936_v9 = vld [vmem:[%s24471_s10 + $0x408] sm:$0xff]  }
 0x8c2   : > { %5453 = vmatprep.mubr.bf16.mxu1 %v4901_v46  ;;  %v17937_v46 = vld [vmem:[%s24471_s10 + $0x450] sm:$0xff]  }
 0x8c3   : > { %5454 = vmatmul.mubr.bf16.vlgmr.msra.gmra.mrb[208].mxu1 %v4900_v8  ;;  %v17940_v8 = vld [vmem:[%s24471_s10 + $0x480] sm:$0xff]  }
 0x8c4   : > { %15362 = vmatpush3.bf16.msra.mxu1 %v17896_v50  ;;  %v4871_v23 = vpop.f32.mrb[196].mxu1  ;;  %v17939_v50 = vld [vmem:[%s24471_s10 + $0x410] sm:$0xff]  }
 0x8c5   : > { %v4873_v10 = vpop.f32.mrb[197].mxu1  ;;  %15363 = vmatprep.subr.bf16.mxu1 %v17898_v51  ;;  %v17941_v51 = vld [vmem:[%s24471_s10 + $0x458] sm:$0xff]  }
 0x8c6   : > { %v4875_v14 = vpop.f32.mrb[198].mxu1 }
 0x8c7   : > { %v4902_v15 = vpack.c.bf16 %v4875_v14, %v4871_v23  ;;  %v4877_v13 = vpop.f32.mrb[199].mxu1  ;;  %v17942_v23 = vld [vmem:[%s24471_s10 + $0x4c8] sm:$0xff]   ;;  %v17946_v14 = vld [vmem:[%s24471_s10 + $0x4d0] sm:$0xff]  }
 0x8c8   : > { %v4903_v16 = vpack.c.bf16 %v4877_v13, %v4873_v10  ;;  %15364 = vmatpush3.bf16.msra.mxu1 %v17900_v11  ;;  %v17943_v11 = vld [vmem:[%s24471_s10 + $0x418] sm:$0xff]   ;;  %v17944_v10 = vld [vmem:[%s24471_s10 + $0x488] sm:$0xff]   ;;  %v17948_v13 = vld [vmem:[%s24471_s10 + $0x490] sm:$0xff]  }
 0x8c9   : > { %15365 = vmatprep.subr.bf16.mxu1 %v17901_v12  ;;  %v17945_v12 = vld [vmem:[%s24471_s10 + $0x460] sm:$0xff]  }
 0x8ca   : > { %5494 = vmatprep.mubr.bf16.mxu0 %v4903_v16  ;;  %v17949_v16 = vld [vmem:[%s24471_s10 + $0x468] sm:$0xff]  }
 0x8cb   : > { %5495 = vmatmul.mubr.bf16.vlgmr.msra.gmra.mrb[128].mxu0 %v4902_v15  ;;  %v17947_v15 = vld [vmem:[%s24471_s10 + $0x420] sm:$0xff]  }
 0x8cc   : > { %15366 = vmatpush3.bf16.msra.mxu1 %v17903_v17  ;;  %15384 = vmatpush3.bf16.msra.mxu0 %v17904_v18  ;;  %v4881_v0 = vpop.f32.mrb[200].mxu1  ;;  %v17950_v17 = vld [vmem:[%s24471_s10 + $0x4d8] sm:$0xff]   ;;  %v17951_v18 = vld [vmem:[%s24471_s10 + $0x428] sm:$0xff]  }
 0x8cd   : > { %15367 = vmatprep.subr.bf16.mxu1 %v17905_v20  ;;  %15385 = vmatprep.subr.bf16.mxu0 %v17906_v22  ;;  %v4883_v19 = vpop.f32.mrb[201].mxu1  ;;  %v17952_v20 = vld [vmem:[%s24471_s10 + $0x498] sm:$0xff]   ;;  %v17953_v22 = vld [vmem:[%s24471_s10 + $0x470] sm:$0xff]  }
 0x8ce   : > { %v4885_v28 = vpop.f32.mrb[202].mxu1 }
 0x8cf   : > { %v4904_v30 = vpack.c.bf16 %v4885_v28, %v4881_v0  ;;  %v4887_v31 = vpop.f32.mrb[203].mxu1  ;;  %v17956_v0 = vld [vmem:[%s24471_s10 + $0x4a0] sm:$0xff]   ;;  %v17960_v28 = vld [vmem:[%s24471_s10 + $0x4a8] sm:$0xff]  }
 0x8d0   : > { %15368 = vmatpush3.bf16.msra.mxu1 %v17907_v25  ;;  %15386 = vmatpush3.bf16.msra.mxu0 %v17908_v26  ;;  %v4905_v35 = vpack.c.bf16 %v4887_v31, %v4883_v19  ;;  %v17954_v25 = vld [vmem:[%s24471_s10 + $0x4e0] sm:$0xff]   ;;  %v17955_v26 = vld [vmem:[%s24471_s10 + $0x430] sm:$0xff]   ;;  %v17959_v19 = vld [vmem:[%s24471_s10 + $0x438] sm:$0xff]  }
 0x8d1   : > { %15369 = vmatprep.subr.bf16.mxu1 %v17909_v2  ;;  %15387 = vmatprep.subr.bf16.mxu0 %v17910_v4  ;;  %v17957_v2 = vld [vmem:[%s24471_s10 + $0x478] sm:$0xff]   ;;  %v17958_v4 = vld [vmem:[%s24471_s10 + $0x4e8] sm:$0xff]   ;;  %v17962_v31 = vld [vmem:[%s24471_s10 + $0x540] sm:$0xff]  }
 0x8d2   : > { %5535 = vmatprep.mubr.bf16.mxu1 %v4905_v35  ;;  %v17967_v35 = vld [vmem:[%s24471_s10 + $0x4b8] sm:$0xff]  }
 0x8d4   : > { %15370 = vmatpush3.bf16.msra.mxu1 %v17911_v32  ;;  %15388 = vmatpush3.bf16.msra.mxu0 %v17912_v33  ;;  %v4891_v42 = vpop.f32.mrb[204].mxu1  ;;  %v17963_v32 = vld [vmem:[%s24471_s10 + $0x4b0] sm:$0xff]   ;;  %v17965_v33 = vld [vmem:[%s24471_s10 + $0x4f8] sm:$0xff]  }
 0x8d5   : > { %15371 = vmatprep.subr.bf16.mxu1 %v17913_v38  ;;  %15389 = vmatprep.subr.bf16.mxu0 %v17914_v39  ;;  %v4893_v45 = vpop.f32.mrb[205].mxu1  ;;  %v17970_v38 = vld [vmem:[%s24471_s10 + $0x5c0] sm:$0xff]  }
 0x8d6   : > { %v4895_v47 = vpop.f32.mrb[206].mxu1 }
 0x8d7   : > { %v4906_v48 = vpack.c.bf16 %v4895_v47, %v4891_v42  ;;  %v4897_v49 = vpop.f32.mrb[207].mxu1 }
 0x8d8   : > { %15372 = vmatpush3.bf16.msra.mxu1 %v17915_v40  ;;  %15390 = vmatpush3.bf16.msra.mxu0 %v17916_v41  ;;  %v4907_v54 = vpack.c.bf16 %v4897_v49, %v4893_v45 }
 0x8d9   : > { %15373 = vmatprep.subr.bf16.mxu1 %v17917_v43  ;;  %15391 = vmatprep.subr.bf16.mxu0 %v17918_v44 }
 0x8da   : > { %5576 = vmatprep.mubr.bf16.mxu0 %v4907_v54 }
 0x8dc   : > { %15374 = vmatpush3.bf16.msra.mxu1 %v17919_v52  ;;  %15392 = vmatpush3.bf16.msra.mxu0 %v17920_v53 }
 0x8dd   : > { %15375 = vmatprep.subr.bf16.mxu1 %v17921_v55  ;;  %15393 = vmatprep.subr.bf16.mxu0 %v17922_v56 }
 0x8e0   : > { %15376 = vmatpush3.bf16.msra.mxu1 %v17923_v57  ;;  %15394 = vmatpush3.bf16.msra.mxu0 %v17924_v58 }
 0x8e1   : > { %15395 = vmatprep.subr.bf16.mxu0 %v17925_v59  ;;  %15405 = vmatprep.subr.bf16.mxu1 %v17933_v62 }
 0x8e3   : > { %5536 = vmatmul.mubr.bf16.vlgmr.msra.gmra.mrb[212].mxu1 %v4904_v30  ;;  %v17961_v30 = vld [vmem:[%s24471_s10 + $0x4f0] sm:$0xff]  }
 0x8e4   : > { %15396 = vmatpush3.bf16.msra.mxu0 %v17926_v60  ;;  %15406 = vmatpush3.bf16.msra.mxu1 %v17934_v5 }
 0x8e5   : > { %15397 = vmatprep.subr.bf16.mxu0 %v17927_v24  ;;  %15407 = vmatprep.subr.bf16.mxu1 %v17935_v6 }
 0x8e8   : > { %15398 = vmatpush3.bf16.msra.mxu0 %v17928_v27  ;;  %15408 = vmatpush3.bf16.msra.mxu1 %v17936_v9 }
 0x8e9   : > { %5628 = vmatprep.subr.bf16.mxu0 %v19533_v37  ;;  %15409 = vmatprep.subr.bf16.mxu1 %v17937_v46 }
 0x8eb   : > { %5577 = vmatmul.mubr.bf16.vlgmr.msra.gmra.mrb[132].mxu0 %v4906_v48 }
 0x8ec   : > { %5629 = vmatpush1.bf16.msra.mxu0 %v19531_v36  ;;  %5660 = vmatprep.mubr.bf16.mxu0 %v18291_v21 }
 0x8ed   : > { %15427 = vmatprep.subr.bf16.mxu0 %v17938_v7  ;;  %15410 = vmatpush3.bf16.msra.mxu1 %v17939_v50 }
 0x8ee   : > { %15411 = vmatprep.subr.bf16.mxu1 %v17941_v51 }
 0x8f1   : > { %15412 = vmatpush3.bf16.msra.mxu1 %v17943_v11 }
 0x8f2   : > { %15413 = vmatprep.subr.bf16.mxu1 %v17945_v12 }
 0x8f3   : > { %13287 = vmatmul.mubr.msk.bf16.vlgmr.msra.gmra.mrb[136].mxu0 %vm4007_vm5, %v17929_v29 }
 0x8f4   : > { %5670 = vmatprep.mubr.bf16.mxu0 %v18291_v21  ;;  %15428 = vmatpush3.bf16.msra.mxu0 %v17940_v8 }
 0x8f5   : > { %15429 = vmatprep.subr.bf16.mxu0 %v17942_v23  ;;  %15414 = vmatpush3.bf16.msra.mxu1 %v17947_v15 }
 0x8f6   : > { %15415 = vmatprep.subr.bf16.mxu1 %v17949_v16  ;;  %v17964_v16 = vld [vmem:[%s24471_s10 + $0x500] sm:$0xff]  }
 0x8f8   : > { %15430 = vmatpush3.bf16.msra.mxu0 %v17944_v10 }
 0x8f9   : > { %15431 = vmatprep.subr.bf16.mxu0 %v17946_v14  ;;  %15416 = vmatpush3.bf16.msra.mxu1 %v17951_v18 }
 0x8fa   : > { %15417 = vmatprep.subr.bf16.mxu1 %v17953_v22 }
 0x8fb   : > { %13288 = vmatmul.mubr.msk.bf16.gmra.mrb[140].mxu0 %vm4007_vm5, %v17930_v61 }
 0x8fc   : > { %5680 = vmatprep.mubr.bf16.mxu0 %v18291_v21  ;;  %15432 = vmatpush3.bf16.msra.mxu0 %v17948_v13 }
 0x8fd   : > { %15433 = vmatprep.subr.bf16.mxu0 %v17950_v17  ;;  %15418 = vmatpush3.bf16.msra.mxu1 %v17955_v26  ;;  %v17966_v17 = vld [vmem:[%s24471_s10 + $0x548] sm:$0xff]  }
 0x8fe   : > { %15419 = vmatprep.subr.bf16.mxu1 %v17957_v2 }
 0x900   : > { %15434 = vmatpush3.bf16.msra.mxu0 %v17952_v20  ;;  %v17968_v20 = vld [vmem:[%s24471_s10 + $0x508] sm:$0xff]  }
 0x901   : > { %15435 = vmatprep.subr.bf16.mxu0 %v17954_v25  ;;  %15420 = vmatpush3.bf16.msra.mxu1 %v17959_v19  ;;  %v17969_v25 = vld [vmem:[%s24471_s10 + $0x550] sm:$0xff]  }
 0x902   : > { %15449 = vmatprep.subr.bf16.mxu1 %v17962_v31  ;;  %v17971_v19 = vld [vmem:[%s24471_s10 + $0x510] sm:$0xff]   ;;  %v17974_v31 = vld [vmem:[%s24471_s10 + $0x5c8] sm:$0xff]  }
 0x903   : > { %13289 = vmatmul.mubr.msk.bf16.gmra.mrb[144].mxu0 %vm4007_vm5, %v17931_v63 }
 0x904   : > { %5690 = vmatprep.mubr.bf16.mxu0 %v18291_v21  ;;  %15436 = vmatpush3.bf16.msra.mxu0 %v17956_v0 }
 0x905   : > { %15437 = vmatprep.subr.bf16.mxu0 %v17958_v4 }
 0x908   : > { %15438 = vmatpush3.bf16.msra.mxu0 %v17960_v28  ;;  %v17972_v28 = vld [vmem:[%s24471_s10 + $0x580] sm:$0xff]  }
 0x909   : > { %15439 = vmatprep.subr.bf16.mxu0 %v17961_v30  ;;  %v17973_v30 = vld [vmem:[%s24471_s10 + $0x558] sm:$0xff]  }
 0x90b   : > { %13290 = vmatmul.mubr.msk.bf16.gmra.mrb[148].mxu0 %vm4007_vm5, %v17932_v1 }
 0x90c   : > { %15440 = vmatpush3.bf16.msra.mxu0 %v17963_v32  ;;  %v17975_v32 = vld [vmem:[%s24471_s10 + $0x518] sm:$0xff]  }
 0x90d   : > { %15441 = vmatprep.subr.bf16.mxu0 %v17965_v33  ;;  %v17976_v33 = vld [vmem:[%s24471_s10 + $0x588] sm:$0xff]  }
 0x910   : > { %15442 = vmatpush3.bf16.msra.mxu0 %v17967_v35 }
 0x911   : > { %15471 = vmatprep.subr.bf16.mxu0 %v17970_v38  ;;  %v17977_v38 = vld [vmem:[%s24471_s10 + $0x560] sm:$0xff]  }
 0x996   : > { %v15333_v39 = vpop.f32.mrb[208].mxu1 }
 0x997   : > { %v15334_v40 = vpop.f32.mrb[209].mxu1 }
 0x998   : > { %v15335_v41 = vadd.f32 %v15334_v40, %v15333_v39  ;;  %v15336_v42 = vpop.f32.mrb[210].mxu1  ;;  %v17978_v39 = vld [vmem:[%s24471_s10 + $0x5d0] sm:$0xff]  }
 0x999   : > { %v15337_v43 = vpop.f32.mrb[211].mxu1 }
 0x99a   : > { %v15338_v44 = vadd.f32 %v15337_v43, %v15336_v42  ;;  %v5456_v48 = vadd.f32 %v15335_v41, %v19842_v34 }
 0x99c   : > { %v5459_v54 = vadd.f32 %v15338_v44, %v19842_v34  ;;  %v17979_v44 = vld [vmem:[%s24471_s10 + $0x520] sm:$0xff]  }
 0x99e   : > { %v15355_v45 = vpop.f32.mrb[128].mxu0 }
 0x99f   : > { %v15356_v47 = vpop.f32.mrb[129].mxu0 }
 0x9a0   : > { %v15357_v49 = vadd.f32 %v15356_v47, %v15355_v45  ;;  %v15358_v52 = vpop.f32.mrb[130].mxu0  ;;  %v17980_v45 = vld [vmem:[%s24471_s10 + $0x590] sm:$0xff]  }
 0x9a1   : > { %v15359_v53 = vpop.f32.mrb[131].mxu0 }
 0x9a2   : > { %v5497_v55 = vadd.f32 %v15357_v49, %v5456_v48  ;;  %v15360_v56 = vadd.f32 %v15359_v53, %v15358_v52  ;;  %v17981_v48 = vld [vmem:[%s24471_s10 + $0x568] sm:$0xff]   ;;  %v17982_v49 = vld [vmem:[%s24471_s10 + $0x5d8] sm:$0xff]  }
 0x9a3   : > { %v17983_v52 = vld [vmem:[%s24471_s10 + $0x528] sm:$0xff]   ;;  %v17984_v53 = vld [vmem:[%s24471_s10 + $0x598] sm:$0xff]  }
 0x9a4   : > { %v5500_v57 = vadd.f32 %v15360_v56, %v5459_v54  ;;  %v17986_v56 = vld [vmem:[%s24471_s10 + $0x5e0] sm:$0xff]  }
 0x9b6   : > { %v15377_v58 = vpop.f32.mrb[212].mxu1 }
 0x9b7   : > { %v15378_v59 = vpop.f32.mrb[213].mxu1 }
 0x9b8   : > { %v15379_v60 = vadd.f32 %v15378_v59, %v15377_v58  ;;  %v15380_v24 = vpop.f32.mrb[214].mxu1 }
 0x9b9   : > { %v15381_v27 = vpop.f32.mrb[215].mxu1 }
 0x9ba   : > { %v5538_v29 = vadd.f32 %v15379_v60, %v5497_v55  ;;  %v15382_v61 = vadd.f32 %v15381_v27, %v15380_v24  ;;  %v17985_v55 = vld [vmem:[%s24471_s10 + $0x570] sm:$0xff]   ;;  %v17988_v27 = vld [vmem:[%s24471_s10 + $0x5a0] sm:$0xff]  }
 0x9bb   : > { %v17987_v24 = vld [vmem:[%s24471_s10 + $0x530] sm:$0xff]  }
 0x9bc   : > { %v5541_v63 = vadd.f32 %v15382_v61, %v5500_v57  ;;  %v17989_v61 = vld [vmem:[%s24471_s10 + $0x578] sm:$0xff]  }
 0x9be   : > { %v15399_v1 = vpop.f32.mrb[132].mxu0 }
 0x9bf   : > { %v15400_v62 = vpop.f32.mrb[133].mxu0 }
 0x9c0   : > { %v15401_v5 = vadd.f32 %v15400_v62, %v15399_v1  ;;  %v15402_v6 = vpop.f32.mrb[134].mxu0  ;;  %v17991_v1 = vld [vmem:[%s24471_s10 + $0x538] sm:$0xff]   ;;  %v17992_v62 = vld [vmem:[%s24471_s10 + $0x5a8] sm:$0xff]  }
 0x9c1   : > { %v15403_v7 = vpop.f32.mrb[135].mxu0 }
 0x9c2   : > { %v5579_v8 = vadd.f32 %v15401_v5, %v5538_v29  ;;  %v15404_v9 = vadd.f32 %v15403_v7, %v15402_v6  ;;  %v17993_v5 = vld [vmem:[%s24471_s10 + $0x5f0] sm:$0xff]   ;;  %v17995_v7 = vld [vmem:[%s24471_s10 + $0x5f8] sm:$0xff]  }
 0x9c3   : > { %v17994_v6 = vld [vmem:[%s24471_s10 + $0x5b0] sm:$0xff]  }
 0x9c4   : > { %v5582_v46 = vadd.f32 %v15404_v9, %v5541_v63  ;;  %v5585_v50 = vmax.f32 %v5579_v8, 0.0  ;;  %v17990_v63 = vld [vmem:[%s24471_s10 + $0x5e8] sm:$0xff]   ;;  %v17996_v8 = vld [vmem:[%s24471_s10 + $0x5b8] sm:$0xff]   ;;  %v17999_v9 = vld [vmem:[%s24470_s9 + $0x70] sm:$0xff]  }
 0x9c6   : > { %v5586_v51 = vmax.f32 %v5582_v46, 0.0  ;;  %v5662_v23 = vpop.f32.mrb[136].mxu0  ;;  %v18000_v46 = vld [vmem:[%s24470_s9 + $0x78] sm:$0xff]  }
 0x9c7   : > { %v5664_v11 = vpop.f32.mrb[137].mxu0 }
 0x9c8   : > { %v20064_v10 = vpack.c.bf16 %v5586_v51, %v5585_v50  ;;  %v5666_v12 = vpop.f32.mrb[138].mxu0  ;;  %v18001_v50 = vld [vmem:[%s24471_s10 + $0x640] sm:$0xff]  }
 0x9c9   : > { %v5701_v14 = vpack.c.bf16 %v5666_v12, %v5662_v23  ;;  %v5668_v15 = vpop.f32.mrb[139].mxu0  ;;  %v18002_v51 = vld [vmem:[%s24471_s10 + $0x600] sm:$0xff]   ;;  %v18003_v23 = vld [vmem:[%s24471_s10 + $0x648] sm:$0xff]  }
 0x9ca   : > { %v5702_v13 = vpack.c.bf16 %v5668_v15, %v5664_v11  ;;  %v18006_v11 = vld [vmem:[%s24471_s10 + $0x6c0] sm:$0xff]   ;;  %v18010_v15 = vld [vmem:[%s24471_s10 + $0x6c8] sm:$0xff]  }
 0x9cb   : > { %v18008_v12 = vld [vmem:[%s24471_s10 + $0x680] sm:$0xff]  }
 0x9cc   : > { %6254 = vmatprep.mubr.bf16.mxu1 %v5702_v13  ;;  %v18012_v13 = vld [vmem:[%s24471_s10 + $0x688] sm:$0xff]  }
 0x9cd   : > { %6255 = vmatmul.mubr.bf16.vlgmr.msra.gmra.mrb[216].mxu1 %v5701_v14  ;;  %v18005_v14 = vld [vmem:[%s24471_s10 + $0x650] sm:$0xff]  }
 0x9ce   : > { %15450 = vmatpush3.bf16.msra.mxu1 %v17964_v16  ;;  %v5672_v18 = vpop.f32.mrb[140].mxu0  ;;  %v18007_v16 = vld [vmem:[%s24471_s10 + $0x610] sm:$0xff]  }
 0x9cf   : > { %v5674_v22 = vpop.f32.mrb[141].mxu0  ;;  %15451 = vmatprep.subr.bf16.mxu1 %v17966_v17  ;;  %v18014_v17 = vld [vmem:[%s24471_s10 + $0x6d0] sm:$0xff]  }
 0x9d0   : > { %v5676_v26 = vpop.f32.mrb[142].mxu0 }
 0x9d1   : > { %v5703_v0 = vpack.c.bf16 %v5676_v26, %v5672_v18  ;;  %v5678_v2 = vpop.f32.mrb[143].mxu0  ;;  %v18009_v18 = vld [vmem:[%s24471_s10 + $0x658] sm:$0xff]   ;;  %v18015_v26 = vld [vmem:[%s24471_s10 + $0x620] sm:$0xff]  }
 0x9d2   : > { %v5704_v4 = vpack.c.bf16 %v5678_v2, %v5674_v22  ;;  %15452 = vmatpush3.bf16.msra.mxu1 %v17968_v20  ;;  %v18016_v20 = vld [vmem:[%s24471_s10 + $0x690] sm:$0xff]   ;;  %v18011_v22 = vld [vmem:[%s24471_s10 + $0x618] sm:$0xff]  }
 0x9d3   : > { %15453 = vmatprep.subr.bf16.mxu1 %v17969_v25  ;;  %v18013_v25 = vld [vmem:[%s24471_s10 + $0x660] sm:$0xff]   ;;  %v18018_v2 = vld [vmem:[%s24471_s10 + $0x6d8] sm:$0xff]  }
 0x9d4   : > { %6295 = vmatprep.mubr.bf16.mxu0 %v5704_v4  ;;  %v18019_v4 = vld [vmem:[%s24471_s10 + $0x628] sm:$0xff]  }
 0x9d5   : > { %6296 = vmatmul.mubr.bf16.vlgmr.msra.gmra.mrb[152].mxu0 %v5703_v0  ;;  %v18017_v0 = vld [vmem:[%s24471_s10 + $0x668] sm:$0xff]  }
 0x9d6   : > { %15454 = vmatpush3.bf16.msra.mxu1 %v17971_v19  ;;  %15472 = vmatpush3.bf16.msra.mxu0 %v17972_v28  ;;  %v5682_v35 = vpop.f32.mrb[144].mxu0  ;;  %v18020_v19 = vld [vmem:[%s24471_s10 + $0x698] sm:$0xff]   ;;  %v18021_v28 = vld [vmem:[%s24471_s10 + $0x670] sm:$0xff]  }
 0x9d7   : > { %15455 = vmatprep.subr.bf16.mxu1 %v17973_v30  ;;  %15473 = vmatprep.subr.bf16.mxu0 %v17974_v31  ;;  %v5684_v40 = vpop.f32.mrb[145].mxu0  ;;  %v18022_v30 = vld [vmem:[%s24471_s10 + $0x6e0] sm:$0xff]   ;;  %v18023_v31 = vld [vmem:[%s24471_s10 + $0x630] sm:$0xff]  }
 0x9d8   : > { %v5686_v41 = vpop.f32.mrb[146].mxu0 }
 0x9d9   : > { %v5705_v42 = vpack.c.bf16 %v5686_v41, %v5682_v35  ;;  %v5688_v43 = vpop.f32.mrb[147].mxu0  ;;  %v18026_v35 = vld [vmem:[%s24471_s10 + $0x6e8] sm:$0xff]   ;;  %v18030_v41 = vld [vmem:[%s24471_s10 + $0x740] sm:$0xff]  }
 0x9da   : > { %15456 = vmatpush3.bf16.msra.mxu1 %v17975_v32  ;;  %15474 = vmatpush3.bf16.msra.mxu0 %v17976_v33  ;;  %v5706_v47 = vpack.c.bf16 %v5688_v43, %v5684_v40  ;;  %v18024_v32 = vld [vmem:[%s24471_s10 + $0x6a0] sm:$0xff]   ;;  %v18025_v33 = vld [vmem:[%s24471_s10 + $0x678] sm:$0xff]   ;;  %v18029_v40 = vld [vmem:[%s24471_s10 + $0x6f0] sm:$0xff]  }
 0x9db   : > { %15457 = vmatprep.subr.bf16.mxu1 %v17977_v38  ;;  %15475 = vmatprep.subr.bf16.mxu0 %v17978_v39  ;;  %v18027_v38 = vld [vmem:[%s24471_s10 + $0x638] sm:$0xff]   ;;  %v18028_v39 = vld [vmem:[%s24471_s10 + $0x6a8] sm:$0xff]  }
 0x9dc   : > { %6336 = vmatprep.mubr.bf16.mxu1 %v5706_v47  ;;  %v18033_v43 = vld [vmem:[%s24471_s10 + $0x6f8] sm:$0xff]  }
 0x9de   : > { %15458 = vmatpush3.bf16.msra.mxu1 %v17979_v44  ;;  %15476 = vmatpush3.bf16.msra.mxu0 %v17980_v45  ;;  %v5692_v54 = vpop.f32.mrb[148].mxu0  ;;  %v18035_v44 = vld [vmem:[%s24471_s10 + $0x6b8] sm:$0xff]   ;;  %v18038_v45 = vld [vmem:[%s24471_s10 + $0x7c0] sm:$0xff]  }
 0x9df   : > { %15459 = vmatprep.subr.bf16.mxu1 %v17981_v48  ;;  %15477 = vmatprep.subr.bf16.mxu0 %v17982_v49  ;;  %v5694_v57 = vpop.f32.mrb[149].mxu0 }
 0x9e0   : > { %v5696_v58 = vpop.f32.mrb[150].mxu0 }
 0x9e1   : > { %v5707_v59 = vpack.c.bf16 %v5696_v58, %v5692_v54  ;;  %v5698_v60 = vpop.f32.mrb[151].mxu0 }
 0x9e2   : > { %15460 = vmatpush3.bf16.msra.mxu1 %v17983_v52  ;;  %15478 = vmatpush3.bf16.msra.mxu0 %v17984_v53  ;;  %v5708_v29 = vpack.c.bf16 %v5698_v60, %v5694_v57 }
 0x9e3   : > { %15461 = vmatprep.subr.bf16.mxu1 %v17985_v55  ;;  %15479 = vmatprep.subr.bf16.mxu0 %v17986_v56 }
 0x9e4   : > { %6377 = vmatprep.mubr.bf16.mxu0 %v5708_v29 }
 0x9e6   : > { %15462 = vmatpush3.bf16.msra.mxu1 %v17987_v24  ;;  %15480 = vmatpush3.bf16.msra.mxu0 %v17988_v27 }
 0x9e7   : > { %15463 = vmatprep.subr.bf16.mxu1 %v17989_v61  ;;  %15481 = vmatprep.subr.bf16.mxu0 %v17990_v63 }
 0x9ea   : > { %15464 = vmatpush3.bf16.msra.mxu1 %v17991_v1  ;;  %15482 = vmatpush3.bf16.msra.mxu0 %v17992_v62 }
 0x9eb   : > { %6429 = vmatprep.subr.bf16.mxu1 %v19533_v37  ;;  %15483 = vmatprep.subr.bf16.mxu0 %v17993_v5  ;;  %v17997_v37 = vld [vmem:[%s24470_s9 + $0x60] sm:$0xff]  }
 0x9ed   : > { %6337 = vmatmul.mubr.bf16.vlgmr.msra.gmra.mrb[220].mxu1 %v5705_v42  ;;  %v18031_v42 = vld [vmem:[%s24471_s10 + $0x6b0] sm:$0xff]  }
 0x9ee   : > { %15484 = vmatpush3.bf16.msra.mxu0 %v17994_v6  ;;  %6430 = vmatpush1.bf16.msra.mxu1 %v19531_v36  ;;  %v17998_v36 = vld [vmem:[%s24470_s9 + $0x68] sm:$0xff]  }
 0x9ef   : > { %15485 = vmatprep.subr.bf16.mxu0 %v17995_v7  ;;  %6461 = vmatprep.mubr.bf16.mxu1 %v18291_v21 }
 0x9f0   : > { %15493 = vmatprep.subr.bf16.mxu1 %v18001_v50 }
 0x9f2   : > { %15486 = vmatpush3.bf16.msra.mxu0 %v17996_v8 }
 0x9f3   : > { %15515 = vmatprep.subr.bf16.mxu0 %v18006_v11 }
 0x9f5   : > { %6378 = vmatmul.mubr.bf16.vlgmr.msra.gmra.mrb[156].mxu0 %v5707_v59  ;;  %13495 = vmatmul.mubr.msk.bf16.vlgmr.msra.gmra.mrb[224].mxu1 %vm4007_vm5, %v17997_v37 }
 0x9f6   : > { %6471 = vmatprep.mubr.bf16.mxu1 %v18291_v21  ;;  %15494 = vmatpush3.bf16.msra.mxu1 %v18002_v51 }
 0x9f7   : > { %15495 = vmatprep.subr.bf16.mxu1 %v18003_v23  ;;  %15516 = vmatpush3.bf16.msra.mxu0 %v18008_v12 }
 0x9f8   : > { %15517 = vmatprep.subr.bf16.mxu0 %v18010_v15 }
 0x9fb   : > { %15518 = vmatpush3.bf16.msra.mxu0 %v18012_v13 }
 0x9fc   : > { %15519 = vmatprep.subr.bf16.mxu0 %v18014_v17  ;;  %v18034_v17 = vld [vmem:[%s24471_s10 + $0x748] sm:$0xff]  }
 0x9fd   : > { %13496 = vmatmul.mubr.msk.bf16.gmra.mrb[228].mxu1 %vm4007_vm5, %v17998_v36 }
 0x9fe   : > { %6481 = vmatprep.mubr.bf16.mxu1 %v18291_v21 }
 0x9ff   : > { %15520 = vmatpush3.bf16.msra.mxu0 %v18016_v20 }
 0xa00   : > { %15521 = vmatprep.subr.bf16.mxu0 %v18018_v2  ;;  %v18037_v2 = vld [vmem:[%s24471_s10 + $0x750] sm:$0xff]  }
 0xa03   : > { %15522 = vmatpush3.bf16.msra.mxu0 %v18020_v19 }
 0xa04   : > { %15523 = vmatprep.subr.bf16.mxu0 %v18022_v30 }
 0xa05   : > { %13497 = vmatmul.mubr.msk.bf16.gmra.mrb[232].mxu1 %vm4007_vm5, %v17999_v9 }
 0xa06   : > { %6491 = vmatprep.mubr.bf16.mxu1 %v18291_v21  ;;  %v18004_v21 = vld [vmem:[%s24471_s10 + $0x608] sm:$0xff]  }
 0xa07   : > { %15496 = vmatpush3.bf16.msra.mxu1 %v18004_v21  ;;  %15524 = vmatpush3.bf16.msra.mxu0 %v18024_v32  ;;  %v18039_v32 = vld [vmem:[%s24471_s10 + $0x710] sm:$0xff]  }
 0xa08   : > { %15497 = vmatprep.subr.bf16.mxu1 %v18005_v14  ;;  %15525 = vmatprep.subr.bf16.mxu0 %v18026_v35  ;;  %v18041_v35 = vld [vmem:[%s24471_s10 + $0x758] sm:$0xff]  }
 0xa0b   : > { %15498 = vmatpush3.bf16.msra.mxu1 %v18007_v16  ;;  %15526 = vmatpush3.bf16.msra.mxu0 %v18028_v39  ;;  %v18032_v16 = vld [vmem:[%s24471_s10 + $0x700] sm:$0xff]   ;;  %v18043_v39 = vld [vmem:[%s24471_s10 + $0x718] sm:$0xff]  }
 0xa0c   : > { %15499 = vmatprep.subr.bf16.mxu1 %v18009_v18  ;;  %15527 = vmatprep.subr.bf16.mxu0 %v18029_v40  ;;  %v18044_v40 = vld [vmem:[%s24471_s10 + $0x788] sm:$0xff]  }
 0xa0d   : > { %13498 = vmatmul.mubr.msk.bf16.gmra.mrb[236].mxu1 %vm4007_vm5, %v18000_v46 }
 0xa0f   : > { %15500 = vmatpush3.bf16.msra.mxu1 %v18011_v22  ;;  %15528 = vmatpush3.bf16.msra.mxu0 %v18031_v42  ;;  %v18045_v42 = vld [vmem:[%s24471_s10 + $0x760] sm:$0xff]  }
 0xa10   : > { %15501 = vmatprep.subr.bf16.mxu1 %v18013_v25  ;;  %15529 = vmatprep.subr.bf16.mxu0 %v18033_v43  ;;  %v18046_v43 = vld [vmem:[%s24471_s10 + $0x7d0] sm:$0xff]  }
 0xa13   : > { %15502 = vmatpush3.bf16.msra.mxu1 %v18015_v26  ;;  %15530 = vmatpush3.bf16.msra.mxu0 %v18035_v44  ;;  %v18036_v26 = vld [vmem:[%s24471_s10 + $0x708] sm:$0xff]  }
 0xa14   : > { %15503 = vmatprep.subr.bf16.mxu1 %v18017_v0  ;;  %15559 = vmatprep.subr.bf16.mxu0 %v18038_v45 }
 0xa17   : > { %15504 = vmatpush3.bf16.msra.mxu1 %v18019_v4 }
 0xa18   : > { %15505 = vmatprep.subr.bf16.mxu1 %v18021_v28 }
 0xa1b   : > { %15506 = vmatpush3.bf16.msra.mxu1 %v18023_v31 }
 0xa1c   : > { %15507 = vmatprep.subr.bf16.mxu1 %v18025_v33  ;;  %v18040_v33 = vld [vmem:[%s24471_s10 + $0x780] sm:$0xff]  }
 0xa1f   : > { %15508 = vmatpush3.bf16.msra.mxu1 %v18027_v38  ;;  %v18042_v38 = vld [vmem:[%s24471_s10 + $0x7c8] sm:$0xff]  }
 0xa20   : > { %15537 = vmatprep.subr.bf16.mxu1 %v18030_v41 }
 0xaa0   : > { %v15421_v47 = vpop.f32.mrb[216].mxu1 }
 0xaa1   : > { %v15422_v48 = vpop.f32.mrb[217].mxu1 }
 0xaa2   : > { %v15423_v49 = vadd.f32 %v15422_v48, %v15421_v47  ;;  %v15424_v52 = vpop.f32.mrb[218].mxu1 }
 0xaa3   : > { %v15425_v53 = vpop.f32.mrb[219].mxu1 }
 0xaa4   : > { %v15426_v54 = vadd.f32 %v15425_v53, %v15424_v52  ;;  %v6257_v57 = vadd.f32 %v15423_v49, %v19842_v34  ;;  %v18047_v49 = vld [vmem:[%s24471_s10 + $0x720] sm:$0xff]   ;;  %v18048_v52 = vld [vmem:[%s24471_s10 + $0x790] sm:$0xff]  }
 0xaa6   : > { %v6260_v24 = vadd.f32 %v15426_v54, %v19842_v34  ;;  %v18049_v54 = vld [vmem:[%s24471_s10 + $0x768] sm:$0xff]  }
 0xaa8   : > { %v15443_v55 = vpop.f32.mrb[152].mxu0 }
 0xaa9   : > { %v15444_v56 = vpop.f32.mrb[153].mxu0 }
 0xaaa   : > { %v15445_v58 = vadd.f32 %v15444_v56, %v15443_v55  ;;  %v15446_v59 = vpop.f32.mrb[154].mxu0  ;;  %v18050_v55 = vld [vmem:[%s24471_s10 + $0x7d8] sm:$0xff]   ;;  %v18051_v56 = vld [vmem:[%s24471_s10 + $0x728] sm:$0xff]  }
 0xaab   : > { %v15447_v60 = vpop.f32.mrb[155].mxu0 }
 0xaac   : > { %v6298_v27 = vadd.f32 %v15445_v58, %v6257_v57  ;;  %v15448_v29 = vadd.f32 %v15447_v60, %v15446_v59  ;;  %v18052_v57 = vld [vmem:[%s24471_s10 + $0x798] sm:$0xff]   ;;  %v18053_v59 = vld [vmem:[%s24471_s10 + $0x770] sm:$0xff]   ;;  %v18054_v60 = vld [vmem:[%s24471_s10 + $0x7e0] sm:$0xff]  }
 0xaae   : > { %v6301_v61 = vadd.f32 %v15448_v29, %v6260_v24 }
 0xac0   : > { %v15465_v63 = vpop.f32.mrb[220].mxu1 }
 0xac1   : > { %v15466_v1 = vpop.f32.mrb[221].mxu1 }
 0xac2   : > { %v15467_v62 = vadd.f32 %v15466_v1, %v15465_v63  ;;  %v15468_v5 = vpop.f32.mrb[222].mxu1  ;;  %v18055_v63 = vld [vmem:[%s24471_s10 + $0x730] sm:$0xff]   ;;  %v18056_v1 = vld [vmem:[%s24471_s10 + $0x7a0] sm:$0xff]  }
 0xac3   : > { %v15469_v6 = vpop.f32.mrb[223].mxu1 }
 0xac4   : > { %v6339_v7 = vadd.f32 %v15467_v62, %v6298_v27  ;;  %v15470_v8 = vadd.f32 %v15469_v6, %v15468_v5  ;;  %v18057_v5 = vld [vmem:[%s24471_s10 + $0x778] sm:$0xff]   ;;  %v18058_v6 = vld [vmem:[%s24471_s10 + $0x7e8] sm:$0xff]  }
 0xac6   : > { %v6342_v37 = vadd.f32 %v15470_v8, %v6301_v61  ;;  %v18060_v8 = vld [vmem:[%s24471_s10 + $0x7a8] sm:$0xff]  }
 0xac8   : > { %v15487_v36 = vpop.f32.mrb[156].mxu0  ;;  %v6463_v9 = vpop.f32.mrb[224].mxu1 }
 0xac9   : > { %v15488_v46 = vpop.f32.mrb[157].mxu0  ;;  %v6465_v50 = vpop.f32.mrb[225].mxu1 }
 0xaca   : > { %v15489_v51 = vadd.f32 %v15488_v46, %v15487_v36  ;;  %v15490_v23 = vpop.f32.mrb[158].mxu0  ;;  %v6467_v21 = vpop.f32.mrb[226].mxu1  ;;  %v18062_v36 = vld [vmem:[%s24471_s10 + $0x7b0] sm:$0xff]   ;;  %v18064_v46 = vld [vmem:[%s24471_s10 + $0x7b8] sm:$0xff]  }
 0xacb   : > { %v6502_v11 = vpack.c.bf16 %v6467_v21, %v6463_v9  ;;  %v15491_v34 = vpop.f32.mrb[159].mxu0  ;;  %v6469_v12 = vpop.f32.mrb[227].mxu1  ;;  %v18063_v9 = vld [vmem:[%s24471_s10 + $0x7f8] sm:$0xff]  }
 0xacc   : > { %v6380_v14 = vadd.f32 %v15489_v51, %v6339_v7  ;;  %v15492_v15 = vadd.f32 %v15491_v34, %v15490_v23  ;;  %v6503_v13 = vpack.c.bf16 %v6469_v12, %v6465_v50  ;;  %v18059_v7 = vld [vmem:[%s24471_s10 + $0x738] sm:$0xff]   ;;  %v18065_v50 = vld [vmem:[%s24473_s12] sm:$0xff]  }
 0xace   : > { %v6383_v18 = vadd.f32 %v15492_v15, %v6342_v37  ;;  %7055 = vmatprep.mubr.bf16.mxu1 %v6503_v13  ;;  %v6386_v20 = vmax.f32 %v6380_v14, 0.0  ;;  %v18061_v37 = vld [vmem:[%s24471_s10 + $0x7f0] sm:$0xff]   ;;  %v18281_v13 = vld [vmem:[%s24472_s11] ss:$0 sm:$0xff] }
 0xacf   : > { %7056 = vmatmul.mubr.bf16.vlgmr.msra.gmra.mrb[240].mxu1 %v6502_v11 }
 0xad0   : > { %v6387_v22 = vmax.f32 %v6383_v18, 0.0  ;;  %15538 = vmatpush3.bf16.msra.mxu1 %v18032_v16  ;;  %v6473_v25 = vpop.f32.mrb[228].mxu1 }
 0xad1   : > { %v6475_v0 = vpop.f32.mrb[229].mxu1  ;;  %15539 = vmatprep.subr.bf16.mxu1 %v18034_v17 }
 0xad2   : > { %v20294_v4 = vpack.c.bf16 %v6387_v22, %v6386_v20  ;;  %v6477_v19 = vpop.f32.mrb[230].mxu1 }
 0xad3   : > { %v6504_v28 = vpack.c.bf16 %v6477_v19, %v6473_v25  ;;  %v6479_v30 = vpop.f32.mrb[231].mxu1 }
 0xad4   : > { %v6505_v31 = vpack.c.bf16 %v6479_v30, %v6475_v0  ;;  %15540 = vmatpush3.bf16.msra.mxu1 %v18036_v26 }
 0xad5   : > { %15541 = vmatprep.subr.bf16.mxu1 %v18037_v2 }
 0xad6   : > { %7096 = vmatprep.mubr.bf16.mxu0 %v6505_v31 }
 0xad7   : > { %7097 = vmatmul.mubr.bf16.vlgmr.msra.gmra.mrb[160].mxu0 %v6504_v28 }
 0xad8   : > { %15542 = vmatpush3.bf16.msra.mxu1 %v18039_v32  ;;  %15560 = vmatpush3.bf16.msra.mxu0 %v18040_v33  ;;  %v6483_v41 = vpop.f32.mrb[232].mxu1 }
 0xad9   : > { %15543 = vmatprep.subr.bf16.mxu1 %v18041_v35  ;;  %15561 = vmatprep.subr.bf16.mxu0 %v18042_v38  ;;  %v6485_v44 = vpop.f32.mrb[233].mxu1 }
 0xada   : > { %v6487_v45 = vpop.f32.mrb[234].mxu1 }
 0xadb   : > { %v6506_v47 = vpack.c.bf16 %v6487_v45, %v6483_v41  ;;  %v6489_v48 = vpop.f32.mrb[235].mxu1 }
 0xadc   : > { %15544 = vmatpush3.bf16.msra.mxu1 %v18043_v39  ;;  %15562 = vmatpush3.bf16.msra.mxu0 %v18044_v40  ;;  %v6507_v53 = vpack.c.bf16 %v6489_v48, %v6485_v44 }
 0xadd   : > { %15545 = vmatprep.subr.bf16.mxu1 %v18045_v42  ;;  %15563 = vmatprep.subr.bf16.mxu0 %v18046_v43 }
 0xade   : > { %7137 = vmatprep.mubr.bf16.mxu1 %v6507_v53  ;;  %v18067_v53 = vld [vmem:[%s24473_s12 + $0x10] sm:$0xff]  }
 0xae0   : > { %15546 = vmatpush3.bf16.msra.mxu1 %v18047_v49  ;;  %15564 = vmatpush3.bf16.msra.mxu0 %v18048_v52  ;;  %v6493_v58 = vpop.f32.mrb[236].mxu1  ;;  %v18066_v52 = vld [vmem:[%s24473_s12 + $0x8] sm:$0xff]  }
 0xae1   : > { %15547 = vmatprep.subr.bf16.mxu1 %v18049_v54  ;;  %15565 = vmatprep.subr.bf16.mxu0 %v18050_v55  ;;  %v6495_v24 = vpop.f32.mrb[237].mxu1  ;;  %v18068_v54 = vld [vmem:[%s24473_s12 + $0x18] sm:$0xff]   ;;  %v18069_v55 = vld [vmem:[%s24473_s12 + $0x20] sm:$0xff]  }
 0xae2   : > { %v6497_v27 = vpop.f32.mrb[238].mxu1 }
 0xae3   : > { %v6508_v29 = vpack.c.bf16 %v6497_v27, %v6493_v58  ;;  %v6499_v61 = vpop.f32.mrb[239].mxu1  ;;  %v18072_v58 = vld [vmem:[%s24473_s12 + $0x38] sm:$0xff]  }
 0xae4   : > { %15548 = vmatpush3.bf16.msra.mxu1 %v18051_v56  ;;  %15566 = vmatpush3.bf16.msra.mxu0 %v18052_v57  ;;  %v6509_v62 = vpack.c.bf16 %v6499_v61, %v6495_v24  ;;  %v18070_v56 = vld [vmem:[%s24473_s12 + $0x28] sm:$0xff]   ;;  %v18071_v57 = vld [vmem:[%s24473_s12 + $0x30] sm:$0xff]   ;;  %v18076_v27 = vld [vmem:[%s24473_s12 + $0x58] sm:$0xff]  }
 0xae5   : > { %15549 = vmatprep.subr.bf16.mxu1 %v18053_v59  ;;  %15567 = vmatprep.subr.bf16.mxu0 %v18054_v60  ;;  %v18073_v59 = vld [vmem:[%s24473_s12 + $0x40] sm:$0xff]   ;;  %v18074_v60 = vld [vmem:[%s24473_s12 + $0x48] sm:$0xff]   ;;  %v18075_v24 = vld [vmem:[%s24473_s12 + $0x50] sm:$0xff]  }
 0xae6   : > { %7178 = vmatprep.mubr.bf16.mxu0 %v6509_v62  ;;  %v18078_v61 = vld [vmem:[%s24473_s12 + $0x68] sm:$0xff]   ;;  %v18081_v62 = vld [vmem:[%s24473_s12 + $0x80] sm:$0xff]  }
 0xae8   : > { %15550 = vmatpush3.bf16.msra.mxu1 %v18055_v63  ;;  %15568 = vmatpush3.bf16.msra.mxu0 %v18056_v1  ;;  %v18079_v63 = vld [vmem:[%s24473_s12 + $0x70] sm:$0xff]   ;;  %v18080_v1 = vld [vmem:[%s24473_s12 + $0x78] sm:$0xff]  }
 0xae9   : > { %15551 = vmatprep.subr.bf16.mxu1 %v18057_v5  ;;  %15569 = vmatprep.subr.bf16.mxu0 %v18058_v6  ;;  %v18082_v5 = vld [vmem:[%s24473_s12 + $0x88] sm:$0xff]   ;;  %v18083_v6 = vld [vmem:[%s24473_s12 + $0x90] sm:$0xff]  }
 0xaec   : > { %15552 = vmatpush3.bf16.msra.mxu1 %v18059_v7  ;;  %15570 = vmatpush3.bf16.msra.mxu0 %v18060_v8  ;;  %v18084_v7 = vld [vmem:[%s24473_s12 + $0x98] sm:$0xff]   ;;  %v18085_v8 = vld [vmem:[%s24473_s12 + $0xa0] sm:$0xff]  }
 0xaed   : > { %16115 = vmatprep.subr.bf16.mxu1 %v19846_v3  ;;  %15571 = vmatprep.subr.bf16.mxu0 %v18061_v37  ;;  %v18117_v37 = vld [vmem:[%s24474_s13 + $0x40] sm:$0xff]  }
 0xaef   : > { %7138 = vmatmul.mubr.bf16.vlgmr.msra.gmra.mrb[244].mxu1 %v6506_v47 }
 0xaf0   : > { %15572 = vmatpush3.bf16.msra.mxu0 %v18062_v36  ;;  %16116 = vmatpush3.bf16.msra.mxu1 %v19846_v3  ;;  %v18118_v36 = vld [vmem:[%s24474_s13] sm:$0xff]  }
 0xaf1   : > { %16117 = vmatprep.subr.bf16.mxu1 %v20064_v10  ;;  %15573 = vmatprep.subr.bf16.mxu0 %v18063_v9  ;;  %v18119_v9 = vld [vmem:[%s24474_s13 + $0x48] sm:$0xff]  }
 0xaf2   : > { %16123 = vmatprep.mubr.msk.bf16.mxu1 %vm2740_vm4, %v18065_v50  ;;  %v18086_v50 = vld [vmem:[%s24473_s12 + $0xa8] sm:$0xff]  }
 0xaf4   : > { %15574 = vmatpush3.bf16.msra.mxu0 %v18064_v46  ;;  %16118 = vmatpush3.bf16.msra.mxu1 %v20064_v10  ;;  %v18120_v46 = vld [vmem:[%s24474_s13 + $0x8] sm:$0xff]  }
 0xaf5   : > { %16119 = vmatprep.subr.bf16.mxu1 %v20294_v4  ;;  %15601 = vmatprep.subr.bf16.mxu0 %v18117_v37 }
 0xaf7   : > { %7179 = vmatmul.mubr.bf16.vlgmr.msra.gmra.mrb[164].mxu0 %v6508_v29  ;;  %v18077_v29 = vld [vmem:[%s24473_s12 + $0x60] sm:$0xff]  }
 0xaf8   : > { %16120 = vmatpush3.bf16.msra.mxu1 %v20294_v4  ;;  %15602 = vmatpush3.bf16.msra.mxu0 %v18118_v36 }
 0xaf9   : > { %15603 = vmatprep.subr.bf16.mxu0 %v18119_v9 }
 0xafc   : > { %15604 = vmatpush3.bf16.msra.mxu0 %v18120_v46 }
 0xba2   : > { %v15509_v51 = vpop.f32.mrb[240].mxu1 }
 0xba3   : > { %v15510_v23 = vpop.f32.mrb[241].mxu1 }
 0xba4   : > { %v15511_v21 = vadd.f32 %v15510_v23, %v15509_v51  ;;  %v15512_v11 = vpop.f32.mrb[242].mxu1  ;;  %v18087_v51 = vld [vmem:[%s24473_s12 + $0xb0] sm:$0xff]  }
 0xba5   : > { %v15513_v34 = vpop.f32.mrb[243].mxu1  ;;  %v18123_v23 = vld [vmem:[%s24474_s13 + $0x50] sm:$0xff]  }
 0xba6   : > { %v15514_v12 = vadd.f32 %v15513_v34, %v15512_v11  ;;  %v7058_v16 = vadd.f32 %v18281_v13, %v15511_v21  ;;  %v18124_v21 = vld [vmem:[%s24474_s13 + $0x10] sm:$0xff]   ;;  %15605 = vmatprep.subr.bf16.mxu0 %v18123_v23  ;;  %v18088_v11 = vld [vmem:[%s24473_s12 + $0xb8] sm:$0xff]   ;;  %v18089_v34 = vld [vmem:[%s24473_s12 + $0xc0] sm:$0xff]  }
 0xba7   : > { %15606 = vmatpush3.bf16.msra.mxu0 %v18124_v21  ;;  %v18145_v21 = vld [vmem:[%s24473_s12 + $0x1e0] sm:$0xff]  }
 0xba8   : > { %v7061_v22 = vadd.f32 %v18281_v13, %v15514_v12  ;;  %v18125_v12 = vld [vmem:[%s24474_s13 + $0x58] sm:$0xff]   ;;  %v18130_v13 = vld [vmem:[%s24474_s13 + $0x20] sm:$0xff]  }
 0xba9   : > { %15607 = vmatprep.subr.bf16.mxu0 %v18125_v12 }
 0xbaa   : > { %v15531_v14 = vpop.f32.mrb[160].mxu0 }
 0xbab   : > { %v15532_v15 = vpop.f32.mrb[161].mxu0 }
 0xbac   : > { %v15533_v17 = vadd.f32 %v15532_v15, %v15531_v14  ;;  %v15534_v18 = vpop.f32.mrb[162].mxu0  ;;  %v18126_v14 = vld [vmem:[%s24474_s13 + $0x18] sm:$0xff]   ;;  %v18129_v15 = vld [vmem:[%s24474_s13 + $0x60] sm:$0xff]  }
 0xbad   : > { %v15535_v20 = vpop.f32.mrb[163].mxu0  ;;  %15608 = vmatpush3.bf16.msra.mxu0 %v18126_v14  ;;  %v18142_v14 = vld [vmem:[%s24474_s13 + $0x80] sm:$0xff]  }
 0xbae   : > { %v7099_v25 = vadd.f32 %v15533_v17, %v7058_v16  ;;  %v15536_v26 = vadd.f32 %v15535_v20, %v15534_v18  ;;  %15609 = vmatprep.subr.bf16.mxu0 %v18129_v15  ;;  %v18090_v16 = vld [vmem:[%s24473_s12 + $0xc8] sm:$0xff]   ;;  %v18091_v17 = vld [vmem:[%s24473_s12 + $0xd0] sm:$0xff]  }
 0xbaf   : > { %v18131_v18 = vld [vmem:[%s24474_s13 + $0x68] sm:$0xff]  }
 0xbb0   : > { %v7102_v0 = vadd.f32 %v15536_v26, %v7061_v22  ;;  %v18132_v20 = vld [vmem:[%s24474_s13 + $0x28] sm:$0xff]   ;;  %v18135_v22 = vld [vmem:[%s24474_s13 + $0x70] sm:$0xff]   ;;  %v18092_v26 = vld [vmem:[%s24473_s12 + $0xd8] sm:$0xff]  }
 0xbb1   : > { %15610 = vmatpush3.bf16.msra.mxu0 %v18130_v13  ;;  %v18143_v15 = vld [vmem:[%s24474_s13 + $0xc8] sm:$0xff]  }
 0xbb2   : > { %15611 = vmatprep.subr.bf16.mxu0 %v18131_v18  ;;  %v18146_v18 = vld [vmem:[%s24473_s12 + $0x1e8] sm:$0xff]  }
 0xbb5   : > { %15612 = vmatpush3.bf16.msra.mxu0 %v18132_v20  ;;  %v18147_v20 = vld [vmem:[%s24474_s13 + $0xd0] sm:$0xff]  }
 0xbb6   : > { %15613 = vmatprep.subr.bf16.mxu0 %v18135_v22 }
 0xbc2   : > { %v15553_v2 = vpop.f32.mrb[244].mxu1 }
 0xbc3   : > { %v15554_v19 = vpop.f32.mrb[245].mxu1 }
 0xbc4   : > { %v15555_v28 = vadd.f32 %v15554_v19, %v15553_v2  ;;  %v15556_v30 = vpop.f32.mrb[246].mxu1  ;;  %v18137_v2 = vld [vmem:[%s24474_s13 + $0x78] sm:$0xff]  }
 0xbc5   : > { %v15557_v31 = vpop.f32.mrb[247].mxu1  ;;  %v18138_v19 = vld [vmem:[%s24474_s13 + $0x38] sm:$0xff]  }
 0xbc6   : > { %v7140_v32 = vadd.f32 %v15555_v28, %v7099_v25  ;;  %v15558_v33 = vadd.f32 %v15557_v31, %v15556_v30  ;;  %v18136_v25 = vld [vmem:[%s24474_s13 + $0x30] sm:$0xff]   ;;  %v18141_v28 = vld [vmem:[%s24474_s13 + $0xc0] sm:$0xff]   ;;  %v18094_v30 = vld [vmem:[%s24473_s12 + $0xe8] sm:$0xff]  }
 0xbc7   : > { %15614 = vmatpush3.bf16.msra.mxu0 %v18136_v25  ;;  %v18095_v31 = vld [vmem:[%s24473_s12 + $0xf0] sm:$0xff]  }
 0xbc8   : > { %v7143_v35 = vadd.f32 %v15558_v33, %v7102_v0  ;;  %v18093_v0 = vld [vmem:[%s24473_s12 + $0xe0] sm:$0xff]   ;;  %15615 = vmatprep.subr.bf16.mxu0 %v18137_v2  ;;  %v18155_v25 = vld [vmem:[%s24473_s12 + $0x1f0] sm:$0xff]  }
 0xbc9   : > { %v18097_v33 = vld [vmem:[%s24473_s12 + $0x100] sm:$0xff]  }
 0xbca   : > { %v15575_v38 = vpop.f32.mrb[164].mxu0 }
 0xbcb   : > { %v15576_v39 = vpop.f32.mrb[165].mxu0  ;;  %15616 = vmatpush3.bf16.msra.mxu0 %v18138_v19  ;;  %v18148_v19 = vld [vmem:[%s24474_s13 + $0x90] sm:$0xff]  }
 0xbcc   : > { %v15577_v40 = vadd.f32 %v15576_v39, %v15575_v38  ;;  %v15578_v41 = vpop.f32.mrb[166].mxu0  ;;  %15641 = vmatprep.subr.bf16.mxu0 %v18141_v28  ;;  %v18099_v38 = vld [vmem:[%s24473_s12 + $0x110] sm:$0xff]   ;;  %v18100_v39 = vld [vmem:[%s24473_s12 + $0x118] sm:$0xff]  }
 0xbcd   : > { %v15579_v42 = vpop.f32.mrb[167].mxu0  ;;  %v18149_v28 = vld [vmem:[%s24474_s13 + $0xd8] sm:$0xff]  }
 0xbce   : > { %v7181_v43 = vadd.f32 %v15577_v40, %v7140_v32  ;;  %v15580_v44 = vadd.f32 %v15579_v42, %v15578_v41  ;;  %v18096_v32 = vld [vmem:[%s24473_s12 + $0xf8] sm:$0xff]   ;;  %v18101_v40 = vld [vmem:[%s24473_s12 + $0x120] sm:$0xff]   ;;  %v18106_v42 = vld [vmem:[%s24473_s12 + $0x148] sm:$0xff]  }
 0xbcf   : > { %v18105_v41 = vld [vmem:[%s24473_s12 + $0x140] sm:$0xff]  }
 0xbd0   : > { %v7184_v45 = vadd.f32 %v15580_v44, %v7143_v35  ;;  %v7187_v47 = vmax.f32 %v7181_v43, 0.0  ;;  %v18098_v35 = vld [vmem:[%s24473_s12 + $0x108] sm:$0xff]   ;;  %v18107_v43 = vld [vmem:[%s24473_s12 + $0x150] sm:$0xff]   ;;  %v18108_v44 = vld [vmem:[%s24473_s12 + $0x158] sm:$0xff]  }
 0xbd2   : > { %v7188_v48 = vmax.f32 %v7184_v45, 0.0  ;;  %v18109_v45 = vld [vmem:[%s24473_s12 + $0x160] sm:$0xff]  }
 0xbd4   : > { %v20387_v49 = vpack.c.bf16 %v7188_v48, %v7187_v47  ;;  %v18110_v47 = vld [vmem:[%s24473_s12 + $0x168] sm:$0xff]   ;;  %v18111_v48 = vld [vmem:[%s24473_s12 + $0x170] sm:$0xff]  }
 0xbd6   : > { %16121 = vmatprep.subr.bf16.mxu1 %v20387_v49 }
 0xbd7   : > { %16122 = vmatpush3.bf16.msra.mxu1 %v20387_v49 }
 0xbd8   : > { %16155 = vmatprep.subr.bf16.mxu1 %v19846_v3 }
 0xbda   : > { %16124 = vmatmul.mubr.msk.bf16.vlgmr.msra.gmra.mrb[248].mxu1 %vm2740_vm4, %v18066_v52  ;;  %v18113_v52 = vld [vmem:[%s24473_s12 + $0x180] sm:$0xff]  }
 0xbdb   : > { %16156 = vmatpush3.bf16.msra.mxu1 %v19846_v3  ;;  %16127 = vmatprep.mubr.msk.bf16.mxu1 %vm2740_vm4, %v18067_v53  ;;  %v18114_v53 = vld [vmem:[%s24473_s12 + $0x188] sm:$0xff]  }
 0xbdc   : > { %16157 = vmatprep.subr.bf16.mxu1 %v20064_v10 }
 0xbdf   : > { %16158 = vmatpush3.bf16.msra.mxu1 %v20064_v10 }
 0xbe0   : > { %16159 = vmatprep.subr.bf16.mxu1 %v20294_v4 }
 0xbe2   : > { %16128 = vmatmul.mubr.msk.bf16.gmra.mrb[252].mxu1 %vm2740_vm4, %v18068_v54  ;;  %v18115_v54 = vld [vmem:[%s24473_s12 + $0x190] sm:$0xff]  }
 0xbe3   : > { %16160 = vmatpush3.bf16.msra.mxu1 %v20294_v4  ;;  %16131 = vmatprep.mubr.msk.bf16.mxu1 %vm2740_vm4, %v18069_v55  ;;  %v18116_v55 = vld [vmem:[%s24473_s12 + $0x198] sm:$0xff]  }
 0xbe4   : > { %16161 = vmatprep.subr.bf16.mxu1 %v20387_v49 }
 0xbe7   : > { %16162 = vmatpush3.bf16.msra.mxu1 %v20387_v49 }
 0xbe8   : > { %16195 = vmatprep.subr.bf16.mxu1 %v19846_v3 }
 0xbea   : > { %16132 = vmatmul.mubr.msk.bf16.gmra.mrb[0].mxu1 %vm2740_vm4, %v18070_v56  ;;  %v18121_v56 = vld [vmem:[%s24473_s12 + $0x1a0] sm:$0xff]  }
 0xbeb   : > { %16135 = vmatprep.mubr.msk.bf16.mxu1 %vm2740_vm4, %v18071_v57  ;;  %v18122_v57 = vld [vmem:[%s24473_s12 + $0x1a8] sm:$0xff]  }
 0xbf2   : > { %16136 = vmatmul.mubr.msk.bf16.gmra.mrb[4].mxu1 %vm2740_vm4, %v18072_v58  ;;  %v18127_v58 = vld [vmem:[%s24473_s12 + $0x1b0] sm:$0xff]  }
 0xbf3   : > { %16139 = vmatprep.mubr.msk.bf16.mxu1 %vm2740_vm4, %v18073_v59 }
 0xbfa   : > { %16140 = vmatmul.mubr.msk.bf16.gmra.mrb[8].mxu1 %vm2740_vm4, %v18074_v60 }
 0xbfb   : > { %16143 = vmatprep.mubr.msk.bf16.mxu1 %vm2740_vm4, %v18075_v24  ;;  %v18128_v24 = vld [vmem:[%s24473_s12 + $0x1b8] sm:$0xff]  }
 0xc02   : > { %16144 = vmatmul.mubr.msk.bf16.gmra.mrb[12].mxu1 %vm2740_vm4, %v18076_v27 }
 0xc03   : > { %16147 = vmatprep.mubr.msk.bf16.mxu1 %vm2740_vm4, %v18077_v29  ;;  %v18133_v29 = vld [vmem:[%s24473_s12 + $0x1c0] sm:$0xff]  }
 0xc0a   : > { %16148 = vmatmul.mubr.msk.bf16.gmra.mrb[16].mxu1 %vm2740_vm4, %v18078_v61 }
 0xc0b   : > { %16151 = vmatprep.mubr.msk.bf16.mxu1 %vm2740_vm4, %v18079_v63 }
 0xc12   : > { %16152 = vmatmul.mubr.msk.bf16.gmra.mrb[20].mxu1 %vm2740_vm4, %v18080_v1 }
 0xc13   : > { %16163 = vmatprep.mubr.msk.bf16.mxu1 %vm2740_vm4, %v18081_v62 }
 0xc1a   : > { %16164 = vmatmul.mubr.msk.bf16.vlgmr.msra.gmra.mrb[24].mxu1 %vm2740_vm4, %v18082_v5 }
 0xc1b   : > { %16196 = vmatpush3.bf16.msra.mxu1 %v19846_v3  ;;  %16167 = vmatprep.mubr.msk.bf16.mxu1 %vm2740_vm4, %v18083_v6  ;;  %v18134_v6 = vld [vmem:[%s24473_s12 + $0x1c8] sm:$0xff]  }
 0xc1c   : > { %16197 = vmatprep.subr.bf16.mxu1 %v20064_v10 }
 0xc1f   : > { %16198 = vmatpush3.bf16.msra.mxu1 %v20064_v10 }
 0xc20   : > { %16199 = vmatprep.subr.bf16.mxu1 %v20294_v4 }
 0xc22   : > { %16168 = vmatmul.mubr.msk.bf16.gmra.mrb[28].mxu1 %vm2740_vm4, %v18084_v7 }
 0xc23   : > { %16200 = vmatpush3.bf16.msra.mxu1 %v20294_v4  ;;  %16171 = vmatprep.mubr.msk.bf16.mxu1 %vm2740_vm4, %v18085_v8  ;;  %v18139_v8 = vld [vmem:[%s24473_s12 + $0x1d0] sm:$0xff]  }
 0xc24   : > { %16201 = vmatprep.subr.bf16.mxu1 %v20387_v49 }
 0xc27   : > { %16202 = vmatpush3.bf16.msra.mxu1 %v20387_v49 }
 0xc28   : > { %16235 = vmatprep.subr.bf16.mxu1 %v19846_v3 }
 0xc2a   : > { %16172 = vmatmul.mubr.msk.bf16.gmra.mrb[32].mxu1 %vm2740_vm4, %v18086_v50 }
 0xc2b   : > { %16175 = vmatprep.mubr.msk.bf16.mxu1 %vm2740_vm4, %v18087_v51  ;;  %v18140_v51 = vld [vmem:[%s24473_s12 + $0x1d8] sm:$0xff]  }
 0xc32   : > { %16176 = vmatmul.mubr.msk.bf16.gmra.mrb[36].mxu1 %vm2740_vm4, %v18088_v11 }
 0xc33   : > { %16179 = vmatprep.mubr.msk.bf16.mxu1 %vm2740_vm4, %v18089_v34 }
 0xc3a   : > { %16180 = vmatmul.mubr.msk.bf16.gmra.mrb[40].mxu1 %vm2740_vm4, %v18090_v16  ;;  %v18144_v16 = vld [vmem:[%s24474_s13 + $0x88] sm:$0xff]  }
 0xc3b   : > { %16183 = vmatprep.mubr.msk.bf16.mxu1 %vm2740_vm4, %v18091_v17 }
 0xc42   : > { %16184 = vmatmul.mubr.msk.bf16.gmra.mrb[44].mxu1 %vm2740_vm4, %v18092_v26 }
 0xc43   : > { %16187 = vmatprep.mubr.msk.bf16.mxu1 %vm2740_vm4, %v18093_v0 }
 0xc4a   : > { %16188 = vmatmul.mubr.msk.bf16.gmra.mrb[48].mxu1 %vm2740_vm4, %v18094_v30 }
 0xc4b   : > { %16191 = vmatprep.mubr.msk.bf16.mxu1 %vm2740_vm4, %v18095_v31  ;;  %v18150_v31 = vld [vmem:[%s24474_s13 + $0x98] sm:$0xff]  }
 0xc52   : > { %16192 = vmatmul.mubr.msk.bf16.gmra.mrb[52].mxu1 %vm2740_vm4, %v18096_v32 }
 0xc53   : > { %16203 = vmatprep.mubr.msk.bf16.mxu1 %vm2740_vm4, %v18097_v33  ;;  %v18151_v33 = vld [vmem:[%s24474_s13 + $0xe0] sm:$0xff]  }
 0xc5a   : > { %16204 = vmatmul.mubr.msk.bf16.vlgmr.msra.gmra.mrb[56].mxu1 %vm2740_vm4, %v18098_v35  ;;  %v18156_v35 = vld [vmem:[%s24473_s12 + $0x1f8] sm:$0xff]  }
 0xc5b   : > { %16236 = vmatpush3.bf16.msra.mxu1 %v19846_v3  ;;  %16207 = vmatprep.mubr.msk.bf16.mxu1 %vm2740_vm4, %v18099_v38  ;;  %v18102_v3 = vld [vmem:[%s24473_s12 + $0x128] sm:$0xff]  }
 0xc5c   : > { %16237 = vmatprep.subr.bf16.mxu1 %v20064_v10 }
 0xc5f   : > { %16238 = vmatpush3.bf16.msra.mxu1 %v20064_v10  ;;  %v18103_v10 = vld [vmem:[%s24473_s12 + $0x130] sm:$0xff]  }
 0xc60   : > { %16239 = vmatprep.subr.bf16.mxu1 %v20294_v4 }
 0xc62   : > { %16208 = vmatmul.mubr.msk.bf16.gmra.mrb[60].mxu1 %vm2740_vm4, %v18100_v39 }
 0xc63   : > { %16240 = vmatpush3.bf16.msra.mxu1 %v20294_v4  ;;  %16211 = vmatprep.mubr.msk.bf16.mxu1 %vm2740_vm4, %v18101_v40  ;;  %v18104_v4 = vld [vmem:[%s24473_s12 + $0x138] sm:$0xff]  }
 0xc64   : > { %16241 = vmatprep.subr.bf16.mxu1 %v20387_v49 }
 0xc67   : > { %16242 = vmatpush3.bf16.msra.mxu1 %v20387_v49  ;;  %v18112_v49 = vld [vmem:[%s24473_s12 + $0x178] sm:$0xff]  }
 0xc6a   : > { %16212 = vmatmul.mubr.msk.bf16.gmra.mrb[64].mxu1 %vm2740_vm4, %v18102_v3 }
 0xc6b   : > { %16215 = vmatprep.mubr.msk.bf16.mxu1 %vm2740_vm4, %v18103_v10  ;;  %v18152_v10 = vld [vmem:[%s24474_s13 + $0xa0] sm:$0xff]  }
 0xc72   : > { %16216 = vmatmul.mubr.msk.bf16.gmra.mrb[68].mxu1 %vm2740_vm4, %v18104_v4  ;;  %v18153_v4 = vld [vmem:[%s24474_s13 + $0xe8] sm:$0xff]  }
 0xc73   : > { %16219 = vmatprep.mubr.msk.bf16.mxu1 %vm2740_vm4, %v18105_v41 }
 0xc7a   : > { %16220 = vmatmul.mubr.msk.bf16.gmra.mrb[72].mxu1 %vm2740_vm4, %v18106_v42  ;;  %v18154_v42 = vld [vmem:[%s24474_s13 + $0xa8] sm:$0xff]  }
 0xc7b   : > { %16223 = vmatprep.mubr.msk.bf16.mxu1 %vm2740_vm4, %v18107_v43 }
 0xc82   : > { %16224 = vmatmul.mubr.msk.bf16.gmra.mrb[76].mxu1 %vm2740_vm4, %v18108_v44  ;;  %v18157_v44 = vld [vmem:[%s24474_s13 + $0xf0] sm:$0xff]  }
 0xc83   : > { %16227 = vmatprep.mubr.msk.bf16.mxu1 %vm2740_vm4, %v18109_v45 }
 0xc8a   : > { %16228 = vmatmul.mubr.msk.bf16.gmra.mrb[80].mxu1 %vm2740_vm4, %v18110_v47 }
 0xc8b   : > { %16231 = vmatprep.mubr.msk.bf16.mxu1 %vm2740_vm4, %v18111_v48 }
 0xc92   : > { %16232 = vmatmul.mubr.msk.bf16.gmra.mrb[84].mxu1 %vm2740_vm4, %v18112_v49 }
 0xc93   : > { %16243 = vmatprep.mubr.msk.bf16.mxu1 %vm2740_vm4, %v18113_v52  ;;  %v18158_v52 = vld [vmem:[%s24474_s13 + $0xb0] sm:$0xff]  }
 0xc9a   : > { %16244 = vmatmul.mubr.msk.bf16.vlgmr.msra.gmra.mrb[88].mxu1 %vm2740_vm4, %v18114_v53  ;;  %v18159_v53 = vld [vmem:[%s24474_s13 + $0xf8] sm:$0xff]  }
 0xc9b   : > { %16247 = vmatprep.mubr.msk.bf16.mxu1 %vm2740_vm4, %v18115_v54 }
 0xca2   : > { %16248 = vmatmul.mubr.msk.bf16.gmra.mrb[92].mxu1 %vm2740_vm4, %v18116_v55  ;;  %v18160_v55 = vld [vmem:[%s24474_s13 + $0xb8] sm:$0xff]  }
 0xca3   : > { %16251 = vmatprep.mubr.msk.bf16.mxu1 %vm2740_vm4, %v18121_v56 }
 0xcaa   : > { %16252 = vmatmul.mubr.msk.bf16.gmra.mrb[96].mxu1 %vm2740_vm4, %v18122_v57  ;;  %v18161_v57 = vld [vmem:[%s24474_s13 + $0x140] sm:$0xff]  }
 0xcab   : > { %16255 = vmatprep.mubr.msk.bf16.mxu1 %vm2740_vm4, %v18127_v58 }
 0xcad   : > { %v16125_v59 = vpop.f32.mrb[248].mxu1 }
 0xcae   : > { %v7387_v60 = vpop.f32.mrb[249].mxu1 }
 0xcaf   : > { %v16126_v27 = vpop.f32.mrb[250].mxu1 }
 0xcb0   : > { %v7515_v61 = vpack.c.bf16 %v16126_v27, %v16125_v59  ;;  %v7390_v63 = vpop.f32.mrb[251].mxu1  ;;  %v18162_v27 = vld [vmem:[%s24474_s13 + $0x100] sm:$0xff]  }
 0xcb1   : > { %v7514_v1 = vpack.c.bf16 %v7390_v63, %v7387_v60  ;;  %v18164_v63 = vld [vmem:[%s24474_s13 + $0x108] sm:$0xff]  }
 0xcb2   : > { %16256 = vmatmul.mubr.msk.bf16.gmra.mrb[100].mxu1 %vm2740_vm4, %v18128_v24 }
 0xcb3   : > { %16259 = vmatprep.mubr.msk.bf16.mxu1 %vm2740_vm4, %v18133_v29  ;;  %v18163_v29 = vld [vmem:[%s24474_s13 + $0x148] sm:$0xff]  }
 0xcb5   : > { %v20690_v62 = vpop.f32.mrb[252].mxu1 }
 0xcb6   : > { %v7403_v5 = vpop.f32.mrb[253].mxu1 }
 0xcb7   : > { %v20695_v7 = vpop.f32.mrb[254].mxu1 }
 0xcb8   : > { %v7517_v37 = vpack.c.bf16 %v20695_v7, %v20690_v62  ;;  %v7406_v36 = vpop.f32.mrb[255].mxu1  ;;  %v18165_v62 = vld [vmem:[%s24474_s13 + $0x150] sm:$0xff]  }
 0xcb9   : > { %v7516_v9 = vpack.c.bf16 %v7406_v36, %v7403_v5  ;;  %v18167_v36 = vld [vmem:[%s24474_s13 + $0x158] sm:$0xff]  }
 0xcba   : > { %16260 = vmatmul.mubr.msk.bf16.gmra.mrb[104].mxu1 %vm2740_vm4, %v18134_v6 }
 0xcbb   : > { %16263 = vmatprep.mubr.msk.bf16.mxu1 %vm2740_vm4, %v18139_v8 }
 0xcbd   : > { %v16133_v46 = vpop.f32.mrb[0].mxu1 }
 0xcbe   : > { %v7419_v50 = vpop.f32.mrb[1].mxu1 }
 0xcbf   : > { %v16134_v23 = vpop.f32.mrb[2].mxu1 }
 0xcc0   : > { %v7519_v11 = vpack.c.bf16 %v16134_v23, %v16133_v46  ;;  %v7422_v34 = vpop.f32.mrb[3].mxu1  ;;  %v18168_v46 = vld [vmem:[%s24474_s13 + $0x118] sm:$0xff]  }
 0xcc1   : > { %v7518_v12 = vpack.c.bf16 %v7422_v34, %v7419_v50 }
 0xcc2   : > { %16264 = vmatmul.mubr.msk.bf16.gmra.mrb[108].mxu1 %vm2740_vm4, %v18140_v51  ;;  %v18169_v51 = vld [vmem:[%s24474_s13 + $0x160] sm:$0xff]  }
 0xcc3   : > { %7825 = vmatprep.mubr.bf16.mxu0 %v7518_v12  ;;  %16267 = vmatprep.mubr.msk.bf16.mxu1 %vm2740_vm4, %v18145_v21  ;;  %v18170_v12 = vld [vmem:[%s24474_s13 + $0x120] sm:$0xff]  }
 0xcc4   : > { %7826 = vmatmul.mubr.bf16.vlgmr.msra.gmra.mrb[168].mxu0 %v7514_v1 }
 0xcc5   : > { %7833 = vmatprep.mubr.bf16.mxu0 %v7519_v11  ;;  %15642 = vmatpush3.bf16.msra.mxu0 %v18142_v14  ;;  %v16137_v13 = vpop.f32.mrb[4].mxu1  ;;  %v18171_v14 = vld [vmem:[%s24474_s13 + $0x168] sm:$0xff]  }
 0xcc6   : > { %v7435_v17 = vpop.f32.mrb[5].mxu1  ;;  %15643 = vmatprep.subr.bf16.mxu0 %v18143_v15 }
 0xcc7   : > { %v16138_v22 = vpop.f32.mrb[6].mxu1 }
 0xcc8   : > { %v7521_v26 = vpack.c.bf16 %v16138_v22, %v16137_v13  ;;  %v7438_v0 = vpop.f32.mrb[7].mxu1  ;;  %v18172_v13 = vld [vmem:[%s24474_s13 + $0x128] sm:$0xff]  }
 0xcc9   : > { %v7520_v2 = vpack.c.bf16 %v7438_v0, %v7435_v17  ;;  %15644 = vmatpush3.bf16.msra.mxu0 %v18144_v16  ;;  %v18173_v17 = vld [vmem:[%s24474_s13 + $0x170] sm:$0xff]   ;;  %v18175_v0 = vld [vmem:[%s24474_s13 + $0x178] sm:$0xff]  }
 0xcca   : > { %16268 = vmatmul.mubr.msk.bf16.gmra.mrb[112].mxu1 %vm2740_vm4, %v18146_v18  ;;  %15645 = vmatprep.subr.bf16.mxu0 %v18147_v20 }
 0xccb   : > { %16271 = vmatprep.mubr.msk.bf16.mxu1 %vm2740_vm4, %v18155_v25 }
 0xccc   : > { %7834 = vmatmul.mubr.bf16.gmra.mrb[172].mxu0 %v7515_v61 }
 0xccd   : > { %7841 = vmatprep.mubr.bf16.mxu0 %v7520_v2  ;;  %15646 = vmatpush3.bf16.msra.mxu0 %v18148_v19  ;;  %v20738_v30 = vpop.f32.mrb[8].mxu1  ;;  %v18176_v19 = vld [vmem:[%s24474_s13 + $0x138] sm:$0xff]  }
 0xcce   : > { %v7451_v32 = vpop.f32.mrb[9].mxu1  ;;  %15647 = vmatprep.subr.bf16.mxu0 %v18149_v28 }
 0xccf   : > { %v16142_v38 = vpop.f32.mrb[10].mxu1 }
 0xcd0   : > { %v7523_v39 = vpack.c.bf16 %v16142_v38, %v20738_v30  ;;  %v7454_v40 = vpop.f32.mrb[11].mxu1  ;;  %v18177_v30 = vld [vmem:[%s24474_s13 + $0x1c0] sm:$0xff]  }
 0xcd1   : > { %v7522_v3 = vpack.c.bf16 %v7454_v40, %v7451_v32  ;;  %15648 = vmatpush3.bf16.msra.mxu0 %v18150_v31  ;;  %v18178_v38 = vld [vmem:[%s24474_s13 + $0x180] sm:$0xff]  }
 0xcd2   : > { %15649 = vmatprep.subr.bf16.mxu0 %v18151_v33  ;;  %16272 = vmatmul.mubr.msk.bf16.gmra.mrb[116].mxu1 %vm2740_vm4, %v18156_v35 }
 0xcd4   : > { %7842 = vmatmul.mubr.bf16.gmra.mrb[176].mxu0 %v7516_v9 }
 0xcd5   : > { %7849 = vmatprep.mubr.bf16.mxu0 %v7521_v26  ;;  %15650 = vmatpush3.bf16.msra.mxu0 %v18152_v10  ;;  %v20757_v41 = vpop.f32.mrb[12].mxu1  ;;  %v18174_v26 = vld [vmem:[%s24474_s13 + $0x130] sm:$0xff]  }
 0xcd6   : > { %v7467_v43 = vpop.f32.mrb[13].mxu1  ;;  %15651 = vmatprep.subr.bf16.mxu0 %v18153_v4  ;;  %v18181_v4 = vld [vmem:[%s24474_s13 + $0x1d0] sm:$0xff]  }
 0xcd7   : > { %v20765_v45 = vpop.f32.mrb[14].mxu1 }
 0xcd8   : > { %v7525_v47 = vpack.c.bf16 %v20765_v45, %v20757_v41  ;;  %v7470_v48 = vpop.f32.mrb[15].mxu1  ;;  %v18182_v45 = vld [vmem:[%s24474_s13 + $0x190] sm:$0xff]  }
 0xcd9   : > { %v7524_v49 = vpack.c.bf16 %v7470_v48, %v7467_v43  ;;  %15652 = vmatpush3.bf16.msra.mxu0 %v18154_v42 }
 0xcda   : > { %15653 = vmatprep.subr.bf16.mxu0 %v18157_v44 }
 0xcdc   : > { %7850 = vmatmul.mubr.bf16.gmra.mrb[180].mxu0 %v7517_v37  ;;  %v18166_v37 = vld [vmem:[%s24474_s13 + $0x110] sm:$0xff]  }
 0xcdd   : > { %v16149_v54 = vpop.f32.mrb[16].mxu1  ;;  %15654 = vmatpush3.bf16.msra.mxu0 %v18158_v52 }
 0xcde   : > { %v7483_v56 = vpop.f32.mrb[17].mxu1  ;;  %15655 = vmatprep.subr.bf16.mxu0 %v18159_v53  ;;  %v18185_v53 = vld [vmem:[%s24474_s13 + $0x1e0] sm:$0xff]  }
 0xcdf   : > { %v16150_v58 = vpop.f32.mrb[18].mxu1 }
 0xce0   : > { %v7527_v59 = vpack.c.bf16 %v16150_v58, %v16149_v54  ;;  %v7486_v60 = vpop.f32.mrb[19].mxu1  ;;  %v18186_v58 = vld [vmem:[%s24474_s13 + $0x1a0] sm:$0xff]  }
 0xce1   : > { %v7526_v24 = vpack.c.bf16 %v7486_v60, %v7483_v56  ;;  %15656 = vmatpush3.bf16.msra.mxu0 %v18160_v55 }
 0xce2   : > { %15701 = vmatprep.subr.bf16.mxu0 %v18161_v57 }
 0xce3   : > { %7890 = vmatprep.mubr.bf16.mxu0 %v7526_v24  ;;  %v18188_v24 = vld [vmem:[%s24474_s13 + $0x1a8] sm:$0xff]  }
 0xce4   : > { %7891 = vmatmul.mubr.bf16.vlgmr.msra.gmra.mrb[184].mxu0 %v7522_v3  ;;  %v18180_v3 = vld [vmem:[%s24474_s13 + $0x188] sm:$0xff]  }
 0xce5   : > { %7898 = vmatprep.mubr.bf16.mxu0 %v7527_v59  ;;  %15702 = vmatpush3.bf16.msra.mxu0 %v18162_v27  ;;  %v16153_v61 = vpop.f32.mrb[20].mxu1  ;;  %v18187_v59 = vld [vmem:[%s24474_s13 + $0x1e8] sm:$0xff]  }
 0xce6   : > { %v7499_v1 = vpop.f32.mrb[21].mxu1  ;;  %15703 = vmatprep.subr.bf16.mxu0 %v18163_v29  ;;  %v18189_v29 = vld [vmem:[%s24474_s13 + $0x1f0] sm:$0xff]  }
 0xce7   : > { %v16154_v5 = vpop.f32.mrb[22].mxu1 }
 0xce8   : > { %v7529_v6 = vpack.c.bf16 %v16154_v5, %v16153_v61  ;;  %v7502_v7 = vpop.f32.mrb[23].mxu1  ;;  %v18190_v5 = vld [vmem:[%s24474_s13 + $0x1b0] sm:$0xff]  }
 0xce9   : > { %v7528_v8 = vpack.c.bf16 %v7502_v7, %v7499_v1  ;;  %15704 = vmatpush3.bf16.msra.mxu0 %v18164_v63 }
 0xcea   : > { %15705 = vmatprep.subr.bf16.mxu0 %v18165_v62 }
 0xcec   : > { %7899 = vmatmul.mubr.bf16.gmra.mrb[188].mxu0 %v7523_v39  ;;  %v18179_v39 = vld [vmem:[%s24474_s13 + $0x1c8] sm:$0xff]  }
 0xced   : > { %7906 = vmatprep.mubr.bf16.mxu0 %v7528_v8  ;;  %15706 = vmatpush3.bf16.msra.mxu0 %v18166_v37  ;;  %v16165_v9 = vpop.f32.mrb[24].mxu1  ;;  %v18192_v8 = vld [vmem:[%s24474_s13 + $0x1b8] sm:$0xff]  }
 0xcee   : > { %v8126_v50 = vpop.f32.mrb[25].mxu1  ;;  %15707 = vmatprep.subr.bf16.mxu0 %v18167_v36  ;;  %v18193_v36 = vld [vmem:[%s24474_s13 + $0x240] sm:$0xff]  }
 0xcef   : > { %v16166_v23 = vpop.f32.mrb[26].mxu1 }
 0xcf0   : > { %v8254_v21 = vpack.c.bf16 %v16166_v23, %v16165_v9  ;;  %v8129_v11 = vpop.f32.mrb[27].mxu1  ;;  %v18194_v23 = vld [vmem:[%s24474_s13 + $0x200] sm:$0xff]  }
 0xcf1   : > { %v8253_v34 = vpack.c.bf16 %v8129_v11, %v8126_v50  ;;  %15708 = vmatpush3.bf16.msra.mxu0 %v18168_v46 }
 0xcf2   : > { %15709 = vmatprep.subr.bf16.mxu0 %v18169_v51 }
 0xcf4   : > { %7907 = vmatmul.mubr.bf16.gmra.mrb[192].mxu0 %v7524_v49  ;;  %v18184_v49 = vld [vmem:[%s24474_s13 + $0x198] sm:$0xff]  }
 0xcf5   : > { %7914 = vmatprep.mubr.bf16.mxu0 %v7529_v6  ;;  %15710 = vmatpush3.bf16.msra.mxu0 %v18170_v12  ;;  %v20814_v15 = vpop.f32.mrb[28].mxu1  ;;  %v18191_v6 = vld [vmem:[%s24474_s13 + $0x1f8] sm:$0xff]  }
 0xcf6   : > { %v8142_v16 = vpop.f32.mrb[29].mxu1  ;;  %15711 = vmatprep.subr.bf16.mxu0 %v18171_v14  ;;  %v18197_v14 = vld [vmem:[%s24474_s13 + $0x250] sm:$0xff]  }
 0xcf7   : > { %v20822_v18 = vpop.f32.mrb[30].mxu1 }
 0xcf8   : > { %v8256_v20 = vpack.c.bf16 %v20822_v18, %v20814_v15  ;;  %v8145_v22 = vpop.f32.mrb[31].mxu1  ;;  %v18198_v18 = vld [vmem:[%s24474_s13 + $0x210] sm:$0xff]  }
 0xcf9   : > { %v8255_v25 = vpack.c.bf16 %v8145_v22, %v8142_v16  ;;  %15712 = vmatpush3.bf16.msra.mxu0 %v18172_v13 }
 0xcfa   : > { %15713 = vmatprep.subr.bf16.mxu0 %v18173_v17 }
 0xcfc   : > { %7915 = vmatmul.mubr.bf16.gmra.mrb[196].mxu0 %v7525_v47  ;;  %v18183_v47 = vld [vmem:[%s24474_s13 + $0x1d8] sm:$0xff]  }
 0xcfd   : > { %v16173_v2 = vpop.f32.mrb[32].mxu1  ;;  %15714 = vmatpush3.bf16.msra.mxu0 %v18174_v26 }
 0xcfe   : > { %v8158_v28 = vpop.f32.mrb[33].mxu1  ;;  %15715 = vmatprep.subr.bf16.mxu0 %v18175_v0  ;;  %v18201_v0 = vld [vmem:[%s24474_s13 + $0x260] sm:$0xff]  }
 0xcff   : > { %v16174_v31 = vpop.f32.mrb[34].mxu1 }
 0xd00   : > { %v8258_v32 = vpack.c.bf16 %v16174_v31, %v16173_v2  ;;  %v8161_v33 = vpop.f32.mrb[35].mxu1  ;;  %v18202_v31 = vld [vmem:[%s24474_s13 + $0x220] sm:$0xff]  }
 0xd01   : > { %v8257_v35 = vpack.c.bf16 %v8161_v33, %v8158_v28  ;;  %15716 = vmatpush3.bf16.msra.mxu0 %v18176_v19 }
 0xd02   : > { %15741 = vmatprep.subr.bf16.mxu0 %v18177_v30 }
 0xd03   : > { %8558 = vmatprep.mubr.bf16.mxu0 %v8257_v35  ;;  %v18204_v35 = vld [vmem:[%s24474_s13 + $0x228] sm:$0xff]  }
 0xd04   : > { %8559 = vmatmul.mubr.bf16.vlgmr.msra.gmra.mrb[200].mxu0 %v8253_v34  ;;  %v18196_v34 = vld [vmem:[%s24474_s13 + $0x208] sm:$0xff]  }
 0xd05   : > { %8566 = vmatprep.mubr.bf16.mxu0 %v8258_v32  ;;  %15742 = vmatpush3.bf16.msra.mxu0 %v18178_v38  ;;  %v16177_v40 = vpop.f32.mrb[36].mxu1  ;;  %v18203_v32 = vld [vmem:[%s24474_s13 + $0x268] sm:$0xff]  }
 0xd06   : > { %v8174_v10 = vpop.f32.mrb[37].mxu1  ;;  %15743 = vmatprep.subr.bf16.mxu0 %v18179_v39  ;;  %v18205_v39 = vld [vmem:[%s24474_s13 + $0x270] sm:$0xff]  }
 0xd07   : > { %v16178_v41 = vpop.f32.mrb[38].mxu1 }
 0xd08   : > { %v8260_v42 = vpack.c.bf16 %v16178_v41, %v16177_v40  ;;  %v8177_v43 = vpop.f32.mrb[39].mxu1  ;;  %v18206_v41 = vld [vmem:[%s24474_s13 + $0x230] sm:$0xff]  }
 0xd09   : > { %v8259_v44 = vpack.c.bf16 %v8177_v43, %v8174_v10  ;;  %15744 = vmatpush3.bf16.msra.mxu0 %v18180_v3 }
 0xd0a   : > { %15745 = vmatprep.subr.bf16.mxu0 %v18181_v4 }
 0xd0c   : > { %8567 = vmatmul.mubr.bf16.gmra.mrb[204].mxu0 %v8254_v21  ;;  %v18195_v21 = vld [vmem:[%s24474_s13 + $0x248] sm:$0xff]  }
 0xd0d   : > { %8574 = vmatprep.mubr.bf16.mxu0 %v8259_v44  ;;  %15746 = vmatpush3.bf16.msra.mxu0 %v18182_v45  ;;  %v16181_v48 = vpop.f32.mrb[40].mxu1  ;;  %v18208_v44 = vld [vmem:[%s24474_s13 + $0x238] sm:$0xff]  }
 0xd0e   : > { %v8190_v52 = vpop.f32.mrb[41].mxu1  ;;  %15747 = vmatprep.subr.bf16.mxu0 %v18183_v47  ;;  %v18209_v47 = vld [vmem:[%s24474_s13 + $0x2c0] sm:$0xff]  }
 0xd0f   : > { %v16182_v54 = vpop.f32.mrb[42].mxu1 }
 0xd10   : > { %v8262_v55 = vpack.c.bf16 %v16182_v54, %v16181_v48  ;;  %v8193_v56 = vpop.f32.mrb[43].mxu1  ;;  %v18210_v54 = vld [vmem:[%s24474_s13 + $0x280] sm:$0xff]  }
 0xd11   : > { %v8261_v57 = vpack.c.bf16 %v8193_v56, %v8190_v52  ;;  %15748 = vmatpush3.bf16.msra.mxu0 %v18184_v49 }
 0xd12   : > { %15749 = vmatprep.subr.bf16.mxu0 %v18185_v53 }
 0xd14   : > { %8575 = vmatmul.mubr.bf16.gmra.mrb[208].mxu0 %v8255_v25  ;;  %v18200_v25 = vld [vmem:[%s24474_s13 + $0x218] sm:$0xff]  }
 0xd15   : > { %8582 = vmatprep.mubr.bf16.mxu0 %v8260_v42  ;;  %15750 = vmatpush3.bf16.msra.mxu0 %v18186_v58  ;;  %v20871_v60 = vpop.f32.mrb[44].mxu1  ;;  %v18207_v42 = vld [vmem:[%s24474_s13 + $0x278] sm:$0xff]  }
 0xd16   : > { %v8206_v27 = vpop.f32.mrb[45].mxu1  ;;  %15751 = vmatprep.subr.bf16.mxu0 %v18187_v59  ;;  %v18213_v59 = vld [vmem:[%s24474_s13 + $0x2d0] sm:$0xff]  }
 0xd17   : > { %v20879_v61 = vpop.f32.mrb[46].mxu1 }
 0xd18   : > { %v8264_v63 = vpack.c.bf16 %v20879_v61, %v20871_v60  ;;  %v8209_v1 = vpop.f32.mrb[47].mxu1  ;;  %v18214_v61 = vld [vmem:[%s24474_s13 + $0x290] sm:$0xff]  }
 0xd19   : > { %v8263_v62 = vpack.c.bf16 %v8209_v1, %v8206_v27  ;;  %15752 = vmatpush3.bf16.msra.mxu0 %v18188_v24 }
 0xd1a   : > { %15753 = vmatprep.subr.bf16.mxu0 %v18189_v29 }
 0xd1c   : > { %8583 = vmatmul.mubr.bf16.gmra.mrb[212].mxu0 %v8256_v20  ;;  %v18199_v20 = vld [vmem:[%s24474_s13 + $0x258] sm:$0xff]  }
 0xd1d   : > { %v16189_v7 = vpop.f32.mrb[48].mxu1  ;;  %15754 = vmatpush3.bf16.msra.mxu0 %v18190_v5 }
 0xd1e   : > { %v8222_v37 = vpop.f32.mrb[49].mxu1  ;;  %15755 = vmatprep.subr.bf16.mxu0 %v18191_v6  ;;  %v18217_v6 = vld [vmem:[%s24474_s13 + $0x2e0] sm:$0xff]  }
 0xd1f   : > { %v16190_v9 = vpop.f32.mrb[50].mxu1 }
 0xd20   : > { %v8266_v46 = vpack.c.bf16 %v16190_v9, %v16189_v7  ;;  %v8225_v50 = vpop.f32.mrb[51].mxu1  ;;  %v18218_v9 = vld [vmem:[%s24474_s13 + $0x2a0] sm:$0xff]  }
 0xd21   : > { %v8265_v51 = vpack.c.bf16 %v8225_v50, %v8222_v37  ;;  %15756 = vmatpush3.bf16.msra.mxu0 %v18192_v8 }
 0xd22   : > { %15801 = vmatprep.subr.bf16.mxu0 %v18193_v36 }
 0xd23   : > { %8623 = vmatprep.mubr.bf16.mxu0 %v8265_v51  ;;  %v18220_v51 = vld [vmem:[%s24474_s13 + $0x2a8] sm:$0xff]  }
 0xd24   : > { %8624 = vmatmul.mubr.bf16.vlgmr.msra.gmra.mrb[216].mxu0 %v8261_v57  ;;  %v18212_v57 = vld [vmem:[%s24474_s13 + $0x288] sm:$0xff]  }
 0xd25   : > { %8631 = vmatprep.mubr.bf16.mxu0 %v8266_v46  ;;  %15802 = vmatpush3.bf16.msra.mxu0 %v18194_v23  ;;  %v16193_v11 = vpop.f32.mrb[52].mxu1  ;;  %v18219_v46 = vld [vmem:[%s24474_s13 + $0x2e8] sm:$0xff]  }
 0xd26   : > { %v8238_v12 = vpop.f32.mrb[53].mxu1  ;;  %15803 = vmatprep.subr.bf16.mxu0 %v18195_v21  ;;  %v18221_v21 = vld [vmem:[%s24474_s13 + $0x2f0] sm:$0xff]  }
 0xd27   : > { %v16194_v15 = vpop.f32.mrb[54].mxu1 }
 0xd28   : > { %v8268_v13 = vpack.c.bf16 %v16194_v15, %v16193_v11  ;;  %v8241_v16 = vpop.f32.mrb[55].mxu1  ;;  %v18222_v15 = vld [vmem:[%s24474_s13 + $0x2b0] sm:$0xff]  }
 0xd29   : > { %v8267_v17 = vpack.c.bf16 %v8241_v16, %v8238_v12  ;;  %15804 = vmatpush3.bf16.msra.mxu0 %v18196_v34 }
 0xd2a   : > { %15805 = vmatprep.subr.bf16.mxu0 %v18197_v14 }
 0xd2c   : > { %8632 = vmatmul.mubr.bf16.gmra.mrb[220].mxu0 %v8262_v55  ;;  %v18211_v55 = vld [vmem:[%s24474_s13 + $0x2c8] sm:$0xff]  }
 0xd2d   : > { %8639 = vmatprep.mubr.bf16.mxu0 %v8267_v17  ;;  %15806 = vmatpush3.bf16.msra.mxu0 %v18198_v18  ;;  %v16205_v22 = vpop.f32.mrb[56].mxu1  ;;  %v18224_v17 = vld [vmem:[%s24474_s13 + $0x2b8] sm:$0xff]  }
 0xd2e   : > { %v8859_v26 = vpop.f32.mrb[57].mxu1  ;;  %15807 = vmatprep.subr.bf16.mxu0 %v18199_v20  ;;  %v18225_v20 = vld [vmem:[%s24474_s13 + $0x340] sm:$0xff]  }
 0xd2f   : > { %v16206_v2 = vpop.f32.mrb[58].mxu1 }
 0xd30   : > { %v8987_v19 = vpack.c.bf16 %v16206_v2, %v16205_v22  ;;  %v8862_v28 = vpop.f32.mrb[59].mxu1  ;;  %v18226_v2 = vld [vmem:[%s24474_s13 + $0x300] sm:$0xff]  }
 0xd31   : > { %v8986_v30 = vpack.c.bf16 %v8862_v28, %v8859_v26  ;;  %15808 = vmatpush3.bf16.msra.mxu0 %v18200_v25 }
 0xd32   : > { %15809 = vmatprep.subr.bf16.mxu0 %v18201_v0 }
 0xd34   : > { %8640 = vmatmul.mubr.bf16.gmra.mrb[224].mxu0 %v8263_v62  ;;  %v18216_v62 = vld [vmem:[%s24474_s13 + $0x298] sm:$0xff]  }
 0xd35   : > { %8647 = vmatprep.mubr.bf16.mxu0 %v8268_v13  ;;  %15810 = vmatpush3.bf16.msra.mxu0 %v18202_v31  ;;  %v20928_v33 = vpop.f32.mrb[60].mxu1  ;;  %v18223_v13 = vld [vmem:[%s24474_s13 + $0x2f8] sm:$0xff]  }
 0xd36   : > { %v8875_v38 = vpop.f32.mrb[61].mxu1  ;;  %15811 = vmatprep.subr.bf16.mxu0 %v18203_v32  ;;  %v18229_v32 = vld [vmem:[%s24474_s13 + $0x350] sm:$0xff]  }
 0xd37   : > { %v20936_v40 = vpop.f32.mrb[62].mxu1 }
 0xd38   : > { %v8989_v3 = vpack.c.bf16 %v20936_v40, %v20928_v33  ;;  %v8878_v10 = vpop.f32.mrb[63].mxu1  ;;  %v18230_v40 = vld [vmem:[%s24474_s13 + $0x310] sm:$0xff]  }
 0xd39   : > { %v8988_v4 = vpack.c.bf16 %v8878_v10, %v8875_v38  ;;  %15812 = vmatpush3.bf16.msra.mxu0 %v18204_v35 }
 0xd3a   : > { %15813 = vmatprep.subr.bf16.mxu0 %v18205_v39 }
 0xd3c   : > { %8648 = vmatmul.mubr.bf16.gmra.mrb[228].mxu0 %v8264_v63  ;;  %v18215_v63 = vld [vmem:[%s24474_s13 + $0x2d8] sm:$0xff]  }
 0xd3d   : > { %v16213_v43 = vpop.f32.mrb[64].mxu1  ;;  %15814 = vmatpush3.bf16.msra.mxu0 %v18206_v41 }
 0xd3e   : > { %v8891_v45 = vpop.f32.mrb[65].mxu1  ;;  %15815 = vmatprep.subr.bf16.mxu0 %v18207_v42  ;;  %v18233_v42 = vld [vmem:[%s24474_s13 + $0x360] sm:$0xff]  }
 0xd3f   : > { %v16214_v48 = vpop.f32.mrb[66].mxu1 }
 0xd40   : > { %v8991_v49 = vpack.c.bf16 %v16214_v48, %v16213_v43  ;;  %v8894_v52 = vpop.f32.mrb[67].mxu1  ;;  %v18234_v48 = vld [vmem:[%s24474_s13 + $0x320] sm:$0xff]  }
 0xd41   : > { %v8990_v53 = vpack.c.bf16 %v8894_v52, %v8891_v45  ;;  %15816 = vmatpush3.bf16.msra.mxu0 %v18208_v44 }
 0xd42   : > { %15841 = vmatprep.subr.bf16.mxu0 %v18209_v47 }
 0xd43   : > { %9291 = vmatprep.mubr.bf16.mxu0 %v8990_v53  ;;  %v18236_v53 = vld [vmem:[%s24474_s13 + $0x328] sm:$0xff]  }
 0xd44   : > { %9292 = vmatmul.mubr.bf16.vlgmr.msra.gmra.mrb[232].mxu0 %v8986_v30  ;;  %v18228_v30 = vld [vmem:[%s24474_s13 + $0x308] sm:$0xff]  }
 0xd45   : > { %9299 = vmatprep.mubr.bf16.mxu0 %v8991_v49  ;;  %15842 = vmatpush3.bf16.msra.mxu0 %v18210_v54  ;;  %v16217_v56 = vpop.f32.mrb[68].mxu1  ;;  %v18235_v49 = vld [vmem:[%s24474_s13 + $0x368] sm:$0xff]  }
 0xd46   : > { %v8907_v58 = vpop.f32.mrb[69].mxu1  ;;  %15843 = vmatprep.subr.bf16.mxu0 %v18211_v55  ;;  %v18237_v55 = vld [vmem:[%s24474_s13 + $0x370] sm:$0xff]  }
 0xd47   : > { %v16218_v60 = vpop.f32.mrb[70].mxu1 }
 0xd48   : > { %v8993_v24 = vpack.c.bf16 %v16218_v60, %v16217_v56  ;;  %v8910_v27 = vpop.f32.mrb[71].mxu1  ;;  %v18238_v60 = vld [vmem:[%s24474_s13 + $0x330] sm:$0xff]  }
 0xd49   : > { %v8992_v29 = vpack.c.bf16 %v8910_v27, %v8907_v58  ;;  %15844 = vmatpush3.bf16.msra.mxu0 %v18212_v57 }
 0xd4a   : > { %15845 = vmatprep.subr.bf16.mxu0 %v18213_v59 }
 0xd4c   : > { %9300 = vmatmul.mubr.bf16.gmra.mrb[236].mxu0 %v8987_v19  ;;  %v18227_v19 = vld [vmem:[%s24474_s13 + $0x348] sm:$0xff]  }
 0xd4d   : > { %9307 = vmatprep.mubr.bf16.mxu0 %v8992_v29  ;;  %15846 = vmatpush3.bf16.msra.mxu0 %v18214_v61  ;;  %v16221_v1 = vpop.f32.mrb[72].mxu1  ;;  %v18240_v29 = vld [vmem:[%s24474_s13 + $0x338] sm:$0xff]  }
 0xd4e   : > { %v8923_v5 = vpop.f32.mrb[73].mxu1  ;;  %15847 = vmatprep.subr.bf16.mxu0 %v18215_v63  ;;  %v18241_v63 = vld [vmem:[%s24474_s13 + $0x3c0] sm:$0xff]  }
 0xd4f   : > { %v16222_v7 = vpop.f32.mrb[74].mxu1 }
 0xd50   : > { %v8995_v8 = vpack.c.bf16 %v16222_v7, %v16221_v1  ;;  %v8926_v37 = vpop.f32.mrb[75].mxu1  ;;  %v18242_v7 = vld [vmem:[%s24474_s13 + $0x380] sm:$0xff]  }
 0xd51   : > { %v8994_v36 = vpack.c.bf16 %v8926_v37, %v8923_v5  ;;  %15848 = vmatpush3.bf16.msra.mxu0 %v18216_v62 }
 0xd52   : > { %15849 = vmatprep.subr.bf16.mxu0 %v18217_v6 }
 0xd54   : > { %9308 = vmatmul.mubr.bf16.gmra.mrb[240].mxu0 %v8988_v4  ;;  %v18232_v4 = vld [vmem:[%s24474_s13 + $0x318] sm:$0xff]  }
 0xd55   : > { %9315 = vmatprep.mubr.bf16.mxu0 %v8993_v24  ;;  %15850 = vmatpush3.bf16.msra.mxu0 %v18218_v9  ;;  %v20985_v50 = vpop.f32.mrb[76].mxu1  ;;  %v18239_v24 = vld [vmem:[%s24474_s13 + $0x378] sm:$0xff]  }
 0xd56   : > { %v8939_v23 = vpop.f32.mrb[77].mxu1  ;;  %15851 = vmatprep.subr.bf16.mxu0 %v18219_v46  ;;  %v18245_v46 = vld [vmem:[%s24474_s13 + $0x3d0] sm:$0xff]  }
 0xd57   : > { %v20993_v11 = vpop.f32.mrb[78].mxu1 }
 0xd58   : > { %v8997_v34 = vpack.c.bf16 %v20993_v11, %v20985_v50  ;;  %v8942_v12 = vpop.f32.mrb[79].mxu1  ;;  %v18246_v11 = vld [vmem:[%s24474_s13 + $0x390] sm:$0xff]  }
 0xd59   : > { %v8996_v14 = vpack.c.bf16 %v8942_v12, %v8939_v23  ;;  %15852 = vmatpush3.bf16.msra.mxu0 %v18220_v51 }
 0xd5a   : > { %15853 = vmatprep.subr.bf16.mxu0 %v18221_v21 }
 0xd5c   : > { %9316 = vmatmul.mubr.bf16.gmra.mrb[244].mxu0 %v8989_v3  ;;  %v18231_v3 = vld [vmem:[%s24474_s13 + $0x358] sm:$0xff]  }
 0xd5d   : > { %v16229_v16 = vpop.f32.mrb[80].mxu1  ;;  %15854 = vmatpush3.bf16.msra.mxu0 %v18222_v15 }
 0xd5e   : > { %v8955_v18 = vpop.f32.mrb[81].mxu1  ;;  %15855 = vmatprep.subr.bf16.mxu0 %v18223_v13  ;;  %v18249_v13 = vld [vmem:[%s24474_s13 + $0x3e0] sm:$0xff]  }
 0xd5f   : > { %v16230_v22 = vpop.f32.mrb[82].mxu1 }
 0xd60   : > { %v8999_v25 = vpack.c.bf16 %v16230_v22, %v16229_v16  ;;  %v8958_v26 = vpop.f32.mrb[83].mxu1  ;;  %v18250_v22 = vld [vmem:[%s24474_s13 + $0x3a0] sm:$0xff]  }
 0xd61   : > { %v8998_v0 = vpack.c.bf16 %v8958_v26, %v8955_v18  ;;  %15856 = vmatpush3.bf16.msra.mxu0 %v18224_v17 }
 0xd62   : > { %15901 = vmatprep.subr.bf16.mxu0 %v18225_v20 }
 0xd63   : > { %9356 = vmatprep.mubr.bf16.mxu0 %v8998_v0  ;;  %v18252_v0 = vld [vmem:[%s24474_s13 + $0x3a8] sm:$0xff]  }
 0xd64   : > { %9357 = vmatmul.mubr.bf16.vlgmr.msra.gmra.mrb[248].mxu0 %v8994_v36  ;;  %v18244_v36 = vld [vmem:[%s24474_s13 + $0x388] sm:$0xff]  }
 0xd65   : > { %9364 = vmatprep.mubr.bf16.mxu0 %v8999_v25  ;;  %15902 = vmatpush3.bf16.msra.mxu0 %v18226_v2  ;;  %v16233_v28 = vpop.f32.mrb[84].mxu1  ;;  %v18251_v25 = vld [vmem:[%s24474_s13 + $0x3e8] sm:$0xff]  }
 0xd66   : > { %v8971_v31 = vpop.f32.mrb[85].mxu1  ;;  %15903 = vmatprep.subr.bf16.mxu0 %v18227_v19  ;;  %v18253_v19 = vld [vmem:[%s24474_s13 + $0x3f0] sm:$0xff]  }
 0xd67   : > { %v16234_v33 = vpop.f32.mrb[86].mxu1 }
 0xd68   : > { %v9001_v35 = vpack.c.bf16 %v16234_v33, %v16233_v28  ;;  %v8974_v38 = vpop.f32.mrb[87].mxu1 }
 0xd69   : > { %v9000_v39 = vpack.c.bf16 %v8974_v38, %v8971_v31  ;;  %15904 = vmatpush3.bf16.msra.mxu0 %v18228_v30 }
 0xd6a   : > { %15905 = vmatprep.subr.bf16.mxu0 %v18229_v32 }
 0xd6c   : > { %9365 = vmatmul.mubr.bf16.gmra.mrb[252].mxu0 %v8995_v8  ;;  %v18243_v8 = vld [vmem:[%s24474_s13 + $0x3c8] sm:$0xff]  }
 0xd6d   : > { %9372 = vmatprep.mubr.bf16.mxu0 %v9000_v39  ;;  %15906 = vmatpush3.bf16.msra.mxu0 %v18230_v40  ;;  %v16245_v10 = vpop.f32.mrb[88].mxu1  ;;  %v18254_v40 = vld [vmem:[%s24474_s13 + $0x3b0] sm:$0xff]  }
 0xd6e   : > { %v9592_v41 = vpop.f32.mrb[89].mxu1  ;;  %15907 = vmatprep.subr.bf16.mxu0 %v18231_v3 }
 0xd6f   : > { %v16246_v43 = vpop.f32.mrb[90].mxu1 }
 0xd70   : > { %v9720_v44 = vpack.c.bf16 %v16246_v43, %v16245_v10  ;;  %v9595_v45 = vpop.f32.mrb[91].mxu1  ;;  %v18255_v10 = vld [vmem:[%s24474_s13 + $0x3f8] sm:$0xff]  }
 0xd71   : > { %v9719_v47 = vpack.c.bf16 %v9595_v45, %v9592_v41  ;;  %15908 = vmatpush3.bf16.msra.mxu0 %v18232_v4 }
 0xd72   : > { %15909 = vmatprep.subr.bf16.mxu0 %v18233_v42  ;;  %v18256_v42 = vld [vmem:[%s24474_s13 + $0x3b8] sm:$0xff]  }
 0xd74   : > { %9373 = vmatmul.mubr.bf16.gmra.mrb[0].mxu0 %v8996_v14  ;;  %v18248_v14 = vld [vmem:[%s24474_s13 + $0x398] sm:$0xff]  }
 0xd75   : > { %9380 = vmatprep.mubr.bf16.mxu0 %v9001_v35  ;;  %15910 = vmatpush3.bf16.msra.mxu0 %v18234_v48  ;;  %v21042_v52 = vpop.f32.mrb[92].mxu1 }
 0xd76   : > { %v9608_v54 = vpop.f32.mrb[93].mxu1  ;;  %15911 = vmatprep.subr.bf16.mxu0 %v18235_v49 }
 0xd77   : > { %v21050_v56 = vpop.f32.mrb[94].mxu1 }
 0xd78   : > { %v9722_v57 = vpack.c.bf16 %v21050_v56, %v21042_v52  ;;  %v9611_v58 = vpop.f32.mrb[95].mxu1 }
 0xd79   : > { %v9721_v59 = vpack.c.bf16 %v9611_v58, %v9608_v54  ;;  %15912 = vmatpush3.bf16.msra.mxu0 %v18236_v53 }
 0xd7a   : > { %15913 = vmatprep.subr.bf16.mxu0 %v18237_v55 }
 0xd7c   : > { %9381 = vmatmul.mubr.bf16.gmra.mrb[4].mxu0 %v8997_v34  ;;  %v18247_v34 = vld [vmem:[%s24474_s13 + $0x3d8] sm:$0xff]  }
 0xd7d   : > { %v16253_v27 = vpop.f32.mrb[96].mxu1  ;;  %15914 = vmatpush3.bf16.msra.mxu0 %v18238_v60 }
 0xd7e   : > { %v9624_v61 = vpop.f32.mrb[97].mxu1  ;;  %15915 = vmatprep.subr.bf16.mxu0 %v18239_v24 }
 0xd7f   : > { %v16254_v1 = vpop.f32.mrb[98].mxu1 }
 0xd80   : > { %v9724_v62 = vpack.c.bf16 %v16254_v1, %v16253_v27  ;;  %v9627_v5 = vpop.f32.mrb[99].mxu1 }
 0xd81   : > { %v9723_v6 = vpack.c.bf16 %v9627_v5, %v9624_v61  ;;  %15916 = vmatpush3.bf16.msra.mxu0 %v18240_v29 }
 0xd82   : > { %15941 = vmatprep.subr.bf16.mxu0 %v18241_v63 }
 0xd83   : > { %10024 = vmatprep.mubr.bf16.mxu0 %v9723_v6 }
 0xd84   : > { %10025 = vmatmul.mubr.bf16.vlgmr.msra.gmra.mrb[8].mxu0 %v9719_v47 }
 0xd85   : > { %10032 = vmatprep.mubr.bf16.mxu0 %v9724_v62  ;;  %15942 = vmatpush3.bf16.msra.mxu0 %v18242_v7  ;;  %v16257_v37 = vpop.f32.mrb[100].mxu1 }
 0xd86   : > { %v9640_v9 = vpop.f32.mrb[101].mxu1  ;;  %15943 = vmatprep.subr.bf16.mxu0 %v18243_v8 }
 0xd87   : > { %v16258_v50 = vpop.f32.mrb[102].mxu1 }
 0xd88   : > { %v9726_v51 = vpack.c.bf16 %v16258_v50, %v16257_v37  ;;  %v9643_v23 = vpop.f32.mrb[103].mxu1 }
 0xd89   : > { %v9725_v21 = vpack.c.bf16 %v9643_v23, %v9640_v9  ;;  %15944 = vmatpush3.bf16.msra.mxu0 %v18244_v36 }
 0xd8a   : > { %15945 = vmatprep.subr.bf16.mxu0 %v18245_v46  ;;  %v21129_v46 = vld [vmem:[%s24475_s14] ss:$0 sm:$0xff] }
 0xd8c   : > { %10033 = vmatmul.mubr.bf16.gmra.mrb[12].mxu0 %v9720_v44 }
 0xd8d   : > { %10040 = vmatprep.mubr.bf16.mxu0 %v9725_v21  ;;  %15946 = vmatpush3.bf16.msra.mxu0 %v18246_v11  ;;  %v21087_v12 = vpop.f32.mrb[104].mxu1 }
 0xd8e   : > { %v9656_v15 = vpop.f32.mrb[105].mxu1  ;;  %15947 = vmatprep.subr.bf16.mxu0 %v18247_v34 }
 0xd8f   : > { %v16262_v16 = vpop.f32.mrb[106].mxu1 }
 0xd90   : > { %v9728_v17 = vpack.c.bf16 %v16262_v16, %v21087_v12  ;;  %v9659_v18 = vpop.f32.mrb[107].mxu1 }
 0xd91   : > { %v9727_v20 = vpack.c.bf16 %v9659_v18, %v9656_v15  ;;  %15948 = vmatpush3.bf16.msra.mxu0 %v18248_v14 }
 0xd92   : > { %15949 = vmatprep.subr.bf16.mxu0 %v18249_v13 }
 0xd94   : > { %10041 = vmatmul.mubr.bf16.gmra.mrb[16].mxu0 %v9721_v59 }
 0xd95   : > { %10048 = vmatprep.mubr.bf16.mxu0 %v9726_v51  ;;  %15950 = vmatpush3.bf16.msra.mxu0 %v18250_v22  ;;  %v21102_v26 = vpop.f32.mrb[108].mxu1 }
 0xd96   : > { %v9672_v2 = vpop.f32.mrb[109].mxu1  ;;  %15951 = vmatprep.subr.bf16.mxu0 %v18251_v25 }
 0xd97   : > { %v15617_v28 = vpop.f32.mrb[168].mxu0  ;;  %v21110_v30 = vpop.f32.mrb[110].mxu1 }
 0xd98   : > { %v15618_v31 = vpop.f32.mrb[169].mxu0  ;;  %v9730_v32 = vpack.c.bf16 %v21110_v30, %v21102_v26  ;;  %v9675_v33 = vpop.f32.mrb[111].mxu1 }
 0xd99   : > { %v15619_v35 = vadd.f32 %v15618_v31, %v15617_v28  ;;  %v15620_v38 = vpop.f32.mrb[170].mxu0  ;;  %v9729_v39 = vpack.c.bf16 %v9675_v33, %v9672_v2  ;;  %15952 = vmatpush3.bf16.msra.mxu0 %v18252_v0 }
 0xd9a   : > { %v15621_v3 = vpop.f32.mrb[171].mxu0  ;;  %15953 = vmatprep.subr.bf16.mxu0 %v18253_v19 }
 0xd9b   : > { %v15622_v4 = vadd.f32 %v15621_v3, %v15620_v38  ;;  %v7828_v23 = vadd.f32 %v15619_v35, %v21129_v46 }
 0xd9c   : > { %10049 = vmatmul.mubr.bf16.gmra.mrb[20].mxu0 %v9722_v57 }
 0xd9d   : > { %v16269_v41 = vpop.f32.mrb[112].mxu1  ;;  %15954 = vmatpush3.bf16.msra.mxu0 %v18254_v40  ;;  %v7831_v12 = vadd.f32 %v15622_v4, %v21129_v46 }
 0xd9e   : > { %v9688_v43 = vpop.f32.mrb[113].mxu1  ;;  %15955 = vmatprep.subr.bf16.mxu0 %v18255_v10 }
 0xd9f   : > { %v15623_v44 = vpop.f32.mrb[172].mxu0  ;;  %v16270_v45 = vpop.f32.mrb[114].mxu1 }
 0xda0   : > { %v9732_v47 = vpack.c.bf16 %v16270_v45, %v16269_v41  ;;  %v15624_v48 = vpop.f32.mrb[173].mxu0  ;;  %v9691_v49 = vpop.f32.mrb[115].mxu1 }
 0xda1   : > { %v15625_v53 = vadd.f32 %v15624_v48, %v15623_v44  ;;  %v9731_v54 = vpack.c.bf16 %v9691_v49, %v9688_v43  ;;  %v15626_v55 = vpop.f32.mrb[174].mxu0  ;;  %15956 = vmatpush3.bf16.msra.mxu0 %v18256_v42 }
 0xda2   : > { %v15627_v58 = vpop.f32.mrb[175].mxu0 }
 0xda3   : > { %v15628_v52 = vadd.f32 %v15627_v58, %v15626_v55  ;;  %10089 = vmatprep.mubr.bf16.mxu0 %v9731_v54  ;;  %v7836_v22 = vadd.f32 %v15625_v53, %v21129_v46 }
 0xda4   : > { %10090 = vmatmul.mubr.bf16.vlgmr.msra.gmra.mrb[24].mxu0 %v9727_v20 }
 0xda5   : > { %10097 = vmatprep.mubr.bf16.mxu0 %v9732_v47  ;;  %v16273_v56 = vpop.f32.mrb[116].mxu1  ;;  %v7839_v28 = vadd.f32 %v15628_v52, %v21129_v46 }
 0xda6   : > { %v9704_v57 = vpop.f32.mrb[117].mxu1 }
 0xda7   : > { %v15629_v59 = vpop.f32.mrb[176].mxu0  ;;  %v16274_v60 = vpop.f32.mrb[118].mxu1 }
 0xda8   : > { %v15630_v24 = vpop.f32.mrb[177].mxu0  ;;  %v9734_v27 = vpack.c.bf16 %v16274_v60, %v16273_v56  ;;  %v9707_v29 = vpop.f32.mrb[119].mxu1 }
 0xda9   : > { %v15631_v61 = vadd.f32 %v15630_v24, %v15629_v59  ;;  %v15632_v63 = vpop.f32.mrb[178].mxu0  ;;  %v9733_v1 = vpack.c.bf16 %v9707_v29, %v9704_v57 }
 0xdaa   : > { %v15633_v62 = vpop.f32.mrb[179].mxu0 }
 0xdab   : > { %v15634_v5 = vadd.f32 %v15633_v62, %v15632_v63 }
 0xdac   : > { %10098 = vmatmul.mubr.bf16.gmra.mrb[28].mxu0 %v9728_v17 }
 0xdad   : > { %10105 = vmatprep.mubr.bf16.mxu0 %v9733_v1  ;;  %v7847_v41 = vadd.f32 %v15634_v5, %v21129_v46 }
 0xdaf   : > { %v15635_v6 = vpop.f32.mrb[180].mxu0 }
 0xdb0   : > { %v15636_v7 = vpop.f32.mrb[181].mxu0 }
 0xdb1   : > { %v15637_v8 = vadd.f32 %v15636_v7, %v15635_v6  ;;  %v15638_v37 = vpop.f32.mrb[182].mxu0 }
 0xdb2   : > { %v15639_v36 = vpop.f32.mrb[183].mxu0 }
 0xdb3   : > { %v15640_v9 = vadd.f32 %v15639_v36, %v15638_v37  ;;  %v7852_v53 = vadd.f32 %v15637_v8, %v21129_v46 }
 0xdb4   : > { %10106 = vmatmul.mubr.bf16.gmra.mrb[32].mxu0 %v9729_v39  ;;  %v7844_v39 = vadd.f32 %v15631_v61, %v21129_v46 }
 0xdb5   : > { %10113 = vmatprep.mubr.bf16.mxu0 %v9734_v27  ;;  %v7855_v56 = vadd.f32 %v15640_v9, %v21129_v46 }
 0xdb7   : > { %v15657_v50 = vpop.f32.mrb[184].mxu0 }
 0xdb8   : > { %v15658_v51 = vpop.f32.mrb[185].mxu0 }
 0xdb9   : > { %v15659_v21 = vadd.f32 %v15658_v51, %v15657_v50  ;;  %v15660_v11 = vpop.f32.mrb[186].mxu0 }
 0xdba   : > { %v15661_v34 = vpop.f32.mrb[187].mxu0 }
 0xdbb   : > { %v7893_v14 = vadd.f32 %v15659_v21, %v7828_v23  ;;  %v15662_v15 = vadd.f32 %v15661_v34, %v15660_v11 }
 0xdbc   : > { %10114 = vmatmul.mubr.bf16.gmra.mrb[36].mxu0 %v9730_v32 }
 0xdbd   : > { %v7896_v13 = vadd.f32 %v15662_v15, %v7831_v12  ;;  %v7923_v16 = vmax.f32 %v7893_v14, 0.0 }
 0xdbf   : > { %v7924_v17 = vmax.f32 %v7896_v13, 0.0  ;;  %v15663_v18 = vpop.f32.mrb[188].mxu0 }
 0xdc0   : > { %v15664_v20 = vpop.f32.mrb[189].mxu0 }
 0xdc1   : > { %v21137_v25 = vpack.c.bf16 %v7924_v17, %v7923_v16  ;;  %v15665_v0 = vadd.f32 %v15664_v20, %v15663_v18  ;;  %v15666_v2 = vpop.f32.mrb[190].mxu0 }
 0xdc2   : > { %v15667_v19 = vpop.f32.mrb[191].mxu0 }
 0xdc3   : > { %v7901_v31 = vadd.f32 %v15665_v0, %v7836_v22  ;;  %v15668_v33 = vadd.f32 %v15667_v19, %v15666_v2 }
 0xdc5   : > { %v7904_v35 = vadd.f32 %v15668_v33, %v7839_v28  ;;  %v7925_v38 = vmax.f32 %v7901_v31, 0.0 }
 0xdc7   : > { %v7926_v26 = vmax.f32 %v7904_v35, 0.0  ;;  %v15669_v30 = vpop.f32.mrb[192].mxu0 }
 0xdc8   : > { %v15670_v32 = vpop.f32.mrb[193].mxu0 }
 0xdc9   : > { %v21141_v40 = vpack.c.bf16 %v7926_v26, %v7925_v38  ;;  %v15671_v3 = vadd.f32 %v15670_v32, %v15669_v30  ;;  %v15672_v10 = vpop.f32.mrb[194].mxu0 }
 0xdca   : > { %v15673_v4 = vpop.f32.mrb[195].mxu0 }
 0xdcb   : > { %v7909_v42 = vadd.f32 %v15671_v3, %v7844_v39  ;;  %v15674_v43 = vadd.f32 %v15673_v4, %v15672_v10 }
 0xdcd   : > { %v7912_v44 = vadd.f32 %v15674_v43, %v7847_v41  ;;  %v7927_v45 = vmax.f32 %v7909_v42, 0.0 }
 0xdcf   : > { %v7928_v47 = vmax.f32 %v7912_v44, 0.0  ;;  %v15675_v48 = vpop.f32.mrb[196].mxu0 }
 0xdd0   : > { %v15676_v49 = vpop.f32.mrb[197].mxu0 }
 0xdd1   : > { %v21145_v54 = vpack.c.bf16 %v7928_v47, %v7927_v45  ;;  %v15677_v55 = vadd.f32 %v15676_v49, %v15675_v48  ;;  %v15678_v58 = vpop.f32.mrb[198].mxu0 }
 0xdd2   : > { %v15679_v52 = vpop.f32.mrb[199].mxu0 }
 0xdd3   : > { %v7917_v57 = vadd.f32 %v15677_v55, %v7852_v53  ;;  %v15680_v59 = vadd.f32 %v15679_v52, %v15678_v58 }
 0xdd5   : > { %v7920_v60 = vadd.f32 %v15680_v59, %v7855_v56  ;;  %v7929_v24 = vmax.f32 %v7917_v57, 0.0 }
 0xdd7   : > { %v7930_v27 = vmax.f32 %v7920_v60, 0.0  ;;  %v15717_v29 = vpop.f32.mrb[200].mxu0 }
 0xdd8   : > { %v15718_v61 = vpop.f32.mrb[201].mxu0 }
 0xdd9   : > { %v21148_v63 = vpack.c.bf16 %v7930_v27, %v7929_v24  ;;  %v15719_v1 = vadd.f32 %v15718_v61, %v15717_v29  ;;  %v15720_v62 = vpop.f32.mrb[202].mxu0 }
 0xdda   : > { %v15721_v5 = vpop.f32.mrb[203].mxu0 }
 0xddb   : > { %v15722_v6 = vadd.f32 %v15721_v5, %v15720_v62  ;;  %v8561_v0 = vadd.f32 %v15719_v1, %v21129_v46 }
 0xddd   : > { %v8564_v31 = vadd.f32 %v15722_v6, %v21129_v46 }
 0xddf   : > { %v15723_v7 = vpop.f32.mrb[204].mxu0 }
 0xde0   : > { %v15724_v8 = vpop.f32.mrb[205].mxu0 }
 0xde1   : > { %v15725_v37 = vadd.f32 %v15724_v8, %v15723_v7  ;;  %v15726_v36 = vpop.f32.mrb[206].mxu0 }
 0xde2   : > { %v15727_v50 = vpop.f32.mrb[207].mxu0 }
 0xde3   : > { %v15728_v51 = vadd.f32 %v15727_v50, %v15726_v36  ;;  %v8569_v3 = vadd.f32 %v15725_v37, %v21129_v46 }
 0xde5   : > { %v8572_v43 = vadd.f32 %v15728_v51, %v21129_v46 }
 0xde7   : > { %v15729_v9 = vpop.f32.mrb[208].mxu0 }
 0xde8   : > { %v15730_v23 = vpop.f32.mrb[209].mxu0 }
 0xde9   : > { %v15731_v21 = vadd.f32 %v15730_v23, %v15729_v9  ;;  %v15732_v11 = vpop.f32.mrb[210].mxu0 }
 0xdea   : > { %v15733_v34 = vpop.f32.mrb[211].mxu0 }
 0xdeb   : > { %v15734_v12 = vadd.f32 %v15733_v34, %v15732_v11  ;;  %v8577_v58 = vadd.f32 %v15731_v21, %v21129_v46 }
 0xded   : > { %v8580_v60 = vadd.f32 %v15734_v12, %v21129_v46 }
 0xdef   : > { %v15735_v14 = vpop.f32.mrb[212].mxu0 }
 0xdf0   : > { %v15736_v15 = vpop.f32.mrb[213].mxu0 }
 0xdf1   : > { %v15737_v13 = vadd.f32 %v15736_v15, %v15735_v14  ;;  %v15738_v16 = vpop.f32.mrb[214].mxu0 }
 0xdf2   : > { %v15739_v17 = vpop.f32.mrb[215].mxu0 }
 0xdf3   : > { %v15740_v18 = vadd.f32 %v15739_v17, %v15738_v16  ;;  %v8585_v6 = vadd.f32 %v15737_v13, %v21129_v46 }
 0xdf5   : > { %v8588_v50 = vadd.f32 %v15740_v18, %v21129_v46 }
 0xdf7   : > { %v15757_v20 = vpop.f32.mrb[216].mxu0 }
 0xdf8   : > { %v15758_v22 = vpop.f32.mrb[217].mxu0 }
 0xdf9   : > { %v15759_v2 = vadd.f32 %v15758_v22, %v15757_v20  ;;  %v15760_v19 = vpop.f32.mrb[218].mxu0  ;;  %v21169_v20 = vld [vmem:[%s24476_s15] sm:$0xff]  }
 0xdfa   : > { %v15761_v28 = vpop.f32.mrb[219].mxu0  ;;  %15997 = vmatprep.mubr.msk.bf16.mxu1 %vm2740_vm4, %v21169_v20 }
 0xdfb   : > { %v8626_v33 = vadd.f32 %v15759_v2, %v8561_v0  ;;  %v15762_v35 = vadd.f32 %v15761_v28, %v15760_v19 }
 0xdfd   : > { %v8629_v38 = vadd.f32 %v15762_v35, %v8564_v31  ;;  %v8656_v26 = vmax.f32 %v8626_v33, 0.0 }
 0xdff   : > { %v8657_v30 = vmax.f32 %v8629_v38, 0.0  ;;  %v15763_v32 = vpop.f32.mrb[220].mxu0 }
 0xe00   : > { %v15764_v39 = vpop.f32.mrb[221].mxu0 }
 0xe01   : > { %v21153_v10 = vpack.c.bf16 %v8657_v30, %v8656_v26  ;;  %v15765_v4 = vadd.f32 %v15764_v39, %v15763_v32  ;;  %v15766_v41 = vpop.f32.mrb[222].mxu0 }
 0xe02   : > { %v15767_v42 = vpop.f32.mrb[223].mxu0 }
 0xe03   : > { %v8634_v44 = vadd.f32 %v15765_v4, %v8569_v3  ;;  %v15768_v45 = vadd.f32 %v15767_v42, %v15766_v41 }
 0xe05   : > { %v8637_v47 = vadd.f32 %v15768_v45, %v8572_v43  ;;  %v8658_v48 = vmax.f32 %v8634_v44, 0.0 }
 0xe07   : > { %v8659_v49 = vmax.f32 %v8637_v47, 0.0  ;;  %v15769_v53 = vpop.f32.mrb[224].mxu0 }
 0xe08   : > { %v15770_v55 = vpop.f32.mrb[225].mxu0 }
 0xe09   : > { %v21157_v52 = vpack.c.bf16 %v8659_v49, %v8658_v48  ;;  %v15771_v56 = vadd.f32 %v15770_v55, %v15769_v53  ;;  %v15772_v57 = vpop.f32.mrb[226].mxu0 }
 0xe0a   : > { %v15773_v59 = vpop.f32.mrb[227].mxu0 }
 0xe0b   : > { %v8642_v24 = vadd.f32 %v15771_v56, %v8577_v58  ;;  %v15774_v27 = vadd.f32 %v15773_v59, %v15772_v57  ;;  %v10388_v56 = vld [vmem:[%s24477_s16 + $0x8] sm:$0xff]  ;;  %v10390_v57 = vld [vmem:[%s24477_s16 + $0x18] sm:$0xff]  ;;  %v10387_v59 = vld [vmem:[%s24477_s16] sm:$0xff] }
 0xe0d   : > { %v8645_v29 = vadd.f32 %v15774_v27, %v8580_v60  ;;  %v8660_v61 = vmax.f32 %v8642_v24, 0.0  ;;  %v16275_v60 = vpack.c.bf16 %v10390_v57, %v10388_v56  ;;  %v10389_v24 = vld [vmem:[%s24477_s16 + $0x10] sm:$0xff]  ;;  %v10392_v27 = vld [vmem:[%s24477_s16 + $0x28] sm:$0xff] }
 0xe0e   : > { %v10408_v57 = vld [vmem:[%s24477_s16 + $0xa8] sm:$0xff] }
 0xe0f   : > { %v8661_v1 = vmax.f32 %v8645_v29, 0.0  ;;  %v15775_v62 = vpop.f32.mrb[228].mxu0  ;;  %v10394_v29 = vld [vmem:[%s24477_s16 + $0x38] sm:$0xff]  ;;  %16276 = vmatprep.subr.bf16.mxu0 %v16275_v60 }
 0xe10   : > { %v15776_v5 = vpop.f32.mrb[229].mxu0 }
 0xe11   : > { %v21161_v7 = vpack.c.bf16 %v8661_v1, %v8660_v61  ;;  %v15777_v8 = vadd.f32 %v15776_v5, %v15775_v62  ;;  %v15778_v37 = vpop.f32.mrb[230].mxu0  ;;  %v16277_v1 = vpack.c.bf16 %v10389_v24, %v10387_v59  ;;  %v16279_v62 = vpack.c.bf16 %v10394_v29, %v10392_v27  ;;  %v10391_v5 = vld [vmem:[%s24477_s16 + $0x20] sm:$0xff]  ;;  %v10410_v59 = vld [vmem:[%s24477_s16 + $0xb8] sm:$0xff] }
 0xe12   : > { %v15779_v36 = vpop.f32.mrb[231].mxu0 }
 0xe13   : > { %v8650_v51 = vadd.f32 %v15777_v8, %v8585_v6  ;;  %v15780_v9 = vadd.f32 %v15779_v36, %v15778_v37  ;;  %v10393_v6 = vld [vmem:[%s24477_s16 + $0x30] sm:$0xff]  ;;  %v10396_v8 = vld [vmem:[%s24477_s16 + $0x48] sm:$0xff]  ;;  %v10398_v37 = vld [vmem:[%s24477_s16 + $0x58] sm:$0xff]  ;;  %16278 = vmatpush1.bf16.msra.mxu0 %v16277_v1  ;;  %v16295_v1 = vpack.c.bf16 %v10410_v59, %v10408_v57 }
 0xe14   : > { %16280 = vmatprep.subr.bf16.mxu0 %v16279_v62  ;;  %v10407_v62 = vld [vmem:[%s24477_s16 + $0xa0] sm:$0xff] }
 0xe15   : > { %v8653_v23 = vadd.f32 %v15780_v9, %v8588_v50  ;;  %v8662_v21 = vmax.f32 %v8650_v51, 0.0  ;;  %v16281_v9 = vpack.c.bf16 %v10393_v6, %v10391_v5  ;;  %v10412_v6 = vld [vmem:[%s24477_s16 + $0xc8] sm:$0xff]  ;;  %v10423_v59 = vld [vmem:[%s24477_s16 + $0x120] sm:$0xff] }
 0xe17   : > { %v8663_v11 = vmax.f32 %v8653_v23, 0.0  ;;  %v15817_v34 = vpop.f32.mrb[232].mxu0  ;;  %16282 = vmatpush1.bf16.msra.mxu0 %v16281_v9 }
 0xe18   : > { %v15818_v12 = vpop.f32.mrb[233].mxu0 }
 0xe19   : > { %v21164_v14 = vpack.c.bf16 %v8663_v11, %v8662_v21  ;;  %v15819_v15 = vadd.f32 %v15818_v12, %v15817_v34  ;;  %v15820_v16 = vpop.f32.mrb[234].mxu0  ;;  %v16283_v21 = vpack.c.bf16 %v10398_v37, %v10396_v8  ;;  %v10395_v11 = vld [vmem:[%s24477_s16 + $0x40] sm:$0xff]  ;;  %v10397_v34 = vld [vmem:[%s24477_s16 + $0x50] sm:$0xff] }
 0xe1a   : > { %v15821_v17 = vpop.f32.mrb[235].mxu0 }
 0xe1b   : > { %v15822_v13 = vadd.f32 %v15821_v17, %v15820_v16  ;;  %v9294_v45 = vadd.f32 %v15819_v15, %v21129_v46  ;;  %16284 = vmatprep.subr.bf16.mxu0 %v16283_v21  ;;  %v10413_v21 = vld [vmem:[%s24477_s16 + $0xd0] sm:$0xff] }
 0xe1d   : > { %v9297_v53 = vadd.f32 %v15822_v13, %v21129_v46  ;;  %v10400_v13 = vld [vmem:[%s24477_s16 + $0x68] sm:$0xff] }
 0xe1f   : > { %v15823_v18 = vpop.f32.mrb[236].mxu0 }
 0xe20   : > { %v15824_v22 = vpop.f32.mrb[237].mxu0 }
 0xe21   : > { %v15825_v0 = vadd.f32 %v15824_v22, %v15823_v18  ;;  %v15826_v2 = vpop.f32.mrb[238].mxu0  ;;  %v10402_v18 = vld [vmem:[%s24477_s16 + $0x78] sm:$0xff] }
 0xe22   : > { %v15827_v19 = vpop.f32.mrb[239].mxu0 }
 0xe23   : > { %v15828_v28 = vadd.f32 %v15827_v19, %v15826_v2  ;;  %v9302_v12 = vadd.f32 %v15825_v0, %v21129_v46  ;;  %v10227_v0 = vsel %vm2740_vm4, %v21137_v25, 0  ;;  %v10406_v25 = vld [vmem:[%s24477_s16 + $0x98] sm:$0xff] }
 0xe25   : > { %v9305_v22 = vadd.f32 %v15828_v28, %v21129_v46  ;;  %v10401_v28 = vld [vmem:[%s24477_s16 + $0x70] sm:$0xff] }
 0xe27   : > { %v15829_v31 = vpop.f32.mrb[240].mxu0 }
 0xe28   : > { %v15830_v33 = vpop.f32.mrb[241].mxu0 }
 0xe29   : > { %v21173_v35 = vadd.f32 %v15830_v33, %v15829_v31  ;;  %v15832_v38 = vpop.f32.mrb[242].mxu0  ;;  %v16285_v33 = vpack.c.bf16 %v10397_v34, %v10395_v11 }
 0xe2a   : > { %v15833_v26 = vpop.f32.mrb[243].mxu0 }
 0xe2b   : > { %v21175_v30 = vadd.f32 %v15833_v26, %v15832_v38  ;;  %v16287_v38 = vpack.c.bf16 %v10402_v18, %v10400_v13  ;;  %v10399_v26 = vld [vmem:[%s24477_s16 + $0x60] sm:$0xff]  ;;  %16286 = vmatpush1.bf16.msra.mxu0 %v16285_v33 }
 0xe2d   : > { %16288 = vmatprep.subr.bf16.mxu0 %v16287_v38  ;;  %v9313_v60 = vadd.f32 %v21175_v30, %v21129_v46  ;;  %v10409_v30 = vld [vmem:[%s24477_s16 + $0xb0] sm:$0xff]  ;;  %v10420_v38 = vld [vmem:[%s24477_s16 + $0x108] sm:$0xff] }
 0xe2f   : > { %v15835_v32 = vpop.f32.mrb[244].mxu0 }
 0xe30   : > { %v15836_v39 = vpop.f32.mrb[245].mxu0 }
 0xe31   : > { %v21177_v3 = vadd.f32 %v15836_v39, %v15835_v32  ;;  %v15838_v4 = vpop.f32.mrb[246].mxu0  ;;  %v10404_v39 = vld [vmem:[%s24477_s16 + $0x88] sm:$0xff] }
 0xe32   : > { %v15839_v41 = vpop.f32.mrb[247].mxu0 }
 0xe33   : > { %v21179_v42 = vadd.f32 %v15839_v41, %v15838_v4  ;;  %v9318_v11 = vadd.f32 %v21177_v3, %v21129_v46  ;;  %v10233_v3 = vsel %vm2740_vm4, %v21145_v54, 0  ;;  %v10422_v54 = vld [vmem:[%s24477_s16 + $0x118] sm:$0xff] }
 0xe35   : > { %v9321_v13 = vadd.f32 %v21179_v42, %v21129_v46  ;;  %v10417_v42 = vld [vmem:[%s24477_s16 + $0xf0] sm:$0xff] }
 0xe37   : > { %v15857_v43 = vpop.f32.mrb[248].mxu0 }
 0xe38   : > { %v15858_v44 = vpop.f32.mrb[249].mxu0 }
 0xe39   : > { %v15859_v47 = vadd.f32 %v15858_v44, %v15857_v43  ;;  %v15860_v48 = vpop.f32.mrb[250].mxu0  ;;  %v16289_v44 = vpack.c.bf16 %v10401_v28, %v10399_v26 }
 0xe3a   : > { %v15861_v49 = vpop.f32.mrb[251].mxu0 }
 0xe3b   : > { %v9359_v55 = vadd.f32 %v15859_v47, %v9294_v45  ;;  %v15862_v58 = vadd.f32 %v15861_v49, %v15860_v48  ;;  %v16291_v47 = vpack.c.bf16 %v10406_v25, %v10404_v39  ;;  %v10403_v48 = vld [vmem:[%s24477_s16 + $0x80] sm:$0xff]  ;;  %v10405_v49 = vld [vmem:[%s24477_s16 + $0x90] sm:$0xff]  ;;  %16290 = vmatpush1.bf16.msra.mxu0 %v16289_v44 }
 0xe3d   : > { %v9362_v61 = vadd.f32 %v15862_v58, %v9297_v53  ;;  %v9389_v36 = vmax.f32 %v9359_v55, 0.0  ;;  %v9310_v53 = vadd.f32 %v21173_v35, %v21129_v46  ;;  %v10230_v35 = vsel %vm2740_vm4, %v21141_v40, 0  ;;  %16292 = vmatprep.subr.bf16.mxu0 %v16291_v47  ;;  %v10414_v40 = vld [vmem:[%s24477_s16 + $0xd8] sm:$0xff] }
 0xe3e   : > { %v16299_v9 = vpack.c.bf16 %v10414_v40, %v10412_v6  ;;  %v10432_v6 = vld [vmem:[%s24477_s16 + $0x168] sm:$0xff]  ;;  %v10434_v40 = vld [vmem:[%s24477_s16 + $0x178] sm:$0xff] }
 0xe3f   : > { %v9390_v50 = vmax.f32 %v9362_v61, 0.0  ;;  %v15863_v51 = vpop.f32.mrb[252].mxu0  ;;  %v16293_v61 = vpack.c.bf16 %v10405_v49, %v10403_v48  ;;  %v10424_v48 = vld [vmem:[%s24477_s16 + $0x128] sm:$0xff]  ;;  %v10426_v49 = vld [vmem:[%s24477_s16 + $0x138] sm:$0xff] }
 0xe40   : > { %v15864_v23 = vpop.f32.mrb[253].mxu0  ;;  %v16311_v57 = vpack.c.bf16 %v10426_v49, %v10424_v48 }
 0xe41   : > { %v10154_v15 = vpack.c.bf16 %v9390_v50, %v9389_v36  ;;  %v15865_v16 = vadd.f32 %v15864_v23, %v15863_v51  ;;  %v15866_v17 = vpop.f32.mrb[254].mxu0  ;;  %16294 = vmatpush1.bf16.msra.mxu0 %v16293_v61  ;;  %v16297_v50 = vpack.c.bf16 %v10409_v30, %v10407_v62  ;;  %v10411_v23 = vld [vmem:[%s24477_s16 + $0xc0] sm:$0xff]  ;;  %v10429_v62 = vld [vmem:[%s24477_s16 + $0x150] sm:$0xff] }
 0xe42   : > { %v15867_v2 = vpop.f32.mrb[255].mxu0  ;;  %16296 = vmatprep.subr.bf16.mxu0 %v16295_v1  ;;  %v10427_v1 = vld [vmem:[%s24477_s16 + $0x140] sm:$0xff] }
 0xe43   : > { %v9367_v19 = vadd.f32 %v15865_v16, %v9302_v12  ;;  %v15868_v31 = vadd.f32 %v15867_v2, %v15866_v17  ;;  %17351 = vmatprep.subr.msk.bf16.mxu1 %vm2740_vm4, %v10154_v15  ;;  %v10416_v16 = vld [vmem:[%s24477_s16 + $0xe8] sm:$0xff]  ;;  %v10418_v17 = vld [vmem:[%s24477_s16 + $0xf8] sm:$0xff] }
 0xe44   : > { %15982 = vmatpush3.bf16.xpose.msra.mxu1 %v10227_v0  ;;  %v10415_v0 = vld [vmem:[%s24477_s16 + $0xe0] sm:$0xff] }
 0xe45   : > { %v9370_v32 = vadd.f32 %v15868_v31, %v9305_v22  ;;  %v9391_v4 = vmax.f32 %v9367_v19, 0.0  ;;  %16298 = vmatpush1.bf16.msra.mxu0 %v16297_v50  ;;  %v16301_v19 = vpack.c.bf16 %v10413_v21, %v10411_v23  ;;  %v16303_v31 = vpack.c.bf16 %v10418_v17, %v10416_v16  ;;  %v10436_v23 = vld [vmem:[%s24477_s16 + $0x188] sm:$0xff]  ;;  %v10438_v21 = vld [vmem:[%s24477_s16 + $0x198] sm:$0xff]  ;;  %v10435_v16 = vld [vmem:[%s24477_s16 + $0x180] sm:$0xff] }
 0xe46   : > { %16300 = vmatprep.subr.bf16.mxu0 %v16299_v9  ;;  %v16305_v39 = vpack.c.bf16 %v10417_v42, %v10415_v0  ;;  %v16319_v50 = vpack.c.bf16 %v10434_v40, %v10432_v6  ;;  %v10433_v9 = vld [vmem:[%s24477_s16 + $0x170] sm:$0xff]  ;;  %v10439_v42 = vld [vmem:[%s24477_s16 + $0x1a0] sm:$0xff] }
 0xe47   : > { %v9392_v41 = vmax.f32 %v9370_v32, 0.0  ;;  %v15869_v43 = vpop.f32.mrb[0].mxu0  ;;  %v10437_v17 = vld [vmem:[%s24477_s16 + $0x190] sm:$0xff] }
 0xe48   : > { %v15870_v45 = vpop.f32.mrb[1].mxu0 }
 0xe49   : > { %v10155_v55 = vpack.c.bf16 %v9392_v41, %v9391_v4  ;;  %v15871_v58 = vadd.f32 %v15870_v45, %v15869_v43  ;;  %v15872_v56 = vpop.f32.mrb[2].mxu0  ;;  %16302 = vmatpush1.bf16.msra.mxu0 %v16301_v19  ;;  %v16307_v4 = vpack.c.bf16 %v10422_v54, %v10420_v38  ;;  %v10419_v41 = vld [vmem:[%s24477_s16 + $0x100] sm:$0xff]  ;;  %v10421_v43 = vld [vmem:[%s24477_s16 + $0x110] sm:$0xff]  ;;  %v10444_v38 = vld [vmem:[%s24477_s16 + $0x1c8] sm:$0xff] }
 0xe4a   : > { %v15873_v24 = vpop.f32.mrb[3].mxu0  ;;  %16304 = vmatprep.subr.bf16.mxu0 %v16303_v31  ;;  %v16325_v31 = vpack.c.bf16 %v10437_v17, %v10435_v16  ;;  %v10446_v54 = vld [vmem:[%s24477_s16 + $0x1d8] sm:$0xff] }
 0xe4b   : > { %v9375_v27 = vadd.f32 %v15871_v58, %v9310_v53  ;;  %v15874_v29 = vadd.f32 %v15873_v24, %v15872_v56  ;;  %17352 = vmatprep.subr.msk.bf16.mxu1 %vm2740_vm4, %v10155_v55  ;;  %v10236_v58 = vsel %vm2740_vm4, %v21148_v63, 0  ;;  %v16309_v56 = vpack.c.bf16 %v10421_v43, %v10419_v41  ;;  %v10428_v24 = vld [vmem:[%s24477_s16 + $0x148] sm:$0xff]  ;;  %v10430_v63 = vld [vmem:[%s24477_s16 + $0x158] sm:$0xff] }
 0xe4c   : > { %15984 = vmatpush3.bf16.xpose.msra.mxu1 %v10230_v35  ;;  %v16315_v61 = vpack.c.bf16 %v10430_v63, %v10428_v24 }
 0xe4d   : > { %v9378_v5 = vadd.f32 %v15874_v29, %v9313_v60  ;;  %v9393_v8 = vmax.f32 %v9375_v27, 0.0  ;;  %16306 = vmatpush1.bf16.msra.mxu0 %v16305_v39  ;;  %v10425_v60 = vld [vmem:[%s24477_s16 + $0x130] sm:$0xff]  ;;  %v16331_v39 = vpack.c.bf16 %v10446_v54, %v10444_v38 }
 0xe4e   : > { %16308 = vmatprep.subr.bf16.mxu0 %v16307_v4  ;;  %v16313_v29 = vpack.c.bf16 %v10425_v60, %v10423_v59  ;;  %v10445_v4 = vld [vmem:[%s24477_s16 + $0x1d0] sm:$0xff] }
 0xe4f   : > { %v9394_v37 = vmax.f32 %v9378_v5, 0.0  ;;  %v15875_v36 = vpop.f32.mrb[4].mxu0 }
 0xe50   : > { %v15876_v51 = vpop.f32.mrb[5].mxu0 }
 0xe51   : > { %v10156_v34 = vpack.c.bf16 %v9394_v37, %v9393_v8  ;;  %v15877_v12 = vadd.f32 %v15876_v51, %v15875_v36  ;;  %v15878_v15 = vpop.f32.mrb[6].mxu0  ;;  %16310 = vmatpush1.bf16.msra.mxu0 %v16309_v56  ;;  %v16317_v36 = vpack.c.bf16 %v10429_v62, %v10427_v1  ;;  %v10431_v51 = vld [vmem:[%s24477_s16 + $0x160] sm:$0xff] }
 0xe52   : > { %v15879_v18 = vpop.f32.mrb[7].mxu0  ;;  %16312 = vmatprep.subr.bf16.mxu0 %v16311_v57  ;;  %v10447_v56 = vld [vmem:[%s24477_s16 + $0x1e0] sm:$0xff]  ;;  %v10449_v57 = vld [vmem:[%s24477_s16 + $0x1f0] sm:$0xff] }
 0xe53   : > { %v9383_v22 = vadd.f32 %v15877_v12, %v9318_v11  ;;  %v15880_v2 = vadd.f32 %v15879_v18, %v15878_v15  ;;  %17353 = vmatprep.subr.msk.bf16.mxu1 %vm2740_vm4, %v10156_v34  ;;  %v16321_v34 = vpack.c.bf16 %v10433_v9, %v10431_v51  ;;  %v16323_v15 = vpack.c.bf16 %v10438_v21, %v10436_v23 }
 0xe54   : > { %15986 = vmatpush3.bf16.xpose.msra.mxu1 %v10233_v3  ;;  %v16337_v60 = vpack.c.bf16 %v10449_v57, %v10447_v56  ;;  %v10248_v56 = vsel %vm2740_vm4, %v21164_v14, 0  ;;  %v14254_v57 = vld [vmem:[%s24477_s16 + $0x810] sm:$0xff]  ;;  %v18258_v14 = vld [vmem:[%s24476_s15 + $0x8] sm:$0xff]  }
 0xe55   : > { %v9386_v33 = vadd.f32 %v15880_v2, %v9321_v13  ;;  %v9395_v26 = vmax.f32 %v9383_v22, 0.0  ;;  %16314 = vmatpush1.bf16.msra.mxu0 %v16313_v29  ;;  %v10440_v22 = vld [vmem:[%s24477_s16 + $0x1a8] sm:$0xff]  ;;  %v10442_v2 = vld [vmem:[%s24477_s16 + $0x1b8] sm:$0xff] }
 0xe56   : > { %16316 = vmatprep.subr.bf16.mxu0 %v16315_v61  ;;  %v16327_v0 = vpack.c.bf16 %v10442_v2, %v10440_v22 }
 0xe57   : > { %v9396_v28 = vmax.f32 %v9386_v33, 0.0  ;;  %v15917_v32 = vpop.f32.mrb[8].mxu0  ;;  %v10441_v33 = vld [vmem:[%s24477_s16 + $0x1b0] sm:$0xff] }
 0xe58   : > { %v15918_v25 = vpop.f32.mrb[9].mxu0 }
 0xe59   : > { %v10157_v44 = vpack.c.bf16 %v9396_v28, %v9395_v26  ;;  %v21310_v45 = vadd.f32 %v15918_v25, %v15917_v32  ;;  %v15920_v47 = vpop.f32.mrb[10].mxu0  ;;  %16318 = vmatpush1.bf16.msra.mxu0 %v16317_v36  ;;  %v16329_v28 = vpack.c.bf16 %v10441_v33, %v10439_v42  ;;  %v10443_v25 = vld [vmem:[%s24477_s16 + $0x1c0] sm:$0xff] }
 0xe5a   : > { %v15921_v53 = vpop.f32.mrb[11].mxu0  ;;  %16320 = vmatprep.subr.bf16.mxu0 %v16319_v50 }
 0xe5b   : > { %v21318_v55 = vadd.f32 %v15921_v53, %v15920_v47  ;;  %17354 = vmatprep.subr.msk.bf16.mxu1 %vm2740_vm4, %v10157_v44  ;;  %v10448_v44 = vld [vmem:[%s24477_s16 + $0x1e8] sm:$0xff]  ;;  %v10450_v47 = vld [vmem:[%s24477_s16 + $0x1f8] sm:$0xff]  ;;  %v16333_v53 = vpack.c.bf16 %v10445_v4, %v10443_v25  ;;  %v10027_v63 = vadd.f32 %v21310_v45, %v21129_v46 }
 0xe5c   : > { %15988 = vmatpush3.bf16.xpose.msra.mxu1 %v10236_v58  ;;  %v16335_v58 = vpack.c.bf16 %v10450_v47, %v10448_v44 }
 0xe5d   : > { %16322 = vmatpush1.bf16.msra.mxu0 %v16321_v34  ;;  %v10030_v61 = vadd.f32 %v21318_v55, %v21129_v46  ;;  %v10239_v34 = vsel %vm2740_vm4, %v21153_v10, 0  ;;  %v10242_v10 = vsel %vm2740_vm4, %v21157_v52, 0  ;;  %v10245_v52 = vsel %vm2740_vm4, %v21161_v7, 0  ;;  %v14252_v7 = vld [vmem:[%s24477_s16 + $0x800] sm:$0xff] }
 0xe5e   : > { %16324 = vmatprep.subr.bf16.mxu0 %v16323_v15 }
 0xe5f   : > { %v15923_v27 = vpop.f32.mrb[12].mxu0 }
 0xe60   : > { %v15924_v35 = vpop.f32.mrb[13].mxu0 }
 0xe61   : > { %v21341_v30 = vadd.f32 %v15924_v35, %v15923_v27  ;;  %v15926_v5 = vpop.f32.mrb[14].mxu0  ;;  %16326 = vmatpush1.bf16.msra.mxu0 %v16325_v31 }
 0xe62   : > { %v15927_v8 = vpop.f32.mrb[15].mxu0  ;;  %16328 = vmatprep.subr.bf16.mxu0 %v16327_v0 }
 0xe63   : > { %v21349_v37 = vadd.f32 %v15927_v8, %v15926_v5  ;;  %v10035_v50 = vadd.f32 %v21341_v30, %v21129_v46 }
 0xe65   : > { %16330 = vmatpush1.bf16.msra.mxu0 %v16329_v28  ;;  %v10038_v21 = vadd.f32 %v21349_v37, %v21129_v46 }
 0xe66   : > { %16332 = vmatprep.subr.bf16.mxu0 %v16331_v39 }
 0xe67   : > { %v15929_v11 = vpop.f32.mrb[16].mxu0 }
 0xe68   : > { %v15930_v12 = vpop.f32.mrb[17].mxu0 }
 0xe69   : > { %v21369_v13 = vadd.f32 %v15930_v12, %v15929_v11  ;;  %v15932_v18 = vpop.f32.mrb[18].mxu0  ;;  %16334 = vmatpush1.bf16.msra.mxu0 %v16333_v53 }
 0xe6a   : > { %v15933_v3 = vpop.f32.mrb[19].mxu0  ;;  %16336 = vmatprep.subr.bf16.mxu0 %v16335_v58 }
 0xe6b   : > { %v21377_v19 = vadd.f32 %v15933_v3, %v15932_v18  ;;  %v10043_v18 = vadd.f32 %v21369_v13, %v21129_v46 }
 0xe6d   : > { %16338 = vmatpush1.bf16.msra.mxu0 %v16337_v60  ;;  %v10046_v31 = vadd.f32 %v21377_v19, %v21129_v46  ;;  %v14259_v60 = vld [vmem:[%s24477_s16 + $0x838] sm:$0xff] }
 0xe6f   : > { %v15935_v26 = vpop.f32.mrb[20].mxu0 }
 0xe70   : > { %v15936_v32 = vpop.f32.mrb[21].mxu0 }
 0xe71   : > { %v15937_v41 = vadd.f32 %v15936_v32, %v15935_v26  ;;  %v15938_v43 = vpop.f32.mrb[22].mxu0 }
 0xe72   : > { %v15939_v48 = vpop.f32.mrb[23].mxu0 }
 0xe73   : > { %v15940_v49 = vadd.f32 %v15939_v48, %v15938_v43  ;;  %v10051_v28 = vadd.f32 %v15937_v41, %v21129_v46  ;;  %v14253_v48 = vld [vmem:[%s24477_s16 + $0x808] sm:$0xff]  ;;  %v14255_v41 = vld [vmem:[%s24477_s16 + $0x818] sm:$0xff] }
 0xe75   : > { %v10054_v19 = vadd.f32 %v15940_v49, %v21129_v46  ;;  %v16531_v49 = vpack.c.bf16 %v14255_v41, %v14253_v48  ;;  %v18262_v48 = vld [vmem:[%s24476_s15 + $0x28] sm:$0xff]  }
 0xe77   : > { %v15957_v59 = vpop.f32.mrb[24].mxu0 }
 0xe78   : > { %v15958_v24 = vpop.f32.mrb[25].mxu0 }
 0xe79   : > { %v15959_v27 = vadd.f32 %v15958_v24, %v15957_v59  ;;  %v15960_v29 = vpop.f32.mrb[26].mxu0  ;;  %v14257_v59 = vld [vmem:[%s24477_s16 + $0x828] sm:$0xff]  ;;  %v16533_v24 = vpack.c.bf16 %v14254_v57, %v14252_v7  ;;  %v14292_v57 = vld [vmem:[%s24477_s16 + $0x940] sm:$0xff] }
 0xe7a   : > { %v15961_v35 = vpop.f32.mrb[27].mxu0 }
 0xe7b   : > { %v10092_v1 = vadd.f32 %v15959_v27, %v10027_v63  ;;  %v15962_v62 = vadd.f32 %v15961_v35, %v15960_v29  ;;  %v16535_v63 = vpack.c.bf16 %v14259_v60, %v14257_v59  ;;  %v14256_v27 = vld [vmem:[%s24477_s16 + $0x820] sm:$0xff]  ;;  %v14258_v29 = vld [vmem:[%s24477_s16 + $0x830] sm:$0xff]  ;;  %v14261_v35 = vld [vmem:[%s24477_s16 + $0x848] sm:$0xff] }
 0xe7c   : > { %v14294_v59 = vld [vmem:[%s24477_s16 + $0x950] sm:$0xff]  ;;  %v14297_v60 = vld [vmem:[%s24477_s16 + $0x968] sm:$0xff] }
 0xe7d   : > { %v10095_v5 = vadd.f32 %v15962_v62, %v10030_v61  ;;  %v10122_v6 = vmax.f32 %v10092_v1, 0.0  ;;  %v14263_v61 = vld [vmem:[%s24477_s16 + $0x858] sm:$0xff]  ;;  %v16537_v1 = vpack.c.bf16 %v14258_v29, %v14256_v27  ;;  %v14296_v27 = vld [vmem:[%s24477_s16 + $0x960] sm:$0xff]  ;;  %v14298_v29 = vld [vmem:[%s24477_s16 + $0x970] sm:$0xff] }
 0xe7e   : > { %v16539_v62 = vpack.c.bf16 %v14263_v61, %v14261_v35  ;;  %v16577_v35 = vpack.c.bf16 %v14298_v29, %v14296_v27  ;;  %v18263_v61 = vld [vmem:[%s24476_s15 + $0x30] sm:$0xff]  }
 0xe7f   : > { %v10123_v40 = vmax.f32 %v10095_v5, 0.0  ;;  %v15963_v8 = vpop.f32.mrb[28].mxu0  ;;  %v14260_v5 = vld [vmem:[%s24477_s16 + $0x840] sm:$0xff] }
 0xe80   : > { %v15964_v36 = vpop.f32.mrb[29].mxu0 }
 0xe81   : > { %v10158_v51 = vpack.c.bf16 %v10123_v40, %v10122_v6  ;;  %v15965_v9 = vadd.f32 %v15964_v36, %v15963_v8  ;;  %v15966_v45 = vpop.f32.mrb[30].mxu0  ;;  %v14262_v6 = vld [vmem:[%s24477_s16 + $0x850] sm:$0xff]  ;;  %v14265_v40 = vld [vmem:[%s24477_s16 + $0x868] sm:$0xff] }
 0xe82   : > { %v15967_v23 = vpop.f32.mrb[31].mxu0  ;;  %v18259_v8 = vld [vmem:[%s24476_s15 + $0x10] sm:$0xff]   ;;  %v16541_v36 = vpack.c.bf16 %v14262_v6, %v14260_v5  ;;  %v14301_v5 = vld [vmem:[%s24477_s16 + $0x988] sm:$0xff] }
 0xe83   : > { %v10100_v11 = vadd.f32 %v15965_v9, %v10035_v50  ;;  %v15968_v55 = vadd.f32 %v15967_v23, %v15966_v45  ;;  %17355 = vmatprep.subr.msk.bf16.mxu1 %vm2740_vm4, %v10158_v51  ;;  %v14264_v51 = vld [vmem:[%s24477_s16 + $0x860] sm:$0xff]  ;;  %v14266_v9 = vld [vmem:[%s24477_s16 + $0x870] sm:$0xff]  ;;  %v14269_v45 = vld [vmem:[%s24477_s16 + $0x888] sm:$0xff] }
 0xe84   : > { %15990 = vmatpush3.bf16.xpose.msra.mxu1 %v10239_v34  ;;  %v14271_v23 = vld [vmem:[%s24477_s16 + $0x898] sm:$0xff]  ;;  %v14270_v34 = vld [vmem:[%s24477_s16 + $0x890] sm:$0xff] }
 0xe85   : > { %v10103_v12 = vadd.f32 %v15968_v55, %v10038_v21  ;;  %v10124_v15 = vmax.f32 %v10100_v11, 0.0  ;;  %v16545_v21 = vpack.c.bf16 %v14266_v9, %v14264_v51  ;;  %v16547_v11 = vpack.c.bf16 %v14271_v23, %v14269_v45  ;;  %v14268_v55 = vld [vmem:[%s24477_s16 + $0x880] sm:$0xff]  ;;  %v14305_v51 = vld [vmem:[%s24477_s16 + $0x9a8] sm:$0xff]  ;;  %v14307_v9 = vld [vmem:[%s24477_s16 + $0x9b8] sm:$0xff] }
 0xe86   : > { %v16583_v45 = vpack.c.bf16 %v14307_v9, %v14305_v51  ;;  %v14304_v23 = vld [vmem:[%s24477_s16 + $0x9a0] sm:$0xff] }
 0xe87   : > { %v10125_v16 = vmax.f32 %v10103_v12, 0.0  ;;  %v15969_v17 = vpop.f32.mrb[32].mxu0  ;;  %v14273_v12 = vld [vmem:[%s24477_s16 + $0x8a8] sm:$0xff]  ;;  %v10471_v9 = vld [vmem:[%s24477_s16 + $0x2a0] sm:$0xff] }
 0xe88   : > { %v15970_v30 = vpop.f32.mrb[33].mxu0 }
 0xe89   : > { %v10159_v22 = vpack.c.bf16 %v10125_v16, %v10124_v15  ;;  %v15971_v2 = vadd.f32 %v15970_v30, %v15969_v17  ;;  %v15972_v3 = vpop.f32.mrb[34].mxu0  ;;  %v14275_v15 = vld [vmem:[%s24477_s16 + $0x8b8] sm:$0xff]  ;;  %v16549_v17 = vpack.c.bf16 %v14270_v34, %v14268_v55  ;;  %v14309_v34 = vld [vmem:[%s24477_s16 + $0x9c8] sm:$0xff] }
 0xe8a   : > { %v15973_v37 = vpop.f32.mrb[35].mxu0  ;;  %v18260_v16 = vld [vmem:[%s24476_s15 + $0x18] sm:$0xff]   ;;  %v16551_v30 = vpack.c.bf16 %v14275_v15, %v14273_v12 }
 0xe8b   : > { %v10108_v0 = vadd.f32 %v15971_v2, %v10043_v18  ;;  %v15974_v42 = vadd.f32 %v15973_v37, %v15972_v3  ;;  %17356 = vmatprep.subr.msk.bf16.mxu1 %vm2740_vm4, %v10159_v22  ;;  %v14272_v18 = vld [vmem:[%s24477_s16 + $0x8a0] sm:$0xff]  ;;  %v14274_v22 = vld [vmem:[%s24477_s16 + $0x8b0] sm:$0xff]  ;;  %v14277_v2 = vld [vmem:[%s24477_s16 + $0x8c8] sm:$0xff] }
 0xe8c   : > { %15992 = vmatpush3.bf16.xpose.msra.mxu1 %v10242_v10  ;;  %v14279_v3 = vld [vmem:[%s24477_s16 + $0x8d8] sm:$0xff]  ;;  %v16553_v37 = vpack.c.bf16 %v14274_v22, %v14272_v18  ;;  %v14281_v10 = vld [vmem:[%s24477_s16 + $0x8e8] sm:$0xff] }
 0xe8d   : > { %v10111_v33 = vadd.f32 %v15974_v42, %v10046_v31  ;;  %v10126_v38 = vmax.f32 %v10108_v0, 0.0  ;;  %v16555_v31 = vpack.c.bf16 %v14279_v3, %v14277_v2  ;;  %v14276_v0 = vld [vmem:[%s24477_s16 + $0x8c0] sm:$0xff]  ;;  %v14278_v42 = vld [vmem:[%s24477_s16 + $0x8d0] sm:$0xff]  ;;  %v14311_v12 = vld [vmem:[%s24477_s16 + $0x9d8] sm:$0xff] }
 0xe8e   : > { %v16587_v15 = vpack.c.bf16 %v14311_v12, %v14309_v34  ;;  %v14313_v18 = vld [vmem:[%s24477_s16 + $0x9e8] sm:$0xff]  ;;  %v14315_v22 = vld [vmem:[%s24477_s16 + $0x9f8] sm:$0xff]  ;;  %v14312_v3 = vld [vmem:[%s24477_s16 + $0x9e0] sm:$0xff] }
 0xe8f   : > { %v10127_v54 = vmax.f32 %v10111_v33, 0.0  ;;  %v15975_v26 = vpop.f32.mrb[36].mxu0  ;;  %v14283_v33 = vld [vmem:[%s24477_s16 + $0x8f8] sm:$0xff]  ;;  %v16591_v2 = vpack.c.bf16 %v14315_v22, %v14313_v18  ;;  %v14322_v34 = vld [vmem:[%s24477_s16 + $0xa30] sm:$0xff]  ;;  %v10476_v12 = vld [vmem:[%s24477_s16 + $0x2c8] sm:$0xff] }
 0xe90   : > { %v15976_v13 = vpop.f32.mrb[37].mxu0 }
 0xe91   : > { %v10160_v32 = vpack.c.bf16 %v10127_v54, %v10126_v38  ;;  %v15977_v39 = vadd.f32 %v15976_v13, %v15975_v26  ;;  %v15978_v25 = vpop.f32.mrb[38].mxu0  ;;  %v16557_v38 = vpack.c.bf16 %v14278_v42, %v14276_v0  ;;  %v18261_v54 = vld [vmem:[%s24476_s15 + $0x20] sm:$0xff]   ;;  %v16559_v26 = vpack.c.bf16 %v14283_v33, %v14281_v10  ;;  %v14317_v0 = vld [vmem:[%s24477_s16 + $0xa08] sm:$0xff]  ;;  %v14319_v42 = vld [vmem:[%s24477_s16 + $0xa18] sm:$0xff] }
 0xe92   : > { %v15979_v4 = vpop.f32.mrb[39].mxu0  ;;  %v14280_v13 = vld [vmem:[%s24477_s16 + $0x8e0] sm:$0xff]  ;;  %v16595_v10 = vpack.c.bf16 %v14319_v42, %v14317_v0 }
 0xe93   : > { %v10116_v43 = vadd.f32 %v15977_v39, %v10051_v28  ;;  %v15980_v44 = vadd.f32 %v15979_v4, %v15978_v25  ;;  %17357 = vmatprep.subr.msk.bf16.mxu1 %vm2740_vm4, %v10160_v32  ;;  %v14282_v28 = vld [vmem:[%s24477_s16 + $0x8f0] sm:$0xff]  ;;  %v14285_v32 = vld [vmem:[%s24477_s16 + $0x908] sm:$0xff]  ;;  %v14287_v39 = vld [vmem:[%s24477_s16 + $0x918] sm:$0xff] }
 0xe94   : > { %15994 = vmatpush3.bf16.xpose.msra.mxu1 %v10245_v52  ;;  %v16561_v25 = vpack.c.bf16 %v14282_v28, %v14280_v13  ;;  %v16563_v4 = vpack.c.bf16 %v14287_v39, %v14285_v32  ;;  %v14291_v52 = vld [vmem:[%s24477_s16 + $0x938] sm:$0xff]  ;;  %v10451_v33 = vld [vmem:[%s24477_s16 + $0x200] sm:$0xff] }
 0xe95   : > { %v10119_v47 = vadd.f32 %v15980_v44, %v10054_v19  ;;  %v10128_v53 = vmax.f32 %v10116_v43, 0.0  ;;  %v14284_v19 = vld [vmem:[%s24477_s16 + $0x900] sm:$0xff]  ;;  %v14286_v43 = vld [vmem:[%s24477_s16 + $0x910] sm:$0xff]  ;;  %v14289_v44 = vld [vmem:[%s24477_s16 + $0x928] sm:$0xff] }
 0xe96   : > { %v16567_v41 = vpack.c.bf16 %v14291_v52, %v14289_v44  ;;  %v10462_v44 = vld [vmem:[%s24477_s16 + $0x258] sm:$0xff]  ;;  %v14324_v42 = vld [vmem:[%s24477_s16 + $0xa40] sm:$0xff] }
 0xe97   : > { %v10129_v58 = vmax.f32 %v10119_v47, 0.0  ;;  %v16565_v47 = vpack.c.bf16 %v14286_v43, %v14284_v19  ;;  %v10460_v43 = vld [vmem:[%s24477_s16 + $0x248] sm:$0xff] }
 0xe99   : > { %v10161_v46 = vpack.c.bf16 %v10129_v58, %v10128_v53  ;;  %v14288_v53 = vld [vmem:[%s24477_s16 + $0x920] sm:$0xff]  ;;  %v14290_v58 = vld [vmem:[%s24477_s16 + $0x930] sm:$0xff] }
 0xe9b   : > { %17358 = vmatprep.subr.msk.bf16.mxu1 %vm2740_vm4, %v10161_v46  ;;  %v14293_v46 = vld [vmem:[%s24477_s16 + $0x948] sm:$0xff] }
 0xe9c   : > { %15996 = vmatpush3.bf16.xpose.msra.mxu1 %v10248_v56  ;;  %v16569_v56 = vpack.c.bf16 %v14290_v58, %v14288_v53  ;;  %v10461_v53 = vld [vmem:[%s24477_s16 + $0x250] sm:$0xff]  ;;  %v10464_v58 = vld [vmem:[%s24477_s16 + $0x268] sm:$0xff] }
 0xe9d   : > { %16532 = vmatprep.subr.bf16.mxu1 %v16531_v49  ;;  %v14295_v49 = vld [vmem:[%s24477_s16 + $0x958] sm:$0xff] }
 0xe9e   : > { %v16571_v7 = vpack.c.bf16 %v14295_v49, %v14293_v46  ;;  %v10466_v46 = vld [vmem:[%s24477_s16 + $0x278] sm:$0xff] }
 0xea3   : > { %15998 = vmatmul.mubr.msk.bf16.vlgmr.msra.gmra.mrb[120].mxu1 %vm2740_vm4, %v21169_v20  ;;  %v14267_v20 = vld [vmem:[%s24477_s16 + $0x878] sm:$0xff] }
 0xea4   : > { %15999 = vmatprep.mubr.msk.bf16.mxu1 %vm2740_vm4, %v18258_v14  ;;  %16534 = vmatpush1.bf16.msra.mxu1 %v16533_v24  ;;  %v16543_v50 = vpack.c.bf16 %v14267_v20, %v14265_v40  ;;  %v16573_v24 = vpack.c.bf16 %v14294_v59, %v14292_v57  ;;  %v14303_v40 = vld [vmem:[%s24477_s16 + $0x998] sm:$0xff]  ;;  %v16351_v57 = vpack.c.bf16 %v10466_v46, %v10464_v58  ;;  %v10463_v59 = vld [vmem:[%s24477_s16 + $0x260] sm:$0xff] }
 0xea5   : > { %16536 = vmatprep.subr.bf16.mxu1 %v16535_v63  ;;  %v16579_v20 = vpack.c.bf16 %v14303_v40, %v14301_v5  ;;  %v14318_v5 = vld [vmem:[%s24477_s16 + $0xa10] sm:$0xff]  ;;  %v10474_v40 = vld [vmem:[%s24477_s16 + $0x2b8] sm:$0xff] }
 0xea6   : > { %v14335_v58 = vld [vmem:[%s24477_s16 + $0xa98] sm:$0xff] }
 0xea8   : > { %16538 = vmatpush1.bf16.msra.mxu1 %v16537_v1  ;;  %v10452_v1 = vld [vmem:[%s24477_s16 + $0x208] sm:$0xff] }
 0xea9   : > { %16540 = vmatprep.subr.bf16.mxu1 %v16539_v62  ;;  %v10454_v62 = vld [vmem:[%s24477_s16 + $0x218] sm:$0xff] }
 0xeaa   : > { %v16339_v6 = vpack.c.bf16 %v10454_v62, %v10452_v1  ;;  %v14316_v62 = vld [vmem:[%s24477_s16 + $0xa00] sm:$0xff] }
 0xeab   : > { %16000 = vmatmul.mubr.msk.bf16.gmra.mrb[124].mxu1 %vm2740_vm4, %v18258_v14  ;;  %v14299_v14 = vld [vmem:[%s24477_s16 + $0x978] sm:$0xff]  ;;  %v16597_v51 = vpack.c.bf16 %v14318_v5, %v14316_v62  ;;  %v14337_v5 = vld [vmem:[%s24477_s16 + $0xaa8] sm:$0xff] }
 0xeac   : > { %16001 = vmatprep.mubr.msk.bf16.mxu1 %vm2740_vm4, %v18259_v8  ;;  %16542 = vmatpush1.bf16.msra.mxu1 %v16541_v36  ;;  %v16575_v63 = vpack.c.bf16 %v14299_v14, %v14297_v60  ;;  %v14302_v36 = vld [vmem:[%s24477_s16 + $0x990] sm:$0xff]  ;;  %v10490_v62 = vld [vmem:[%s24477_s16 + $0x338] sm:$0xff] }
 0xead   : > { %16544 = vmatprep.subr.bf16.mxu1 %v16543_v50  ;;  %16340 = vmatprep.subr.bf16.mxu0 %v16339_v6  ;;  %v10465_v60 = vld [vmem:[%s24477_s16 + $0x270] sm:$0xff]  ;;  %v10472_v6 = vld [vmem:[%s24477_s16 + $0x2a8] sm:$0xff] }
 0xeae   : > { %v16353_v29 = vpack.c.bf16 %v10465_v60, %v10463_v59  ;;  %v10483_v60 = vld [vmem:[%s24477_s16 + $0x300] sm:$0xff] }
 0xeb0   : > { %16546 = vmatpush1.bf16.msra.mxu1 %v16545_v21  ;;  %v14306_v21 = vld [vmem:[%s24477_s16 + $0x9b0] sm:$0xff] }
 0xeb1   : > { %16548 = vmatprep.subr.bf16.mxu1 %v16547_v11  ;;  %v18264_v11 = vld [vmem:[%s24476_s15 + $0x38] sm:$0xff]   ;;  %v16585_v55 = vpack.c.bf16 %v14306_v21, %v14304_v23  ;;  %v16359_v21 = vpack.c.bf16 %v10474_v40, %v10472_v6 }
 0xeb2   : > { %v14339_v6 = vld [vmem:[%s24477_s16 + $0xab8] sm:$0xff] }
 0xeb3   : > { %16002 = vmatmul.mubr.msk.bf16.gmra.mrb[128].mxu1 %vm2740_vm4, %v18259_v8  ;;  %v14300_v8 = vld [vmem:[%s24477_s16 + $0x980] sm:$0xff] }
 0xeb4   : > { %16003 = vmatprep.mubr.msk.bf16.mxu1 %vm2740_vm4, %v18260_v16  ;;  %16550 = vmatpush1.bf16.msra.mxu1 %v16549_v17  ;;  %v16581_v50 = vpack.c.bf16 %v14302_v36, %v14300_v8  ;;  %v14310_v17 = vld [vmem:[%s24477_s16 + $0x9d0] sm:$0xff]  ;;  %v14323_v8 = vld [vmem:[%s24477_s16 + $0xa38] sm:$0xff] }
 0xeb5   : > { %16552 = vmatprep.subr.bf16.mxu1 %v16551_v30 }
 0xeb8   : > { %16554 = vmatpush1.bf16.msra.mxu1 %v16553_v37  ;;  %v14314_v37 = vld [vmem:[%s24477_s16 + $0x9f0] sm:$0xff] }
 0xeb9   : > { %16556 = vmatprep.subr.bf16.mxu1 %v16555_v31  ;;  %v16593_v31 = vpack.c.bf16 %v14314_v37, %v14312_v3  ;;  %v10475_v3 = vld [vmem:[%s24477_s16 + $0x2c0] sm:$0xff]  ;;  %v10477_v37 = vld [vmem:[%s24477_s16 + $0x2d0] sm:$0xff] }
 0xebb   : > { %16004 = vmatmul.mubr.msk.bf16.gmra.mrb[132].mxu1 %vm2740_vm4, %v18260_v16  ;;  %v14308_v16 = vld [vmem:[%s24477_s16 + $0x9c0] sm:$0xff] }
 0xebc   : > { %16558 = vmatpush1.bf16.msra.mxu1 %v16557_v38  ;;  %16005 = vmatprep.mubr.msk.bf16.mxu1 %vm2740_vm4, %v18261_v54  ;;  %v16589_v30 = vpack.c.bf16 %v14310_v17, %v14308_v16  ;;  %v10453_v38 = vld [vmem:[%s24477_s16 + $0x210] sm:$0xff]  ;;  %v10478_v16 = vld [vmem:[%s24477_s16 + $0x2d8] sm:$0xff]  ;;  %v14325_v17 = vld [vmem:[%s24477_s16 + $0xa48] sm:$0xff] }
 0xebd   : > { %16560 = vmatprep.subr.bf16.mxu1 %v16559_v26  ;;  %v10458_v26 = vld [vmem:[%s24477_s16 + $0x238] sm:$0xff]  ;;  %v16341_v28 = vpack.c.bf16 %v10453_v38, %v10451_v33  ;;  %v10480_v33 = vld [vmem:[%s24477_s16 + $0x2e8] sm:$0xff] }
 0xebe   : > { %v10482_v38 = vld [vmem:[%s24477_s16 + $0x2f8] sm:$0xff] }
 0xec0   : > { %16562 = vmatpush1.bf16.msra.mxu1 %v16561_v25  ;;  %v10455_v25 = vld [vmem:[%s24477_s16 + $0x220] sm:$0xff] }
 0xec1   : > { %16564 = vmatprep.subr.bf16.mxu1 %v16563_v4  ;;  %v10457_v4 = vld [vmem:[%s24477_s16 + $0x230] sm:$0xff] }
 0xec3   : > { %16006 = vmatmul.mubr.msk.bf16.gmra.mrb[136].mxu1 %vm2740_vm4, %v18261_v54  ;;  %v10456_v54 = vld [vmem:[%s24477_s16 + $0x228] sm:$0xff] }
 0xec4   : > { %16566 = vmatpush1.bf16.msra.mxu1 %v16565_v47  ;;  %16007 = vmatprep.mubr.msk.bf16.mxu1 %vm2740_vm4, %v18262_v48  ;;  %v16343_v39 = vpack.c.bf16 %v10458_v26, %v10456_v54  ;;  %v16345_v47 = vpack.c.bf16 %v10457_v4, %v10455_v25  ;;  %v14329_v54 = vld [vmem:[%s24477_s16 + $0xa68] sm:$0xff]  ;;  %v14331_v26 = vld [vmem:[%s24477_s16 + $0xa78] sm:$0xff]  ;;  %v16367_v4 = vpack.c.bf16 %v10482_v38, %v10480_v33  ;;  %v10495_v33 = vld [vmem:[%s24477_s16 + $0x360] sm:$0xff] }
 0xec5   : > { %16568 = vmatprep.subr.bf16.mxu1 %v16567_v41  ;;  %v10459_v41 = vld [vmem:[%s24477_s16 + $0x240] sm:$0xff]  ;;  %v10497_v38 = vld [vmem:[%s24477_s16 + $0x370] sm:$0xff] }
 0xec8   : > { %16570 = vmatpush1.bf16.msra.mxu1 %v16569_v56  ;;  %v16349_v56 = vpack.c.bf16 %v10461_v53, %v10459_v41  ;;  %v10486_v41 = vld [vmem:[%s24477_s16 + $0x318] sm:$0xff]  ;;  %v14333_v53 = vld [vmem:[%s24477_s16 + $0xa88] sm:$0xff] }
 0xec9   : > { %16572 = vmatprep.subr.bf16.mxu1 %v16571_v7 }
 0xecb   : > { %16008 = vmatmul.mubr.msk.bf16.gmra.mrb[140].mxu1 %vm2740_vm4, %v18262_v48  ;;  %v16347_v48 = vpack.c.bf16 %v10462_v44, %v10460_v43  ;;  %v16607_v43 = vpack.c.bf16 %v14331_v26, %v14329_v54  ;;  %v14328_v44 = vld [vmem:[%s24477_s16 + $0xa60] sm:$0xff] }
 0xecc   : > { %16574 = vmatpush1.bf16.msra.mxu1 %v16573_v24  ;;  %16009 = vmatprep.mubr.msk.bf16.mxu1 %vm2740_vm4, %v18263_v61  ;;  %v10468_v24 = vld [vmem:[%s24477_s16 + $0x288] sm:$0xff] }
 0xecd   : > { %16576 = vmatprep.subr.bf16.mxu1 %v16575_v63  ;;  %v10470_v63 = vld [vmem:[%s24477_s16 + $0x298] sm:$0xff] }
 0xece   : > { %v16355_v1 = vpack.c.bf16 %v10470_v63, %v10468_v24  ;;  %v10485_v24 = vld [vmem:[%s24477_s16 + $0x310] sm:$0xff] }
 0xecf   : > { %v16373_v40 = vpack.c.bf16 %v10485_v24, %v10483_v60  ;;  %v10504_v60 = vld [vmem:[%s24477_s16 + $0x3a8] sm:$0xff]  ;;  %v10506_v24 = vld [vmem:[%s24477_s16 + $0x3b8] sm:$0xff] }
 0xed0   : > { %16578 = vmatpush1.bf16.msra.mxu1 %v16577_v35  ;;  %v10467_v35 = vld [vmem:[%s24477_s16 + $0x280] sm:$0xff] }
 0xed1   : > { %16580 = vmatprep.subr.bf16.mxu1 %v16579_v20  ;;  %v14321_v20 = vld [vmem:[%s24477_s16 + $0xa28] sm:$0xff] }
 0xed3   : > { %16010 = vmatmul.mubr.msk.bf16.gmra.mrb[144].mxu1 %vm2740_vm4, %v18263_v61  ;;  %v10469_v61 = vld [vmem:[%s24477_s16 + $0x290] sm:$0xff] }
 0xed4   : > { %16582 = vmatpush1.bf16.msra.mxu1 %v16581_v50  ;;  %16011 = vmatprep.mubr.msk.bf16.mxu1 %vm2740_vm4, %v18264_v11  ;;  %v16357_v50 = vpack.c.bf16 %v10469_v61, %v10467_v35  ;;  %v14332_v35 = vld [vmem:[%s24477_s16 + $0xa80] sm:$0xff]  ;;  %v14334_v61 = vld [vmem:[%s24477_s16 + $0xa90] sm:$0xff] }
 0xed5   : > { %16584 = vmatprep.subr.bf16.mxu1 %v16583_v45  ;;  %v10473_v45 = vld [vmem:[%s24477_s16 + $0x2b0] sm:$0xff] }
 0xed6   : > { %v16361_v22 = vpack.c.bf16 %v10473_v45, %v10471_v9  ;;  %v14336_v9 = vld [vmem:[%s24477_s16 + $0xaa0] sm:$0xff]  ;;  %v14338_v45 = vld [vmem:[%s24477_s16 + $0xab0] sm:$0xff] }
 0xed8   : > { %16586 = vmatpush1.bf16.msra.mxu1 %v16585_v55  ;;  %v14320_v55 = vld [vmem:[%s24477_s16 + $0xa20] sm:$0xff] }
 0xed9   : > { %16588 = vmatprep.subr.bf16.mxu1 %v16587_v15 }
 0xedb   : > { %16012 = vmatmul.mubr.msk.bf16.gmra.mrb[148].mxu1 %vm2740_vm4, %v18264_v11  ;;  %v16599_v11 = vpack.c.bf16 %v14323_v8, %v14321_v20  ;;  %v16613_v20 = vpack.c.bf16 %v14334_v61, %v14332_v35  ;;  %v10487_v8 = vld [vmem:[%s24477_s16 + $0x320] sm:$0xff] }
 0xedc   : > { %16590 = vmatpush1.bf16.msra.mxu1 %v16589_v30  ;;  %v14327_v30 = vld [vmem:[%s24477_s16 + $0xa58] sm:$0xff] }
 0xedd   : > { %16592 = vmatprep.subr.bf16.mxu1 %v16591_v2  ;;  %v16601_v2 = vpack.c.bf16 %v14322_v34, %v14320_v55  ;;  %v16603_v0 = vpack.c.bf16 %v14327_v30, %v14325_v17  ;;  %v14343_v55 = vld [vmem:[%s24477_s16 + $0xad8] sm:$0xff]  ;;  %v10493_v17 = vld [vmem:[%s24477_s16 + $0x350] sm:$0xff] }
 0xee0   : > { %16594 = vmatpush1.bf16.msra.mxu1 %v16593_v31  ;;  %v16363_v31 = vpack.c.bf16 %v10478_v16, %v10476_v12  ;;  %v16617_v12 = vpack.c.bf16 %v14338_v45, %v14336_v9  ;;  %v10491_v16 = vld [vmem:[%s24477_s16 + $0x340] sm:$0xff] }
 0xee1   : > { %16596 = vmatprep.subr.bf16.mxu1 %v16595_v10  ;;  %v14326_v10 = vld [vmem:[%s24477_s16 + $0xa50] sm:$0xff] }
 0xf76   : > { %v10308_v13 = vpop.f32.mrb[120].mxu1 }
 0xf77   : > { %v10310_v32 = vpop.f32.mrb[121].mxu1 }
 0xf78   : > { %10709 = vmatprep.mubr.f32.mxu0 %v10310_v32  ;;  %v21694_v19 = vpop.f32.mrb[122].mxu1  ;;  %v10479_v32 = vld [vmem:[%s24477_s16 + $0x2e0] sm:$0xff] }
 0xf79   : > { %10710 = vmatmul.mubr.f32.vlgmr.msra.gmra.mrb[40].mxu0 %v10308_v13  ;;  %v10314_v52 = vpop.f32.mrb[123].mxu1  ;;  %v16365_v13 = vpack.c.bf16 %v10477_v37, %v10475_v3  ;;  %v10496_v3 = vld [vmem:[%s24477_s16 + $0x368] sm:$0xff]  ;;  %v10498_v37 = vld [vmem:[%s24477_s16 + $0x378] sm:$0xff] }
 0xf7a   : > { %16342 = vmatpush1.bf16.msra.mxu0 %v16341_v28  ;;  %10780 = vmatprep.mubr.f32.mxu0 %v10314_v52  ;;  %v16605_v28 = vpack.c.bf16 %v14326_v10, %v14324_v42  ;;  %v14330_v52 = vld [vmem:[%s24477_s16 + $0xa70] sm:$0xff]  ;;  %v16381_v42 = vpack.c.bf16 %v10493_v17, %v10491_v16  ;;  %v16383_v54 = vpack.c.bf16 %v10498_v37, %v10496_v3  ;;  %v10512_v16 = vld [vmem:[%s24477_s16 + $0x3e8] sm:$0xff]  ;;  %v10514_v17 = vld [vmem:[%s24477_s16 + $0x3f8] sm:$0xff] }
 0xf7b   : > { %16344 = vmatprep.subr.bf16.mxu0 %v16343_v39  ;;  %v10481_v39 = vld [vmem:[%s24477_s16 + $0x2f0] sm:$0xff]  ;;  %v16609_v59 = vpack.c.bf16 %v14330_v52, %v14328_v44  ;;  %v16385_v44 = vpack.c.bf16 %v10497_v38, %v10495_v33  ;;  %v10511_v3 = vld [vmem:[%s24477_s16 + $0x3e0] sm:$0xff]  ;;  %v10516_v33 = vld [vmem:[%s24477_s16 + $0x408] sm:$0xff] }
 0xf7c   : > { %v10513_v37 = vld [vmem:[%s24477_s16 + $0x3f0] sm:$0xff]  ;;  %v10518_v38 = vld [vmem:[%s24477_s16 + $0x418] sm:$0xff] }
 0xf7e   : > { %16346 = vmatpush1.bf16.msra.mxu0 %v16345_v47  ;;  %v21714_v49 = vpop.f32.mrb[124].mxu1  ;;  %v10484_v47 = vld [vmem:[%s24477_s16 + $0x308] sm:$0xff] }
 0xf7f   : > { %16348 = vmatprep.subr.bf16.mxu0 %v16347_v48  ;;  %v21716_v7 = vpop.f32.mrb[125].mxu1  ;;  %v16371_v63 = vpack.c.bf16 %v10486_v41, %v10484_v47  ;;  %v10499_v47 = vld [vmem:[%s24477_s16 + $0x380] sm:$0xff]  ;;  %v10501_v41 = vld [vmem:[%s24477_s16 + $0x390] sm:$0xff] }
 0xf80   : > { %v21724_v14 = vpop.f32.mrb[126].mxu1  ;;  %v16389_v35 = vpack.c.bf16 %v10501_v41, %v10499_v47  ;;  %v10520_v47 = vld [vmem:[%s24477_s16 + $0x428] sm:$0xff]  ;;  %v10522_v41 = vld [vmem:[%s24477_s16 + $0x438] sm:$0xff] }
 0xf81   : > { %v21732_v27 = vpop.f32.mrb[127].mxu1 }
 0xf82   : > { %16350 = vmatpush1.bf16.msra.mxu0 %v16349_v56 }
 0xf83   : > { %16352 = vmatprep.subr.bf16.mxu0 %v16351_v57  ;;  %v16369_v57 = vpack.c.bf16 %v10481_v39, %v10479_v32  ;;  %v10500_v32 = vld [vmem:[%s24477_s16 + $0x388] sm:$0xff]  ;;  %v10502_v39 = vld [vmem:[%s24477_s16 + $0x398] sm:$0xff] }
 0xf86   : > { %16354 = vmatpush1.bf16.msra.mxu0 %v16353_v29  ;;  %v10328_v36 = vpop.f32.mrb[128].mxu1  ;;  %v16611_v29 = vpack.c.bf16 %v14335_v58, %v14333_v53  ;;  %v16387_v53 = vpack.c.bf16 %v10502_v39, %v10500_v32  ;;  %v16403_v32 = vpack.c.bf16 %v10518_v38, %v10516_v33 }
 0xf87   : > { %v10330_v23 = vpop.f32.mrb[129].mxu1  ;;  %16356 = vmatprep.subr.bf16.mxu0 %v16355_v1  ;;  %v10488_v1 = vld [vmem:[%s24477_s16 + $0x328] sm:$0xff] }
 0xf88   : > { %11259 = vmatprep.mubr.f32.mxu1 %v10330_v23  ;;  %v21773_v15 = vpop.f32.mrb[130].mxu1  ;;  %v10492_v23 = vld [vmem:[%s24477_s16 + $0x348] sm:$0xff] }
 0xf89   : > { %11260 = vmatmul.mubr.f32.vlgmr.msra.gmra.mrb[152].mxu1 %v10328_v36  ;;  %v10334_v18 = vpop.f32.mrb[131].mxu1  ;;  %v10489_v36 = vld [vmem:[%s24477_s16 + $0x330] sm:$0xff] }
 0xf8a   : > { %16358 = vmatpush1.bf16.msra.mxu0 %v16357_v50  ;;  %16598 = vmatpush1.bf16.msra.mxu1 %v16597_v51  ;;  %v16375_v50 = vpack.c.bf16 %v10490_v62, %v10488_v1  ;;  %v16615_v51 = vpack.c.bf16 %v14339_v6, %v14337_v5  ;;  %v16377_v34 = vpack.c.bf16 %v10489_v36, %v10487_v8  ;;  %v10503_v1 = vld [vmem:[%s24477_s16 + $0x3a0] sm:$0xff]  ;;  %v10505_v62 = vld [vmem:[%s24477_s16 + $0x3b0] sm:$0xff]  ;;  %v10508_v8 = vld [vmem:[%s24477_s16 + $0x3c8] sm:$0xff] }
 0xf8b   : > { %16360 = vmatprep.subr.bf16.mxu0 %v16359_v21  ;;  %16600 = vmatprep.subr.bf16.mxu1 %v16599_v11  ;;  %v10494_v21 = vld [vmem:[%s24477_s16 + $0x358] sm:$0xff]  ;;  %v14341_v11 = vld [vmem:[%s24477_s16 + $0xac8] sm:$0xff]  ;;  %v16391_v5 = vpack.c.bf16 %v10506_v24, %v10504_v60  ;;  %v16393_v9 = vpack.c.bf16 %v10505_v62, %v10503_v1  ;;  %v16407_v60 = vpack.c.bf16 %v10522_v41, %v10520_v47  ;;  %v10519_v24 = vld [vmem:[%s24477_s16 + $0x420] sm:$0xff] }
 0xf8c   : > { %11330 = vmatprep.mubr.f32.mxu1 %v10334_v18  ;;  %v16379_v30 = vpack.c.bf16 %v10494_v21, %v10492_v23  ;;  %v16619_v18 = vpack.c.bf16 %v14343_v55, %v14341_v11  ;;  %v10510_v36 = vld [vmem:[%s24477_s16 + $0x3d8] sm:$0xff]  ;;  %v10507_v23 = vld [vmem:[%s24477_s16 + $0x3c0] sm:$0xff]  ;;  %v10509_v21 = vld [vmem:[%s24477_s16 + $0x3d0] sm:$0xff] }
 0xf8d   : > { %v16395_v11 = vpack.c.bf16 %v10510_v36, %v10508_v8  ;;  %v10524_v1 = vld [vmem:[%s24477_s16 + $0x448] sm:$0xff]  ;;  %v10526_v62 = vld [vmem:[%s24477_s16 + $0x458] sm:$0xff]  ;;  %v10525_v36 = vld [vmem:[%s24477_s16 + $0x450] sm:$0xff] }
 0xf8e   : > { %16362 = vmatpush1.bf16.msra.mxu0 %v16361_v22  ;;  %16602 = vmatpush1.bf16.msra.mxu1 %v16601_v2  ;;  %v21814_v25 = vpop.f32.mrb[132].mxu1  ;;  %v14340_v22 = vld [vmem:[%s24477_s16 + $0xac0] sm:$0xff]  ;;  %v14342_v2 = vld [vmem:[%s24477_s16 + $0xad0] sm:$0xff]  ;;  %v16411_v8 = vpack.c.bf16 %v10526_v62, %v10524_v1  ;;  %v14387_v47 = vld [vmem:[%s24477_s16 + $0xc38] sm:$0xff] }
 0xf8f   : > { %16364 = vmatprep.subr.bf16.mxu0 %v16363_v31  ;;  %16604 = vmatprep.subr.bf16.mxu1 %v16603_v0  ;;  %v21825_v48 = vpop.f32.mrb[133].mxu1  ;;  %v14345_v31 = vld [vmem:[%s24477_s16 + $0xae8] sm:$0xff]  ;;  %v14347_v0 = vld [vmem:[%s24477_s16 + $0xaf8] sm:$0xff]  ;;  %v16621_v10 = vpack.c.bf16 %v14342_v2, %v14340_v22  ;;  %v16397_v22 = vpack.c.bf16 %v10509_v21, %v10507_v23 }
 0xf90   : > { %v21836_v46 = vpop.f32.mrb[134].mxu1  ;;  %v16623_v26 = vpack.c.bf16 %v14347_v0, %v14345_v31  ;;  %v16399_v31 = vpack.c.bf16 %v10514_v17, %v10512_v16  ;;  %v14377_v21 = vld [vmem:[%s24477_s16 + $0xbe8] sm:$0xff]  ;;  %v10542_v62 = vld [vmem:[%s24477_s16 + $0x4d8] sm:$0xff] }
 0xf91   : > { %v21838_v56 = vpop.f32.mrb[135].mxu1  ;;  %v10540_v1 = vld [vmem:[%s24477_s16 + $0x4c8] sm:$0xff] }
 0xf92   : > { %16366 = vmatpush1.bf16.msra.mxu0 %v16365_v13  ;;  %16606 = vmatpush1.bf16.msra.mxu1 %v16605_v28  ;;  %v14344_v13 = vld [vmem:[%s24477_s16 + $0xae0] sm:$0xff]  ;;  %v14346_v28 = vld [vmem:[%s24477_s16 + $0xaf0] sm:$0xff] }
 0xf93   : > { %16368 = vmatprep.subr.bf16.mxu0 %v16367_v4  ;;  %16608 = vmatprep.subr.bf16.mxu1 %v16607_v43  ;;  %v14349_v4 = vld [vmem:[%s24477_s16 + $0xb08] sm:$0xff]  ;;  %v14351_v43 = vld [vmem:[%s24477_s16 + $0xb18] sm:$0xff]  ;;  %v16625_v52 = vpack.c.bf16 %v14346_v28, %v14344_v13  ;;  %v16401_v13 = vpack.c.bf16 %v10513_v37, %v10511_v3  ;;  %v14378_v37 = vld [vmem:[%s24477_s16 + $0xbf0] sm:$0xff] }
 0xf94   : > { %v16627_v58 = vpack.c.bf16 %v14351_v43, %v14349_v4  ;;  %v10515_v4 = vld [vmem:[%s24477_s16 + $0x400] sm:$0xff]  ;;  %v10517_v43 = vld [vmem:[%s24477_s16 + $0x410] sm:$0xff] }
 0xf96   : > { %16370 = vmatpush1.bf16.msra.mxu0 %v16369_v57  ;;  %16610 = vmatpush1.bf16.msra.mxu1 %v16609_v59  ;;  %v14348_v57 = vld [vmem:[%s24477_s16 + $0xb00] sm:$0xff]  ;;  %v14350_v59 = vld [vmem:[%s24477_s16 + $0xb10] sm:$0xff]  ;;  %v22100_v23 = vpop.f32.mrb[136].mxu1 }
 0xf97   : > { %16372 = vmatprep.subr.bf16.mxu0 %v16371_v63  ;;  %16612 = vmatprep.subr.bf16.mxu1 %v16611_v29  ;;  %v14353_v63 = vld [vmem:[%s24477_s16 + $0xb28] sm:$0xff]  ;;  %v14355_v29 = vld [vmem:[%s24477_s16 + $0xb38] sm:$0xff]  ;;  %v16629_v61 = vpack.c.bf16 %v14350_v59, %v14348_v57  ;;  %v16405_v57 = vpack.c.bf16 %v10517_v43, %v10515_v4 }
 0xf98   : > { %v16631_v6 = vpack.c.bf16 %v14355_v29, %v14353_v63  ;;  %v10521_v63 = vld [vmem:[%s24477_s16 + $0x430] sm:$0xff]  ;;  %v14368_v29 = vld [vmem:[%s24477_s16 + $0xba0] sm:$0xff]  ;;  %v10536_v4 = vld [vmem:[%s24477_s16 + $0x4a8] sm:$0xff] }
 0xf99   : > { %v10538_v43 = vld [vmem:[%s24477_s16 + $0x4b8] sm:$0xff] }
 0xf9a   : > { %16374 = vmatpush1.bf16.msra.mxu0 %v16373_v40  ;;  %16614 = vmatpush1.bf16.msra.mxu1 %v16613_v20  ;;  %v14352_v40 = vld [vmem:[%s24477_s16 + $0xb20] sm:$0xff]  ;;  %v14354_v20 = vld [vmem:[%s24477_s16 + $0xb30] sm:$0xff] }
 0xf9b   : > { %16376 = vmatprep.subr.bf16.mxu0 %v16375_v50  ;;  %16616 = vmatprep.subr.bf16.mxu1 %v16615_v51  ;;  %v14357_v50 = vld [vmem:[%s24477_s16 + $0xb48] sm:$0xff]  ;;  %v14359_v51 = vld [vmem:[%s24477_s16 + $0xb58] sm:$0xff]  ;;  %v16633_v45 = vpack.c.bf16 %v14354_v20, %v14352_v40  ;;  %v16409_v40 = vpack.c.bf16 %v10521_v63, %v10519_v24  ;;  %v10537_v24 = vld [vmem:[%s24477_s16 + $0x4b0] sm:$0xff] }
 0xf9c   : > { %v16635_v55 = vpack.c.bf16 %v14359_v51, %v14357_v50  ;;  %v14372_v50 = vld [vmem:[%s24477_s16 + $0xbc0] sm:$0xff] }
 0xf9d   : > { %v14384_v63 = vld [vmem:[%s24477_s16 + $0xc20] sm:$0xff] }
 0xf9e   : > { %16378 = vmatpush1.bf16.msra.mxu0 %v16377_v34  ;;  %16618 = vmatpush1.bf16.msra.mxu1 %v16617_v12  ;;  %v14356_v34 = vld [vmem:[%s24477_s16 + $0xb40] sm:$0xff]  ;;  %v14358_v12 = vld [vmem:[%s24477_s16 + $0xb50] sm:$0xff] }
 0xf9f   : > { %16380 = vmatprep.subr.bf16.mxu0 %v16379_v30  ;;  %16620 = vmatprep.subr.bf16.mxu1 %v16619_v18  ;;  %v14361_v30 = vld [vmem:[%s24477_s16 + $0xb68] sm:$0xff]  ;;  %v14363_v18 = vld [vmem:[%s24477_s16 + $0xb78] sm:$0xff]  ;;  %v16637_v2 = vpack.c.bf16 %v14358_v12, %v14356_v34 }
 0xfa0   : > { %v16639_v0 = vpack.c.bf16 %v14363_v18, %v14361_v30  ;;  %v10527_v30 = vld [vmem:[%s24477_s16 + $0x460] sm:$0xff]  ;;  %v10529_v18 = vld [vmem:[%s24477_s16 + $0x470] sm:$0xff] }
 0xfa1   : > { %v16417_v33 = vpack.c.bf16 %v10529_v18, %v10527_v30  ;;  %v10543_v18 = vld [vmem:[%s24477_s16 + $0x4e0] sm:$0xff] }
 0xfa2   : > { %16382 = vmatpush1.bf16.msra.mxu0 %v16381_v42  ;;  %16622 = vmatpush1.bf16.msra.mxu1 %v16621_v10  ;;  %v14360_v42 = vld [vmem:[%s24477_s16 + $0xb60] sm:$0xff]  ;;  %v14362_v10 = vld [vmem:[%s24477_s16 + $0xb70] sm:$0xff] }
 0xfa3   : > { %16384 = vmatprep.subr.bf16.mxu0 %v16383_v54  ;;  %16624 = vmatprep.subr.bf16.mxu1 %v16623_v26  ;;  %v14365_v54 = vld [vmem:[%s24477_s16 + $0xb88] sm:$0xff]  ;;  %v14367_v26 = vld [vmem:[%s24477_s16 + $0xb98] sm:$0xff]  ;;  %v16641_v28 = vpack.c.bf16 %v14362_v10, %v14360_v42 }
 0xfa4   : > { %v16643_v39 = vpack.c.bf16 %v14367_v26, %v14365_v54  ;;  %v14381_v42 = vld [vmem:[%s24477_s16 + $0xc08] sm:$0xff]  ;;  %v14383_v10 = vld [vmem:[%s24477_s16 + $0xc18] sm:$0xff]  ;;  %v10531_v26 = vld [vmem:[%s24477_s16 + $0x480] sm:$0xff] }
 0xfa6   : > { %16386 = vmatpush1.bf16.msra.mxu0 %v16385_v44  ;;  %16626 = vmatpush1.bf16.msra.mxu1 %v16625_v52  ;;  %v14364_v44 = vld [vmem:[%s24477_s16 + $0xb80] sm:$0xff]  ;;  %v14366_v52 = vld [vmem:[%s24477_s16 + $0xb90] sm:$0xff] }
 0xfa7   : > { %16388 = vmatprep.subr.bf16.mxu0 %v16387_v53  ;;  %16628 = vmatprep.subr.bf16.mxu1 %v16627_v58  ;;  %v14369_v53 = vld [vmem:[%s24477_s16 + $0xba8] sm:$0xff]  ;;  %v14371_v58 = vld [vmem:[%s24477_s16 + $0xbb8] sm:$0xff]  ;;  %v16645_v59 = vpack.c.bf16 %v14366_v52, %v14364_v44 }
 0xfa8   : > { %v14385_v52 = vld [vmem:[%s24477_s16 + $0xc28] sm:$0xff] }
 0xfaa   : > { %16390 = vmatpush1.bf16.msra.mxu0 %v16389_v35  ;;  %16630 = vmatpush1.bf16.msra.mxu1 %v16629_v61  ;;  %v16647_v35 = vpack.c.bf16 %v14371_v58, %v14369_v53  ;;  %v14370_v61 = vld [vmem:[%s24477_s16 + $0xbb0] sm:$0xff] }
 0xfab   : > { %16392 = vmatprep.subr.bf16.mxu0 %v16391_v5  ;;  %16632 = vmatprep.subr.bf16.mxu1 %v16631_v6  ;;  %v14373_v5 = vld [vmem:[%s24477_s16 + $0xbc8] sm:$0xff]  ;;  %v14375_v6 = vld [vmem:[%s24477_s16 + $0xbd8] sm:$0xff]  ;;  %v16649_v20 = vpack.c.bf16 %v14370_v61, %v14368_v29  ;;  %v14386_v61 = vld [vmem:[%s24477_s16 + $0xc30] sm:$0xff] }
 0xfac   : > { %v16651_v51 = vpack.c.bf16 %v14375_v6, %v14373_v5  ;;  %v14389_v5 = vld [vmem:[%s24477_s16 + $0xc48] sm:$0xff]  ;;  %v14391_v6 = vld [vmem:[%s24477_s16 + $0xc58] sm:$0xff] }
 0xfae   : > { %16394 = vmatpush1.bf16.msra.mxu0 %v16393_v9  ;;  %16634 = vmatpush1.bf16.msra.mxu1 %v16633_v45  ;;  %v10528_v9 = vld [vmem:[%s24477_s16 + $0x468] sm:$0xff]  ;;  %v10530_v45 = vld [vmem:[%s24477_s16 + $0x478] sm:$0xff] }
 0xfaf   : > { %16396 = vmatprep.subr.bf16.mxu0 %v16395_v11  ;;  %16636 = vmatprep.subr.bf16.mxu1 %v16635_v55  ;;  %v14379_v11 = vld [vmem:[%s24477_s16 + $0xbf8] sm:$0xff]  ;;  %v22108_v55 = vpop.f32.mrb[137].mxu1  ;;  %v16415_v17 = vpack.c.bf16 %v10530_v45, %v10528_v9 }
 0xfb0   : > { %v22110_v12 = vpop.f32.mrb[138].mxu1  ;;  %v16655_v3 = vpack.c.bf16 %v14379_v11, %v14377_v21  ;;  %v10546_v9 = vld [vmem:[%s24477_s16 + $0x4f8] sm:$0xff]  ;;  %v14393_v21 = vld [vmem:[%s24477_s16 + $0xc68] sm:$0xff] }
 0xfb1   : > { %v14395_v11 = vld [vmem:[%s24477_s16 + $0xc78] sm:$0xff] }
 0xfb2   : > { %16398 = vmatpush1.bf16.msra.mxu0 %v16397_v22  ;;  %16638 = vmatpush1.bf16.msra.mxu1 %v16637_v2  ;;  %v14376_v22 = vld [vmem:[%s24477_s16 + $0xbe0] sm:$0xff]  ;;  %v22121_v2 = vpop.f32.mrb[139].mxu1 }
 0xfb3   : > { %16400 = vmatprep.subr.bf16.mxu0 %v16399_v31  ;;  %16640 = vmatprep.subr.bf16.mxu1 %v16639_v0  ;;  %v10532_v31 = vld [vmem:[%s24477_s16 + $0x488] sm:$0xff]  ;;  %v10534_v0 = vld [vmem:[%s24477_s16 + $0x498] sm:$0xff]  ;;  %v16657_v38 = vpack.c.bf16 %v14378_v37, %v14376_v22  ;;  %v22156_v44 = vpop.f32.mrb[140].mxu1  ;;  %v10545_v22 = vld [vmem:[%s24477_s16 + $0x4f0] sm:$0xff] }
 0xfb4   : > { %v16419_v54 = vpack.c.bf16 %v10534_v0, %v10532_v31  ;;  %v22164_v41 = vpop.f32.mrb[141].mxu1  ;;  %v16671_v31 = vpack.c.bf16 %v14395_v11, %v14393_v21  ;;  %v14394_v0 = vld [vmem:[%s24477_s16 + $0xc70] sm:$0xff]  ;;  %v14404_v11 = vld [vmem:[%s24477_s16 + $0xcc0] sm:$0xff] }
 0xfb5   : > { %v22166_v58 = vpop.f32.mrb[142].mxu1  ;;  %v10557_v21 = vld [vmem:[%s24477_s16 + $0x550] sm:$0xff] }
 0xfb6   : > { %16402 = vmatpush1.bf16.msra.mxu0 %v16401_v13  ;;  %16642 = vmatpush1.bf16.msra.mxu1 %v16641_v28  ;;  %v10533_v13 = vld [vmem:[%s24477_s16 + $0x490] sm:$0xff]  ;;  %v14380_v28 = vld [vmem:[%s24477_s16 + $0xc00] sm:$0xff]  ;;  %v22177_v29 = vpop.f32.mrb[143].mxu1 }
 0xfb7   : > { %16404 = vmatprep.subr.bf16.mxu0 %v16403_v32  ;;  %16644 = vmatprep.subr.bf16.mxu1 %v16643_v39  ;;  %v16659_v32 = vpack.c.bf16 %v14383_v10, %v14381_v42  ;;  %v14382_v39 = vld [vmem:[%s24477_s16 + $0xc10] sm:$0xff]  ;;  %v16421_v53 = vpack.c.bf16 %v10533_v13, %v10531_v26  ;;  %v22214_v45 = vpop.f32.mrb[144].mxu1  ;;  %v10548_v42 = vld [vmem:[%s24477_s16 + $0x508] sm:$0xff]  ;;  %v10550_v10 = vld [vmem:[%s24477_s16 + $0x518] sm:$0xff] }
 0xfb8   : > { %v16435_v13 = vpack.c.bf16 %v10550_v10, %v10548_v42  ;;  %v10559_v10 = vld [vmem:[%s24477_s16 + $0x560] sm:$0xff] }
 0xfb9   : > { %10781 = vmatmul.mubr.f32.vlgmr.msra.gmra.mrb[40].mxu0 %v21694_v19  ;;  %v10523_v19 = vld [vmem:[%s24477_s16 + $0x440] sm:$0xff] }
 0xfba   : > { %16406 = vmatpush1.bf16.msra.mxu0 %v16405_v57  ;;  %10851 = vmatprep.mubr.f32.mxu0 %v21716_v7  ;;  %v14374_v7 = vld [vmem:[%s24477_s16 + $0xbd0] sm:$0xff]  ;;  %v16413_v34 = vpack.c.bf16 %v10525_v36, %v10523_v19  ;;  %v16661_v57 = vpack.c.bf16 %v14382_v39, %v14380_v28  ;;  %v10539_v19 = vld [vmem:[%s24477_s16 + $0x4c0] sm:$0xff] }
 0xfbb   : > { %16646 = vmatpush1.bf16.msra.mxu1 %v16645_v59  ;;  %16408 = vmatprep.subr.bf16.mxu0 %v16407_v60  ;;  %v16653_v16 = vpack.c.bf16 %v14374_v7, %v14372_v50  ;;  %v16423_v59 = vpack.c.bf16 %v10538_v43, %v10536_v4  ;;  %v10535_v60 = vld [vmem:[%s24477_s16 + $0x4a0] sm:$0xff]  ;;  %v10541_v36 = vld [vmem:[%s24477_s16 + $0x4d0] sm:$0xff]  ;;  %v10544_v7 = vld [vmem:[%s24477_s16 + $0x4e8] sm:$0xff] }
 0xfbc   : > { %16648 = vmatprep.subr.bf16.mxu1 %v16647_v35  ;;  %v16663_v35 = vpack.c.bf16 %v14387_v47, %v14385_v52  ;;  %v14388_v50 = vld [vmem:[%s24477_s16 + $0xc40] sm:$0xff]  ;;  %v14398_v43 = vld [vmem:[%s24477_s16 + $0xc90] sm:$0xff]  ;;  %v10552_v52 = vld [vmem:[%s24477_s16 + $0x528] sm:$0xff] }
 0xfbd   : > { %v10547_v28 = vld [vmem:[%s24477_s16 + $0x500] sm:$0xff]  ;;  %v10554_v47 = vld [vmem:[%s24477_s16 + $0x538] sm:$0xff] }
 0xfbe   : > { %16410 = vmatpush1.bf16.msra.mxu0 %v16409_v40  ;;  %v16425_v40 = vpack.c.bf16 %v10537_v24, %v10535_v60  ;;  %v14396_v39 = vld [vmem:[%s24477_s16 + $0xc80] sm:$0xff] }
 0xfbf   : > { %16650 = vmatpush1.bf16.msra.mxu1 %v16649_v20  ;;  %16412 = vmatprep.subr.bf16.mxu0 %v16411_v8  ;;  %v16665_v20 = vpack.c.bf16 %v14386_v61, %v14384_v63  ;;  %v16427_v8 = vpack.c.bf16 %v10542_v62, %v10540_v1  ;;  %v16439_v61 = vpack.c.bf16 %v10554_v47, %v10552_v52  ;;  %v10551_v1 = vld [vmem:[%s24477_s16 + $0x520] sm:$0xff]  ;;  %v10553_v62 = vld [vmem:[%s24477_s16 + $0x530] sm:$0xff] }
 0xfc0   : > { %16652 = vmatprep.subr.bf16.mxu1 %v16651_v51  ;;  %v14390_v51 = vld [vmem:[%s24477_s16 + $0xc50] sm:$0xff]  ;;  %v10563_v47 = vld [vmem:[%s24477_s16 + $0x580] sm:$0xff] }
 0xfc1   : > { %v16669_v30 = vpack.c.bf16 %v14390_v51, %v14388_v50  ;;  %v14407_v50 = vld [vmem:[%s24477_s16 + $0xcd8] sm:$0xff] }
 0xfc2   : > { %16414 = vmatpush1.bf16.msra.mxu0 %v16413_v34  ;;  %v22222_v34 = vpop.f32.mrb[145].mxu1 }
 0xfc3   : > { %16654 = vmatpush1.bf16.msra.mxu1 %v16653_v16  ;;  %16416 = vmatprep.subr.bf16.mxu0 %v16415_v17  ;;  %v16429_v16 = vpack.c.bf16 %v10541_v36, %v10539_v19  ;;  %v22224_v17 = vpop.f32.mrb[146].mxu1  ;;  %v10558_v19 = vld [vmem:[%s24477_s16 + $0x558] sm:$0xff]  ;;  %v14405_v36 = vld [vmem:[%s24477_s16 + $0xcc8] sm:$0xff] }
 0xfc4   : > { %16656 = vmatprep.subr.bf16.mxu1 %v16655_v3  ;;  %v14392_v3 = vld [vmem:[%s24477_s16 + $0xc60] sm:$0xff]  ;;  %v22235_v37 = vpop.f32.mrb[147].mxu1 }
 0xfc5   : > { %v16673_v26 = vpack.c.bf16 %v14394_v0, %v14392_v3  ;;  %v14411_v3 = vld [vmem:[%s24477_s16 + $0xcf8] sm:$0xff] }
 0xfc6   : > { %16418 = vmatpush1.bf16.msra.mxu0 %v16417_v33  ;;  %v14397_v33 = vld [vmem:[%s24477_s16 + $0xc88] sm:$0xff] }
 0xfc7   : > { %16658 = vmatpush1.bf16.msra.mxu1 %v16657_v38  ;;  %16420 = vmatprep.subr.bf16.mxu0 %v16419_v54  ;;  %v14399_v38 = vld [vmem:[%s24477_s16 + $0xc98] sm:$0xff]  ;;  %v16433_v54 = vpack.c.bf16 %v10545_v22, %v10543_v18  ;;  %v14409_v22 = vld [vmem:[%s24477_s16 + $0xce8] sm:$0xff] }
 0xfc8   : > { %16660 = vmatprep.subr.bf16.mxu1 %v16659_v32  ;;  %v10549_v32 = vld [vmem:[%s24477_s16 + $0x510] sm:$0xff]  ;;  %v16675_v4 = vpack.c.bf16 %v14399_v38, %v14397_v33  ;;  %v10562_v18 = vld [vmem:[%s24477_s16 + $0x578] sm:$0xff]  ;;  %v14408_v38 = vld [vmem:[%s24477_s16 + $0xce0] sm:$0xff] }
 0xfc9   : > { %v16437_v24 = vpack.c.bf16 %v10549_v32, %v10547_v28  ;;  %v10561_v33 = vld [vmem:[%s24477_s16 + $0x570] sm:$0xff]  ;;  %v10566_v28 = vld [vmem:[%s24477_s16 + $0x598] sm:$0xff]  ;;  %v14413_v32 = vld [vmem:[%s24477_s16 + $0xd08] sm:$0xff] }
 0xfca   : > { %11331 = vmatmul.mubr.f32.vlgmr.msra.gmra.mrb[152].mxu1 %v21773_v15  ;;  %16422 = vmatpush1.bf16.msra.mxu0 %v16421_v53  ;;  %v16667_v15 = vpack.c.bf16 %v14391_v6, %v14389_v5  ;;  %v22270_v53 = vpop.f32.mrb[148].mxu1  ;;  %v14400_v5 = vld [vmem:[%s24477_s16 + $0xca0] sm:$0xff] }
 0xfcb   : > { %16662 = vmatpush1.bf16.msra.mxu1 %v16661_v57  ;;  %16424 = vmatprep.subr.bf16.mxu0 %v16423_v59  ;;  %v14401_v57 = vld [vmem:[%s24477_s16 + $0xca8] sm:$0xff]  ;;  %v14403_v59 = vld [vmem:[%s24477_s16 + $0xcb8] sm:$0xff]  ;;  %v22278_v60 = vpop.f32.mrb[149].mxu1 }
 0xfcc   : > { %16664 = vmatprep.subr.bf16.mxu1 %v16663_v35  ;;  %11401 = vmatprep.mubr.f32.mxu1 %v21825_v48  ;;  %v16431_v48 = vpack.c.bf16 %v10546_v9, %v10544_v7  ;;  %v22280_v63 = vpop.f32.mrb[150].mxu1  ;;  %v16677_v35 = vpack.c.bf16 %v14398_v43, %v14396_v39  ;;  %v10555_v9 = vld [vmem:[%s24477_s16 + $0x540] sm:$0xff]  ;;  %v14415_v39 = vld [vmem:[%s24477_s16 + $0xd18] sm:$0xff] }
 0xfcd   : > { %v22291_v6 = vpop.f32.mrb[151].mxu1 }
 0xfce   : > { %16426 = vmatpush1.bf16.msra.mxu0 %v16425_v40  ;;  %v16679_v40 = vpack.c.bf16 %v14403_v59, %v14401_v57  ;;  %v10565_v57 = vld [vmem:[%s24477_s16 + $0x590] sm:$0xff]  ;;  %v14412_v59 = vld [vmem:[%s24477_s16 + $0xd00] sm:$0xff] }
 0xfcf   : > { %16666 = vmatpush1.bf16.msra.mxu1 %v16665_v20  ;;  %16428 = vmatprep.subr.bf16.mxu0 %v16427_v8  ;;  %v14402_v20 = vld [vmem:[%s24477_s16 + $0xcb0] sm:$0xff]  ;;  %v10556_v8 = vld [vmem:[%s24477_s16 + $0x548] sm:$0xff] }
 0xfd0   : > { %16668 = vmatprep.subr.bf16.mxu1 %v16667_v15  ;;  %v16441_v15 = vpack.c.bf16 %v10553_v62, %v10551_v1  ;;  %v16681_v51 = vpack.c.bf16 %v14402_v20, %v14400_v5  ;;  %v16443_v7 = vpack.c.bf16 %v10558_v19, %v10556_v8  ;;  %v10570_v1 = vld [vmem:[%s24477_s16 + $0x5b8] sm:$0xff]  ;;  %v14417_v62 = vld [vmem:[%s24477_s16 + $0xd28] sm:$0xff]  ;;  %v10567_v19 = vld [vmem:[%s24477_s16 + $0x5a0] sm:$0xff] }
 0xfd1   : > { %v14419_v5 = vld [vmem:[%s24477_s16 + $0xd38] sm:$0xff] }
 0xfd2   : > { %16430 = vmatpush1.bf16.msra.mxu0 %v16429_v16  ;;  %v16683_v16 = vpack.c.bf16 %v14407_v50, %v14405_v36  ;;  %v10569_v36 = vld [vmem:[%s24477_s16 + $0x5b0] sm:$0xff]  ;;  %v14416_v50 = vld [vmem:[%s24477_s16 + $0xd20] sm:$0xff] }
 0xfd3   : > { %16670 = vmatpush1.bf16.msra.mxu1 %v16669_v30  ;;  %16432 = vmatprep.subr.bf16.mxu0 %v16431_v48  ;;  %v14406_v30 = vld [vmem:[%s24477_s16 + $0xcd0] sm:$0xff]  ;;  %v10560_v48 = vld [vmem:[%s24477_s16 + $0x568] sm:$0xff] }
 0xfd4   : > { %16672 = vmatprep.subr.bf16.mxu1 %v16671_v31  ;;  %v16445_v31 = vpack.c.bf16 %v10557_v21, %v10555_v9  ;;  %v16685_v0 = vpack.c.bf16 %v14406_v30, %v14404_v11  ;;  %v16447_v42 = vpack.c.bf16 %v10562_v18, %v10560_v48  ;;  %v10574_v9 = vld [vmem:[%s24477_s16 + $0x5d8] sm:$0xff]  ;;  %v14421_v21 = vld [vmem:[%s24477_s16 + $0xd48] sm:$0xff]  ;;  %v10571_v18 = vld [vmem:[%s24477_s16 + $0x5c0] sm:$0xff] }
 0xfd5   : > { %v14423_v11 = vld [vmem:[%s24477_s16 + $0xd58] sm:$0xff] }
 0xfd6   : > { %16434 = vmatpush1.bf16.msra.mxu0 %v16433_v54  ;;  %v16687_v54 = vpack.c.bf16 %v14411_v3, %v14409_v22  ;;  %v10573_v22 = vld [vmem:[%s24477_s16 + $0x5d0] sm:$0xff]  ;;  %v14420_v3 = vld [vmem:[%s24477_s16 + $0xd40] sm:$0xff] }
 0xfd7   : > { %16674 = vmatpush1.bf16.msra.mxu1 %v16673_v26  ;;  %16436 = vmatprep.subr.bf16.mxu0 %v16435_v13  ;;  %v14410_v26 = vld [vmem:[%s24477_s16 + $0xcf0] sm:$0xff]  ;;  %v10564_v13 = vld [vmem:[%s24477_s16 + $0x588] sm:$0xff] }
 0xfd8   : > { %16676 = vmatprep.subr.bf16.mxu1 %v16675_v4  ;;  %v16449_v4 = vpack.c.bf16 %v10561_v33, %v10559_v10  ;;  %v16689_v43 = vpack.c.bf16 %v14410_v26, %v14408_v38  ;;  %v16451_v52 = vpack.c.bf16 %v10566_v28, %v10564_v13  ;;  %v10578_v10 = vld [vmem:[%s24477_s16 + $0x5f8] sm:$0xff]  ;;  %v14425_v33 = vld [vmem:[%s24477_s16 + $0xd68] sm:$0xff]  ;;  %v10575_v28 = vld [vmem:[%s24477_s16 + $0x5e0] sm:$0xff] }
 0xfd9   : > { %v14427_v38 = vld [vmem:[%s24477_s16 + $0xd78] sm:$0xff] }
 0xfda   : > { %16438 = vmatpush1.bf16.msra.mxu0 %v16437_v24  ;;  %v16691_v24 = vpack.c.bf16 %v14415_v39, %v14413_v32  ;;  %v10577_v32 = vld [vmem:[%s24477_s16 + $0x5f0] sm:$0xff]  ;;  %v14424_v39 = vld [vmem:[%s24477_s16 + $0xd60] sm:$0xff] }
 0xfdb   : > { %16678 = vmatpush1.bf16.msra.mxu1 %v16677_v35  ;;  %16440 = vmatprep.subr.bf16.mxu0 %v16439_v61  ;;  %v14414_v35 = vld [vmem:[%s24477_s16 + $0xd10] sm:$0xff]  ;;  %v10568_v61 = vld [vmem:[%s24477_s16 + $0x5a8] sm:$0xff] }
 0xfdc   : > { %16680 = vmatprep.subr.bf16.mxu1 %v16679_v40  ;;  %v16453_v40 = vpack.c.bf16 %v10565_v57, %v10563_v47  ;;  %v16693_v20 = vpack.c.bf16 %v14414_v35, %v14412_v59  ;;  %v16455_v8 = vpack.c.bf16 %v10570_v1, %v10568_v61  ;;  %v10582_v47 = vld [vmem:[%s24477_s16 + $0x618] sm:$0xff]  ;;  %v14429_v57 = vld [vmem:[%s24477_s16 + $0xd88] sm:$0xff]  ;;  %v10579_v1 = vld [vmem:[%s24477_s16 + $0x600] sm:$0xff] }
 0xfdd   : > { %v14431_v59 = vld [vmem:[%s24477_s16 + $0xd98] sm:$0xff] }
 0xfde   : > { %16442 = vmatpush1.bf16.msra.mxu0 %v16441_v15  ;;  %v16695_v15 = vpack.c.bf16 %v14419_v5, %v14417_v62  ;;  %v10581_v62 = vld [vmem:[%s24477_s16 + $0x610] sm:$0xff]  ;;  %v14428_v5 = vld [vmem:[%s24477_s16 + $0xd80] sm:$0xff] }
 0xfdf   : > { %16682 = vmatpush1.bf16.msra.mxu1 %v16681_v51  ;;  %16444 = vmatprep.subr.bf16.mxu0 %v16443_v7  ;;  %v14418_v51 = vld [vmem:[%s24477_s16 + $0xd30] sm:$0xff]  ;;  %v10572_v7 = vld [vmem:[%s24477_s16 + $0x5c8] sm:$0xff] }
 0xfe0   : > { %16684 = vmatprep.subr.bf16.mxu1 %v16683_v16  ;;  %v16457_v16 = vpack.c.bf16 %v10569_v36, %v10567_v19  ;;  %v16697_v30 = vpack.c.bf16 %v14418_v51, %v14416_v50  ;;  %v16459_v48 = vpack.c.bf16 %v10574_v9, %v10572_v7  ;;  %v10586_v19 = vld [vmem:[%s24477_s16 + $0x638] sm:$0xff]  ;;  %v14433_v36 = vld [vmem:[%s24477_s16 + $0xda8] sm:$0xff]  ;;  %v10583_v9 = vld [vmem:[%s24477_s16 + $0x620] sm:$0xff] }
 0xfe1   : > { %v14435_v50 = vld [vmem:[%s24477_s16 + $0xdb8] sm:$0xff] }
 0xfe2   : > { %16446 = vmatpush1.bf16.msra.mxu0 %v16445_v31  ;;  %v16699_v31 = vpack.c.bf16 %v14423_v11, %v14421_v21  ;;  %v10585_v21 = vld [vmem:[%s24477_s16 + $0x630] sm:$0xff]  ;;  %v14432_v11 = vld [vmem:[%s24477_s16 + $0xda0] sm:$0xff] }
 0xfe3   : > { %16686 = vmatpush1.bf16.msra.mxu1 %v16685_v0  ;;  %16448 = vmatprep.subr.bf16.mxu0 %v16447_v42  ;;  %v14422_v0 = vld [vmem:[%s24477_s16 + $0xd50] sm:$0xff]  ;;  %v10576_v42 = vld [vmem:[%s24477_s16 + $0x5e8] sm:$0xff] }
 0xfe4   : > { %16688 = vmatprep.subr.bf16.mxu1 %v16687_v54  ;;  %v16461_v54 = vpack.c.bf16 %v10573_v22, %v10571_v18  ;;  %v16701_v26 = vpack.c.bf16 %v14422_v0, %v14420_v3  ;;  %v16463_v13 = vpack.c.bf16 %v10578_v10, %v10576_v42  ;;  %v10590_v18 = vld [vmem:[%s24477_s16 + $0x658] sm:$0xff]  ;;  %v14437_v22 = vld [vmem:[%s24477_s16 + $0xdc8] sm:$0xff]  ;;  %v10589_v10 = vld [vmem:[%s24477_s16 + $0x650] sm:$0xff] }
 0xfe5   : > { %v14439_v3 = vld [vmem:[%s24477_s16 + $0xdd8] sm:$0xff] }
 0xfe6   : > { %16450 = vmatpush1.bf16.msra.mxu0 %v16449_v4  ;;  %v16703_v4 = vpack.c.bf16 %v14427_v38, %v14425_v33  ;;  %v14436_v33 = vld [vmem:[%s24477_s16 + $0xdc0] sm:$0xff]  ;;  %v16715_v38 = vpack.c.bf16 %v14439_v3, %v14437_v22  ;;  %v14450_v3 = vld [vmem:[%s24477_s16 + $0xe30] sm:$0xff] }
 0xfe7   : > { %16690 = vmatpush1.bf16.msra.mxu1 %v16689_v43  ;;  %16452 = vmatprep.subr.bf16.mxu0 %v16451_v52  ;;  %v14426_v43 = vld [vmem:[%s24477_s16 + $0xd70] sm:$0xff]  ;;  %v10580_v52 = vld [vmem:[%s24477_s16 + $0x608] sm:$0xff] }
 0xfe8   : > { %16692 = vmatprep.subr.bf16.mxu1 %v16691_v24  ;;  %v16465_v24 = vpack.c.bf16 %v10577_v32, %v10575_v28  ;;  %v16705_v35 = vpack.c.bf16 %v14426_v43, %v14424_v39  ;;  %v16467_v61 = vpack.c.bf16 %v10582_v47, %v10580_v52  ;;  %v14443_v28 = vld [vmem:[%s24477_s16 + $0xdf8] sm:$0xff]  ;;  %v10591_v43 = vld [vmem:[%s24477_s16 + $0x660] sm:$0xff]  ;;  %v10593_v52 = vld [vmem:[%s24477_s16 + $0x670] sm:$0xff] }
 0xfe9   : > { %v14440_v47 = vld [vmem:[%s24477_s16 + $0xde0] sm:$0xff] }
 0xfea   : > { %16454 = vmatpush1.bf16.msra.mxu0 %v16453_v40  ;;  %v16707_v40 = vpack.c.bf16 %v14431_v59, %v14429_v57  ;;  %v14442_v59 = vld [vmem:[%s24477_s16 + $0xdf0] sm:$0xff] }
 0xfeb   : > { %16694 = vmatpush1.bf16.msra.mxu1 %v16693_v20  ;;  %16456 = vmatprep.subr.bf16.mxu0 %v16455_v8  ;;  %v14430_v20 = vld [vmem:[%s24477_s16 + $0xd90] sm:$0xff]  ;;  %v10584_v8 = vld [vmem:[%s24477_s16 + $0x628] sm:$0xff] }
 0xfec   : > { %16696 = vmatprep.subr.bf16.mxu1 %v16695_v15  ;;  %v16469_v15 = vpack.c.bf16 %v10581_v62, %v10579_v1  ;;  %v16709_v51 = vpack.c.bf16 %v14430_v20, %v14428_v5  ;;  %v16471_v7 = vpack.c.bf16 %v10586_v19, %v10584_v8  ;;  %v14447_v1 = vld [vmem:[%s24477_s16 + $0xe18] sm:$0xff]  ;;  %v16481_v62 = vpack.c.bf16 %v10593_v52, %v10591_v43  ;;  %v10595_v20 = vld [vmem:[%s24477_s16 + $0x680] sm:$0xff]  ;;  %v10597_v8 = vld [vmem:[%s24477_s16 + $0x690] sm:$0xff] }
 0xfed   : > { %v16721_v5 = vpack.c.bf16 %v14442_v59, %v14440_v47  ;;  %v14444_v19 = vld [vmem:[%s24477_s16 + $0xe00] sm:$0xff] }
 0xfee   : > { %16458 = vmatpush1.bf16.msra.mxu0 %v16457_v16  ;;  %v16711_v16 = vpack.c.bf16 %v14435_v50, %v14433_v36  ;;  %v14446_v50 = vld [vmem:[%s24477_s16 + $0xe10] sm:$0xff]  ;;  %v10607_v47 = vld [vmem:[%s24477_s16 + $0x6e0] sm:$0xff] }
 0xfef   : > { %16698 = vmatpush1.bf16.msra.mxu1 %v16697_v30  ;;  %16460 = vmatprep.subr.bf16.mxu0 %v16459_v48  ;;  %v14434_v30 = vld [vmem:[%s24477_s16 + $0xdb0] sm:$0xff]  ;;  %v10588_v48 = vld [vmem:[%s24477_s16 + $0x648] sm:$0xff]  ;;  %v14456_v59 = vld [vmem:[%s24477_s16 + $0xe60] sm:$0xff] }
 0xff0   : > { %16700 = vmatprep.subr.bf16.mxu1 %v16699_v31  ;;  %v16473_v31 = vpack.c.bf16 %v10585_v21, %v10583_v9  ;;  %v16713_v0 = vpack.c.bf16 %v14434_v30, %v14432_v11  ;;  %v16475_v42 = vpack.c.bf16 %v10590_v18, %v10588_v48  ;;  %v14451_v9 = vld [vmem:[%s24477_s16 + $0xe38] sm:$0xff]  ;;  %v16485_v21 = vpack.c.bf16 %v10597_v8, %v10595_v20  ;;  %v10599_v30 = vld [vmem:[%s24477_s16 + $0x6a0] sm:$0xff]  ;;  %v10601_v48 = vld [vmem:[%s24477_s16 + $0x6b0] sm:$0xff] }
 0xff1   : > { %v16725_v11 = vpack.c.bf16 %v14446_v50, %v14444_v19  ;;  %v14448_v18 = vld [vmem:[%s24477_s16 + $0xe20] sm:$0xff] }
 0xff2   : > { %16462 = vmatpush1.bf16.msra.mxu0 %v16461_v54  ;;  %v10592_v54 = vld [vmem:[%s24477_s16 + $0x668] sm:$0xff]  ;;  %v10611_v19 = vld [vmem:[%s24477_s16 + $0x700] sm:$0xff] }
 0xff3   : > { %16702 = vmatpush1.bf16.msra.mxu1 %v16701_v26  ;;  %16464 = vmatprep.subr.bf16.mxu0 %v16463_v13  ;;  %v10594_v26 = vld [vmem:[%s24477_s16 + $0x678] sm:$0xff]  ;;  %v14441_v13 = vld [vmem:[%s24477_s16 + $0xde8] sm:$0xff]  ;;  %v14460_v50 = vld [vmem:[%s24477_s16 + $0xe80] sm:$0xff] }
 0xff4   : > { %16704 = vmatprep.subr.bf16.mxu1 %v16703_v4  ;;  %v16479_v4 = vpack.c.bf16 %v10594_v26, %v10592_v54  ;;  %v16719_v57 = vpack.c.bf16 %v14443_v28, %v14441_v13  ;;  %v10605_v54 = vld [vmem:[%s24477_s16 + $0x6d0] sm:$0xff]  ;;  %v14452_v26 = vld [vmem:[%s24477_s16 + $0xe40] sm:$0xff]  ;;  %v10608_v28 = vld [vmem:[%s24477_s16 + $0x6e8] sm:$0xff] }
 0xff5   : > { %v14454_v13 = vld [vmem:[%s24477_s16 + $0xe50] sm:$0xff] }
 0xff6   : > { %16466 = vmatpush1.bf16.msra.mxu0 %v16465_v24  ;;  %v10596_v24 = vld [vmem:[%s24477_s16 + $0x688] sm:$0xff]  ;;  %v16733_v43 = vpack.c.bf16 %v14454_v13, %v14452_v26  ;;  %v10619_v26 = vld [vmem:[%s24477_s16 + $0x740] sm:$0xff] }
 0xff7   : > { %16706 = vmatpush1.bf16.msra.mxu1 %v16705_v35  ;;  %16468 = vmatprep.subr.bf16.mxu0 %v16467_v61  ;;  %v10598_v35 = vld [vmem:[%s24477_s16 + $0x698] sm:$0xff]  ;;  %v14445_v61 = vld [vmem:[%s24477_s16 + $0xe08] sm:$0xff]  ;;  %v14468_v13 = vld [vmem:[%s24477_s16 + $0xec0] sm:$0xff] }
 0xff8   : > { %16708 = vmatprep.subr.bf16.mxu1 %v16707_v40  ;;  %v16483_v40 = vpack.c.bf16 %v10598_v35, %v10596_v24  ;;  %v16723_v36 = vpack.c.bf16 %v14447_v1, %v14445_v61  ;;  %v14458_v35 = vld [vmem:[%s24477_s16 + $0xe70] sm:$0xff]  ;;  %v10612_v61 = vld [vmem:[%s24477_s16 + $0x708] sm:$0xff]  ;;  %v10614_v1 = vld [vmem:[%s24477_s16 + $0x718] sm:$0xff] }
 0xff9   : > { %10852 = vmatmul.mubr.f32.vlgmr.msra.gmra.mrb[40].mxu0 %v21714_v49  ;;  %v10587_v49 = vld [vmem:[%s24477_s16 + $0x640] sm:$0xff]  ;;  %v16737_v20 = vpack.c.bf16 %v14458_v35, %v14456_v59  ;;  %v16499_v8 = vpack.c.bf16 %v10614_v1, %v10612_v61  ;;  %v14474_v1 = vld [vmem:[%s24477_s16 + $0xef0] sm:$0xff] }
 0xffa   : > { %16470 = vmatpush1.bf16.msra.mxu0 %v16469_v15  ;;  %10922 = vmatprep.mubr.f32.mxu0 %v21732_v27  ;;  %v14438_v27 = vld [vmem:[%s24477_s16 + $0xdd0] sm:$0xff]  ;;  %v16477_v32 = vpack.c.bf16 %v10589_v10, %v10587_v49  ;;  %v10600_v15 = vld [vmem:[%s24477_s16 + $0x6a8] sm:$0xff]  ;;  %v14455_v49 = vld [vmem:[%s24477_s16 + $0xe58] sm:$0xff]  ;;  %v16489_v10 = vpack.c.bf16 %v10601_v48, %v10599_v30 }
 0xffb   : > { %16710 = vmatpush1.bf16.msra.mxu1 %v16709_v51  ;;  %16472 = vmatprep.subr.bf16.mxu0 %v16471_v7  ;;  %v16717_v39 = vpack.c.bf16 %v14438_v27, %v14436_v33  ;;  %v10602_v51 = vld [vmem:[%s24477_s16 + $0x6b8] sm:$0xff]  ;;  %v14449_v7 = vld [vmem:[%s24477_s16 + $0xe28] sm:$0xff]  ;;  %v16729_v33 = vpack.c.bf16 %v14450_v3, %v14448_v18  ;;  %v10603_v27 = vld [vmem:[%s24477_s16 + $0x6c0] sm:$0xff] }
 0xffc   : > { %16712 = vmatprep.subr.bf16.mxu1 %v16711_v16  ;;  %v16487_v16 = vpack.c.bf16 %v10602_v51, %v10600_v15  ;;  %v16727_v22 = vpack.c.bf16 %v14451_v9, %v14449_v7  ;;  %v14462_v51 = vld [vmem:[%s24477_s16 + $0xe90] sm:$0xff]  ;;  %v10616_v7 = vld [vmem:[%s24477_s16 + $0x728] sm:$0xff]  ;;  %v10618_v9 = vld [vmem:[%s24477_s16 + $0x738] sm:$0xff] }
 0xffd   : > { %v16741_v30 = vpack.c.bf16 %v14462_v51, %v14460_v50  ;;  %v16503_v48 = vpack.c.bf16 %v10618_v9, %v10616_v7  ;;  %v10615_v18 = vld [vmem:[%s24477_s16 + $0x720] sm:$0xff]  ;;  %v14478_v9 = vld [vmem:[%s24477_s16 + $0xf10] sm:$0xff] }
 0xffe   : > { %16474 = vmatpush1.bf16.msra.mxu0 %v16473_v31  ;;  %v10604_v31 = vld [vmem:[%s24477_s16 + $0x6c8] sm:$0xff]  ;;  %v14464_v3 = vld [vmem:[%s24477_s16 + $0xea0] sm:$0xff] }
 0xfff   : > { %16714 = vmatpush1.bf16.msra.mxu1 %v16713_v0  ;;  %16476 = vmatprep.subr.bf16.mxu0 %v16475_v42  ;;  %v10606_v0 = vld [vmem:[%s24477_s16 + $0x6d8] sm:$0xff]  ;;  %v14453_v42 = vld [vmem:[%s24477_s16 + $0xe48] sm:$0xff]  ;;  %v10623_v59 = vld [vmem:[%s24477_s16 + $0x760] sm:$0xff] }
0x1000   : > { %16716 = vmatprep.subr.bf16.mxu1 %v16715_v38  ;;  %v16491_v38 = vpack.c.bf16 %v10606_v0, %v10604_v31  ;;  %v14466_v0 = vld [vmem:[%s24477_s16 + $0xeb0] sm:$0xff]  ;;  %v14472_v35 = vld [vmem:[%s24477_s16 + $0xee0] sm:$0xff] }
0x1001   : > { %v10627_v50 = vld [vmem:[%s24477_s16 + $0x780] sm:$0xff] }
0x1002   : > { %16478 = vmatpush1.bf16.msra.mxu0 %v16477_v32  ;;  %v10610_v32 = vld [vmem:[%s24477_s16 + $0x6f8] sm:$0xff]  ;;  %v14476_v51 = vld [vmem:[%s24477_s16 + $0xf00] sm:$0xff] }
0x1003   : > { %16718 = vmatpush1.bf16.msra.mxu1 %v16717_v39  ;;  %16480 = vmatprep.subr.bf16.mxu0 %v16479_v4  ;;  %v14457_v39 = vld [vmem:[%s24477_s16 + $0xe68] sm:$0xff]  ;;  %v16493_v4 = vpack.c.bf16 %v10605_v54, %v10603_v27  ;;  %v16495_v52 = vpack.c.bf16 %v10610_v32, %v10608_v28  ;;  %v16745_v27 = vpack.c.bf16 %v14466_v0, %v14464_v3  ;;  %v14470_v32 = vld [vmem:[%s24477_s16 + $0xed0] sm:$0xff]  ;;  %v10631_v3 = vld [vmem:[%s24477_s16 + $0x7a0] sm:$0xff] }
0x1004   : > { %16720 = vmatprep.subr.bf16.mxu1 %v16719_v57  ;;  %v10609_v57 = vld [vmem:[%s24477_s16 + $0x6f0] sm:$0xff]  ;;  %v14480_v0 = vld [vmem:[%s24477_s16 + $0xf20] sm:$0xff] }
0x1006   : > { %16482 = vmatpush1.bf16.msra.mxu0 %v16481_v62  ;;  %v14461_v62 = vld [vmem:[%s24477_s16 + $0xe88] sm:$0xff] }
0x1007   : > { %16722 = vmatpush1.bf16.msra.mxu1 %v16721_v5  ;;  %16484 = vmatprep.subr.bf16.mxu0 %v16483_v40  ;;  %v14463_v5 = vld [vmem:[%s24477_s16 + $0xe98] sm:$0xff]  ;;  %v16497_v40 = vpack.c.bf16 %v10609_v57, %v10607_v47  ;;  %v16749_v47 = vpack.c.bf16 %v14470_v32, %v14468_v13  ;;  %v10635_v13 = vld [vmem:[%s24477_s16 + $0x7c0] sm:$0xff] }
0x1008   : > { %16724 = vmatprep.subr.bf16.mxu1 %v16723_v36  ;;  %v10613_v36 = vld [vmem:[%s24477_s16 + $0x710] sm:$0xff]  ;;  %v16739_v15 = vpack.c.bf16 %v14463_v5, %v14461_v62  ;;  %v10628_v62 = vld [vmem:[%s24477_s16 + $0x788] sm:$0xff]  ;;  %v10630_v5 = vld [vmem:[%s24477_s16 + $0x798] sm:$0xff] }
0x1009   : > { %v14484_v32 = vld [vmem:[%s24477_s16 + $0xf40] sm:$0xff] }
0x100a   : > { %16486 = vmatpush1.bf16.msra.mxu0 %v16485_v21  ;;  %11402 = vmatmul.mubr.f32.vlgmr.msra.gmra.mrb[152].mxu1 %v21814_v25  ;;  %v16731_v25 = vpack.c.bf16 %v14455_v49, %v14453_v42  ;;  %v14465_v21 = vld [vmem:[%s24477_s16 + $0xea8] sm:$0xff]  ;;  %v10622_v49 = vld [vmem:[%s24477_s16 + $0x758] sm:$0xff] }
0x100b   : > { %16726 = vmatpush1.bf16.msra.mxu1 %v16725_v11  ;;  %16488 = vmatprep.subr.bf16.mxu0 %v16487_v16  ;;  %v14467_v11 = vld [vmem:[%s24477_s16 + $0xeb8] sm:$0xff]  ;;  %v16501_v16 = vpack.c.bf16 %v10613_v36, %v10611_v19  ;;  %v10620_v42 = vld [vmem:[%s24477_s16 + $0x748] sm:$0xff]  ;;  %v16753_v19 = vpack.c.bf16 %v14474_v1, %v14472_v35  ;;  %v16515_v36 = vpack.c.bf16 %v10630_v5, %v10628_v62  ;;  %v10639_v35 = vld [vmem:[%s24477_s16 + $0x7e0] sm:$0xff] }
0x100c   : > { %16728 = vmatprep.subr.bf16.mxu1 %v16727_v22  ;;  %11472 = vmatprep.mubr.f32.mxu1 %v21838_v56  ;;  %v14459_v56 = vld [vmem:[%s24477_s16 + $0xe78] sm:$0xff]  ;;  %v10617_v22 = vld [vmem:[%s24477_s16 + $0x730] sm:$0xff]  ;;  %v16743_v31 = vpack.c.bf16 %v14467_v11, %v14465_v21  ;;  %v16507_v54 = vpack.c.bf16 %v10622_v49, %v10620_v42  ;;  %v10632_v21 = vld [vmem:[%s24477_s16 + $0x7a8] sm:$0xff] }
0x100d   : > { %v16735_v24 = vpack.c.bf16 %v14459_v56, %v14457_v39  ;;  %v10624_v39 = vld [vmem:[%s24477_s16 + $0x768] sm:$0xff]  ;;  %v10626_v56 = vld [vmem:[%s24477_s16 + $0x778] sm:$0xff]  ;;  %v14482_v49 = vld [vmem:[%s24477_s16 + $0xf30] sm:$0xff] }
0x100e   : > { %16490 = vmatpush1.bf16.msra.mxu0 %v16489_v10  ;;  %v14469_v10 = vld [vmem:[%s24477_s16 + $0xec8] sm:$0xff]  ;;  %v16511_v57 = vpack.c.bf16 %v10626_v56, %v10624_v39  ;;  %v10634_v11 = vld [vmem:[%s24477_s16 + $0x7b8] sm:$0xff]  ;;  %v14486_v56 = vld [vmem:[%s24477_s16 + $0xf50] sm:$0xff] }
0x100f   : > { %16730 = vmatpush1.bf16.msra.mxu1 %v16729_v33  ;;  %16492 = vmatprep.subr.bf16.mxu0 %v16491_v38  ;;  %v14471_v33 = vld [vmem:[%s24477_s16 + $0xed8] sm:$0xff]  ;;  %v16505_v38 = vpack.c.bf16 %v10617_v22, %v10615_v18  ;;  %v16757_v18 = vpack.c.bf16 %v14478_v9, %v14476_v51  ;;  %v16519_v22 = vpack.c.bf16 %v10634_v11, %v10632_v21  ;;  %v14488_v1 = vld [vmem:[%s24477_s16 + $0xf60] sm:$0xff]  ;;  %v14490_v5 = vld [vmem:[%s24477_s16 + $0xf70] sm:$0xff] }
0x1010   : > { %16732 = vmatprep.subr.bf16.mxu1 %v16731_v25  ;;  %v10621_v25 = vld [vmem:[%s24477_s16 + $0x750] sm:$0xff]  ;;  %v16747_v28 = vpack.c.bf16 %v14471_v33, %v14469_v10  ;;  %v10636_v10 = vld [vmem:[%s24477_s16 + $0x7c8] sm:$0xff]  ;;  %v10638_v33 = vld [vmem:[%s24477_s16 + $0x7d8] sm:$0xff] }
0x1011   : > { %v14492_v51 = vld [vmem:[%s24477_s16 + $0xf80] sm:$0xff]  ;;  %v14511_v9 = vld [vmem:[%s24477_s16 + $0x1010] sm:$0xff] }
0x1012   : > { %16494 = vmatpush1.bf16.msra.mxu0 %v16493_v4  ;;  %v14473_v4 = vld [vmem:[%s24477_s16 + $0xee8] sm:$0xff]  ;;  %v14494_v11 = vld [vmem:[%s24477_s16 + $0xf90] sm:$0xff] }
0x1013   : > { %16734 = vmatpush1.bf16.msra.mxu1 %v16733_v43  ;;  %16496 = vmatprep.subr.bf16.mxu0 %v16495_v52  ;;  %v14475_v43 = vld [vmem:[%s24477_s16 + $0xef8] sm:$0xff]  ;;  %v16509_v52 = vpack.c.bf16 %v10621_v25, %v10619_v26  ;;  %v16761_v26 = vpack.c.bf16 %v14482_v49, %v14480_v0  ;;  %v16523_v25 = vpack.c.bf16 %v10638_v33, %v10636_v10  ;;  %v14496_v0 = vld [vmem:[%s24477_s16 + $0xfa0] sm:$0xff]  ;;  %v14515_v49 = vld [vmem:[%s24477_s16 + $0x1030] sm:$0xff] }
0x1014   : > { %16736 = vmatprep.subr.bf16.mxu1 %v16735_v24  ;;  %v10625_v24 = vld [vmem:[%s24477_s16 + $0x770] sm:$0xff]  ;;  %v16751_v61 = vpack.c.bf16 %v14475_v43, %v14473_v4  ;;  %v10640_v4 = vld [vmem:[%s24477_s16 + $0x7e8] sm:$0xff]  ;;  %v10642_v43 = vld [vmem:[%s24477_s16 + $0x7f8] sm:$0xff] }
0x1015   : > { %v14498_v33 = vld [vmem:[%s24477_s16 + $0xfb0] sm:$0xff] }
0x1016   : > { %16498 = vmatpush1.bf16.msra.mxu0 %v16497_v40  ;;  %v14477_v40 = vld [vmem:[%s24477_s16 + $0xf08] sm:$0xff] }
0x1017   : > { %16738 = vmatpush1.bf16.msra.mxu1 %v16737_v20  ;;  %16500 = vmatprep.subr.bf16.mxu0 %v16499_v8  ;;  %v14479_v20 = vld [vmem:[%s24477_s16 + $0xf18] sm:$0xff]  ;;  %v16513_v8 = vpack.c.bf16 %v10625_v24, %v10623_v59  ;;  %v16765_v59 = vpack.c.bf16 %v14486_v56, %v14484_v32  ;;  %v16527_v24 = vpack.c.bf16 %v10642_v43, %v10640_v4  ;;  %v14517_v32 = vld [vmem:[%s24477_s16 + $0x1040] sm:$0xff]  ;;  %v14522_v4 = vld [vmem:[%s24477_s16 + $0x1068] sm:$0xff] }
0x1018   : > { %16740 = vmatprep.subr.bf16.mxu1 %v16739_v15  ;;  %v10629_v15 = vld [vmem:[%s24477_s16 + $0x790] sm:$0xff]  ;;  %v16755_v7 = vpack.c.bf16 %v14479_v20, %v14477_v40  ;;  %v14510_v40 = vld [vmem:[%s24477_s16 + $0x1008] sm:$0xff]  ;;  %v14512_v20 = vld [vmem:[%s24477_s16 + $0x1018] sm:$0xff] }
0x1019   : > { %v14524_v43 = vld [vmem:[%s24477_s16 + $0x1078] sm:$0xff] }
0x101a   : > { %16502 = vmatpush1.bf16.msra.mxu0 %v16501_v16  ;;  %v14481_v16 = vld [vmem:[%s24477_s16 + $0xf28] sm:$0xff] }
0x101b   : > { %16742 = vmatpush1.bf16.msra.mxu1 %v16741_v30  ;;  %16504 = vmatprep.subr.bf16.mxu0 %v16503_v48  ;;  %v14483_v30 = vld [vmem:[%s24477_s16 + $0xf38] sm:$0xff]  ;;  %v16517_v48 = vpack.c.bf16 %v10629_v15, %v10627_v50  ;;  %v16769_v50 = vpack.c.bf16 %v14490_v5, %v14488_v1  ;;  %v16787_v15 = vpack.c.bf16 %v14512_v20, %v14510_v40  ;;  %v14523_v1 = vld [vmem:[%s24477_s16 + $0x1070] sm:$0xff]  ;;  %v14526_v40 = vld [vmem:[%s24477_s16 + $0x1088] sm:$0xff] }
0x101c   : > { %16744 = vmatprep.subr.bf16.mxu1 %v16743_v31  ;;  %v10633_v31 = vld [vmem:[%s24477_s16 + $0x7b0] sm:$0xff]  ;;  %v16759_v42 = vpack.c.bf16 %v14483_v30, %v14481_v16  ;;  %v14514_v16 = vld [vmem:[%s24477_s16 + $0x1028] sm:$0xff]  ;;  %v14516_v30 = vld [vmem:[%s24477_s16 + $0x1038] sm:$0xff] }
0x101d   : > { %v14506_v5 = vld [vmem:[%s24477_s16 + $0xff0] sm:$0xff]  ;;  %v14528_v20 = vld [vmem:[%s24477_s16 + $0x1098] sm:$0xff] }
0x101e   : > { %16506 = vmatpush1.bf16.msra.mxu0 %v16505_v38  ;;  %v14485_v38 = vld [vmem:[%s24477_s16 + $0xf48] sm:$0xff] }
0x101f   : > { %16746 = vmatpush1.bf16.msra.mxu1 %v16745_v27  ;;  %16508 = vmatprep.subr.bf16.mxu0 %v16507_v54  ;;  %v14487_v27 = vld [vmem:[%s24477_s16 + $0xf58] sm:$0xff]  ;;  %v16521_v54 = vpack.c.bf16 %v10633_v31, %v10631_v3  ;;  %v16773_v3 = vpack.c.bf16 %v14494_v11, %v14492_v51  ;;  %v16791_v31 = vpack.c.bf16 %v14516_v30, %v14514_v16  ;;  %v14525_v51 = vld [vmem:[%s24477_s16 + $0x1080] sm:$0xff]  ;;  %v14768_v11 = vld [vmem:[%s24477_s16 + $0x1810] sm:$0xff] }
0x1020   : > { %16748 = vmatprep.subr.bf16.mxu1 %v16747_v28  ;;  %v10637_v28 = vld [vmem:[%s24477_s16 + $0x7d0] sm:$0xff]  ;;  %v16763_v39 = vpack.c.bf16 %v14487_v27, %v14485_v38  ;;  %v14518_v38 = vld [vmem:[%s24477_s16 + $0x1048] sm:$0xff]  ;;  %v14520_v27 = vld [vmem:[%s24477_s16 + $0x1058] sm:$0xff] }
0x1021   : > { %v14530_v16 = vld [vmem:[%s24477_s16 + $0x10a8] sm:$0xff]  ;;  %v14532_v30 = vld [vmem:[%s24477_s16 + $0x10b8] sm:$0xff] }
0x1022   : > { %16510 = vmatpush1.bf16.msra.mxu0 %v16509_v52  ;;  %v14489_v52 = vld [vmem:[%s24477_s16 + $0xf68] sm:$0xff] }
0x1023   : > { %16750 = vmatpush1.bf16.msra.mxu1 %v16749_v47  ;;  %16512 = vmatprep.subr.bf16.mxu0 %v16511_v57  ;;  %v14491_v47 = vld [vmem:[%s24477_s16 + $0xf78] sm:$0xff]  ;;  %v16525_v57 = vpack.c.bf16 %v10637_v28, %v10635_v13  ;;  %v16777_v13 = vpack.c.bf16 %v14498_v33, %v14496_v0  ;;  %v16795_v28 = vpack.c.bf16 %v14520_v27, %v14518_v38  ;;  %v14529_v0 = vld [vmem:[%s24477_s16 + $0x10a0] sm:$0xff]  ;;  %v14772_v33 = vld [vmem:[%s24477_s16 + $0x1830] sm:$0xff] }
0x1024   : > { %16752 = vmatprep.subr.bf16.mxu1 %v16751_v61  ;;  %v10641_v61 = vld [vmem:[%s24477_s16 + $0x7f0] sm:$0xff]  ;;  %v16767_v62 = vpack.c.bf16 %v14491_v47, %v14489_v52  ;;  %v14505_v52 = vld [vmem:[%s24477_s16 + $0xfe8] sm:$0xff]  ;;  %v14507_v47 = vld [vmem:[%s24477_s16 + $0xff8] sm:$0xff] }
0x1025   : > { %v14534_v38 = vld [vmem:[%s24477_s16 + $0x10c8] sm:$0xff]  ;;  %v14536_v27 = vld [vmem:[%s24477_s16 + $0x10d8] sm:$0xff] }
0x1026   : > { %16514 = vmatpush1.bf16.msra.mxu0 %v16513_v8  ;;  %v14493_v8 = vld [vmem:[%s24477_s16 + $0xf88] sm:$0xff] }
0x1027   : > { %16754 = vmatpush1.bf16.msra.mxu1 %v16753_v19  ;;  %16516 = vmatprep.subr.bf16.mxu0 %v16515_v36  ;;  %v14495_v19 = vld [vmem:[%s24477_s16 + $0xf98] sm:$0xff]  ;;  %v16529_v36 = vpack.c.bf16 %v10641_v61, %v10639_v35  ;;  %v14504_v35 = vld [vmem:[%s24477_s16 + $0xfe0] sm:$0xff] }
0x1028   : > { %16756 = vmatprep.subr.bf16.mxu1 %v16755_v7  ;;  %v14509_v7 = vld [vmem:[%s24477_s16 + $0x1000] sm:$0xff]  ;;  %v16771_v21 = vpack.c.bf16 %v14495_v19, %v14493_v8  ;;  %v14767_v8 = vld [vmem:[%s24477_s16 + $0x1808] sm:$0xff]  ;;  %v14769_v19 = vld [vmem:[%s24477_s16 + $0x1818] sm:$0xff] }
0x1029   : > { %v14521_v61 = vld [vmem:[%s24477_s16 + $0x1060] sm:$0xff] }
0x102a   : > { %16518 = vmatpush1.bf16.msra.mxu0 %v16517_v48  ;;  %v14497_v48 = vld [vmem:[%s24477_s16 + $0xfa8] sm:$0xff] }
0x102b   : > { %16758 = vmatpush1.bf16.msra.mxu1 %v16757_v18  ;;  %16520 = vmatprep.subr.bf16.mxu0 %v16519_v22  ;;  %v14499_v18 = vld [vmem:[%s24477_s16 + $0xfb8] sm:$0xff]  ;;  %v16789_v22 = vpack.c.bf16 %v14511_v9, %v14509_v7  ;;  %v14527_v7 = vld [vmem:[%s24477_s16 + $0x1090] sm:$0xff]  ;;  %v14766_v9 = vld [vmem:[%s24477_s16 + $0x1800] sm:$0xff] }
0x102c   : > { %16760 = vmatprep.subr.bf16.mxu1 %v16759_v42  ;;  %v14513_v42 = vld [vmem:[%s24477_s16 + $0x1020] sm:$0xff]  ;;  %v16775_v10 = vpack.c.bf16 %v14499_v18, %v14497_v48  ;;  %v14771_v48 = vld [vmem:[%s24477_s16 + $0x1828] sm:$0xff]  ;;  %v14773_v18 = vld [vmem:[%s24477_s16 + $0x1838] sm:$0xff] }
0x102e   : > { %16522 = vmatpush1.bf16.msra.mxu0 %v16521_v54  ;;  %v14501_v54 = vld [vmem:[%s24477_s16 + $0xfc8] sm:$0xff] }
0x102f   : > { %16762 = vmatpush1.bf16.msra.mxu1 %v16761_v26  ;;  %16524 = vmatprep.subr.bf16.mxu0 %v16523_v25  ;;  %v14503_v26 = vld [vmem:[%s24477_s16 + $0xfd8] sm:$0xff]  ;;  %v16793_v25 = vpack.c.bf16 %v14515_v49, %v14513_v42  ;;  %v14531_v42 = vld [vmem:[%s24477_s16 + $0x10b0] sm:$0xff]  ;;  %v14770_v49 = vld [vmem:[%s24477_s16 + $0x1820] sm:$0xff] }
0x1030   : > { %16764 = vmatprep.subr.bf16.mxu1 %v16763_v39  ;;  %v14519_v39 = vld [vmem:[%s24477_s16 + $0x1050] sm:$0xff]  ;;  %v16779_v56 = vpack.c.bf16 %v14503_v26, %v14501_v54  ;;  %v14775_v54 = vld [vmem:[%s24477_s16 + $0x1848] sm:$0xff]  ;;  %v14777_v26 = vld [vmem:[%s24477_s16 + $0x1858] sm:$0xff] }
0x1032   : > { %16526 = vmatpush1.bf16.msra.mxu0 %v16525_v57  ;;  %v16797_v57 = vpack.c.bf16 %v14519_v39, %v14517_v32  ;;  %v14535_v32 = vld [vmem:[%s24477_s16 + $0x10d0] sm:$0xff]  ;;  %v14774_v39 = vld [vmem:[%s24477_s16 + $0x1840] sm:$0xff] }
0x1033   : > { %16766 = vmatpush1.bf16.msra.mxu1 %v16765_v59  ;;  %16528 = vmatprep.subr.bf16.mxu0 %v16527_v24  ;;  %v16799_v24 = vpack.c.bf16 %v14524_v43, %v14522_v4  ;;  %v14540_v4 = vld [vmem:[%s24477_s16 + $0x10f8] sm:$0xff]  ;;  %v14779_v43 = vld [vmem:[%s24477_s16 + $0x1868] sm:$0xff] }
0x1034   : > { %16768 = vmatprep.subr.bf16.mxu1 %v16767_v62  ;;  %v16783_v62 = vpack.c.bf16 %v14507_v47, %v14505_v52  ;;  %v14781_v52 = vld [vmem:[%s24477_s16 + $0x1878] sm:$0xff] }
0x1036   : > { %16530 = vmatpush1.bf16.msra.mxu0 %v16529_v36  ;;  %v16801_v36 = vpack.c.bf16 %v14523_v1, %v14521_v61  ;;  %v17055_v61 = vpack.c.bf16 %v14781_v52, %v14779_v43  ;;  %v14780_v1 = vld [vmem:[%s24477_s16 + $0x1870] sm:$0xff] }
0x1037   : > { %16770 = vmatpush1.bf16.msra.mxu1 %v16769_v50  ;;  %16788 = vmatprep.subr.bf16.mxu0 %v16787_v15  ;;  %v16785_v50 = vpack.c.bf16 %v14506_v5, %v14504_v35  ;;  %v16803_v15 = vpack.c.bf16 %v14528_v20, %v14526_v40  ;;  %v14778_v35 = vld [vmem:[%s24477_s16 + $0x1860] sm:$0xff]  ;;  %v14544_v5 = vld [vmem:[%s24477_s16 + $0x1118] sm:$0xff]  ;;  %v14783_v40 = vld [vmem:[%s24477_s16 + $0x1888] sm:$0xff] }
0x1038   : > { %16772 = vmatprep.subr.bf16.mxu1 %v16771_v21  ;;  %v17043_v21 = vpack.c.bf16 %v14769_v19, %v14767_v8  ;;  %v14785_v20 = vld [vmem:[%s24477_s16 + $0x1898] sm:$0xff]  ;;  %v17057_v19 = vpack.c.bf16 %v14780_v1, %v14778_v35  ;;  %v14796_v35 = vld [vmem:[%s24477_s16 + $0x18f0] sm:$0xff] }
0x1039   : > { %10923 = vmatmul.mubr.f32.vlgmr.msra.gmra.mrb[40].mxu0 %v21724_v14  ;;  %v14500_v14 = vld [vmem:[%s24477_s16 + $0xfc0] sm:$0xff]  ;;  %v14560_v1 = vld [vmem:[%s24477_s16 + $0x1198] sm:$0xff] }
0x103a   : > { %16790 = vmatpush1.bf16.msra.mxu0 %v16789_v22  ;;  %11810 = vmatprep.mubr.f32.mxu0 %v22108_v55  ;;  %v14502_v55 = vld [vmem:[%s24477_s16 + $0xfd0] sm:$0xff]  ;;  %v16805_v22 = vpack.c.bf16 %v14527_v7, %v14525_v51  ;;  %v14782_v51 = vld [vmem:[%s24477_s16 + $0x1880] sm:$0xff]  ;;  %v17059_v7 = vpack.c.bf16 %v14785_v20, %v14783_v40 }
0x103b   : > { %16774 = vmatpush1.bf16.msra.mxu1 %v16773_v3  ;;  %16792 = vmatprep.subr.bf16.mxu0 %v16791_v31  ;;  %v16781_v59 = vpack.c.bf16 %v14502_v55, %v14500_v14  ;;  %v17045_v3 = vpack.c.bf16 %v14768_v11, %v14766_v9  ;;  %v16807_v31 = vpack.c.bf16 %v14532_v30, %v14530_v16  ;;  %v14533_v14 = vld [vmem:[%s24477_s16 + $0x10c0] sm:$0xff]  ;;  %v14538_v55 = vld [vmem:[%s24477_s16 + $0x10e8] sm:$0xff]  ;;  %v14784_v9 = vld [vmem:[%s24477_s16 + $0x1890] sm:$0xff] }
0x103c   : > { %16776 = vmatprep.subr.bf16.mxu1 %v16775_v10  ;;  %v17047_v10 = vpack.c.bf16 %v14773_v18, %v14771_v48  ;;  %v16813_v47 = vpack.c.bf16 %v14535_v32, %v14533_v14  ;;  %v14548_v11 = vld [vmem:[%s24477_s16 + $0x1138] sm:$0xff]  ;;  %v14787_v16 = vld [vmem:[%s24477_s16 + $0x18a8] sm:$0xff]  ;;  %v17061_v18 = vpack.c.bf16 %v14784_v9, %v14782_v51  ;;  %v14790_v14 = vld [vmem:[%s24477_s16 + $0x18c0] sm:$0xff] }
0x103d   : > { %v14789_v30 = vld [vmem:[%s24477_s16 + $0x18b8] sm:$0xff]  ;;  %v14800_v51 = vld [vmem:[%s24477_s16 + $0x1910] sm:$0xff] }
0x103e   : > { %16794 = vmatpush1.bf16.msra.mxu0 %v16793_v25  ;;  %v16809_v25 = vpack.c.bf16 %v14531_v42, %v14529_v0  ;;  %v14786_v0 = vld [vmem:[%s24477_s16 + $0x18a0] sm:$0xff]  ;;  %v17063_v42 = vpack.c.bf16 %v14789_v30, %v14787_v16  ;;  %v14564_v9 = vld [vmem:[%s24477_s16 + $0x11b8] sm:$0xff] }
0x103f   : > { %16778 = vmatpush1.bf16.msra.mxu1 %v16777_v13  ;;  %16796 = vmatprep.subr.bf16.mxu0 %v16795_v28  ;;  %v17049_v13 = vpack.c.bf16 %v14772_v33, %v14770_v49  ;;  %v16811_v28 = vpack.c.bf16 %v14536_v27, %v14534_v38  ;;  %v14788_v49 = vld [vmem:[%s24477_s16 + $0x18b0] sm:$0xff]  ;;  %v14552_v33 = vld [vmem:[%s24477_s16 + $0x1158] sm:$0xff]  ;;  %v14791_v38 = vld [vmem:[%s24477_s16 + $0x18c8] sm:$0xff] }
0x1040   : > { %16780 = vmatprep.subr.bf16.mxu1 %v16779_v56  ;;  %v14776_v56 = vld [vmem:[%s24477_s16 + $0x1850] sm:$0xff]  ;;  %v14793_v27 = vld [vmem:[%s24477_s16 + $0x18d8] sm:$0xff] }
0x1041   : > { %v17067_v32 = vpack.c.bf16 %v14793_v27, %v14791_v38 }
0x1042   : > { %16798 = vmatpush1.bf16.msra.mxu0 %v16797_v57  ;;  %v16815_v57 = vpack.c.bf16 %v14540_v4, %v14538_v55  ;;  %v14795_v55 = vld [vmem:[%s24477_s16 + $0x18e8] sm:$0xff]  ;;  %v14797_v4 = vld [vmem:[%s24477_s16 + $0x18f8] sm:$0xff] }
0x1043   : > { %16782 = vmatpush1.bf16.msra.mxu1 %v16781_v59  ;;  %16800 = vmatprep.subr.bf16.mxu0 %v16799_v24  ;;  %v14537_v59 = vld [vmem:[%s24477_s16 + $0x10e0] sm:$0xff]  ;;  %v14539_v24 = vld [vmem:[%s24477_s16 + $0x10f0] sm:$0xff] }
0x1044   : > { %16784 = vmatprep.subr.bf16.mxu1 %v16783_v62  ;;  %v14542_v62 = vld [vmem:[%s24477_s16 + $0x1108] sm:$0xff]  ;;  %v16817_v8 = vpack.c.bf16 %v14539_v24, %v14537_v59  ;;  %v14794_v59 = vld [vmem:[%s24477_s16 + $0x18e0] sm:$0xff]  ;;  %v17071_v24 = vpack.c.bf16 %v14797_v4, %v14795_v55 }
0x1045   : > { %v17073_v20 = vpack.c.bf16 %v14796_v35, %v14794_v59  ;;  %v14812_v59 = vld [vmem:[%s24477_s16 + $0x1970] sm:$0xff]  ;;  %v14576_v35 = vld [vmem:[%s24477_s16 + $0x1218] sm:$0xff] }
0x1046   : > { %16802 = vmatpush1.bf16.msra.mxu0 %v16801_v36  ;;  %v16819_v36 = vpack.c.bf16 %v14544_v5, %v14542_v62  ;;  %v14799_v62 = vld [vmem:[%s24477_s16 + $0x1908] sm:$0xff]  ;;  %v14801_v5 = vld [vmem:[%s24477_s16 + $0x1918] sm:$0xff] }
0x1047   : > { %16786 = vmatpush1.bf16.msra.mxu1 %v16785_v50  ;;  %16804 = vmatprep.subr.bf16.mxu0 %v16803_v15  ;;  %v14541_v50 = vld [vmem:[%s24477_s16 + $0x1100] sm:$0xff]  ;;  %v14543_v15 = vld [vmem:[%s24477_s16 + $0x1110] sm:$0xff] }
0x1048   : > { %17044 = vmatprep.subr.bf16.mxu1 %v17043_v21  ;;  %v14546_v21 = vld [vmem:[%s24477_s16 + $0x1128] sm:$0xff]  ;;  %v16821_v48 = vpack.c.bf16 %v14543_v15, %v14541_v50  ;;  %v14798_v50 = vld [vmem:[%s24477_s16 + $0x1900] sm:$0xff]  ;;  %v17075_v15 = vpack.c.bf16 %v14801_v5, %v14799_v62 }
0x1049   : > { %v17077_v30 = vpack.c.bf16 %v14800_v51, %v14798_v50  ;;  %v14816_v50 = vld [vmem:[%s24477_s16 + $0x1990] sm:$0xff]  ;;  %v14580_v51 = vld [vmem:[%s24477_s16 + $0x1238] sm:$0xff] }
0x104a   : > { %11473 = vmatmul.mubr.f32.vlgmr.msra.gmra.mrb[152].mxu1 %v21836_v46  ;;  %16806 = vmatpush1.bf16.msra.mxu0 %v16805_v22  ;;  %v17051_v46 = vpack.c.bf16 %v14777_v26, %v14775_v54  ;;  %v16823_v22 = vpack.c.bf16 %v14548_v11, %v14546_v21  ;;  %v17065_v26 = vpack.c.bf16 %v14788_v49, %v14786_v0  ;;  %v14803_v21 = vld [vmem:[%s24477_s16 + $0x1928] sm:$0xff]  ;;  %v14805_v11 = vld [vmem:[%s24477_s16 + $0x1938] sm:$0xff]  ;;  %v14804_v0 = vld [vmem:[%s24477_s16 + $0x1930] sm:$0xff] }
0x104b   : > { %17046 = vmatpush1.bf16.msra.mxu1 %v17045_v3  ;;  %16808 = vmatprep.subr.bf16.mxu0 %v16807_v31  ;;  %v14545_v3 = vld [vmem:[%s24477_s16 + $0x1120] sm:$0xff]  ;;  %v14547_v31 = vld [vmem:[%s24477_s16 + $0x1130] sm:$0xff]  ;;  %v14568_v49 = vld [vmem:[%s24477_s16 + $0x11d8] sm:$0xff] }
0x104c   : > { %17048 = vmatprep.subr.bf16.mxu1 %v17047_v10  ;;  %12361 = vmatprep.mubr.f32.mxu1 %v22222_v34  ;;  %v17053_v34 = vpack.c.bf16 %v14776_v56, %v14774_v39  ;;  %v14550_v10 = vld [vmem:[%s24477_s16 + $0x1148] sm:$0xff]  ;;  %v16825_v54 = vpack.c.bf16 %v14547_v31, %v14545_v3  ;;  %v14792_v39 = vld [vmem:[%s24477_s16 + $0x18d0] sm:$0xff]  ;;  %v14556_v56 = vld [vmem:[%s24477_s16 + $0x1178] sm:$0xff]  ;;  %v17079_v31 = vpack.c.bf16 %v14805_v11, %v14803_v21 }
0x104d   : > { %v17069_v52 = vpack.c.bf16 %v14792_v39, %v14790_v14  ;;  %v14802_v3 = vld [vmem:[%s24477_s16 + $0x1920] sm:$0xff]  ;;  %v14808_v14 = vld [vmem:[%s24477_s16 + $0x1950] sm:$0xff]  ;;  %v14572_v39 = vld [vmem:[%s24477_s16 + $0x11f8] sm:$0xff] }
0x104e   : > { %16810 = vmatpush1.bf16.msra.mxu0 %v16809_v25  ;;  %v16827_v25 = vpack.c.bf16 %v14552_v33, %v14550_v10  ;;  %v14807_v10 = vld [vmem:[%s24477_s16 + $0x1948] sm:$0xff]  ;;  %v14809_v33 = vld [vmem:[%s24477_s16 + $0x1958] sm:$0xff]  ;;  %v17081_v27 = vpack.c.bf16 %v14804_v0, %v14802_v3  ;;  %v14820_v3 = vld [vmem:[%s24477_s16 + $0x19b0] sm:$0xff] }
0x104f   : > { %17050 = vmatpush1.bf16.msra.mxu1 %v17049_v13  ;;  %16812 = vmatprep.subr.bf16.mxu0 %v16811_v28  ;;  %v14549_v13 = vld [vmem:[%s24477_s16 + $0x1140] sm:$0xff]  ;;  %v14551_v28 = vld [vmem:[%s24477_s16 + $0x1150] sm:$0xff]  ;;  %v14584_v0 = vld [vmem:[%s24477_s16 + $0x1258] sm:$0xff] }
0x1050   : > { %17052 = vmatprep.subr.bf16.mxu1 %v17051_v46  ;;  %v14554_v46 = vld [vmem:[%s24477_s16 + $0x1168] sm:$0xff]  ;;  %v16829_v43 = vpack.c.bf16 %v14551_v28, %v14549_v13  ;;  %v14806_v13 = vld [vmem:[%s24477_s16 + $0x1940] sm:$0xff]  ;;  %v17083_v28 = vpack.c.bf16 %v14809_v33, %v14807_v10 }
0x1051   : > { %v17085_v4 = vpack.c.bf16 %v14808_v14, %v14806_v13  ;;  %v14588_v13 = vld [vmem:[%s24477_s16 + $0x1278] sm:$0xff] }
0x1052   : > { %16814 = vmatpush1.bf16.msra.mxu0 %v16813_v47  ;;  %v16831_v47 = vpack.c.bf16 %v14556_v56, %v14554_v46  ;;  %v14811_v46 = vld [vmem:[%s24477_s16 + $0x1968] sm:$0xff]  ;;  %v14813_v56 = vld [vmem:[%s24477_s16 + $0x1978] sm:$0xff] }
0x1053   : > { %17054 = vmatpush1.bf16.msra.mxu1 %v17053_v34  ;;  %16816 = vmatprep.subr.bf16.mxu0 %v16815_v57  ;;  %v14553_v34 = vld [vmem:[%s24477_s16 + $0x1160] sm:$0xff]  ;;  %v14555_v57 = vld [vmem:[%s24477_s16 + $0x1170] sm:$0xff]  ;;  %v14829_v14 = vld [vmem:[%s24477_s16 + $0x19f8] sm:$0xff] }
0x1054   : > { %17056 = vmatprep.subr.bf16.mxu1 %v17055_v61  ;;  %v14558_v61 = vld [vmem:[%s24477_s16 + $0x1188] sm:$0xff]  ;;  %v16833_v40 = vpack.c.bf16 %v14555_v57, %v14553_v34  ;;  %v14810_v34 = vld [vmem:[%s24477_s16 + $0x1960] sm:$0xff]  ;;  %v17087_v57 = vpack.c.bf16 %v14813_v56, %v14811_v46 }
0x1055   : > { %v17089_v5 = vpack.c.bf16 %v14812_v59, %v14810_v34  ;;  %v14585_v56 = vld [vmem:[%s24477_s16 + $0x1260] sm:$0xff]  ;;  %v14592_v34 = vld [vmem:[%s24477_s16 + $0x1298] sm:$0xff] }
0x1056   : > { %16818 = vmatpush1.bf16.msra.mxu0 %v16817_v8  ;;  %v16835_v8 = vpack.c.bf16 %v14560_v1, %v14558_v61  ;;  %v14815_v61 = vld [vmem:[%s24477_s16 + $0x1988] sm:$0xff]  ;;  %v14817_v1 = vld [vmem:[%s24477_s16 + $0x1998] sm:$0xff] }
0x1057   : > { %17058 = vmatpush1.bf16.msra.mxu1 %v17057_v19  ;;  %16820 = vmatprep.subr.bf16.mxu0 %v16819_v36  ;;  %v14557_v19 = vld [vmem:[%s24477_s16 + $0x1180] sm:$0xff]  ;;  %v14559_v36 = vld [vmem:[%s24477_s16 + $0x1190] sm:$0xff]  ;;  %v14833_v59 = vld [vmem:[%s24477_s16 + $0x1a18] sm:$0xff] }
0x1058   : > { %17060 = vmatprep.subr.bf16.mxu1 %v17059_v7  ;;  %v14562_v7 = vld [vmem:[%s24477_s16 + $0x11a8] sm:$0xff]  ;;  %v16837_v16 = vpack.c.bf16 %v14559_v36, %v14557_v19  ;;  %v14814_v19 = vld [vmem:[%s24477_s16 + $0x1980] sm:$0xff]  ;;  %v17091_v36 = vpack.c.bf16 %v14817_v1, %v14815_v61 }
0x1059   : > { %v17093_v11 = vpack.c.bf16 %v14816_v50, %v14814_v19  ;;  %v14589_v1 = vld [vmem:[%s24477_s16 + $0x1280] sm:$0xff]  ;;  %v14596_v19 = vld [vmem:[%s24477_s16 + $0x12b8] sm:$0xff] }
0x105a   : > { %16822 = vmatpush1.bf16.msra.mxu0 %v16821_v48  ;;  %v16839_v48 = vpack.c.bf16 %v14564_v9, %v14562_v7  ;;  %v14819_v7 = vld [vmem:[%s24477_s16 + $0x19a8] sm:$0xff]  ;;  %v14821_v9 = vld [vmem:[%s24477_s16 + $0x19b8] sm:$0xff] }
0x105b   : > { %17062 = vmatpush1.bf16.msra.mxu1 %v17061_v18  ;;  %16824 = vmatprep.subr.bf16.mxu0 %v16823_v22  ;;  %v14561_v18 = vld [vmem:[%s24477_s16 + $0x11a0] sm:$0xff]  ;;  %v14563_v22 = vld [vmem:[%s24477_s16 + $0x11b0] sm:$0xff]  ;;  %v14837_v50 = vld [vmem:[%s24477_s16 + $0x1a38] sm:$0xff] }
0x105c   : > { %17064 = vmatprep.subr.bf16.mxu1 %v17063_v42  ;;  %v14566_v42 = vld [vmem:[%s24477_s16 + $0x11c8] sm:$0xff]  ;;  %v16841_v38 = vpack.c.bf16 %v14563_v22, %v14561_v18  ;;  %v14818_v18 = vld [vmem:[%s24477_s16 + $0x19a0] sm:$0xff]  ;;  %v17095_v22 = vpack.c.bf16 %v14821_v9, %v14819_v7  ;;  %v14595_v9 = vld [vmem:[%s24477_s16 + $0x12b0] sm:$0xff] }
0x105d   : > { %v17097_v33 = vpack.c.bf16 %v14820_v3, %v14818_v18  ;;  %v14593_v7 = vld [vmem:[%s24477_s16 + $0x12a0] sm:$0xff]  ;;  %v14600_v18 = vld [vmem:[%s24477_s16 + $0x12d8] sm:$0xff] }
0x105e   : > { %16826 = vmatpush1.bf16.msra.mxu0 %v16825_v54  ;;  %v16843_v54 = vpack.c.bf16 %v14568_v49, %v14566_v42  ;;  %v14823_v42 = vld [vmem:[%s24477_s16 + $0x19c8] sm:$0xff]  ;;  %v14825_v49 = vld [vmem:[%s24477_s16 + $0x19d8] sm:$0xff] }
0x105f   : > { %17066 = vmatpush1.bf16.msra.mxu1 %v17065_v26  ;;  %16828 = vmatprep.subr.bf16.mxu0 %v16827_v25  ;;  %v14565_v26 = vld [vmem:[%s24477_s16 + $0x11c0] sm:$0xff]  ;;  %v14567_v25 = vld [vmem:[%s24477_s16 + $0x11d0] sm:$0xff]  ;;  %v14841_v3 = vld [vmem:[%s24477_s16 + $0x1a58] sm:$0xff] }
0x1060   : > { %17068 = vmatprep.subr.bf16.mxu1 %v17067_v32  ;;  %v14570_v32 = vld [vmem:[%s24477_s16 + $0x11e8] sm:$0xff]  ;;  %v16845_v55 = vpack.c.bf16 %v14567_v25, %v14565_v26  ;;  %v17099_v26 = vpack.c.bf16 %v14825_v49, %v14823_v42  ;;  %v14597_v49 = vld [vmem:[%s24477_s16 + $0x12c0] sm:$0xff] }
0x1061   : > { %v14586_v25 = vld [vmem:[%s24477_s16 + $0x1268] sm:$0xff] }
0x1062   : > { %16830 = vmatpush1.bf16.msra.mxu0 %v16829_v43  ;;  %v16847_v43 = vpack.c.bf16 %v14572_v39, %v14570_v32  ;;  %v16863_v46 = vpack.c.bf16 %v14588_v13, %v14586_v25  ;;  %v14601_v13 = vld [vmem:[%s24477_s16 + $0x12e0] sm:$0xff] }
0x1063   : > { %17070 = vmatpush1.bf16.msra.mxu1 %v17069_v52  ;;  %16832 = vmatprep.subr.bf16.mxu0 %v16831_v47  ;;  %v14569_v52 = vld [vmem:[%s24477_s16 + $0x11e0] sm:$0xff]  ;;  %v14571_v47 = vld [vmem:[%s24477_s16 + $0x11f0] sm:$0xff] }
0x1064   : > { %17072 = vmatprep.subr.bf16.mxu1 %v17071_v24  ;;  %v14574_v24 = vld [vmem:[%s24477_s16 + $0x1208] sm:$0xff]  ;;  %v16849_v62 = vpack.c.bf16 %v14571_v47, %v14569_v52  ;;  %v14828_v52 = vld [vmem:[%s24477_s16 + $0x19f0] sm:$0xff] }
0x1065   : > { %v14590_v47 = vld [vmem:[%s24477_s16 + $0x1288] sm:$0xff] }
0x1066   : > { %16834 = vmatpush1.bf16.msra.mxu0 %v16833_v40  ;;  %v16851_v40 = vpack.c.bf16 %v14576_v35, %v14574_v24  ;;  %v16867_v61 = vpack.c.bf16 %v14592_v34, %v14590_v47  ;;  %v14605_v34 = vld [vmem:[%s24477_s16 + $0x1300] sm:$0xff] }
0x1067   : > { %17074 = vmatpush1.bf16.msra.mxu1 %v17073_v20  ;;  %16836 = vmatprep.subr.bf16.mxu0 %v16835_v8  ;;  %v14573_v20 = vld [vmem:[%s24477_s16 + $0x1200] sm:$0xff]  ;;  %v14575_v8 = vld [vmem:[%s24477_s16 + $0x1210] sm:$0xff] }
0x1068   : > { %17076 = vmatprep.subr.bf16.mxu1 %v17075_v15  ;;  %v14578_v15 = vld [vmem:[%s24477_s16 + $0x1228] sm:$0xff]  ;;  %v16853_v21 = vpack.c.bf16 %v14575_v8, %v14573_v20  ;;  %v14832_v20 = vld [vmem:[%s24477_s16 + $0x1a10] sm:$0xff] }
0x1069   : > { %v14594_v8 = vld [vmem:[%s24477_s16 + $0x12a8] sm:$0xff] }
0x106a   : > { %16838 = vmatpush1.bf16.msra.mxu0 %v16837_v16  ;;  %v16855_v16 = vpack.c.bf16 %v14580_v51, %v14578_v15 }
0x106b   : > { %17078 = vmatpush1.bf16.msra.mxu1 %v17077_v30  ;;  %16840 = vmatprep.subr.bf16.mxu0 %v16839_v48  ;;  %v14577_v30 = vld [vmem:[%s24477_s16 + $0x1220] sm:$0xff]  ;;  %v14579_v48 = vld [vmem:[%s24477_s16 + $0x1230] sm:$0xff] }
0x106c   : > { %17080 = vmatprep.subr.bf16.mxu1 %v17079_v31  ;;  %v14582_v31 = vld [vmem:[%s24477_s16 + $0x1248] sm:$0xff]  ;;  %v16857_v10 = vpack.c.bf16 %v14579_v48, %v14577_v30  ;;  %v14836_v30 = vld [vmem:[%s24477_s16 + $0x1a30] sm:$0xff] }
0x106d   : > { %v14598_v48 = vld [vmem:[%s24477_s16 + $0x12c8] sm:$0xff] }
0x106e   : > { %16842 = vmatpush1.bf16.msra.mxu0 %v16841_v38  ;;  %v16859_v38 = vpack.c.bf16 %v14584_v0, %v14582_v31  ;;  %v16873_v31 = vpack.c.bf16 %v14595_v9, %v14593_v7  ;;  %v16875_v42 = vpack.c.bf16 %v14600_v18, %v14598_v48  ;;  %v14614_v7 = vld [vmem:[%s24477_s16 + $0x1348] sm:$0xff]  ;;  %v14616_v9 = vld [vmem:[%s24477_s16 + $0x1358] sm:$0xff]  ;;  %v14613_v18 = vld [vmem:[%s24477_s16 + $0x1340] sm:$0xff] }
0x106f   : > { %17082 = vmatpush1.bf16.msra.mxu1 %v17081_v27  ;;  %16844 = vmatprep.subr.bf16.mxu0 %v16843_v54  ;;  %v14583_v27 = vld [vmem:[%s24477_s16 + $0x1250] sm:$0xff]  ;;  %v14822_v54 = vld [vmem:[%s24477_s16 + $0x19c0] sm:$0xff]  ;;  %v16891_v48 = vpack.c.bf16 %v14616_v9, %v14614_v7 }
0x1070   : > { %17084 = vmatprep.subr.bf16.mxu1 %v17083_v28  ;;  %v14827_v28 = vld [vmem:[%s24477_s16 + $0x19e8] sm:$0xff]  ;;  %v14629_v9 = vld [vmem:[%s24477_s16 + $0x13c0] sm:$0xff] }
0x1072   : > { %16846 = vmatpush1.bf16.msra.mxu0 %v16845_v55  ;;  %v14587_v55 = vld [vmem:[%s24477_s16 + $0x1270] sm:$0xff] }
0x1073   : > { %17086 = vmatpush1.bf16.msra.mxu1 %v17085_v4  ;;  %16848 = vmatprep.subr.bf16.mxu0 %v16847_v43  ;;  %v14826_v4 = vld [vmem:[%s24477_s16 + $0x19e0] sm:$0xff]  ;;  %v17103_v43 = vpack.c.bf16 %v14829_v14, %v14827_v28  ;;  %v16865_v24 = vpack.c.bf16 %v14587_v55, %v14585_v56  ;;  %v14603_v28 = vld [vmem:[%s24477_s16 + $0x12f0] sm:$0xff]  ;;  %v14608_v56 = vld [vmem:[%s24477_s16 + $0x1318] sm:$0xff] }
0x1074   : > { %17088 = vmatprep.subr.bf16.mxu1 %v17087_v57  ;;  %v14831_v57 = vld [vmem:[%s24477_s16 + $0x1a08] sm:$0xff]  ;;  %v17105_v35 = vpack.c.bf16 %v14828_v52, %v14826_v4  ;;  %v14842_v14 = vld [vmem:[%s24477_s16 + $0x1a60] sm:$0xff]  ;;  %v14849_v4 = vld [vmem:[%s24477_s16 + $0x1a98] sm:$0xff] }
0x1075   : > { %v14847_v55 = vld [vmem:[%s24477_s16 + $0x1a88] sm:$0xff] }
0x1076   : > { %16850 = vmatpush1.bf16.msra.mxu0 %v16849_v62  ;;  %v14591_v62 = vld [vmem:[%s24477_s16 + $0x1290] sm:$0xff] }
0x1077   : > { %17090 = vmatpush1.bf16.msra.mxu1 %v17089_v5  ;;  %16852 = vmatprep.subr.bf16.mxu0 %v16851_v40  ;;  %v17107_v5 = vpack.c.bf16 %v14833_v59, %v14831_v57  ;;  %v14830_v40 = vld [vmem:[%s24477_s16 + $0x1a00] sm:$0xff]  ;;  %v16869_v15 = vpack.c.bf16 %v14591_v62, %v14589_v1  ;;  %v14607_v57 = vld [vmem:[%s24477_s16 + $0x1310] sm:$0xff]  ;;  %v14612_v1 = vld [vmem:[%s24477_s16 + $0x1338] sm:$0xff] }
0x1078   : > { %17092 = vmatprep.subr.bf16.mxu1 %v17091_v36  ;;  %v14835_v36 = vld [vmem:[%s24477_s16 + $0x1a28] sm:$0xff]  ;;  %v17109_v51 = vpack.c.bf16 %v14832_v20, %v14830_v40  ;;  %v14846_v59 = vld [vmem:[%s24477_s16 + $0x1a80] sm:$0xff]  ;;  %v16885_v40 = vpack.c.bf16 %v14607_v57, %v14605_v34  ;;  %v14628_v34 = vld [vmem:[%s24477_s16 + $0x13b8] sm:$0xff] }
0x1079   : > { %11811 = vmatmul.mubr.f32.vlgmr.msra.gmra.mrb[42].mxu0 %v22100_v23  ;;  %v14581_v23 = vld [vmem:[%s24477_s16 + $0x1240] sm:$0xff]  ;;  %v14851_v62 = vld [vmem:[%s24477_s16 + $0x1aa8] sm:$0xff] }
0x107a   : > { %16854 = vmatpush1.bf16.msra.mxu0 %v16853_v21  ;;  %11881 = vmatprep.mubr.f32.mxu0 %v22121_v2  ;;  %v14824_v2 = vld [vmem:[%s24477_s16 + $0x19d0] sm:$0xff]  ;;  %v16861_v32 = vpack.c.bf16 %v14583_v27, %v14581_v23  ;;  %v14834_v21 = vld [vmem:[%s24477_s16 + $0x1a20] sm:$0xff]  ;;  %v14604_v23 = vld [vmem:[%s24477_s16 + $0x12f8] sm:$0xff] }
0x107b   : > { %17094 = vmatpush1.bf16.msra.mxu1 %v17093_v11  ;;  %16856 = vmatprep.subr.bf16.mxu0 %v16855_v16  ;;  %v17101_v39 = vpack.c.bf16 %v14824_v2, %v14822_v54  ;;  %v16871_v11 = vpack.c.bf16 %v14596_v19, %v14594_v8  ;;  %v17111_v16 = vpack.c.bf16 %v14837_v50, %v14835_v36  ;;  %v14843_v27 = vld [vmem:[%s24477_s16 + $0x1a68] sm:$0xff]  ;;  %v14845_v54 = vld [vmem:[%s24477_s16 + $0x1a78] sm:$0xff]  ;;  %v14609_v19 = vld [vmem:[%s24477_s16 + $0x1320] sm:$0xff] }
0x107c   : > { %17096 = vmatprep.subr.bf16.mxu1 %v17095_v22  ;;  %v14839_v22 = vld [vmem:[%s24477_s16 + $0x1a48] sm:$0xff]  ;;  %v17113_v0 = vpack.c.bf16 %v14836_v30, %v14834_v21  ;;  %v14611_v36 = vld [vmem:[%s24477_s16 + $0x1330] sm:$0xff]  ;;  %v14850_v50 = vld [vmem:[%s24477_s16 + $0x1aa0] sm:$0xff] }
0x107d   : > { %v14855_v21 = vld [vmem:[%s24477_s16 + $0x1ac8] sm:$0xff] }
0x107e   : > { %16858 = vmatpush1.bf16.msra.mxu0 %v16857_v10  ;;  %v14599_v10 = vld [vmem:[%s24477_s16 + $0x12d0] sm:$0xff]  ;;  %v14867_v57 = vld [vmem:[%s24477_s16 + $0x1b28] sm:$0xff] }
0x107f   : > { %17098 = vmatpush1.bf16.msra.mxu1 %v17097_v33  ;;  %16860 = vmatprep.subr.bf16.mxu0 %v16859_v38  ;;  %v14838_v33 = vld [vmem:[%s24477_s16 + $0x1a40] sm:$0xff]  ;;  %v14602_v38 = vld [vmem:[%s24477_s16 + $0x12e8] sm:$0xff] }
0x1080   : > { %17100 = vmatprep.subr.bf16.mxu1 %v17099_v26  ;;  %v16877_v26 = vpack.c.bf16 %v14599_v10, %v14597_v49  ;;  %v16879_v25 = vpack.c.bf16 %v14604_v23, %v14602_v38  ;;  %v14620_v49 = vld [vmem:[%s24477_s16 + $0x1378] sm:$0xff]  ;;  %v14859_v10 = vld [vmem:[%s24477_s16 + $0x1ae8] sm:$0xff]  ;;  %v14617_v23 = vld [vmem:[%s24477_s16 + $0x1360] sm:$0xff] }
0x1082   : > { %16862 = vmatpush1.bf16.msra.mxu0 %v16861_v32  ;;  %v17119_v32 = vpack.c.bf16 %v14845_v54, %v14843_v27  ;;  %v14619_v27 = vld [vmem:[%s24477_s16 + $0x1370] sm:$0xff]  ;;  %v14858_v54 = vld [vmem:[%s24477_s16 + $0x1ae0] sm:$0xff] }
0x1083   : > { %17102 = vmatpush1.bf16.msra.mxu1 %v17101_v39  ;;  %16864 = vmatprep.subr.bf16.mxu0 %v16863_v46  ;;  %v14844_v39 = vld [vmem:[%s24477_s16 + $0x1a70] sm:$0xff]  ;;  %v14606_v46 = vld [vmem:[%s24477_s16 + $0x1308] sm:$0xff] }
0x1084   : > { %17104 = vmatprep.subr.bf16.mxu1 %v17103_v43  ;;  %v16881_v43 = vpack.c.bf16 %v14603_v28, %v14601_v13  ;;  %v17121_v52 = vpack.c.bf16 %v14844_v39, %v14842_v14  ;;  %v16883_v47 = vpack.c.bf16 %v14608_v56, %v14606_v46  ;;  %v14624_v13 = vld [vmem:[%s24477_s16 + $0x1398] sm:$0xff]  ;;  %v14863_v28 = vld [vmem:[%s24477_s16 + $0x1b08] sm:$0xff]  ;;  %v14621_v56 = vld [vmem:[%s24477_s16 + $0x1380] sm:$0xff] }
0x1085   : > { %v14865_v14 = vld [vmem:[%s24477_s16 + $0x1b18] sm:$0xff] }
0x1086   : > { %16866 = vmatpush1.bf16.msra.mxu0 %v16865_v24  ;;  %v17123_v24 = vpack.c.bf16 %v14849_v4, %v14847_v55  ;;  %v14623_v55 = vld [vmem:[%s24477_s16 + $0x1390] sm:$0xff]  ;;  %v14862_v4 = vld [vmem:[%s24477_s16 + $0x1b00] sm:$0xff] }
0x1087   : > { %17106 = vmatpush1.bf16.msra.mxu1 %v17105_v35  ;;  %16868 = vmatprep.subr.bf16.mxu0 %v16867_v61  ;;  %v14848_v35 = vld [vmem:[%s24477_s16 + $0x1a90] sm:$0xff]  ;;  %v14610_v61 = vld [vmem:[%s24477_s16 + $0x1328] sm:$0xff] }
0x1088   : > { %17108 = vmatprep.subr.bf16.mxu1 %v17107_v5  ;;  %v14853_v5 = vld [vmem:[%s24477_s16 + $0x1ab8] sm:$0xff]  ;;  %v17125_v20 = vpack.c.bf16 %v14848_v35, %v14846_v59  ;;  %v16887_v8 = vpack.c.bf16 %v14612_v1, %v14610_v61  ;;  %v14625_v1 = vld [vmem:[%s24477_s16 + $0x13a0] sm:$0xff] }
0x1089   : > { %v14869_v59 = vld [vmem:[%s24477_s16 + $0x1b38] sm:$0xff] }
0x108a   : > { %12362 = vmatmul.mubr.f32.vlgmr.msra.gmra.mrb[154].mxu1 %v22214_v45  ;;  %16870 = vmatpush1.bf16.msra.mxu0 %v16869_v15  ;;  %v17115_v45 = vpack.c.bf16 %v14841_v3, %v14839_v22  ;;  %v17127_v15 = vpack.c.bf16 %v14853_v5, %v14851_v62  ;;  %v14615_v22 = vld [vmem:[%s24477_s16 + $0x1350] sm:$0xff]  ;;  %v14854_v3 = vld [vmem:[%s24477_s16 + $0x1ac0] sm:$0xff] }
0x108b   : > { %17110 = vmatpush1.bf16.msra.mxu1 %v17109_v51  ;;  %12432 = vmatprep.mubr.f32.mxu1 %v22235_v37  ;;  %v14840_v37 = vld [vmem:[%s24477_s16 + $0x1a50] sm:$0xff]  ;;  %v14866_v5 = vld [vmem:[%s24477_s16 + $0x1b20] sm:$0xff] }
0x108c   : > { %16872 = vmatprep.subr.bf16.mxu0 %v16871_v11  ;;  %17112 = vmatprep.subr.bf16.mxu1 %v17111_v16  ;;  %v17117_v2 = vpack.c.bf16 %v14840_v37, %v14838_v33  ;;  %v14852_v51 = vld [vmem:[%s24477_s16 + $0x1ab0] sm:$0xff]  ;;  %v14857_v11 = vld [vmem:[%s24477_s16 + $0x1ad8] sm:$0xff]  ;;  %v16889_v16 = vpack.c.bf16 %v14611_v36, %v14609_v19  ;;  %v14871_v36 = vld [vmem:[%s24477_s16 + $0x1b48] sm:$0xff] }
0x108d   : > { %v17129_v30 = vpack.c.bf16 %v14852_v51, %v14850_v50  ;;  %v14861_v33 = vld [vmem:[%s24477_s16 + $0x1af8] sm:$0xff]  ;;  %v14627_v62 = vld [vmem:[%s24477_s16 + $0x13b0] sm:$0xff] }
0x108e   : > { %16874 = vmatpush1.bf16.msra.mxu0 %v16873_v31  ;;  %v17131_v31 = vpack.c.bf16 %v14857_v11, %v14855_v21  ;;  %v14632_v19 = vld [vmem:[%s24477_s16 + $0x13d8] sm:$0xff]  ;;  %v14631_v21 = vld [vmem:[%s24477_s16 + $0x13d0] sm:$0xff]  ;;  %v14870_v11 = vld [vmem:[%s24477_s16 + $0x1b40] sm:$0xff] }
0x108f   : > { %17114 = vmatpush1.bf16.msra.mxu1 %v17113_v0  ;;  %16876 = vmatprep.subr.bf16.mxu0 %v16875_v42  ;;  %v14856_v0 = vld [vmem:[%s24477_s16 + $0x1ad0] sm:$0xff]  ;;  %v14618_v42 = vld [vmem:[%s24477_s16 + $0x1368] sm:$0xff]  ;;  %v14873_v50 = vld [vmem:[%s24477_s16 + $0x1b58] sm:$0xff] }
0x1090   : > { %17116 = vmatprep.subr.bf16.mxu1 %v17115_v45  ;;  %v16893_v45 = vpack.c.bf16 %v14615_v22, %v14613_v18  ;;  %v17133_v37 = vpack.c.bf16 %v14856_v0, %v14854_v3  ;;  %v16895_v38 = vpack.c.bf16 %v14620_v49, %v14618_v42  ;;  %v14636_v18 = vld [vmem:[%s24477_s16 + $0x13f8] sm:$0xff]  ;;  %v14875_v22 = vld [vmem:[%s24477_s16 + $0x1b68] sm:$0xff]  ;;  %v14633_v49 = vld [vmem:[%s24477_s16 + $0x13e0] sm:$0xff] }
0x1091   : > { %v14877_v3 = vld [vmem:[%s24477_s16 + $0x1b78] sm:$0xff] }
0x1092   : > { %16878 = vmatpush1.bf16.msra.mxu0 %v16877_v26  ;;  %v17135_v26 = vpack.c.bf16 %v14861_v33, %v14859_v10  ;;  %v14635_v10 = vld [vmem:[%s24477_s16 + $0x13f0] sm:$0xff]  ;;  %v14874_v33 = vld [vmem:[%s24477_s16 + $0x1b60] sm:$0xff] }
0x1093   : > { %17118 = vmatpush1.bf16.msra.mxu1 %v17117_v2  ;;  %16880 = vmatprep.subr.bf16.mxu0 %v16879_v25  ;;  %v14860_v2 = vld [vmem:[%s24477_s16 + $0x1af0] sm:$0xff]  ;;  %v14622_v25 = vld [vmem:[%s24477_s16 + $0x1388] sm:$0xff] }
0x1094   : > { %17120 = vmatprep.subr.bf16.mxu1 %v17119_v32  ;;  %v16897_v32 = vpack.c.bf16 %v14619_v27, %v14617_v23  ;;  %v17137_v39 = vpack.c.bf16 %v14860_v2, %v14858_v54  ;;  %v16899_v46 = vpack.c.bf16 %v14624_v13, %v14622_v25  ;;  %v14640_v23 = vld [vmem:[%s24477_s16 + $0x1418] sm:$0xff]  ;;  %v14879_v27 = vld [vmem:[%s24477_s16 + $0x1b88] sm:$0xff]  ;;  %v14637_v13 = vld [vmem:[%s24477_s16 + $0x1400] sm:$0xff] }
0x1095   : > { %v14881_v54 = vld [vmem:[%s24477_s16 + $0x1b98] sm:$0xff] }
0x1096   : > { %16882 = vmatpush1.bf16.msra.mxu0 %v16881_v43  ;;  %v17139_v43 = vpack.c.bf16 %v14865_v14, %v14863_v28  ;;  %v14639_v28 = vld [vmem:[%s24477_s16 + $0x1410] sm:$0xff]  ;;  %v14878_v14 = vld [vmem:[%s24477_s16 + $0x1b80] sm:$0xff] }
0x1097   : > { %17122 = vmatpush1.bf16.msra.mxu1 %v17121_v52  ;;  %16884 = vmatprep.subr.bf16.mxu0 %v16883_v47  ;;  %v14864_v52 = vld [vmem:[%s24477_s16 + $0x1b10] sm:$0xff]  ;;  %v14626_v47 = vld [vmem:[%s24477_s16 + $0x13a8] sm:$0xff] }
0x1098   : > { %17124 = vmatprep.subr.bf16.mxu1 %v17123_v24  ;;  %v16901_v24 = vpack.c.bf16 %v14623_v55, %v14621_v56  ;;  %v17141_v35 = vpack.c.bf16 %v14864_v52, %v14862_v4  ;;  %v16903_v61 = vpack.c.bf16 %v14628_v34, %v14626_v47  ;;  %v14644_v56 = vld [vmem:[%s24477_s16 + $0x1438] sm:$0xff]  ;;  %v14883_v55 = vld [vmem:[%s24477_s16 + $0x1ba8] sm:$0xff]  ;;  %v14641_v34 = vld [vmem:[%s24477_s16 + $0x1420] sm:$0xff] }
0x1099   : > { %v14885_v4 = vld [vmem:[%s24477_s16 + $0x1bb8] sm:$0xff] }
0x109a   : > { %16886 = vmatpush1.bf16.msra.mxu0 %v16885_v40  ;;  %v17143_v40 = vpack.c.bf16 %v14869_v59, %v14867_v57  ;;  %v14643_v57 = vld [vmem:[%s24477_s16 + $0x1430] sm:$0xff]  ;;  %v14882_v59 = vld [vmem:[%s24477_s16 + $0x1ba0] sm:$0xff] }
0x109b   : > { %17126 = vmatpush1.bf16.msra.mxu1 %v17125_v20  ;;  %16888 = vmatprep.subr.bf16.mxu0 %v16887_v8  ;;  %v14868_v20 = vld [vmem:[%s24477_s16 + $0x1b30] sm:$0xff]  ;;  %v14630_v8 = vld [vmem:[%s24477_s16 + $0x13c8] sm:$0xff] }
0x109c   : > { %17128 = vmatprep.subr.bf16.mxu1 %v17127_v15  ;;  %v16905_v15 = vpack.c.bf16 %v14627_v62, %v14625_v1  ;;  %v17145_v51 = vpack.c.bf16 %v14868_v20, %v14866_v5  ;;  %v16907_v7 = vpack.c.bf16 %v14632_v19, %v14630_v8  ;;  %v14648_v1 = vld [vmem:[%s24477_s16 + $0x1458] sm:$0xff]  ;;  %v14887_v62 = vld [vmem:[%s24477_s16 + $0x1bc8] sm:$0xff]  ;;  %v14647_v19 = vld [vmem:[%s24477_s16 + $0x1450] sm:$0xff] }
0x109d   : > { %v14889_v5 = vld [vmem:[%s24477_s16 + $0x1bd8] sm:$0xff] }
0x109e   : > { %16890 = vmatpush1.bf16.msra.mxu0 %v16889_v16  ;;  %v17147_v16 = vpack.c.bf16 %v14873_v50, %v14871_v36  ;;  %v14886_v36 = vld [vmem:[%s24477_s16 + $0x1bc0] sm:$0xff]  ;;  %v17163_v50 = vpack.c.bf16 %v14889_v5, %v14887_v62  ;;  %v14666_v62 = vld [vmem:[%s24477_s16 + $0x14e8] sm:$0xff]  ;;  %v14668_v5 = vld [vmem:[%s24477_s16 + $0x14f8] sm:$0xff] }
0x109f   : > { %17130 = vmatpush1.bf16.msra.mxu1 %v17129_v30  ;;  %16892 = vmatprep.subr.bf16.mxu0 %v16891_v48  ;;  %v14872_v30 = vld [vmem:[%s24477_s16 + $0x1b50] sm:$0xff]  ;;  %v14634_v48 = vld [vmem:[%s24477_s16 + $0x13e8] sm:$0xff] }
0x10a0   : > { %17132 = vmatprep.subr.bf16.mxu1 %v17131_v31  ;;  %v16909_v31 = vpack.c.bf16 %v14631_v21, %v14629_v9  ;;  %v17149_v0 = vpack.c.bf16 %v14872_v30, %v14870_v11  ;;  %v16911_v42 = vpack.c.bf16 %v14636_v18, %v14634_v48  ;;  %v14893_v9 = vld [vmem:[%s24477_s16 + $0x1bf8] sm:$0xff]  ;;  %v14649_v30 = vld [vmem:[%s24477_s16 + $0x1460] sm:$0xff]  ;;  %v14651_v48 = vld [vmem:[%s24477_s16 + $0x1470] sm:$0xff] }
0x10a1   : > { %v14890_v18 = vld [vmem:[%s24477_s16 + $0x1be0] sm:$0xff] }
0x10a2   : > { %16894 = vmatpush1.bf16.msra.mxu0 %v16893_v45  ;;  %v17151_v45 = vpack.c.bf16 %v14877_v3, %v14875_v22  ;;  %v14892_v3 = vld [vmem:[%s24477_s16 + $0x1bf0] sm:$0xff] }
0x10a3   : > { %17134 = vmatpush1.bf16.msra.mxu1 %v17133_v37  ;;  %16896 = vmatprep.subr.bf16.mxu0 %v16895_v38  ;;  %v14876_v37 = vld [vmem:[%s24477_s16 + $0x1b70] sm:$0xff]  ;;  %v14638_v38 = vld [vmem:[%s24477_s16 + $0x1408] sm:$0xff] }
0x10a4   : > { %17136 = vmatprep.subr.bf16.mxu1 %v17135_v26  ;;  %v16913_v26 = vpack.c.bf16 %v14635_v10, %v14633_v49  ;;  %v17153_v2 = vpack.c.bf16 %v14876_v37, %v14874_v33  ;;  %v16915_v25 = vpack.c.bf16 %v14640_v23, %v14638_v38  ;;  %v14897_v49 = vld [vmem:[%s24477_s16 + $0x1c18] sm:$0xff]  ;;  %v16929_v10 = vpack.c.bf16 %v14651_v48, %v14649_v30  ;;  %v14653_v37 = vld [vmem:[%s24477_s16 + $0x1480] sm:$0xff]  ;;  %v14655_v38 = vld [vmem:[%s24477_s16 + $0x1490] sm:$0xff] }
0x10a5   : > { %v17169_v33 = vpack.c.bf16 %v14892_v3, %v14890_v18  ;;  %v14669_v18 = vld [vmem:[%s24477_s16 + $0x1500] sm:$0xff] }
0x10a6   : > { %16898 = vmatpush1.bf16.msra.mxu0 %v16897_v32  ;;  %v17155_v32 = vpack.c.bf16 %v14881_v54, %v14879_v27  ;;  %v14894_v27 = vld [vmem:[%s24477_s16 + $0x1c00] sm:$0xff]  ;;  %v14896_v54 = vld [vmem:[%s24477_s16 + $0x1c10] sm:$0xff] }
0x10a7   : > { %17138 = vmatpush1.bf16.msra.mxu1 %v17137_v39  ;;  %16900 = vmatprep.subr.bf16.mxu0 %v16899_v46  ;;  %v14880_v39 = vld [vmem:[%s24477_s16 + $0x1b90] sm:$0xff]  ;;  %v14642_v46 = vld [vmem:[%s24477_s16 + $0x1428] sm:$0xff]  ;;  %v14910_v3 = vld [vmem:[%s24477_s16 + $0x1c80] sm:$0xff] }
0x10a8   : > { %17140 = vmatprep.subr.bf16.mxu1 %v17139_v43  ;;  %v16917_v43 = vpack.c.bf16 %v14639_v28, %v14637_v13  ;;  %v17157_v52 = vpack.c.bf16 %v14880_v39, %v14878_v14  ;;  %v16919_v47 = vpack.c.bf16 %v14644_v56, %v14642_v46  ;;  %v14901_v13 = vld [vmem:[%s24477_s16 + $0x1c38] sm:$0xff]  ;;  %v16933_v28 = vpack.c.bf16 %v14655_v38, %v14653_v37  ;;  %v14659_v39 = vld [vmem:[%s24477_s16 + $0x14b0] sm:$0xff]  ;;  %v14898_v46 = vld [vmem:[%s24477_s16 + $0x1c20] sm:$0xff] }
0x10a9   : > { %v17173_v14 = vpack.c.bf16 %v14896_v54, %v14894_v27  ;;  %v14675_v27 = vld [vmem:[%s24477_s16 + $0x1530] sm:$0xff]  ;;  %v14914_v54 = vld [vmem:[%s24477_s16 + $0x1ca0] sm:$0xff] }
0x10aa   : > { %16902 = vmatpush1.bf16.msra.mxu0 %v16901_v24  ;;  %v17159_v24 = vpack.c.bf16 %v14885_v4, %v14883_v55  ;;  %v14900_v4 = vld [vmem:[%s24477_s16 + $0x1c30] sm:$0xff] }
0x10ab   : > { %17142 = vmatpush1.bf16.msra.mxu1 %v17141_v35  ;;  %16904 = vmatprep.subr.bf16.mxu0 %v16903_v61  ;;  %v14884_v35 = vld [vmem:[%s24477_s16 + $0x1bb0] sm:$0xff]  ;;  %v14646_v61 = vld [vmem:[%s24477_s16 + $0x1448] sm:$0xff] }
0x10ac   : > { %17144 = vmatprep.subr.bf16.mxu1 %v17143_v40  ;;  %v16921_v40 = vpack.c.bf16 %v14643_v57, %v14641_v34  ;;  %v17161_v20 = vpack.c.bf16 %v14884_v35, %v14882_v59  ;;  %v16923_v8 = vpack.c.bf16 %v14648_v1, %v14646_v61  ;;  %v14905_v34 = vld [vmem:[%s24477_s16 + $0x1c58] sm:$0xff]  ;;  %v17177_v59 = vpack.c.bf16 %v14900_v4, %v14898_v46  ;;  %v14661_v35 = vld [vmem:[%s24477_s16 + $0x14c0] sm:$0xff]  ;;  %v14663_v61 = vld [vmem:[%s24477_s16 + $0x14d0] sm:$0xff] }
0x10ad   : > { %v14902_v1 = vld [vmem:[%s24477_s16 + $0x1c40] sm:$0xff] }
0x10ae   : > { %16906 = vmatpush1.bf16.msra.mxu0 %v16905_v15  ;;  %v14650_v15 = vld [vmem:[%s24477_s16 + $0x1468] sm:$0xff]  ;;  %v14918_v4 = vld [vmem:[%s24477_s16 + $0x1cc0] sm:$0xff] }
0x10af   : > { %17146 = vmatpush1.bf16.msra.mxu1 %v17145_v51  ;;  %16908 = vmatprep.subr.bf16.mxu0 %v16907_v7  ;;  %v14652_v51 = vld [vmem:[%s24477_s16 + $0x1478] sm:$0xff]  ;;  %v14891_v7 = vld [vmem:[%s24477_s16 + $0x1be8] sm:$0xff] }
0x10b0   : > { %17148 = vmatprep.subr.bf16.mxu1 %v17147_v16  ;;  %v16927_v16 = vpack.c.bf16 %v14652_v51, %v14650_v15  ;;  %v17167_v22 = vpack.c.bf16 %v14893_v9, %v14891_v7  ;;  %v14908_v51 = vld [vmem:[%s24477_s16 + $0x1c70] sm:$0xff]  ;;  %v14670_v7 = vld [vmem:[%s24477_s16 + $0x1508] sm:$0xff]  ;;  %v14672_v9 = vld [vmem:[%s24477_s16 + $0x1518] sm:$0xff] }
0x10b1   : > { %v16947_v48 = vpack.c.bf16 %v14672_v9, %v14670_v7  ;;  %v14928_v9 = vld [vmem:[%s24477_s16 + $0x1d10] sm:$0xff] }
0x10b2   : > { %16910 = vmatpush1.bf16.msra.mxu0 %v16909_v31  ;;  %v14654_v31 = vld [vmem:[%s24477_s16 + $0x1488] sm:$0xff] }
0x10b3   : > { %17150 = vmatpush1.bf16.msra.mxu1 %v17149_v0  ;;  %16912 = vmatprep.subr.bf16.mxu0 %v16911_v42  ;;  %v14656_v0 = vld [vmem:[%s24477_s16 + $0x1498] sm:$0xff]  ;;  %v14895_v42 = vld [vmem:[%s24477_s16 + $0x1c08] sm:$0xff] }
0x10b4   : > { %17152 = vmatprep.subr.bf16.mxu1 %v17151_v45  ;;  %v16931_v45 = vpack.c.bf16 %v14656_v0, %v14654_v31  ;;  %v17171_v23 = vpack.c.bf16 %v14897_v49, %v14895_v42  ;;  %v14912_v0 = vld [vmem:[%s24477_s16 + $0x1c90] sm:$0xff]  ;;  %v14674_v42 = vld [vmem:[%s24477_s16 + $0x1528] sm:$0xff]  ;;  %v14676_v49 = vld [vmem:[%s24477_s16 + $0x1538] sm:$0xff] }
0x10b5   : > { %v17189_v37 = vpack.c.bf16 %v14912_v0, %v14910_v3  ;;  %v16951_v38 = vpack.c.bf16 %v14676_v49, %v14674_v42  ;;  %v14689_v3 = vld [vmem:[%s24477_s16 + $0x15a0] sm:$0xff]  ;;  %v14932_v49 = vld [vmem:[%s24477_s16 + $0x1d30] sm:$0xff] }
0x10b6   : > { %16914 = vmatpush1.bf16.msra.mxu0 %v16913_v26  ;;  %v14658_v26 = vld [vmem:[%s24477_s16 + $0x14a8] sm:$0xff]  ;;  %v14930_v0 = vld [vmem:[%s24477_s16 + $0x1d20] sm:$0xff] }
0x10b7   : > { %17154 = vmatpush1.bf16.msra.mxu1 %v17153_v2  ;;  %16916 = vmatprep.subr.bf16.mxu0 %v16915_v25  ;;  %v14660_v2 = vld [vmem:[%s24477_s16 + $0x14b8] sm:$0xff]  ;;  %v14899_v25 = vld [vmem:[%s24477_s16 + $0x1c28] sm:$0xff] }
0x10b8   : > { %17156 = vmatprep.subr.bf16.mxu1 %v17155_v32  ;;  %v14657_v32 = vld [vmem:[%s24477_s16 + $0x14a0] sm:$0xff]  ;;  %v16935_v56 = vpack.c.bf16 %v14660_v2, %v14658_v26  ;;  %v17175_v55 = vpack.c.bf16 %v14901_v13, %v14899_v25  ;;  %v14916_v2 = vld [vmem:[%s24477_s16 + $0x1cb0] sm:$0xff]  ;;  %v14678_v25 = vld [vmem:[%s24477_s16 + $0x1548] sm:$0xff] }
0x10b9   : > { %11882 = vmatmul.mubr.f32.vlgmr.msra.gmra.mrb[42].mxu0 %v22110_v12  ;;  %v14645_v12 = vld [vmem:[%s24477_s16 + $0x1440] sm:$0xff]  ;;  %v16937_v57 = vpack.c.bf16 %v14659_v39, %v14657_v32  ;;  %v14680_v13 = vld [vmem:[%s24477_s16 + $0x1558] sm:$0xff]  ;;  %v17193_v39 = vpack.c.bf16 %v14916_v2, %v14914_v54 }
0x10ba   : > { %16918 = vmatpush1.bf16.msra.mxu0 %v16917_v43  ;;  %11952 = vmatprep.mubr.f32.mxu0 %v22164_v41  ;;  %v14888_v41 = vld [vmem:[%s24477_s16 + $0x1bd0] sm:$0xff]  ;;  %v16925_v21 = vpack.c.bf16 %v14647_v19, %v14645_v12  ;;  %v14662_v43 = vld [vmem:[%s24477_s16 + $0x14c8] sm:$0xff]  ;;  %v16943_v19 = vpack.c.bf16 %v14668_v5, %v14666_v62  ;;  %v16955_v46 = vpack.c.bf16 %v14680_v13, %v14678_v25  ;;  %v14693_v54 = vld [vmem:[%s24477_s16 + $0x15c0] sm:$0xff] }
0x10bb   : > { %17158 = vmatpush1.bf16.msra.mxu1 %v17157_v52  ;;  %16920 = vmatprep.subr.bf16.mxu0 %v16919_v47  ;;  %v17165_v11 = vpack.c.bf16 %v14888_v41, %v14886_v36  ;;  %v14664_v52 = vld [vmem:[%s24477_s16 + $0x14d8] sm:$0xff]  ;;  %v14903_v47 = vld [vmem:[%s24477_s16 + $0x1c48] sm:$0xff]  ;;  %v14665_v36 = vld [vmem:[%s24477_s16 + $0x14e0] sm:$0xff] }
0x10bc   : > { %17160 = vmatprep.subr.bf16.mxu1 %v17159_v24  ;;  %v16939_v24 = vpack.c.bf16 %v14664_v52, %v14662_v43  ;;  %v14906_v41 = vld [vmem:[%s24477_s16 + $0x1c60] sm:$0xff]  ;;  %v14920_v52 = vld [vmem:[%s24477_s16 + $0x1cd0] sm:$0xff] }
0x10bd   : > { %v17185_v30 = vpack.c.bf16 %v14908_v51, %v14906_v41  ;;  %v14924_v5 = vld [vmem:[%s24477_s16 + $0x1cf0] sm:$0xff]  ;;  %v14685_v41 = vld [vmem:[%s24477_s16 + $0x1580] sm:$0xff] }
0x10be   : > { %16922 = vmatpush1.bf16.msra.mxu0 %v16921_v40  ;;  %v14907_v40 = vld [vmem:[%s24477_s16 + $0x1c68] sm:$0xff]  ;;  %v14926_v51 = vld [vmem:[%s24477_s16 + $0x1d00] sm:$0xff]  ;;  %v14936_v13 = vld [vmem:[%s24477_s16 + $0x1d50] sm:$0xff] }
0x10bf   : > { %17162 = vmatpush1.bf16.msra.mxu1 %v17161_v20  ;;  %16924 = vmatprep.subr.bf16.mxu0 %v16923_v8  ;;  %v14909_v20 = vld [vmem:[%s24477_s16 + $0x1c78] sm:$0xff]  ;;  %v16941_v8 = vpack.c.bf16 %v14663_v61, %v14661_v35  ;;  %v17197_v35 = vpack.c.bf16 %v14920_v52, %v14918_v4  ;;  %v14934_v2 = vld [vmem:[%s24477_s16 + $0x1d40] sm:$0xff] }
0x10c0   : > { %17164 = vmatprep.subr.bf16.mxu1 %v17163_v50  ;;  %v14667_v50 = vld [vmem:[%s24477_s16 + $0x14f0] sm:$0xff]  ;;  %v17183_v15 = vpack.c.bf16 %v14909_v20, %v14907_v40  ;;  %v14686_v40 = vld [vmem:[%s24477_s16 + $0x1588] sm:$0xff]  ;;  %v14688_v20 = vld [vmem:[%s24477_s16 + $0x1598] sm:$0xff] }
0x10c1   : > { %v14697_v4 = vld [vmem:[%s24477_s16 + $0x15e0] sm:$0xff] }
0x10c2   : > { %16926 = vmatpush1.bf16.msra.mxu0 %v16925_v21  ;;  %v14911_v21 = vld [vmem:[%s24477_s16 + $0x1c88] sm:$0xff]  ;;  %v14938_v52 = vld [vmem:[%s24477_s16 + $0x1d60] sm:$0xff] }
0x10c3   : > { %17166 = vmatpush1.bf16.msra.mxu1 %v17165_v11  ;;  %16928 = vmatprep.subr.bf16.mxu0 %v16927_v16  ;;  %v14913_v11 = vld [vmem:[%s24477_s16 + $0x1c98] sm:$0xff]  ;;  %v16945_v16 = vpack.c.bf16 %v14667_v50, %v14665_v36  ;;  %v16963_v50 = vpack.c.bf16 %v14688_v20, %v14686_v40  ;;  %v14944_v20 = vld [vmem:[%s24477_s16 + $0x1d90] sm:$0xff] }
0x10c4   : > { %17168 = vmatprep.subr.bf16.mxu1 %v17167_v22  ;;  %v14671_v22 = vld [vmem:[%s24477_s16 + $0x1510] sm:$0xff]  ;;  %v17187_v31 = vpack.c.bf16 %v14913_v11, %v14911_v21  ;;  %v14690_v21 = vld [vmem:[%s24477_s16 + $0x15a8] sm:$0xff]  ;;  %v14692_v11 = vld [vmem:[%s24477_s16 + $0x15b8] sm:$0xff] }
0x10c6   : > { %16930 = vmatpush1.bf16.msra.mxu0 %v16929_v10  ;;  %v14915_v10 = vld [vmem:[%s24477_s16 + $0x1ca8] sm:$0xff] }
0x10c7   : > { %17170 = vmatpush1.bf16.msra.mxu1 %v17169_v33  ;;  %16932 = vmatprep.subr.bf16.mxu0 %v16931_v45  ;;  %v14917_v33 = vld [vmem:[%s24477_s16 + $0x1cb8] sm:$0xff]  ;;  %v16949_v45 = vpack.c.bf16 %v14671_v22, %v14669_v18  ;;  %v17205_v18 = vpack.c.bf16 %v14928_v9, %v14926_v51  ;;  %v16967_v22 = vpack.c.bf16 %v14692_v11, %v14690_v21  ;;  %v14705_v51 = vld [vmem:[%s24477_s16 + $0x1620] sm:$0xff]  ;;  %v14948_v11 = vld [vmem:[%s24477_s16 + $0x1db0] sm:$0xff] }
0x10c8   : > { %17172 = vmatprep.subr.bf16.mxu1 %v17171_v23  ;;  %v14673_v23 = vld [vmem:[%s24477_s16 + $0x1520] sm:$0xff]  ;;  %v17191_v26 = vpack.c.bf16 %v14917_v33, %v14915_v10  ;;  %v14694_v10 = vld [vmem:[%s24477_s16 + $0x15c8] sm:$0xff]  ;;  %v14696_v33 = vld [vmem:[%s24477_s16 + $0x15d8] sm:$0xff] }
0x10c9   : > { %v16953_v32 = vpack.c.bf16 %v14675_v27, %v14673_v23  ;;  %v17209_v23 = vpack.c.bf16 %v14932_v49, %v14930_v0  ;;  %v16971_v27 = vpack.c.bf16 %v14696_v33, %v14694_v10  ;;  %v14946_v9 = vld [vmem:[%s24477_s16 + $0x1da0] sm:$0xff]  ;;  %v14711_v0 = vld [vmem:[%s24477_s16 + $0x1650] sm:$0xff]  ;;  %v14714_v10 = vld [vmem:[%s24477_s16 + $0x1668] sm:$0xff] }
0x10ca   : > { %12433 = vmatmul.mubr.f32.vlgmr.msra.gmra.mrb[154].mxu1 %v22224_v17  ;;  %16934 = vmatpush1.bf16.msra.mxu0 %v16933_v28  ;;  %v17179_v17 = vpack.c.bf16 %v14905_v34, %v14903_v47  ;;  %v14919_v28 = vld [vmem:[%s24477_s16 + $0x1cc8] sm:$0xff]  ;;  %v14684_v34 = vld [vmem:[%s24477_s16 + $0x1578] sm:$0xff] }
0x10cb   : > { %17174 = vmatpush1.bf16.msra.mxu1 %v17173_v14  ;;  %12503 = vmatprep.mubr.f32.mxu1 %v22278_v60  ;;  %v14904_v60 = vld [vmem:[%s24477_s16 + $0x1c50] sm:$0xff]  ;;  %v14921_v14 = vld [vmem:[%s24477_s16 + $0x1cd8] sm:$0xff]  ;;  %v14682_v47 = vld [vmem:[%s24477_s16 + $0x1568] sm:$0xff] }
0x10cc   : > { %16936 = vmatprep.subr.bf16.mxu0 %v16935_v56  ;;  %17176 = vmatprep.subr.bf16.mxu1 %v17175_v55  ;;  %v17181_v12 = vpack.c.bf16 %v14904_v60, %v14902_v1  ;;  %v14677_v56 = vld [vmem:[%s24477_s16 + $0x1540] sm:$0xff]  ;;  %v14679_v55 = vld [vmem:[%s24477_s16 + $0x1550] sm:$0xff]  ;;  %v17195_v43 = vpack.c.bf16 %v14921_v14, %v14919_v28  ;;  %v16959_v61 = vpack.c.bf16 %v14684_v34, %v14682_v47  ;;  %v14698_v28 = vld [vmem:[%s24477_s16 + $0x15e8] sm:$0xff] }
0x10cd   : > { %v14681_v1 = vld [vmem:[%s24477_s16 + $0x1560] sm:$0xff]  ;;  %v14700_v14 = vld [vmem:[%s24477_s16 + $0x15f8] sm:$0xff]  ;;  %v14940_v34 = vld [vmem:[%s24477_s16 + $0x1d70] sm:$0xff] }
0x10ce   : > { %16938 = vmatpush1.bf16.msra.mxu0 %v16937_v57  ;;  %v14923_v57 = vld [vmem:[%s24477_s16 + $0x1ce8] sm:$0xff]  ;;  %v14922_v60 = vld [vmem:[%s24477_s16 + $0x1ce0] sm:$0xff]  ;;  %v14716_v33 = vld [vmem:[%s24477_s16 + $0x1678] sm:$0xff] }
0x10cf   : > { %17178 = vmatpush1.bf16.msra.mxu1 %v17177_v59  ;;  %16940 = vmatprep.subr.bf16.mxu0 %v16939_v24  ;;  %v14925_v59 = vld [vmem:[%s24477_s16 + $0x1cf8] sm:$0xff]  ;;  %v16957_v24 = vpack.c.bf16 %v14679_v55, %v14677_v56  ;;  %v17201_v36 = vpack.c.bf16 %v14924_v5, %v14922_v60  ;;  %v17213_v56 = vpack.c.bf16 %v14936_v13, %v14934_v2  ;;  %v14701_v60 = vld [vmem:[%s24477_s16 + $0x1600] sm:$0xff]  ;;  %v14956_v13 = vld [vmem:[%s24477_s16 + $0x1df0] sm:$0xff] }
0x10d0   : > { %17180 = vmatprep.subr.bf16.mxu1 %v17179_v17  ;;  %v14683_v17 = vld [vmem:[%s24477_s16 + $0x1570] sm:$0xff]  ;;  %v17199_v62 = vpack.c.bf16 %v14925_v59, %v14923_v57  ;;  %v16975_v55 = vpack.c.bf16 %v14700_v14, %v14698_v28  ;;  %v14702_v57 = vld [vmem:[%s24477_s16 + $0x1608] sm:$0xff]  ;;  %v14704_v59 = vld [vmem:[%s24477_s16 + $0x1618] sm:$0xff] }
0x10d1   : > { %v14942_v5 = vld [vmem:[%s24477_s16 + $0x1d80] sm:$0xff]  ;;  %v14718_v28 = vld [vmem:[%s24477_s16 + $0x1688] sm:$0xff]  ;;  %v14720_v14 = vld [vmem:[%s24477_s16 + $0x1698] sm:$0xff] }
0x10d2   : > { %16942 = vmatpush1.bf16.msra.mxu0 %v16941_v8  ;;  %v14927_v8 = vld [vmem:[%s24477_s16 + $0x1d08] sm:$0xff]  ;;  %v14954_v2 = vld [vmem:[%s24477_s16 + $0x1de0] sm:$0xff] }
0x10d3   : > { %17182 = vmatpush1.bf16.msra.mxu1 %v17181_v12  ;;  %16944 = vmatprep.subr.bf16.mxu0 %v16943_v19  ;;  %v14929_v12 = vld [vmem:[%s24477_s16 + $0x1d18] sm:$0xff]  ;;  %v16961_v19 = vpack.c.bf16 %v14683_v17, %v14681_v1  ;;  %v17217_v1 = vpack.c.bf16 %v14940_v34, %v14938_v52  ;;  %v16979_v17 = vpack.c.bf16 %v14704_v59, %v14702_v57  ;;  %v14960_v34 = vld [vmem:[%s24477_s16 + $0x1e10] sm:$0xff]  ;;  %v14722_v57 = vld [vmem:[%s24477_s16 + $0x16a8] sm:$0xff] }
0x10d4   : > { %17184 = vmatprep.subr.bf16.mxu1 %v17183_v15  ;;  %v14687_v15 = vld [vmem:[%s24477_s16 + $0x1590] sm:$0xff]  ;;  %v17203_v7 = vpack.c.bf16 %v14929_v12, %v14927_v8  ;;  %v14706_v8 = vld [vmem:[%s24477_s16 + $0x1628] sm:$0xff]  ;;  %v14708_v12 = vld [vmem:[%s24477_s16 + $0x1638] sm:$0xff] }
0x10d5   : > { %v14724_v59 = vld [vmem:[%s24477_s16 + $0x16b8] sm:$0xff] }
0x10d6   : > { %16946 = vmatpush1.bf16.msra.mxu0 %v16945_v16  ;;  %v14931_v16 = vld [vmem:[%s24477_s16 + $0x1d28] sm:$0xff] }
0x10d7   : > { %17186 = vmatpush1.bf16.msra.mxu1 %v17185_v30  ;;  %16948 = vmatprep.subr.bf16.mxu0 %v16947_v48  ;;  %v14933_v30 = vld [vmem:[%s24477_s16 + $0x1d38] sm:$0xff]  ;;  %v16965_v48 = vpack.c.bf16 %v14687_v15, %v14685_v41  ;;  %v17221_v41 = vpack.c.bf16 %v14944_v20, %v14942_v5  ;;  %v16983_v15 = vpack.c.bf16 %v14708_v12, %v14706_v8  ;;  %v14964_v20 = vld [vmem:[%s24477_s16 + $0x1e30] sm:$0xff]  ;;  %v14726_v8 = vld [vmem:[%s24477_s16 + $0x16c8] sm:$0xff] }
0x10d8   : > { %17188 = vmatprep.subr.bf16.mxu1 %v17187_v31  ;;  %v14691_v31 = vld [vmem:[%s24477_s16 + $0x15b0] sm:$0xff]  ;;  %v17207_v42 = vpack.c.bf16 %v14933_v30, %v14931_v16  ;;  %v14710_v16 = vld [vmem:[%s24477_s16 + $0x1648] sm:$0xff]  ;;  %v14712_v30 = vld [vmem:[%s24477_s16 + $0x1658] sm:$0xff]  ;;  %v16999_v5 = vpack.c.bf16 %v14724_v59, %v14722_v57 }
0x10d9   : > { %v14728_v12 = vld [vmem:[%s24477_s16 + $0x16d8] sm:$0xff]  ;;  %v14739_v57 = vld [vmem:[%s24477_s16 + $0x1730] sm:$0xff]  ;;  %v14978_v59 = vld [vmem:[%s24477_s16 + $0x1ea0] sm:$0xff] }
0x10da   : > { %16950 = vmatpush1.bf16.msra.mxu0 %v16949_v45  ;;  %v14935_v45 = vld [vmem:[%s24477_s16 + $0x1d48] sm:$0xff] }
0x10db   : > { %17190 = vmatpush1.bf16.msra.mxu1 %v17189_v37  ;;  %16952 = vmatprep.subr.bf16.mxu0 %v16951_v38  ;;  %v14937_v37 = vld [vmem:[%s24477_s16 + $0x1d58] sm:$0xff]  ;;  %v16969_v38 = vpack.c.bf16 %v14691_v31, %v14689_v3  ;;  %v17225_v3 = vpack.c.bf16 %v14948_v11, %v14946_v9  ;;  %v16987_v31 = vpack.c.bf16 %v14712_v30, %v14710_v16  ;;  %v14727_v9 = vld [vmem:[%s24477_s16 + $0x16d0] sm:$0xff]  ;;  %v14730_v30 = vld [vmem:[%s24477_s16 + $0x16e8] sm:$0xff] }
0x10dc   : > { %17192 = vmatprep.subr.bf16.mxu1 %v17191_v26  ;;  %v14695_v26 = vld [vmem:[%s24477_s16 + $0x15d0] sm:$0xff]  ;;  %v17211_v25 = vpack.c.bf16 %v14937_v37, %v14935_v45  ;;  %v14955_v45 = vld [vmem:[%s24477_s16 + $0x1de8] sm:$0xff]  ;;  %v14957_v37 = vld [vmem:[%s24477_s16 + $0x1df8] sm:$0xff] }
0x10de   : > { %16954 = vmatpush1.bf16.msra.mxu0 %v16953_v32  ;;  %v14939_v32 = vld [vmem:[%s24477_s16 + $0x1d68] sm:$0xff] }
0x10df   : > { %17194 = vmatpush1.bf16.msra.mxu1 %v17193_v39  ;;  %16956 = vmatprep.subr.bf16.mxu0 %v16955_v46  ;;  %v14941_v39 = vld [vmem:[%s24477_s16 + $0x1d78] sm:$0xff]  ;;  %v16973_v46 = vpack.c.bf16 %v14695_v26, %v14693_v54  ;;  %v14713_v54 = vld [vmem:[%s24477_s16 + $0x1660] sm:$0xff]  ;;  %v14715_v26 = vld [vmem:[%s24477_s16 + $0x1670] sm:$0xff] }
0x10e0   : > { %17196 = vmatprep.subr.bf16.mxu1 %v17195_v43  ;;  %v14699_v43 = vld [vmem:[%s24477_s16 + $0x15f0] sm:$0xff]  ;;  %v17215_v47 = vpack.c.bf16 %v14941_v39, %v14939_v32  ;;  %v14959_v32 = vld [vmem:[%s24477_s16 + $0x1e08] sm:$0xff]  ;;  %v14961_v39 = vld [vmem:[%s24477_s16 + $0x1e18] sm:$0xff] }
0x10e1   : > { %v17235_v52 = vpack.c.bf16 %v14961_v39, %v14959_v32  ;;  %v14976_v39 = vld [vmem:[%s24477_s16 + $0x1e90] sm:$0xff] }
0x10e2   : > { %16958 = vmatpush1.bf16.msra.mxu0 %v16957_v24  ;;  %v14943_v24 = vld [vmem:[%s24477_s16 + $0x1d88] sm:$0xff] }
0x10e3   : > { %17198 = vmatpush1.bf16.msra.mxu1 %v17197_v35  ;;  %16960 = vmatprep.subr.bf16.mxu0 %v16959_v61  ;;  %v14945_v35 = vld [vmem:[%s24477_s16 + $0x1d98] sm:$0xff]  ;;  %v16977_v61 = vpack.c.bf16 %v14699_v43, %v14697_v4  ;;  %v14717_v4 = vld [vmem:[%s24477_s16 + $0x1680] sm:$0xff]  ;;  %v14719_v43 = vld [vmem:[%s24477_s16 + $0x1690] sm:$0xff] }
0x10e4   : > { %17200 = vmatprep.subr.bf16.mxu1 %v17199_v62  ;;  %v14703_v62 = vld [vmem:[%s24477_s16 + $0x1610] sm:$0xff]  ;;  %v17219_v40 = vpack.c.bf16 %v14945_v35, %v14943_v24  ;;  %v14963_v24 = vld [vmem:[%s24477_s16 + $0x1e28] sm:$0xff]  ;;  %v14965_v35 = vld [vmem:[%s24477_s16 + $0x1e38] sm:$0xff] }
0x10e6   : > { %16962 = vmatpush1.bf16.msra.mxu0 %v16961_v19  ;;  %v14947_v19 = vld [vmem:[%s24477_s16 + $0x1da8] sm:$0xff] }
0x10e7   : > { %17202 = vmatpush1.bf16.msra.mxu1 %v17201_v36  ;;  %16964 = vmatprep.subr.bf16.mxu0 %v16963_v50  ;;  %v14949_v36 = vld [vmem:[%s24477_s16 + $0x1db8] sm:$0xff]  ;;  %v16981_v50 = vpack.c.bf16 %v14703_v62, %v14701_v60  ;;  %v14723_v60 = vld [vmem:[%s24477_s16 + $0x16b0] sm:$0xff]  ;;  %v14962_v62 = vld [vmem:[%s24477_s16 + $0x1e20] sm:$0xff] }
0x10e8   : > { %17204 = vmatprep.subr.bf16.mxu1 %v17203_v7  ;;  %v14707_v7 = vld [vmem:[%s24477_s16 + $0x1630] sm:$0xff]  ;;  %v17223_v21 = vpack.c.bf16 %v14949_v36, %v14947_v19  ;;  %v14967_v19 = vld [vmem:[%s24477_s16 + $0x1e48] sm:$0xff]  ;;  %v14969_v36 = vld [vmem:[%s24477_s16 + $0x1e58] sm:$0xff] }
0x10e9   : > { %v17243_v16 = vpack.c.bf16 %v14969_v36, %v14967_v19  ;;  %v14741_v19 = vld [vmem:[%s24477_s16 + $0x1740] sm:$0xff]  ;;  %v14743_v36 = vld [vmem:[%s24477_s16 + $0x1750] sm:$0xff] }
0x10ea   : > { %16966 = vmatpush1.bf16.msra.mxu0 %v16965_v48  ;;  %v14951_v48 = vld [vmem:[%s24477_s16 + $0x1dc8] sm:$0xff] }
0x10eb   : > { %17206 = vmatpush1.bf16.msra.mxu1 %v17205_v18  ;;  %16968 = vmatprep.subr.bf16.mxu0 %v16967_v22  ;;  %v14953_v18 = vld [vmem:[%s24477_s16 + $0x1dd8] sm:$0xff]  ;;  %v16985_v22 = vpack.c.bf16 %v14707_v7, %v14705_v51  ;;  %v17241_v51 = vpack.c.bf16 %v14964_v20, %v14962_v62  ;;  %v17003_v7 = vpack.c.bf16 %v14728_v12, %v14726_v8 }
0x10ec   : > { %17208 = vmatprep.subr.bf16.mxu1 %v17207_v42  ;;  %v14950_v42 = vld [vmem:[%s24477_s16 + $0x1dc0] sm:$0xff]  ;;  %v17227_v49 = vpack.c.bf16 %v14953_v18, %v14951_v48  ;;  %v14732_v48 = vld [vmem:[%s24477_s16 + $0x16f8] sm:$0xff] }
0x10ed   : > { %v14985_v62 = vld [vmem:[%s24477_s16 + $0x1ed8] sm:$0xff] }
0x10ee   : > { %16970 = vmatpush1.bf16.msra.mxu0 %v16969_v38 }
0x10ef   : > { %17210 = vmatpush1.bf16.msra.mxu1 %v17209_v23  ;;  %16972 = vmatprep.subr.bf16.mxu0 %v16971_v27  ;;  %v16991_v27 = vpack.c.bf16 %v14716_v33, %v14714_v10  ;;  %v14731_v10 = vld [vmem:[%s24477_s16 + $0x16f0] sm:$0xff]  ;;  %v14970_v33 = vld [vmem:[%s24477_s16 + $0x1e60] sm:$0xff] }
0x10f0   : > { %17212 = vmatprep.subr.bf16.mxu1 %v17211_v25  ;;  %v17231_v25 = vpack.c.bf16 %v14957_v37, %v14955_v45  ;;  %v14972_v37 = vld [vmem:[%s24477_s16 + $0x1e70] sm:$0xff] }
0x10f2   : > { %16974 = vmatpush1.bf16.msra.mxu0 %v16973_v46  ;;  %v16993_v46 = vpack.c.bf16 %v14715_v26, %v14713_v54  ;;  %v14977_v54 = vld [vmem:[%s24477_s16 + $0x1e98] sm:$0xff] }
0x10f3   : > { %17214 = vmatpush1.bf16.msra.mxu1 %v17213_v56  ;;  %16976 = vmatprep.subr.bf16.mxu0 %v16975_v55  ;;  %v17233_v56 = vpack.c.bf16 %v14956_v13, %v14954_v2  ;;  %v16995_v55 = vpack.c.bf16 %v14720_v14, %v14718_v28  ;;  %v17249_v2 = vpack.c.bf16 %v14972_v37, %v14970_v33  ;;  %v14733_v13 = vld [vmem:[%s24477_s16 + $0x1700] sm:$0xff]  ;;  %v14735_v28 = vld [vmem:[%s24477_s16 + $0x1710] sm:$0xff]  ;;  %v14991_v33 = vld [vmem:[%s24477_s16 + $0x1f08] sm:$0xff] }
0x10f4   : > { %17216 = vmatprep.subr.bf16.mxu1 %v17215_v47  ;;  %v14958_v47 = vld [vmem:[%s24477_s16 + $0x1e00] sm:$0xff] }
0x10f5   : > { %v14974_v14 = vld [vmem:[%s24477_s16 + $0x1e80] sm:$0xff] }
0x10f6   : > { %16978 = vmatpush1.bf16.msra.mxu0 %v16977_v61  ;;  %v16997_v61 = vpack.c.bf16 %v14719_v43, %v14717_v4  ;;  %v14981_v4 = vld [vmem:[%s24477_s16 + $0x1eb8] sm:$0xff]  ;;  %v17013_v43 = vpack.c.bf16 %v14735_v28, %v14733_v13  ;;  %v14754_v13 = vld [vmem:[%s24477_s16 + $0x17a8] sm:$0xff] }
0x10f7   : > { %17218 = vmatpush1.bf16.msra.mxu1 %v17217_v1  ;;  %16980 = vmatprep.subr.bf16.mxu0 %v16979_v17  ;;  %v17237_v1 = vpack.c.bf16 %v14960_v34, %v14958_v47  ;;  %v14721_v17 = vld [vmem:[%s24477_s16 + $0x16a0] sm:$0xff]  ;;  %v14756_v28 = vld [vmem:[%s24477_s16 + $0x17b8] sm:$0xff] }
0x10f8   : > { %17220 = vmatprep.subr.bf16.mxu1 %v17219_v40  ;;  %v17239_v40 = vpack.c.bf16 %v14965_v35, %v14963_v24  ;;  %v14737_v34 = vld [vmem:[%s24477_s16 + $0x1720] sm:$0xff]  ;;  %v14980_v35 = vld [vmem:[%s24477_s16 + $0x1eb0] sm:$0xff] }
0x10f9   : > { %11953 = vmatmul.mubr.f32.vlgmr.msra.gmra.mrb[42].mxu0 %v22156_v44  ;;  %v14709_v44 = vld [vmem:[%s24477_s16 + $0x1640] sm:$0xff]  ;;  %v17257_v8 = vpack.c.bf16 %v14980_v35, %v14978_v59  ;;  %v14999_v59 = vld [vmem:[%s24477_s16 + $0x1f48] sm:$0xff] }
0x10fa   : > { %16982 = vmatpush1.bf16.msra.mxu0 %v16981_v50  ;;  %12023 = vmatprep.mubr.f32.mxu0 %v22177_v29  ;;  %v14952_v29 = vld [vmem:[%s24477_s16 + $0x1dd0] sm:$0xff]  ;;  %v16989_v38 = vpack.c.bf16 %v14711_v0, %v14709_v44  ;;  %v24154_v50 = vld [vmem:[%s24478_s17] sm:$0xff] }
0x10fb   : > { %17222 = vmatpush1.bf16.msra.mxu1 %v17221_v41  ;;  %16984 = vmatprep.subr.bf16.mxu0 %v16983_v15  ;;  %v17229_v23 = vpack.c.bf16 %v14952_v29, %v14950_v42  ;;  %v24159_v41 = vld [vmem:[%s24478_s17 + $0x8] sm:$0xff]  ;;  %v17001_v15 = vpack.c.bf16 %v14723_v60, %v14721_v17  ;;  %v14729_v29 = vld [vmem:[%s24477_s16 + $0x16e0] sm:$0xff] }
0x10fc   : > { %17224 = vmatprep.subr.bf16.mxu1 %v17223_v21  ;;  %v14966_v21 = vld [vmem:[%s24477_s16 + $0x1e40] sm:$0xff]  ;;  %v17009_v26 = vpack.c.bf16 %v14731_v10, %v14729_v29  ;;  %v14983_v60 = vld [vmem:[%s24477_s16 + $0x1ec8] sm:$0xff]  ;;  %v14752_v10 = vld [vmem:[%s24477_s16 + $0x1798] sm:$0xff] }
0x10fd   : > { %v14750_v29 = vld [vmem:[%s24477_s16 + $0x1788] sm:$0xff] }
0x10fe   : > { %16986 = vmatpush1.bf16.msra.mxu0 %v16985_v22 }
0x10ff   : > { %17226 = vmatpush1.bf16.msra.mxu1 %v17225_v3  ;;  %16988 = vmatprep.subr.bf16.mxu0 %v16987_v31  ;;  %v14971_v3 = vld [vmem:[%s24477_s16 + $0x1e68] sm:$0xff]  ;;  %v14973_v31 = vld [vmem:[%s24477_s16 + $0x1e78] sm:$0xff] }
0x1100   : > { %17228 = vmatprep.subr.bf16.mxu1 %v17227_v49  ;;  %v17007_v49 = vpack.c.bf16 %v14732_v48, %v14730_v30  ;;  %v17247_v45 = vpack.c.bf16 %v14973_v31, %v14971_v3  ;;  %v17021_v48 = vpack.c.bf16 %v14743_v36, %v14741_v19  ;;  %v14745_v31 = vld [vmem:[%s24477_s16 + $0x1760] sm:$0xff]  ;;  %v14762_v19 = vld [vmem:[%s24477_s16 + $0x17e8] sm:$0xff]  ;;  %v14764_v36 = vld [vmem:[%s24477_s16 + $0x17f8] sm:$0xff] }
0x1102   : > { %16990 = vmatpush1.bf16.msra.mxu0 %v16989_v38  ;;  %v14734_v38 = vld [vmem:[%s24477_s16 + $0x1708] sm:$0xff] }
0x1103   : > { %17230 = vmatpush1.bf16.msra.mxu1 %v17229_v23  ;;  %16992 = vmatprep.subr.bf16.mxu0 %v16991_v27  ;;  %v14736_v23 = vld [vmem:[%s24477_s16 + $0x1718] sm:$0xff]  ;;  %v14975_v27 = vld [vmem:[%s24477_s16 + $0x1e88] sm:$0xff] }
0x1104   : > { %17232 = vmatprep.subr.bf16.mxu1 %v17231_v25  ;;  %v17011_v25 = vpack.c.bf16 %v14736_v23, %v14734_v38  ;;  %v17251_v32 = vpack.c.bf16 %v14977_v54, %v14975_v27  ;;  %v17027_v23 = vpack.c.bf16 %v14752_v10, %v14750_v29  ;;  %v14749_v27 = vld [vmem:[%s24477_s16 + $0x1780] sm:$0xff]  ;;  %v14751_v54 = vld [vmem:[%s24477_s16 + $0x1790] sm:$0xff] }
0x1106   : > { %16994 = vmatpush1.bf16.msra.mxu0 %v16993_v46  ;;  %v14738_v46 = vld [vmem:[%s24477_s16 + $0x1728] sm:$0xff] }
0x1107   : > { %17234 = vmatpush1.bf16.msra.mxu1 %v17233_v56  ;;  %16996 = vmatprep.subr.bf16.mxu0 %v16995_v55  ;;  %v14740_v56 = vld [vmem:[%s24477_s16 + $0x1738] sm:$0xff]  ;;  %v14979_v55 = vld [vmem:[%s24477_s16 + $0x1ea8] sm:$0xff] }
0x1108   : > { %17236 = vmatprep.subr.bf16.mxu1 %v17235_v52  ;;  %v17253_v52 = vpack.c.bf16 %v14976_v39, %v14974_v14  ;;  %v17015_v47 = vpack.c.bf16 %v14740_v56, %v14738_v46  ;;  %v17255_v24 = vpack.c.bf16 %v14981_v4, %v14979_v55  ;;  %v14995_v14 = vld [vmem:[%s24477_s16 + $0x1f28] sm:$0xff]  ;;  %v17029_v39 = vpack.c.bf16 %v14751_v54, %v14749_v27  ;;  %v14753_v55 = vld [vmem:[%s24477_s16 + $0x17a0] sm:$0xff]  ;;  %v14755_v4 = vld [vmem:[%s24477_s16 + $0x17b0] sm:$0xff] }
0x1109   : > { %v17031_v56 = vpack.c.bf16 %v14756_v28, %v14754_v13  ;;  %v15014_v54 = vld [vmem:[%s24477_s16 + $0x1fc0] sm:$0xff] }
0x110a   : > { %12504 = vmatmul.mubr.f32.vlgmr.msra.gmra.mrb[154].mxu1 %v22270_v53  ;;  %16998 = vmatpush1.bf16.msra.mxu0 %v16997_v61  ;;  %v14725_v53 = vld [vmem:[%s24477_s16 + $0x16c0] sm:$0xff]  ;;  %v14742_v61 = vld [vmem:[%s24477_s16 + $0x1748] sm:$0xff] }
0x110b   : > { %17238 = vmatpush1.bf16.msra.mxu1 %v17237_v1  ;;  %12574 = vmatprep.mubr.f32.mxu1 %v22291_v6  ;;  %v14968_v6 = vld [vmem:[%s24477_s16 + $0x1e50] sm:$0xff]  ;;  %v17005_v0 = vpack.c.bf16 %v14727_v9, %v14725_v53  ;;  %v14744_v1 = vld [vmem:[%s24477_s16 + $0x1758] sm:$0xff]  ;;  %v14746_v53 = vld [vmem:[%s24477_s16 + $0x1768] sm:$0xff] }
0x110c   : > { %v10924_v11 = vpop.f32.mrb[40].mxu0  ;;  %17000 = vmatprep.subr.bf16.mxu0 %v16999_v5  ;;  %17240 = vmatprep.subr.bf16.mxu1 %v17239_v40  ;;  %v17245_v42 = vpack.c.bf16 %v14968_v6, %v14966_v21  ;;  %v17017_v40 = vpack.c.bf16 %v14739_v57, %v14737_v34  ;;  %v17019_v12 = vpack.c.bf16 %v14744_v1, %v14742_v61  ;;  %v14748_v9 = vld [vmem:[%s24477_s16 + $0x1778] sm:$0xff]  ;;  %v14758_v34 = vld [vmem:[%s24477_s16 + $0x17c8] sm:$0xff]  ;;  %v15018_v28 = vld [vmem:[%s24477_s16 + $0x1fe0] sm:$0xff] }
0x110d   : > { %v17303_v18 = vadd.f32 %v10924_v11, %v24154_v50  ;;  %v10926_v22 = vpop.f32.mrb[41].mxu0  ;;  %v14987_v11 = vld [vmem:[%s24477_s16 + $0x1ee8] sm:$0xff]  ;;  %v17023_v3 = vpack.c.bf16 %v14748_v9, %v14746_v53  ;;  %v14760_v57 = vld [vmem:[%s24477_s16 + $0x17d8] sm:$0xff]  ;;  %v17033_v61 = vpack.c.bf16 %v14755_v4, %v14753_v55  ;;  %v17039_v9 = vpack.c.bf16 %v14764_v36, %v14762_v19 }
0x110e   : > { %v17304_v44 = vadd.f32 %v10926_v22, %v24159_v41  ;;  %17002 = vmatpush1.bf16.msra.mxu0 %v17001_v15  ;;  %v14982_v15 = vld [vmem:[%s24477_s16 + $0x1ec0] sm:$0xff] }
0x110f   : > { %18265 = vtanh.f32 %v17303_v18  ;;  %17242 = vmatpush1.bf16.msra.mxu1 %v17241_v51  ;;  %17004 = vmatprep.subr.bf16.mxu0 %v17003_v7  ;;  %v17259_v51 = vpack.c.bf16 %v14985_v62, %v14983_v60  ;;  %v14984_v7 = vld [vmem:[%s24477_s16 + $0x1ed0] sm:$0xff]  ;;  %v17035_v60 = vpack.c.bf16 %v14760_v57, %v14758_v34  ;;  %v14757_v62 = vld [vmem:[%s24477_s16 + $0x17c0] sm:$0xff] }
0x1110   : > { %18267 = vtanh.f32 %v17304_v44  ;;  %17244 = vmatprep.subr.bf16.mxu1 %v17243_v16  ;;  %v14989_v16 = vld [vmem:[%s24477_s16 + $0x1ef8] sm:$0xff]  ;;  %v17261_v22 = vpack.c.bf16 %v14984_v7, %v14982_v15  ;;  %v14747_v44 = vld [vmem:[%s24477_s16 + $0x1770] sm:$0xff]  ;;  %v15003_v15 = vld [vmem:[%s24477_s16 + $0x1f68] sm:$0xff] }
0x1111   : > { %v17025_v37 = vpack.c.bf16 %v14747_v44, %v14745_v31  ;;  %v15006_v44 = vld [vmem:[%s24477_s16 + $0x1f80] sm:$0xff] }
0x1112   : > { %17006 = vmatpush1.bf16.msra.mxu0 %v17005_v0  ;;  %v14986_v0 = vld [vmem:[%s24477_s16 + $0x1ee0] sm:$0xff] }
0x1113   : > { %17246 = vmatpush1.bf16.msra.mxu1 %v17245_v42  ;;  %17008 = vmatprep.subr.bf16.mxu0 %v17007_v49  ;;  %v17263_v42 = vpack.c.bf16 %v14989_v16, %v14987_v11  ;;  %v14988_v49 = vld [vmem:[%s24477_s16 + $0x1ef0] sm:$0xff] }
0x1114   : > { %17248 = vmatprep.subr.bf16.mxu1 %v17247_v45  ;;  %v14993_v45 = vld [vmem:[%s24477_s16 + $0x1f18] sm:$0xff]  ;;  %v17265_v38 = vpack.c.bf16 %v14988_v49, %v14986_v0  ;;  %v14763_v11 = vld [vmem:[%s24477_s16 + $0x17f0] sm:$0xff] }
0x1115   : > { %v15008_v0 = vld [vmem:[%s24477_s16 + $0x1f90] sm:$0xff]  ;;  %v15013_v49 = vld [vmem:[%s24477_s16 + $0x1fb8] sm:$0xff] }
0x1116   : > { %17010 = vmatpush1.bf16.msra.mxu0 %v17009_v26  ;;  %v14990_v26 = vld [vmem:[%s24477_s16 + $0x1f00] sm:$0xff]  ;;  %v17285_v29 = vpack.c.bf16 %v15008_v0, %v15006_v44 }
0x1117   : > { %17250 = vmatpush1.bf16.msra.mxu1 %v17249_v2  ;;  %17012 = vmatprep.subr.bf16.mxu0 %v17011_v25  ;;  %v17267_v2 = vpack.c.bf16 %v14993_v45, %v14991_v33  ;;  %v14992_v25 = vld [vmem:[%s24477_s16 + $0x1f10] sm:$0xff]  ;;  %v15010_v33 = vld [vmem:[%s24477_s16 + $0x1fa0] sm:$0xff] }
0x1118   : > { %17252 = vmatprep.subr.bf16.mxu1 %v17251_v32  ;;  %v14997_v32 = vld [vmem:[%s24477_s16 + $0x1f38] sm:$0xff]  ;;  %v17269_v46 = vpack.c.bf16 %v14992_v25, %v14990_v26  ;;  %v15012_v45 = vld [vmem:[%s24477_s16 + $0x1fb0] sm:$0xff]  ;;  %v15019_v26 = vld [vmem:[%s24477_s16 + $0x1fe8] sm:$0xff] }
0x1119   : > { %v18266_v17 = vpop.eup %18265 }
0x111a   : > { %v18268_v5 = vpop.eup %18267  ;;  %17014 = vmatpush1.bf16.msra.mxu0 %v17013_v43  ;;  %v14994_v43 = vld [vmem:[%s24477_s16 + $0x1f20] sm:$0xff] }
0x111b   : > { %v10933_v20 = vcombine.low %v18266_v17, %v18268_v5  ;;  %17254 = vmatpush1.bf16.msra.mxu1 %v17253_v52  ;;  %17016 = vmatprep.subr.bf16.mxu0 %v17015_v47  ;;  %v17271_v52 = vpack.c.bf16 %v14997_v32, %v14995_v14  ;;  %v14996_v47 = vld [vmem:[%s24477_s16 + $0x1f30] sm:$0xff] }
0x111c   : > { %17256 = vmatprep.subr.bf16.mxu1 %v17255_v24  ;;  %v15001_v24 = vld [vmem:[%s24477_s16 + $0x1f58] sm:$0xff]  ;;  %v17273_v17 = vpack.c.bf16 %v14996_v47, %v14994_v43  ;;  %v14759_v5 = vld [vmem:[%s24477_s16 + $0x17d0] sm:$0xff] }
0x111d   : > { %10935 = vst [vmem:[%s24264_s24] sm:$0x77] %v10933_v20  ;;  %v11474_v21 = vpop.f32.mrb[152].mxu1  ;;  %v17037_v7 = vpack.c.bf16 %v14759_v5, %v14757_v62  ;;  %v15020_v14 = vld [vmem:[%s24477_s16 + $0x1ff0] sm:$0xff] }
0x111e   : > { %v17305_v6 = vadd.f32 %v11474_v21, %v24154_v50  ;;  %v11476_v30 = vpop.f32.mrb[153].mxu1  ;;  %17018 = vmatpush1.bf16.msra.mxu0 %v17017_v40  ;;  %v14998_v40 = vld [vmem:[%s24477_s16 + $0x1f40] sm:$0xff]  ;;  %v17297_v32 = vpack.c.bf16 %v15020_v14, %v15018_v28 }
0x111f   : > { %v17306_v18 = vadd.f32 %v11476_v30, %v24159_v41  ;;  %17258 = vmatpush1.bf16.msra.mxu1 %v17257_v8  ;;  %17020 = vmatprep.subr.bf16.mxu0 %v17019_v12  ;;  %v17275_v8 = vpack.c.bf16 %v15001_v24, %v14999_v59  ;;  %v15000_v12 = vld [vmem:[%s24477_s16 + $0x1f50] sm:$0xff]  ;;  %v14761_v21 = vld [vmem:[%s24477_s16 + $0x17e0] sm:$0xff] }
0x1120   : > { %18269 = vtanh.f32 %v17305_v6  ;;  %17260 = vmatprep.subr.bf16.mxu1 %v17259_v51  ;;  %v15005_v51 = vld [vmem:[%s24477_s16 + $0x1f78] sm:$0xff]  ;;  %v17277_v53 = vpack.c.bf16 %v15000_v12, %v14998_v40  ;;  %v15002_v6 = vld [vmem:[%s24477_s16 + $0x1f60] sm:$0xff]  ;;  %v15004_v30 = vld [vmem:[%s24477_s16 + $0x1f70] sm:$0xff] }
0x1121   : > { %18271 = vtanh.f32 %v17306_v18  ;;  %v17279_v16 = vpack.c.bf16 %v15005_v51, %v15003_v15  ;;  %v15009_v18 = vld [vmem:[%s24477_s16 + $0x1f98] sm:$0xff] }
0x1122   : > { %17022 = vmatpush1.bf16.msra.mxu0 %v17021_v48  ;;  %v15007_v48 = vld [vmem:[%s24477_s16 + $0x1f88] sm:$0xff] }
0x1123   : > { %17262 = vmatpush1.bf16.msra.mxu1 %v17261_v22  ;;  %17024 = vmatprep.subr.bf16.mxu0 %v17023_v3  ;;  %v17041_v22 = vpack.c.bf16 %v14763_v11, %v14761_v21  ;;  %v17281_v3 = vpack.c.bf16 %v15004_v30, %v15002_v6  ;;  %v17283_v31 = vpack.c.bf16 %v15009_v18, %v15007_v48 }
0x1124   : > { %17264 = vmatprep.subr.bf16.mxu1 %v17263_v42  ;;  %v15011_v42 = vld [vmem:[%s24477_s16 + $0x1fa8] sm:$0xff] }
0x1125   : > { %v17287_v10 = vpack.c.bf16 %v15013_v49, %v15011_v42 }
0x1126   : > { %17026 = vmatpush1.bf16.msra.mxu0 %v17025_v37  ;;  %v15015_v37 = vld [vmem:[%s24477_s16 + $0x1fc8] sm:$0xff] }
0x1127   : > { %17266 = vmatpush1.bf16.msra.mxu1 %v17265_v38  ;;  %17028 = vmatprep.subr.bf16.mxu0 %v17027_v23  ;;  %v15017_v38 = vld [vmem:[%s24477_s16 + $0x1fd8] sm:$0xff]  ;;  %v17289_v23 = vpack.c.bf16 %v15012_v45, %v15010_v33 }
0x1128   : > { %17268 = vmatprep.subr.bf16.mxu1 %v17267_v2  ;;  %v17291_v27 = vpack.c.bf16 %v15017_v38, %v15015_v37  ;;  %v15021_v2 = vld [vmem:[%s24477_s16 + $0x1ff8] sm:$0xff] }
0x1129   : > { %v17295_v13 = vpack.c.bf16 %v15021_v2, %v15019_v26 }
0x112a   : > { %v18270_v35 = vpop.eup %18269  ;;  %17030 = vmatpush1.bf16.msra.mxu0 %v17029_v39 }
0x112b   : > { %v18272_v1 = vpop.eup %18271  ;;  %17270 = vmatpush1.bf16.msra.mxu1 %v17269_v46  ;;  %17032 = vmatprep.subr.bf16.mxu0 %v17031_v56 }
0x112c   : > { %v11483_v20 = vcombine.low %v18270_v35, %v18272_v1  ;;  %17272 = vmatprep.subr.bf16.mxu1 %v17271_v52 }
0x112e   : > { %14508 = vst [vmem:[%s24264_s24 + $0x8] sm:$0x77] %v11483_v20  ;;  %17034 = vmatpush1.bf16.msra.mxu0 %v17033_v61 }
0x112f   : > { %17274 = vmatpush1.bf16.msra.mxu1 %v17273_v17  ;;  %17036 = vmatprep.subr.bf16.mxu0 %v17035_v60 }
0x1130   : > { %17276 = vmatprep.subr.bf16.mxu1 %v17275_v8 }
0x1132   : > { %17038 = vmatpush1.bf16.msra.mxu0 %v17037_v7 }
0x1133   : > { %17278 = vmatpush1.bf16.msra.mxu1 %v17277_v53  ;;  %17040 = vmatprep.subr.bf16.mxu0 %v17039_v9 }
0x1134   : > { %17280 = vmatprep.subr.bf16.mxu1 %v17279_v16 }
0x1136   : > { %17042 = vmatpush1.bf16.msra.mxu0 %v17041_v22 }
0x1137   : > { %17282 = vmatpush1.bf16.msra.mxu1 %v17281_v3 }
0x1138   : > { %17284 = vmatprep.subr.bf16.mxu1 %v17283_v31 }
0x1139   : > { %12024 = vmatmul.mubr.f32.vlgmr.msra.gmra.mrb[42].mxu0 %v22166_v58  ;;  %v15016_v58 = vld [vmem:[%s24477_s16 + $0x1fd0] sm:$0xff] }
0x113a   : > { %v17293_v25 = vpack.c.bf16 %v15016_v58, %v15014_v54 }
0x113b   : > { %17286 = vmatpush1.bf16.msra.mxu1 %v17285_v29 }
0x113c   : > { %17288 = vmatprep.subr.bf16.mxu1 %v17287_v10 }
0x113f   : > { %17290 = vmatpush1.bf16.msra.mxu1 %v17289_v23 }
0x1140   : > { %17292 = vmatprep.subr.bf16.mxu1 %v17291_v27 }
0x1143   : > { %17294 = vmatpush1.bf16.msra.mxu1 %v17293_v25 }
0x1144   : > { %17296 = vmatprep.subr.bf16.mxu1 %v17295_v13 }
0x1147   : > { %17298 = vmatpush1.bf16.msra.mxu1 %v17297_v32 }
0x114a   : > { %12575 = vmatmul.mubr.f32.vlgmr.msra.gmra.mrb[154].mxu1 %v22280_v63 }
0x120c   : > { %v12025_v39 = vpop.f32.mrb[42].mxu0 }
0x120d   : > { %v17307_v46 = vadd.f32 %v12025_v39, %v24154_v50  ;;  %v12027_v56 = vpop.f32.mrb[43].mxu0 }
0x120e   : > { %v17308_v55 = vadd.f32 %v12027_v56, %v24159_v41 }
0x120f   : > { %18273 = vtanh.f32 %v17307_v46 }
0x1210   : > { %18275 = vtanh.f32 %v17308_v55 }
0x1219   : > { %v18274_v4 = vpop.eup %18273 }
0x121a   : > { %v18276_v43 = vpop.eup %18275 }
0x121b   : > { %v12034_v52 = vcombine.low %v18274_v4, %v18276_v43 }
0x121d   : > { %14765 = vst [vmem:[%s24264_s24 + $0x10] sm:$0x77] %v12034_v52  ;;  %v12576_v47 = vpop.f32.mrb[154].mxu1 }
0x121e   : > { %v17309_v34 = vadd.f32 %v12576_v47, %v24154_v50  ;;  %v12578_v57 = vpop.f32.mrb[155].mxu1 }
0x121f   : > { %v17310_v59 = vadd.f32 %v12578_v57, %v24159_v41 }
0x1220   : > { %18277 = vtanh.f32 %v17309_v34 }
0x1221   : > { %18279 = vtanh.f32 %v17310_v59 }
0x122a   : > { %v18278_v63 = vpop.eup %18277 }
0x122b   : > { %v18280_v24 = vpop.eup %18279 }
0x122c   : > { %v12585_v35 = vcombine.low %v18278_v63, %v18280_v24 }
0x122e   : > { %15022 = vst [vmem:[%s24264_s24 + $0x18] sm:$0x77] %v12585_v35 }
0x122f PF: > { %s28_s27 = sadd.s32 1, %s18288_s27  }
0x1230   : > { %p25_p4 = scmp.ge.s32.totalorder %s28_s27, 4  }
0x1232   :  { %27 = sbr.rel (!%p25_p4) target bundleno = 4 (0x4), region = 140 }

</bundles_post_ra>
